<compile_context>
chip_gen: v7x
topology: tpu7x:2x2x1
jax: 0.10.0
libtpu: 0.0.40
codegen_flags: <defaults>
</compile_context>

<pallas_src>
import numpy as np
import jax
import jax.numpy as jnp
from jax import lax
from jax.experimental import pallas as pl
from jax.experimental.pallas import tpu as pltpu

M_BRANCHES = 2
PMAX = 2   # max conv padding among branches (5x5 -> pad 2)


def _row_block(H, W, BtC):
    """Largest divisor of H with RB*W*BtC <= 16384 (<= 16 vregs per accumulator)."""
    limit = max(1, 16384 // max(1, W * BtC))
    rb = 1
    for r in range(1, H + 1):
        if H % r == 0 and r <= limit:
            rb = r
    return rb


def _skconv_kernel(x_ref, w3_ref, w5_ref, sh_ref, wfc_ref, fcsh_ref, wfcs_ref,
                   bfcs_ref, o_ref,
                   xs_m2, xs_m1, xs_c0, xs_p1, xs_p2, f3_ref, f5_ref):
    # x_ref: (1, H, W, BtC); xs_*: (H + 2*PMAX, W, BtC) column-pre-shifted copies
    H, W, BtC = x_ref.shape[1], x_ref.shape[2], x_ref.shape[3]
    Hp = H + 2 * PMAX
    n = H * W
    f32 = jnp.float32
    xs_refs = (xs_m2, xs_m1, xs_c0, xs_p1, xs_p2)

    # ---- per-sample/channel normalization: fused single sweep for mean & var
    #      (torch.std is unbiased); centering folded into one mul+add pass ----
    x = x_ref[0].astype(f32)                               # (H, W, BtC)
    s1 = jnp.sum(x, axis=(0, 1), keepdims=True)
    s2 = jnp.sum(x * x, axis=(0, 1), keepdims=True)
    mean = s1 * (1.0 / n)
    var = jnp.maximum((s2 - n * mean * mean) * (1.0 / (n - 1)), 0.0)
    inv_std = 1.0 / (jnp.sqrt(var) + 1e-8)
    xn = x * inv_std - mean * inv_std                      # (H, W, BtC)

    # ---- hoist the horizontal (dx) shift out of the 25-tap hot loop:
    #      build 5 column-shifted, row-padded copies once per step; every tap
    #      below becomes a pure (tile-aligned) row-offset slice ----
    zrows = jnp.zeros((PMAX, W, BtC), f32)                 # hoisted, reused 10x
    zcols = {k: jnp.zeros((H, k, BtC), f32) for k in range(1, PMAX + 1)}
    for dx in range(-PMAX, PMAX + 1):
        dst = xs_refs[dx + PMAX]
        if dx == 0:
            body = xn
        elif dx > 0:
            body = jnp.concatenate([xn[:, dx:, :], zcols[dx]], axis=1)
        else:
            body = jnp.concatenate([zcols[-dx], xn[:, :W + dx, :]], axis=1)
        # small row halo re-zeroed every step (megacore-safe: no reliance on
        # program_id==0 ever running on this core's private scratch)
        dst[0:PMAX, :, :] = zrows
        dst[PMAX + H:Hp, :, :] = zrows
        dst[PMAX:PMAX + H, :, :] = body

    # ---- two depthwise branches (BN scale already folded into the weights) ----
    w3 = w3_ref[...]                                       # (3, 3, BtC)
    w5 = w5_ref[...]                                       # (5, 5, BtC)
    sh3 = sh_ref[0]                                        # (BtC,)
    sh5 = sh_ref[1]

    RB = _row_block(H, W, BtC)                             # acc3+acc5 <= 32 vregs
    n_chunks = H // RB

    def chunk_body(ci, u_sum):
        h0 = ci * RB
        acc3 = jnp.zeros((RB, W, BtC), f32)
        acc5 = jnp.zeros((RB, W, BtC), f32)
        for dy in range(-PMAX, PMAX + 1):                  # 25-tap loop stays unrolled
            for dx in range(-PMAX, PMAX + 1):
                tap = xs_refs[dx + PMAX][pl.ds(h0 + dy + PMAX, RB), :, :]
                acc5 = acc5 + tap * w5[dy + PMAX, dx + PMAX]
                if abs(dy) <= 1 and abs(dx) <= 1:
                    acc3 = acc3 + tap * w3[dy + 1, dx + 1]
        f3c = jnp.maximum(acc3 + sh3, 0.0)                 # folded BN shift + ReLU
        f5c = jnp.maximum(acc5 + sh5, 0.0)
        f3_ref[pl.ds(h0, RB), :, :] = f3c.astype(f3_ref.dtype)   # bf16 scratch store
        f5_ref[pl.ds(h0, RB), :, :] = f5c.astype(f5_ref.dtype)
        return u_sum + jnp.sum(f3c + f5c, axis=(0, 1))[None, :]  # f32 global-avg-pool

    u_sum = lax.fori_loop(0, n_chunks, chunk_body,
                          jnp.zeros((1, BtC), f32), unroll=(n_chunks <= 4))

    # ---- squeeze / excite attention, batched over the bt packed samples via
    #      block-diagonal weights (one tiny MXU op per matmul) ----
    s = u_sum * (1.0 / n)                                  # (1, BtC)
    z = jnp.dot(s, wfc_ref[...], preferred_element_type=f32) + fcsh_ref[...]
    z = jnp.maximum(z, 0.0)                                # (1, bt*d)
    a3 = jnp.dot(z, wfcs_ref[0], preferred_element_type=f32) + bfcs_ref[0]
    a5 = jnp.dot(z, wfcs_ref[1], preferred_element_type=f32) + bfcs_ref[1]
    mx = jnp.maximum(a3, a5)
    e3 = jnp.exp(a3 - mx)
    e5 = jnp.exp(a5 - mx)
    inv = 1.0 / (e3 + e5)
    att3 = (e3 * inv)[0]                                   # (BtC,)
    att5 = (e5 * inv)[0]

    # ---- attention-weighted sum, written directly (lane-dense store) ----
    o_ref[0] = (f3_ref[...].astype(f32) * att3 +
                f5_ref[...].astype(f32) * att5).astype(o_ref.dtype)


def skconv_forward(x_nchw, params, bt=None):
    B, C, H, W = x_nchw.shape
    d = params["wfc"].shape[1]

    # Pack bt samples onto the lane axis so bt*C approaches 128 (lane-dense
    # blocks). Pad the batch up to a multiple of bt instead of degrading the
    # packing; with B=8, C=32 this gives bt=4, G=2 (both v7x TCs get steps).
    if bt is None:
        bt = max(1, min(128 // max(C, 1), B))
    bt = max(1, min(bt, B))
    Bp = -(-B // bt) * bt
    G = Bp // bt
    BtC, Btd = bt * C, bt * d
    Hp = H + 2 * PMAX

    x_in = x_nchw
    if Bp != B:
        x_in = jnp.concatenate(
            [x_nchw, jnp.zeros((Bp - B, C, H, W), x_nchw.dtype)], axis=0)

    # NCHW -> (G, H, W, bt*C) with lane index = b_local*C + c
    x = x_in.reshape(G, bt, C, H, W).transpose(0, 3, 4, 1, 2).reshape(G, H, W, BtC)

    f32 = jnp.float32
    # fold BN scales into the conv / fc weights; tile per-channel vectors over bt
    w3_t = jnp.tile(params["w3"] * params["bn_scale"][0], (1, 1, bt)).astype(f32)
    w5_t = jnp.tile(params["w5"] * params["bn_scale"][1], (1, 1, bt)).astype(f32)
    sh_t = jnp.tile(params["bn_shift"], (1, bt)).astype(f32)                    # (2, BtC)
    eye_bt = jnp.eye(bt, dtype=f32)
    wfc_bd = jnp.kron(eye_bt, params["wfc"] * params["fc_scale"]).astype(f32)   # (BtC, Btd)
    fcsh_t = jnp.tile(params["fc_shift"], (1, bt)).astype(f32)                  # (1, Btd)
    wfcs_bd = jnp.stack([jnp.kron(eye_bt, params["wfcs"][m])
                         for m in range(M_BRANCHES)]).astype(f32)               # (2, Btd, BtC)
    bfcs_t = jnp.tile(params["bfcs"], (1, bt)).astype(f32)                      # (2, BtC)

    # scoped-VMEM budget: floor 32 MiB, ceiling ~80% of this chip's physical VMEM
    blk = H * W * BtC
    step_bytes = (4 * 2 * 2 * blk                        # x + out blocks, double-buffered
                  + 4 * 5 * Hp * W * BtC                 # column-shifted input scratch (f32)
                  + 2 * 2 * blk                          # branch-feature scratch (bf16)
                  + 4 * 2 * ((9 + 25 + 2) * BtC + BtC * Btd + Btd
                             + M_BRANCHES * Btd * BtC + M_BRANCHES * BtC))
    try:
        cap = int(getattr(pltpu.get_tpu_info(), "vmem_capacity_bytes", 128 << 20))
    except Exception:
        cap = 128 << 20
    vmem_limit = int(min(max(32 << 20, 2 * step_bytes), int(0.80 * cap)))

    kernel = pl.pallas_call(
        _skconv_kernel,
        out_shape=jax.ShapeDtypeStruct((G, H, W, BtC), x_nchw.dtype),
        grid_spec=pltpu.PrefetchScalarGridSpec(
            num_scalar_prefetch=0,
            grid=(G,),
            in_specs=[
                pl.BlockSpec((1, H, W, BtC), lambda g: (g, 0, 0, 0)),       # x
                pl.BlockSpec((3, 3, BtC), lambda g: (0, 0, 0)),             # 3x3 dw w (scaled, tiled)
                pl.BlockSpec((5, 5, BtC), lambda g: (0, 0, 0)),             # 5x5 dw w (scaled, tiled)
                pl.BlockSpec((M_BRANCHES, BtC), lambda g: (0, 0)),          # branch BN shifts
                pl.BlockSpec((BtC, Btd), lambda g: (0, 0)),                 # block-diag fc weight
                pl.BlockSpec((1, Btd), lambda g: (0, 0)),                   # fc BN shift
                pl.BlockSpec((M_BRANCHES, Btd, BtC), lambda g: (0, 0, 0)),  # block-diag fcs weights
                pl.BlockSpec((M_BRANCHES, BtC), lambda g: (0, 0)),          # fcs biases
            ],
            out_specs=pl.BlockSpec((1, H, W, BtC), lambda g: (g, 0, 0, 0)),
            scratch_shapes=(
                [pltpu.VMEM((Hp, W, BtC), jnp.float32) for _ in range(5)]   # 5 dx-shifted inputs
                + [pltpu.VMEM((H, W, BtC), jnp.bfloat16) for _ in range(2)]  # f3 / f5 features
            ),
        ),
        compiler_params=pltpu.CompilerParams(
            dimension_semantics=("parallel",),
            vmem_limit_bytes=vmem_limit,
        ),
    )
    out = kernel(x, w3_t, w5_t, sh_t, wfc_bd, fcsh_t, wfcs_bd, bfcs_t)
    out = out.reshape(G, H, W, bt, C).transpose(0, 3, 4, 1, 2).reshape(Bp, C, H, W)
    return out[:B]


def init_params(key, features, r=16, L=32):
    C = features
    d = max(int(features / r), L)
    keys = jax.random.split(key, 16)

    def fold_bn(kg, kb, km, kv, n):
        gamma = 1.0 + 0.1 * jax.random.normal(kg, (n,), jnp.float32)
        beta = 0.1 * jax.random.normal(kb, (n,), jnp.float32)
        rmean = 0.1 * jax.random.normal(km, (n,), jnp.float32)
        rvar = jnp.abs(1.0 + 0.1 * jax.random.normal(kv, (n,), jnp.float32))
        scale = gamma / jnp.sqrt(rvar + 1e-5)
        shift = beta - rmean * scale
        return scale, shift

    # depthwise conv weights: PyTorch (C, 1, k, k) -> kernel layout (k, k, C)
    w3 = 0.10 * jax.random.normal(keys[0], (3, 3, C), jnp.float32)
    w5 = 0.05 * jax.random.normal(keys[1], (5, 5, C), jnp.float32)

    sc0, sh0 = fold_bn(keys[2], keys[3], keys[4], keys[5], C)
    sc1, sh1 = fold_bn(keys[6], keys[7], keys[8], keys[9], C)
    bn_scale = jnp.stack([sc0, sc1], axis=0)                      # (M, C)
    bn_shift = jnp.stack([sh0, sh1], axis=0)

    # fc: PyTorch 1x1 conv weight (d, C, 1, 1) -> (C, d) for s @ W
    wfc = 0.1 * jax.random.normal(keys[10], (C, d), jnp.float32)
    fsc, fsh = fold_bn(keys[11], keys[12], keys[13], keys[14], d)
    fc_scale = fsc.reshape(1, d)
    fc_shift = fsh.reshape(1, d)

    # fcs: PyTorch (C, d, 1, 1) + bias (C,) -> (M, d, C) / (M, C)
    kw, kb = jax.random.split(keys[15])
    wfcs = 0.1 * jax.random.normal(kw, (M_BRANCHES, d, C), jnp.float32)
    bfcs = 0.05 * jax.random.normal(kb, (M_BRANCHES, C), jnp.float32)

    return dict(w3=w3, w5=w5, bn_scale=bn_scale, bn_shift=bn_shift,
                wfc=wfc, fc_scale=fc_scale, fc_shift=fc_shift,
                wfcs=wfcs, bfcs=bfcs)


def skconv_reference(x_nchw, params):
    """Pure-JAX (XLA) reference, same NCHW interface as the PyTorch module."""
    B, C, H, W = x_nchw.shape
    x = x_nchw.astype(jnp.float32)
    mean = jnp.mean(x, axis=(2, 3), keepdims=True)
    var = jnp.sum((x - mean) ** 2, axis=(2, 3), keepdims=True) / (H * W - 1)
    xn = (x - mean) / (jnp.sqrt(var) + 1e-8)
    xn = jnp.transpose(xn, (0, 2, 3, 1))                          # NHWC

    branch_ws = [(params["w3"], 3, 1), (params["w5"], 5, 2)]
    feats = []
    for m, (w, k, p) in enumerate(branch_ws):
        wk = w.reshape(k, k, 1, C)                                # HWIO depthwise
        f = lax.conv_general_dilated(
            xn, wk, window_strides=(1, 1), padding=[(p, p), (p, p)],
            dimension_numbers=("NHWC", "HWIO", "NHWC"), feature_group_count=C)
        f = jnp.maximum(f * params["bn_scale"][m] + params["bn_shift"][m], 0.0)
        feats.append(f)
    feats = jnp.stack(feats, axis=1)                              # (B, M, H, W, C)

    U = jnp.sum(feats, axis=1)
    s = jnp.mean(U, axis=(1, 2))                                  # (B, C)
    z = jnp.maximum(s @ params["wfc"] * params["fc_scale"] + params["fc_shift"], 0.0)
    logits = jnp.stack([z @ params["wfcs"][m] + params["bfcs"][m]
                        for m in range(M_BRANCHES)], axis=1)      # (B, M, C)
    att = jax.nn.softmax(logits, axis=1)
    out = jnp.sum(feats * att[:, :, None, None, :], axis=1)       # (B, H, W, C)
    return jnp.transpose(out, (0, 3, 1, 2))


if __name__ == "__main__":
    key = jax.random.PRNGKey(0)
    B, C, H, W = 8, 32, 16, 16
    kx, kp = jax.random.split(key)
    x = jax.random.normal(kx, (B, C, H, W), jnp.float32)
    params = init_params(kp, C)

    out = skconv_forward(x, params)
    out = jax.block_until_ready(out)

    ref = skconv_reference(x, params)
    np.testing.assert_allclose(np.asarray(out), np.asarray(ref), rtol=5e-3, atol=5e-3)

    print("KERNEL_OK")
</pallas_src>

<mosaic_0001>
module attributes {stable_mosaic.version = 11 : i64} {
  func.func @_skconv_kernel(%arg0: i32, %arg1: memref<1x16x16x128xf32, #tpu.memory_space<vmem>>, %arg2: memref<3x3x128xf32, #tpu.memory_space<vmem>>, %arg3: memref<5x5x128xf32, #tpu.memory_space<vmem>>, %arg4: memref<2x128xf32, #tpu.memory_space<vmem>>, %arg5: memref<128x128xf32, #tpu.memory_space<vmem>>, %arg6: memref<1x128xf32, #tpu.memory_space<vmem>>, %arg7: memref<2x128x128xf32, #tpu.memory_space<vmem>>, %arg8: memref<2x128xf32, #tpu.memory_space<vmem>>, %arg9: memref<1x16x16x128xf32, #tpu.memory_space<vmem>>, %arg10: memref<20x16x128xf32, #tpu.memory_space<vmem>>, %arg11: memref<20x16x128xf32, #tpu.memory_space<vmem>>, %arg12: memref<20x16x128xf32, #tpu.memory_space<vmem>>, %arg13: memref<20x16x128xf32, #tpu.memory_space<vmem>>, %arg14: memref<20x16x128xf32, #tpu.memory_space<vmem>>, %arg15: memref<16x16x128xbf16, #tpu.memory_space<vmem>>, %arg16: memref<16x16x128xbf16, #tpu.memory_space<vmem>>) attributes {dimension_semantics = [#tpu.dimension_semantics<parallel>], iteration_bounds = array<i64: 2>, scalar_prefetch = 0 : i64, scratch_operands = 7 : i64, tpu.core_type = #tpu.core_type<tc>, window_params = [{transform_indices = @transform_0, window_bounds = array<i64: 1, 16, 16, 128>}, {pipeline_mode = #tpu.pipeline_mode<synchronous>, transform_indices = @transform_1, window_bounds = array<i64: 3, 3, 128>}, {pipeline_mode = #tpu.pipeline_mode<synchronous>, transform_indices = @transform_2, window_bounds = array<i64: 5, 5, 128>}, {pipeline_mode = #tpu.pipeline_mode<synchronous>, transform_indices = @transform_3, window_bounds = array<i64: 2, 128>}, {pipeline_mode = #tpu.pipeline_mode<synchronous>, transform_indices = @transform_4, window_bounds = array<i64: 128, 128>}, {pipeline_mode = #tpu.pipeline_mode<synchronous>, transform_indices = @transform_5, window_bounds = array<i64: 1, 128>}, {pipeline_mode = #tpu.pipeline_mode<synchronous>, transform_indices = @transform_6, window_bounds = array<i64: 2, 128, 128>}, {pipeline_mode = #tpu.pipeline_mode<synchronous>, transform_indices = @transform_7, window_bounds = array<i64: 2, 128>}, {transform_indices = @transform_8, window_bounds = array<i64: 1, 16, 16, 128>}]} {
    %c0 = arith.constant 0 : index
    %c0_0 = arith.constant 0 : index
    %c0_1 = arith.constant 0 : index
    %c0_2 = arith.constant 0 : index
    %0 = vector.load %arg1[%c0, %c0_0, %c0_1, %c0_2] : memref<1x16x16x128xf32, #tpu.memory_space<vmem>>, vector<1x16x16x128xf32>
    %1 = vector.shape_cast %0 : vector<1x16x16x128xf32> to vector<16x16x128xf32>
    %cst = arith.constant dense<0.000000e+00> : vector<128xf32>
    %2 = vector.multi_reduction <add>, %1, %cst [0, 1] : vector<16x16x128xf32> to vector<128xf32>
    %3 = vector.shape_cast %2 : vector<128xf32> to vector<1x1x128xf32>
    %4 = arith.mulf %1, %1 : vector<16x16x128xf32>
    %cst_3 = arith.constant dense<0.000000e+00> : vector<128xf32>
    %5 = vector.multi_reduction <add>, %4, %cst_3 [0, 1] : vector<16x16x128xf32> to vector<128xf32>
    %6 = vector.shape_cast %5 : vector<128xf32> to vector<1x1x128xf32>
    %cst_4 = arith.constant 3.906250e-03 : f32
    %7 = vector.broadcast %cst_4 : f32 to vector<1x1x128xf32>
    %8 = arith.mulf %3, %7 : vector<1x1x128xf32>
    %cst_5 = arith.constant 2.560000e+02 : f32
    %9 = vector.broadcast %cst_5 : f32 to vector<1x1x128xf32>
    %10 = arith.mulf %9, %8 : vector<1x1x128xf32>
    %11 = arith.mulf %10, %8 : vector<1x1x128xf32>
    %12 = arith.subf %6, %11 : vector<1x1x128xf32>
    %cst_6 = arith.constant 0.00392156886 : f32
    %13 = vector.broadcast %cst_6 : f32 to vector<1x1x128xf32>
    %14 = arith.mulf %12, %13 : vector<1x1x128xf32>
    %cst_7 = arith.constant 0.000000e+00 : f32
    %15 = vector.broadcast %cst_7 : f32 to vector<1x1x128xf32>
    %16 = arith.maximumf %14, %15 : vector<1x1x128xf32>
    %17 = math.sqrt %16 : vector<1x1x128xf32>
    %cst_8 = arith.constant 9.99999993E-9 : f32
    %18 = vector.broadcast %cst_8 : f32 to vector<1x1x128xf32>
    %19 = arith.addf %17, %18 : vector<1x1x128xf32>
    %cst_9 = arith.constant 1.000000e+00 : f32
    %20 = vector.broadcast %cst_9 : f32 to vector<1x1x128xf32>
    %21 = arith.divf %20, %19 : vector<1x1x128xf32>
    %22 = vector.broadcast %21 : vector<1x1x128xf32> to vector<16x16x128xf32>
    %23 = arith.mulf %1, %22 : vector<16x16x128xf32>
    %24 = arith.mulf %8, %21 : vector<1x1x128xf32>
    %25 = vector.broadcast %24 : vector<1x1x128xf32> to vector<16x16x128xf32>
    %26 = arith.subf %23, %25 : vector<16x16x128xf32>
    %cst_10 = arith.constant 0.000000e+00 : f32
    %27 = vector.broadcast %cst_10 : f32 to vector<2x16x128xf32>
    %cst_11 = arith.constant 0.000000e+00 : f32
    %28 = vector.broadcast %cst_11 : f32 to vector<16x1x128xf32>
    %cst_12 = arith.constant 0.000000e+00 : f32
    %29 = vector.broadcast %cst_12 : f32 to vector<16x2x128xf32>
    %30 = vector.extract_strided_slice %26 {offsets = [0, 0, 0], sizes = [16, 14, 128], strides = [1, 1, 1]} : vector<16x16x128xf32> to vector<16x14x128xf32>
    %31 = tpu.concatenate %29, %30 in 1 : vector<16x2x128xf32>, vector<16x14x128xf32> -> vector<16x16x128xf32>
    %c0_13 = arith.constant 0 : index
    %c0_14 = arith.constant 0 : index
    %c0_15 = arith.constant 0 : index
    %32 = vector.load %arg10[%c0_13, %c0_14, %c0_15] : memref<20x16x128xf32, #tpu.memory_space<vmem>>, vector<2x16x128xf32>
    tpu.vector_store %arg10[%c0_13, %c0_14, %c0_15], %27 {strides = array<i32>} : memref<20x16x128xf32, #tpu.memory_space<vmem>>, vector<2x16x128xf32>,
    %c18 = arith.constant 18 : index
    %c0_16 = arith.constant 0 : index
    %c0_17 = arith.constant 0 : index
    %33 = vector.load %arg10[%c18, %c0_16, %c0_17] : memref<20x16x128xf32, #tpu.memory_space<vmem>>, vector<2x16x128xf32>
    tpu.vector_store %arg10[%c18, %c0_16, %c0_17], %27 {strides = array<i32>} : memref<20x16x128xf32, #tpu.memory_space<vmem>>, vector<2x16x128xf32>,
    %c2 = arith.constant 2 : index
    %c0_18 = arith.constant 0 : index
    %c0_19 = arith.constant 0 : index
    %34 = vector.load %arg10[%c2, %c0_18, %c0_19] : memref<20x16x128xf32, #tpu.memory_space<vmem>>, vector<16x16x128xf32>
    tpu.vector_store %arg10[%c2, %c0_18, %c0_19], %31 {strides = array<i32>} : memref<20x16x128xf32, #tpu.memory_space<vmem>>, vector<16x16x128xf32>,
    %35 = vector.extract_strided_slice %26 {offsets = [0, 0, 0], sizes = [16, 15, 128], strides = [1, 1, 1]} : vector<16x16x128xf32> to vector<16x15x128xf32>
    %36 = tpu.concatenate %28, %35 in 1 : vector<16x1x128xf32>, vector<16x15x128xf32> -> vector<16x16x128xf32>
    %c0_20 = arith.constant 0 : index
    %c0_21 = arith.constant 0 : index
    %c0_22 = arith.constant 0 : index
    %37 = vector.load %arg11[%c0_20, %c0_21, %c0_22] : memref<20x16x128xf32, #tpu.memory_space<vmem>>, vector<2x16x128xf32>
    tpu.vector_store %arg11[%c0_20, %c0_21, %c0_22], %27 {strides = array<i32>} : memref<20x16x128xf32, #tpu.memory_space<vmem>>, vector<2x16x128xf32>,
    %c18_23 = arith.constant 18 : index
    %c0_24 = arith.constant 0 : index
    %c0_25 = arith.constant 0 : index
    %38 = vector.load %arg11[%c18_23, %c0_24, %c0_25] : memref<20x16x128xf32, #tpu.memory_space<vmem>>, vector<2x16x128xf32>
    tpu.vector_store %arg11[%c18_23, %c0_24, %c0_25], %27 {strides = array<i32>} : memref<20x16x128xf32, #tpu.memory_space<vmem>>, vector<2x16x128xf32>,
    %c2_26 = arith.constant 2 : index
    %c0_27 = arith.constant 0 : index
    %c0_28 = arith.constant 0 : index
    %39 = vector.load %arg11[%c2_26, %c0_27, %c0_28] : memref<20x16x128xf32, #tpu.memory_space<vmem>>, vector<16x16x128xf32>
    tpu.vector_store %arg11[%c2_26, %c0_27, %c0_28], %36 {strides = array<i32>} : memref<20x16x128xf32, #tpu.memory_space<vmem>>, vector<16x16x128xf32>,
    %c0_29 = arith.constant 0 : index
    %c0_30 = arith.constant 0 : index
    %c0_31 = arith.constant 0 : index
    %40 = vector.load %arg12[%c0_29, %c0_30, %c0_31] : memref<20x16x128xf32, #tpu.memory_space<vmem>>, vector<2x16x128xf32>
    tpu.vector_store %arg12[%c0_29, %c0_30, %c0_31], %27 {strides = array<i32>} : memref<20x16x128xf32, #tpu.memory_space<vmem>>, vector<2x16x128xf32>,
    %c18_32 = arith.constant 18 : index
    %c0_33 = arith.constant 0 : index
    %c0_34 = arith.constant 0 : index
    %41 = vector.load %arg12[%c18_32, %c0_33, %c0_34] : memref<20x16x128xf32, #tpu.memory_space<vmem>>, vector<2x16x128xf32>
    tpu.vector_store %arg12[%c18_32, %c0_33, %c0_34], %27 {strides = array<i32>} : memref<20x16x128xf32, #tpu.memory_space<vmem>>, vector<2x16x128xf32>,
    %c2_35 = arith.constant 2 : index
    %c0_36 = arith.constant 0 : index
    %c0_37 = arith.constant 0 : index
    %42 = vector.load %arg12[%c2_35, %c0_36, %c0_37] : memref<20x16x128xf32, #tpu.memory_space<vmem>>, vector<16x16x128xf32>
    tpu.vector_store %arg12[%c2_35, %c0_36, %c0_37], %26 {strides = array<i32>} : memref<20x16x128xf32, #tpu.memory_space<vmem>>, vector<16x16x128xf32>,
    %43 = vector.extract_strided_slice %26 {offsets = [0, 1, 0], sizes = [16, 15, 128], strides = [1, 1, 1]} : vector<16x16x128xf32> to vector<16x15x128xf32>
    %44 = tpu.concatenate %43, %28 in 1 : vector<16x15x128xf32>, vector<16x1x128xf32> -> vector<16x16x128xf32>
    %c0_38 = arith.constant 0 : index
    %c0_39 = arith.constant 0 : index
    %c0_40 = arith.constant 0 : index
    %45 = vector.load %arg13[%c0_38, %c0_39, %c0_40] : memref<20x16x128xf32, #tpu.memory_space<vmem>>, vector<2x16x128xf32>
    tpu.vector_store %arg13[%c0_38, %c0_39, %c0_40], %27 {strides = array<i32>} : memref<20x16x128xf32, #tpu.memory_space<vmem>>, vector<2x16x128xf32>,
    %c18_41 = arith.constant 18 : index
    %c0_42 = arith.constant 0 : index
    %c0_43 = arith.constant 0 : index
    %46 = vector.load %arg13[%c18_41, %c0_42, %c0_43] : memref<20x16x128xf32, #tpu.memory_space<vmem>>, vector<2x16x128xf32>
    tpu.vector_store %arg13[%c18_41, %c0_42, %c0_43], %27 {strides = array<i32>} : memref<20x16x128xf32, #tpu.memory_space<vmem>>, vector<2x16x128xf32>,
    %c2_44 = arith.constant 2 : index
    %c0_45 = arith.constant 0 : index
    %c0_46 = arith.constant 0 : index
    %47 = vector.load %arg13[%c2_44, %c0_45, %c0_46] : memref<20x16x128xf32, #tpu.memory_space<vmem>>, vector<16x16x128xf32>
    tpu.vector_store %arg13[%c2_44, %c0_45, %c0_46], %44 {strides = array<i32>} : memref<20x16x128xf32, #tpu.memory_space<vmem>>, vector<16x16x128xf32>,
    %48 = vector.extract_strided_slice %26 {offsets = [0, 2, 0], sizes = [16, 14, 128], strides = [1, 1, 1]} : vector<16x16x128xf32> to vector<16x14x128xf32>
    %49 = tpu.concatenate %48, %29 in 1 : vector<16x14x128xf32>, vector<16x2x128xf32> -> vector<16x16x128xf32>
    %c0_47 = arith.constant 0 : index
    %c0_48 = arith.constant 0 : index
    %c0_49 = arith.constant 0 : index
    %50 = vector.load %arg14[%c0_47, %c0_48, %c0_49] : memref<20x16x128xf32, #tpu.memory_space<vmem>>, vector<2x16x128xf32>
    tpu.vector_store %arg14[%c0_47, %c0_48, %c0_49], %27 {strides = array<i32>} : memref<20x16x128xf32, #tpu.memory_space<vmem>>, vector<2x16x128xf32>,
    %c18_50 = arith.constant 18 : index
    %c0_51 = arith.constant 0 : index
    %c0_52 = arith.constant 0 : index
    %51 = vector.load %arg14[%c18_50, %c0_51, %c0_52] : memref<20x16x128xf32, #tpu.memory_space<vmem>>, vector<2x16x128xf32>
    tpu.vector_store %arg14[%c18_50, %c0_51, %c0_52], %27 {strides = array<i32>} : memref<20x16x128xf32, #tpu.memory_space<vmem>>, vector<2x16x128xf32>,
    %c2_53 = arith.constant 2 : index
    %c0_54 = arith.constant 0 : index
    %c0_55 = arith.constant 0 : index
    %52 = vector.load %arg14[%c2_53, %c0_54, %c0_55] : memref<20x16x128xf32, #tpu.memory_space<vmem>>, vector<16x16x128xf32>
    tpu.vector_store %arg14[%c2_53, %c0_54, %c0_55], %49 {strides = array<i32>} : memref<20x16x128xf32, #tpu.memory_space<vmem>>, vector<16x16x128xf32>,
    %c0_56 = arith.constant 0 : index
    %c0_57 = arith.constant 0 : index
    %c0_58 = arith.constant 0 : index
    %53 = vector.load %arg2[%c0_56, %c0_57, %c0_58] : memref<3x3x128xf32, #tpu.memory_space<vmem>>, vector<3x3x128xf32>
    %c0_59 = arith.constant 0 : index
    %c0_60 = arith.constant 0 : index
    %c0_61 = arith.constant 0 : index
    %54 = vector.load %arg3[%c0_59, %c0_60, %c0_61] : memref<5x5x128xf32, #tpu.memory_space<vmem>>, vector<5x5x128xf32>
    %c0_62 = arith.constant 0 : index
    %c0_63 = arith.constant 0 : index
    %55 = vector.load %arg4[%c0_62, %c0_63] : memref<2x128xf32, #tpu.memory_space<vmem>>, vector<1x128xf32>
    %56 = vector.shape_cast %55 : vector<1x128xf32> to vector<128xf32>
    %c1 = arith.constant 1 : index
    %c0_64 = arith.constant 0 : index
    %57 = vector.load %arg4[%c1, %c0_64] : memref<2x128xf32, #tpu.memory_space<vmem>>, vector<1x128xf32>
    %58 = vector.shape_cast %57 : vector<1x128xf32> to vector<128xf32>
    %cst_65 = arith.constant 0.000000e+00 : f32
    %59 = vector.broadcast %cst_65 : f32 to vector<1x128xf32>
    %c0_i32 = arith.constant 0 : i32
    %c8_i32 = arith.constant 8 : i32
    %60 = arith.muli %c0_i32, %c8_i32 : i32
    %cst_66 = arith.constant 0.000000e+00 : f32
    %61 = vector.broadcast %cst_66 : f32 to vector<8x16x128xf32>
    %cst_67 = arith.constant 0.000000e+00 : f32
    %62 = vector.broadcast %cst_67 : f32 to vector<8x16x128xf32>
    %c-2_i32 = arith.constant -2 : i32
    %63 = arith.addi %60, %c-2_i32 : i32
    %c2_i32 = arith.constant 2 : i32
    %64 = arith.addi %63, %c2_i32 : i32
    %65 = arith.index_cast %64 : i32 to index
    %c0_68 = arith.constant 0 : index
    %c0_69 = arith.constant 0 : index
    %66 = vector.load %arg10[%65, %c0_68, %c0_69] : memref<20x16x128xf32, #tpu.memory_space<vmem>>, vector<8x16x128xf32>
    %67 = vector.extract_strided_slice %54 {offsets = [0, 0, 0], sizes = [1, 1, 128], strides = [1, 1, 1]} : vector<5x5x128xf32> to vector<1x1x128xf32>
    %68 = vector.shape_cast %67 : vector<1x1x128xf32> to vector<128xf32>
    %69 = vector.shape_cast %68 : vector<128xf32> to vector<1x1x128xf32>
    %70 = vector.broadcast %69 : vector<1x1x128xf32> to vector<8x16x128xf32>
    %71 = arith.mulf %66, %70 : vector<8x16x128xf32>
    %72 = arith.addf %62, %71 : vector<8x16x128xf32>
    %c-2_i32_70 = arith.constant -2 : i32
    %73 = arith.addi %60, %c-2_i32_70 : i32
    %c2_i32_71 = arith.constant 2 : i32
    %74 = arith.addi %73, %c2_i32_71 : i32
    %75 = arith.index_cast %74 : i32 to index
    %c0_72 = arith.constant 0 : index
    %c0_73 = arith.constant 0 : index
    %76 = vector.load %arg11[%75, %c0_72, %c0_73] : memref<20x16x128xf32, #tpu.memory_space<vmem>>, vector<8x16x128xf32>
    %77 = vector.extract_strided_slice %54 {offsets = [0, 1, 0], sizes = [1, 1, 128], strides = [1, 1, 1]} : vector<5x5x128xf32> to vector<1x1x128xf32>
    %78 = vector.shape_cast %77 : vector<1x1x128xf32> to vector<128xf32>
    %79 = vector.shape_cast %78 : vector<128xf32> to vector<1x1x128xf32>
    %80 = vector.broadcast %79 : vector<1x1x128xf32> to vector<8x16x128xf32>
    %81 = arith.mulf %76, %80 : vector<8x16x128xf32>
    %82 = arith.addf %72, %81 : vector<8x16x128xf32>
    %c-2_i32_74 = arith.constant -2 : i32
    %83 = arith.addi %60, %c-2_i32_74 : i32
    %c2_i32_75 = arith.constant 2 : i32
    %84 = arith.addi %83, %c2_i32_75 : i32
    %85 = arith.index_cast %84 : i32 to index
    %c0_76 = arith.constant 0 : index
    %c0_77 = arith.constant 0 : index
    %86 = vector.load %arg12[%85, %c0_76, %c0_77] : memref<20x16x128xf32, #tpu.memory_space<vmem>>, vector<8x16x128xf32>
    %87 = vector.extract_strided_slice %54 {offsets = [0, 2, 0], sizes = [1, 1, 128], strides = [1, 1, 1]} : vector<5x5x128xf32> to vector<1x1x128xf32>
    %88 = vector.shape_cast %87 : vector<1x1x128xf32> to vector<128xf32>
    %89 = vector.shape_cast %88 : vector<128xf32> to vector<1x1x128xf32>
    %90 = vector.broadcast %89 : vector<1x1x128xf32> to vector<8x16x128xf32>
    %91 = arith.mulf %86, %90 : vector<8x16x128xf32>
    %92 = arith.addf %82, %91 : vector<8x16x128xf32>
    %c-2_i32_78 = arith.constant -2 : i32
    %93 = arith.addi %60, %c-2_i32_78 : i32
    %c2_i32_79 = arith.constant 2 : i32
    %94 = arith.addi %93, %c2_i32_79 : i32
    %95 = arith.index_cast %94 : i32 to index
    %c0_80 = arith.constant 0 : index
    %c0_81 = arith.constant 0 : index
    %96 = vector.load %arg13[%95, %c0_80, %c0_81] : memref<20x16x128xf32, #tpu.memory_space<vmem>>, vector<8x16x128xf32>
    %97 = vector.extract_strided_slice %54 {offsets = [0, 3, 0], sizes = [1, 1, 128], strides = [1, 1, 1]} : vector<5x5x128xf32> to vector<1x1x128xf32>
    %98 = vector.shape_cast %97 : vector<1x1x128xf32> to vector<128xf32>
    %99 = vector.shape_cast %98 : vector<128xf32> to vector<1x1x128xf32>
    %100 = vector.broadcast %99 : vector<1x1x128xf32> to vector<8x16x128xf32>
    %101 = arith.mulf %96, %100 : vector<8x16x128xf32>
    %102 = arith.addf %92, %101 : vector<8x16x128xf32>
    %c-2_i32_82 = arith.constant -2 : i32
    %103 = arith.addi %60, %c-2_i32_82 : i32
    %c2_i32_83 = arith.constant 2 : i32
    %104 = arith.addi %103, %c2_i32_83 : i32
    %105 = arith.index_cast %104 : i32 to index
    %c0_84 = arith.constant 0 : index
    %c0_85 = arith.constant 0 : index
    %106 = vector.load %arg14[%105, %c0_84, %c0_85] : memref<20x16x128xf32, #tpu.memory_space<vmem>>, vector<8x16x128xf32>
    %107 = vector.extract_strided_slice %54 {offsets = [0, 4, 0], sizes = [1, 1, 128], strides = [1, 1, 1]} : vector<5x5x128xf32> to vector<1x1x128xf32>
    %108 = vector.shape_cast %107 : vector<1x1x128xf32> to vector<128xf32>
    %109 = vector.shape_cast %108 : vector<128xf32> to vector<1x1x128xf32>
    %110 = vector.broadcast %109 : vector<1x1x128xf32> to vector<8x16x128xf32>
    %111 = arith.mulf %106, %110 : vector<8x16x128xf32>
    %112 = arith.addf %102, %111 : vector<8x16x128xf32>
    %c-1_i32 = arith.constant -1 : i32
    %113 = arith.addi %60, %c-1_i32 : i32
    %c2_i32_86 = arith.constant 2 : i32
    %114 = arith.addi %113, %c2_i32_86 : i32
    %115 = arith.index_cast %114 : i32 to index
    %c0_87 = arith.constant 0 : index
    %c0_88 = arith.constant 0 : index
    %116 = vector.load %arg10[%115, %c0_87, %c0_88] : memref<20x16x128xf32, #tpu.memory_space<vmem>>, vector<8x16x128xf32>
    %117 = vector.extract_strided_slice %54 {offsets = [1, 0, 0], sizes = [1, 1, 128], strides = [1, 1, 1]} : vector<5x5x128xf32> to vector<1x1x128xf32>
    %118 = vector.shape_cast %117 : vector<1x1x128xf32> to vector<128xf32>
    %119 = vector.shape_cast %118 : vector<128xf32> to vector<1x1x128xf32>
    %120 = vector.broadcast %119 : vector<1x1x128xf32> to vector<8x16x128xf32>
    %121 = arith.mulf %116, %120 : vector<8x16x128xf32>
    %122 = arith.addf %112, %121 : vector<8x16x128xf32>
    %c-1_i32_89 = arith.constant -1 : i32
    %123 = arith.addi %60, %c-1_i32_89 : i32
    %c2_i32_90 = arith.constant 2 : i32
    %124 = arith.addi %123, %c2_i32_90 : i32
    %125 = arith.index_cast %124 : i32 to index
    %c0_91 = arith.constant 0 : index
    %c0_92 = arith.constant 0 : index
    %126 = vector.load %arg11[%125, %c0_91, %c0_92] : memref<20x16x128xf32, #tpu.memory_space<vmem>>, vector<8x16x128xf32>
    %127 = vector.extract_strided_slice %54 {offsets = [1, 1, 0], sizes = [1, 1, 128], strides = [1, 1, 1]} : vector<5x5x128xf32> to vector<1x1x128xf32>
    %128 = vector.shape_cast %127 : vector<1x1x128xf32> to vector<128xf32>
    %129 = vector.shape_cast %128 : vector<128xf32> to vector<1x1x128xf32>
    %130 = vector.broadcast %129 : vector<1x1x128xf32> to vector<8x16x128xf32>
    %131 = arith.mulf %126, %130 : vector<8x16x128xf32>
    %132 = arith.addf %122, %131 : vector<8x16x128xf32>
    %133 = vector.extract_strided_slice %53 {offsets = [0, 0, 0], sizes = [1, 1, 128], strides = [1, 1, 1]} : vector<3x3x128xf32> to vector<1x1x128xf32>
    %134 = vector.shape_cast %133 : vector<1x1x128xf32> to vector<128xf32>
    %135 = vector.shape_cast %134 : vector<128xf32> to vector<1x1x128xf32>
    %136 = vector.broadcast %135 : vector<1x1x128xf32> to vector<8x16x128xf32>
    %137 = arith.mulf %126, %136 : vector<8x16x128xf32>
    %138 = arith.addf %61, %137 : vector<8x16x128xf32>
    %c-1_i32_93 = arith.constant -1 : i32
    %139 = arith.addi %60, %c-1_i32_93 : i32
    %c2_i32_94 = arith.constant 2 : i32
    %140 = arith.addi %139, %c2_i32_94 : i32
    %141 = arith.index_cast %140 : i32 to index
    %c0_95 = arith.constant 0 : index
    %c0_96 = arith.constant 0 : index
    %142 = vector.load %arg12[%141, %c0_95, %c0_96] : memref<20x16x128xf32, #tpu.memory_space<vmem>>, vector<8x16x128xf32>
    %143 = vector.extract_strided_slice %54 {offsets = [1, 2, 0], sizes = [1, 1, 128], strides = [1, 1, 1]} : vector<5x5x128xf32> to vector<1x1x128xf32>
    %144 = vector.shape_cast %143 : vector<1x1x128xf32> to vector<128xf32>
    %145 = vector.shape_cast %144 : vector<128xf32> to vector<1x1x128xf32>
    %146 = vector.broadcast %145 : vector<1x1x128xf32> to vector<8x16x128xf32>
    %147 = arith.mulf %142, %146 : vector<8x16x128xf32>
    %148 = arith.addf %132, %147 : vector<8x16x128xf32>
    %149 = vector.extract_strided_slice %53 {offsets = [0, 1, 0], sizes = [1, 1, 128], strides = [1, 1, 1]} : vector<3x3x128xf32> to vector<1x1x128xf32>
    %150 = vector.shape_cast %149 : vector<1x1x128xf32> to vector<128xf32>
    %151 = vector.shape_cast %150 : vector<128xf32> to vector<1x1x128xf32>
    %152 = vector.broadcast %151 : vector<1x1x128xf32> to vector<8x16x128xf32>
    %153 = arith.mulf %142, %152 : vector<8x16x128xf32>
    %154 = arith.addf %138, %153 : vector<8x16x128xf32>
    %c-1_i32_97 = arith.constant -1 : i32
    %155 = arith.addi %60, %c-1_i32_97 : i32
    %c2_i32_98 = arith.constant 2 : i32
    %156 = arith.addi %155, %c2_i32_98 : i32
    %157 = arith.index_cast %156 : i32 to index
    %c0_99 = arith.constant 0 : index
    %c0_100 = arith.constant 0 : index
    %158 = vector.load %arg13[%157, %c0_99, %c0_100] : memref<20x16x128xf32, #tpu.memory_space<vmem>>, vector<8x16x128xf32>
    %159 = vector.extract_strided_slice %54 {offsets = [1, 3, 0], sizes = [1, 1, 128], strides = [1, 1, 1]} : vector<5x5x128xf32> to vector<1x1x128xf32>
    %160 = vector.shape_cast %159 : vector<1x1x128xf32> to vector<128xf32>
    %161 = vector.shape_cast %160 : vector<128xf32> to vector<1x1x128xf32>
    %162 = vector.broadcast %161 : vector<1x1x128xf32> to vector<8x16x128xf32>
    %163 = arith.mulf %158, %162 : vector<8x16x128xf32>
    %164 = arith.addf %148, %163 : vector<8x16x128xf32>
    %165 = vector.extract_strided_slice %53 {offsets = [0, 2, 0], sizes = [1, 1, 128], strides = [1, 1, 1]} : vector<3x3x128xf32> to vector<1x1x128xf32>
    %166 = vector.shape_cast %165 : vector<1x1x128xf32> to vector<128xf32>
    %167 = vector.shape_cast %166 : vector<128xf32> to vector<1x1x128xf32>
    %168 = vector.broadcast %167 : vector<1x1x128xf32> to vector<8x16x128xf32>
    %169 = arith.mulf %158, %168 : vector<8x16x128xf32>
    %170 = arith.addf %154, %169 : vector<8x16x128xf32>
    %c-1_i32_101 = arith.constant -1 : i32
    %171 = arith.addi %60, %c-1_i32_101 : i32
    %c2_i32_102 = arith.constant 2 : i32
    %172 = arith.addi %171, %c2_i32_102 : i32
    %173 = arith.index_cast %172 : i32 to index
    %c0_103 = arith.constant 0 : index
    %c0_104 = arith.constant 0 : index
    %174 = vector.load %arg14[%173, %c0_103, %c0_104] : memref<20x16x128xf32, #tpu.memory_space<vmem>>, vector<8x16x128xf32>
    %175 = vector.extract_strided_slice %54 {offsets = [1, 4, 0], sizes = [1, 1, 128], strides = [1, 1, 1]} : vector<5x5x128xf32> to vector<1x1x128xf32>
    %176 = vector.shape_cast %175 : vector<1x1x128xf32> to vector<128xf32>
    %177 = vector.shape_cast %176 : vector<128xf32> to vector<1x1x128xf32>
    %178 = vector.broadcast %177 : vector<1x1x128xf32> to vector<8x16x128xf32>
    %179 = arith.mulf %174, %178 : vector<8x16x128xf32>
    %180 = arith.addf %164, %179 : vector<8x16x128xf32>
    %c0_i32_105 = arith.constant 0 : i32
    %181 = arith.addi %60, %c0_i32_105 : i32
    %c2_i32_106 = arith.constant 2 : i32
    %182 = arith.addi %181, %c2_i32_106 : i32
    %183 = arith.index_cast %182 : i32 to index
    %c0_107 = arith.constant 0 : index
    %c0_108 = arith.constant 0 : index
    %184 = vector.load %arg10[%183, %c0_107, %c0_108] : memref<20x16x128xf32, #tpu.memory_space<vmem>>, vector<8x16x128xf32>
    %185 = vector.extract_strided_slice %54 {offsets = [2, 0, 0], sizes = [1, 1, 128], strides = [1, 1, 1]} : vector<5x5x128xf32> to vector<1x1x128xf32>
    %186 = vector.shape_cast %185 : vector<1x1x128xf32> to vector<128xf32>
    %187 = vector.shape_cast %186 : vector<128xf32> to vector<1x1x128xf32>
    %188 = vector.broadcast %187 : vector<1x1x128xf32> to vector<8x16x128xf32>
    %189 = arith.mulf %184, %188 : vector<8x16x128xf32>
    %190 = arith.addf %180, %189 : vector<8x16x128xf32>
    %c0_i32_109 = arith.constant 0 : i32
    %191 = arith.addi %60, %c0_i32_109 : i32
    %c2_i32_110 = arith.constant 2 : i32
    %192 = arith.addi %191, %c2_i32_110 : i32
    %193 = arith.index_cast %192 : i32 to index
    %c0_111 = arith.constant 0 : index
    %c0_112 = arith.constant 0 : index
    %194 = vector.load %arg11[%193, %c0_111, %c0_112] : memref<20x16x128xf32, #tpu.memory_space<vmem>>, vector<8x16x128xf32>
    %195 = vector.extract_strided_slice %54 {offsets = [2, 1, 0], sizes = [1, 1, 128], strides = [1, 1, 1]} : vector<5x5x128xf32> to vector<1x1x128xf32>
    %196 = vector.shape_cast %195 : vector<1x1x128xf32> to vector<128xf32>
    %197 = vector.shape_cast %196 : vector<128xf32> to vector<1x1x128xf32>
    %198 = vector.broadcast %197 : vector<1x1x128xf32> to vector<8x16x128xf32>
    %199 = arith.mulf %194, %198 : vector<8x16x128xf32>
    %200 = arith.addf %190, %199 : vector<8x16x128xf32>
    %201 = vector.extract_strided_slice %53 {offsets = [1, 0, 0], sizes = [1, 1, 128], strides = [1, 1, 1]} : vector<3x3x128xf32> to vector<1x1x128xf32>
    %202 = vector.shape_cast %201 : vector<1x1x128xf32> to vector<128xf32>
    %203 = vector.shape_cast %202 : vector<128xf32> to vector<1x1x128xf32>
    %204 = vector.broadcast %203 : vector<1x1x128xf32> to vector<8x16x128xf32>
    %205 = arith.mulf %194, %204 : vector<8x16x128xf32>
    %206 = arith.addf %170, %205 : vector<8x16x128xf32>
    %c0_i32_113 = arith.constant 0 : i32
    %207 = arith.addi %60, %c0_i32_113 : i32
    %c2_i32_114 = arith.constant 2 : i32
    %208 = arith.addi %207, %c2_i32_114 : i32
    %209 = arith.index_cast %208 : i32 to index
    %c0_115 = arith.constant 0 : index
    %c0_116 = arith.constant 0 : index
    %210 = vector.load %arg12[%209, %c0_115, %c0_116] : memref<20x16x128xf32, #tpu.memory_space<vmem>>, vector<8x16x128xf32>
    %211 = vector.extract_strided_slice %54 {offsets = [2, 2, 0], sizes = [1, 1, 128], strides = [1, 1, 1]} : vector<5x5x128xf32> to vector<1x1x128xf32>
    %212 = vector.shape_cast %211 : vector<1x1x128xf32> to vector<128xf32>
    %213 = vector.shape_cast %212 : vector<128xf32> to vector<1x1x128xf32>
    %214 = vector.broadcast %213 : vector<1x1x128xf32> to vector<8x16x128xf32>
    %215 = arith.mulf %210, %214 : vector<8x16x128xf32>
    %216 = arith.addf %200, %215 : vector<8x16x128xf32>
    %217 = vector.extract_strided_slice %53 {offsets = [1, 1, 0], sizes = [1, 1, 128], strides = [1, 1, 1]} : vector<3x3x128xf32> to vector<1x1x128xf32>
    %218 = vector.shape_cast %217 : vector<1x1x128xf32> to vector<128xf32>
    %219 = vector.shape_cast %218 : vector<128xf32> to vector<1x1x128xf32>
    %220 = vector.broadcast %219 : vector<1x1x128xf32> to vector<8x16x128xf32>
    %221 = arith.mulf %210, %220 : vector<8x16x128xf32>
    %222 = arith.addf %206, %221 : vector<8x16x128xf32>
    %c0_i32_117 = arith.constant 0 : i32
    %223 = arith.addi %60, %c0_i32_117 : i32
    %c2_i32_118 = arith.constant 2 : i32
    %224 = arith.addi %223, %c2_i32_118 : i32
    %225 = arith.index_cast %224 : i32 to index
    %c0_119 = arith.constant 0 : index
    %c0_120 = arith.constant 0 : index
    %226 = vector.load %arg13[%225, %c0_119, %c0_120] : memref<20x16x128xf32, #tpu.memory_space<vmem>>, vector<8x16x128xf32>
    %227 = vector.extract_strided_slice %54 {offsets = [2, 3, 0], sizes = [1, 1, 128], strides = [1, 1, 1]} : vector<5x5x128xf32> to vector<1x1x128xf32>
    %228 = vector.shape_cast %227 : vector<1x1x128xf32> to vector<128xf32>
    %229 = vector.shape_cast %228 : vector<128xf32> to vector<1x1x128xf32>
    %230 = vector.broadcast %229 : vector<1x1x128xf32> to vector<8x16x128xf32>
    %231 = arith.mulf %226, %230 : vector<8x16x128xf32>
    %232 = arith.addf %216, %231 : vector<8x16x128xf32>
    %233 = vector.extract_strided_slice %53 {offsets = [1, 2, 0], sizes = [1, 1, 128], strides = [1, 1, 1]} : vector<3x3x128xf32> to vector<1x1x128xf32>
    %234 = vector.shape_cast %233 : vector<1x1x128xf32> to vector<128xf32>
    %235 = vector.shape_cast %234 : vector<128xf32> to vector<1x1x128xf32>
    %236 = vector.broadcast %235 : vector<1x1x128xf32> to vector<8x16x128xf32>
    %237 = arith.mulf %226, %236 : vector<8x16x128xf32>
    %238 = arith.addf %222, %237 : vector<8x16x128xf32>
    %c0_i32_121 = arith.constant 0 : i32
    %239 = arith.addi %60, %c0_i32_121 : i32
    %c2_i32_122 = arith.constant 2 : i32
    %240 = arith.addi %239, %c2_i32_122 : i32
    %241 = arith.index_cast %240 : i32 to index
    %c0_123 = arith.constant 0 : index
    %c0_124 = arith.constant 0 : index
    %242 = vector.load %arg14[%241, %c0_123, %c0_124] : memref<20x16x128xf32, #tpu.memory_space<vmem>>, vector<8x16x128xf32>
    %243 = vector.extract_strided_slice %54 {offsets = [2, 4, 0], sizes = [1, 1, 128], strides = [1, 1, 1]} : vector<5x5x128xf32> to vector<1x1x128xf32>
    %244 = vector.shape_cast %243 : vector<1x1x128xf32> to vector<128xf32>
    %245 = vector.shape_cast %244 : vector<128xf32> to vector<1x1x128xf32>
    %246 = vector.broadcast %245 : vector<1x1x128xf32> to vector<8x16x128xf32>
    %247 = arith.mulf %242, %246 : vector<8x16x128xf32>
    %248 = arith.addf %232, %247 : vector<8x16x128xf32>
    %c1_i32 = arith.constant 1 : i32
    %249 = arith.addi %60, %c1_i32 : i32
    %c2_i32_125 = arith.constant 2 : i32
    %250 = arith.addi %249, %c2_i32_125 : i32
    %251 = arith.index_cast %250 : i32 to index
    %c0_126 = arith.constant 0 : index
    %c0_127 = arith.constant 0 : index
    %252 = vector.load %arg10[%251, %c0_126, %c0_127] : memref<20x16x128xf32, #tpu.memory_space<vmem>>, vector<8x16x128xf32>
    %253 = vector.extract_strided_slice %54 {offsets = [3, 0, 0], sizes = [1, 1, 128], strides = [1, 1, 1]} : vector<5x5x128xf32> to vector<1x1x128xf32>
    %254 = vector.shape_cast %253 : vector<1x1x128xf32> to vector<128xf32>
    %255 = vector.shape_cast %254 : vector<128xf32> to vector<1x1x128xf32>
    %256 = vector.broadcast %255 : vector<1x1x128xf32> to vector<8x16x128xf32>
    %257 = arith.mulf %252, %256 : vector<8x16x128xf32>
    %258 = arith.addf %248, %257 : vector<8x16x128xf32>
    %c1_i32_128 = arith.constant 1 : i32
    %259 = arith.addi %60, %c1_i32_128 : i32
    %c2_i32_129 = arith.constant 2 : i32
    %260 = arith.addi %259, %c2_i32_129 : i32
    %261 = arith.index_cast %260 : i32 to index
    %c0_130 = arith.constant 0 : index
    %c0_131 = arith.constant 0 : index
    %262 = vector.load %arg11[%261, %c0_130, %c0_131] : memref<20x16x128xf32, #tpu.memory_space<vmem>>, vector<8x16x128xf32>
    %263 = vector.extract_strided_slice %54 {offsets = [3, 1, 0], sizes = [1, 1, 128], strides = [1, 1, 1]} : vector<5x5x128xf32> to vector<1x1x128xf32>
    %264 = vector.shape_cast %263 : vector<1x1x128xf32> to vector<128xf32>
    %265 = vector.shape_cast %264 : vector<128xf32> to vector<1x1x128xf32>
    %266 = vector.broadcast %265 : vector<1x1x128xf32> to vector<8x16x128xf32>
    %267 = arith.mulf %262, %266 : vector<8x16x128xf32>
    %268 = arith.addf %258, %267 : vector<8x16x128xf32>
    %269 = vector.extract_strided_slice %53 {offsets = [2, 0, 0], sizes = [1, 1, 128], strides = [1, 1, 1]} : vector<3x3x128xf32> to vector<1x1x128xf32>
    %270 = vector.shape_cast %269 : vector<1x1x128xf32> to vector<128xf32>
    %271 = vector.shape_cast %270 : vector<128xf32> to vector<1x1x128xf32>
    %272 = vector.broadcast %271 : vector<1x1x128xf32> to vector<8x16x128xf32>
    %273 = arith.mulf %262, %272 : vector<8x16x128xf32>
    %274 = arith.addf %238, %273 : vector<8x16x128xf32>
    %c1_i32_132 = arith.constant 1 : i32
    %275 = arith.addi %60, %c1_i32_132 : i32
    %c2_i32_133 = arith.constant 2 : i32
    %276 = arith.addi %275, %c2_i32_133 : i32
    %277 = arith.index_cast %276 : i32 to index
    %c0_134 = arith.constant 0 : index
    %c0_135 = arith.constant 0 : index
    %278 = vector.load %arg12[%277, %c0_134, %c0_135] : memref<20x16x128xf32, #tpu.memory_space<vmem>>, vector<8x16x128xf32>
    %279 = vector.extract_strided_slice %54 {offsets = [3, 2, 0], sizes = [1, 1, 128], strides = [1, 1, 1]} : vector<5x5x128xf32> to vector<1x1x128xf32>
    %280 = vector.shape_cast %279 : vector<1x1x128xf32> to vector<128xf32>
    %281 = vector.shape_cast %280 : vector<128xf32> to vector<1x1x128xf32>
    %282 = vector.broadcast %281 : vector<1x1x128xf32> to vector<8x16x128xf32>
    %283 = arith.mulf %278, %282 : vector<8x16x128xf32>
    %284 = arith.addf %268, %283 : vector<8x16x128xf32>
    %285 = vector.extract_strided_slice %53 {offsets = [2, 1, 0], sizes = [1, 1, 128], strides = [1, 1, 1]} : vector<3x3x128xf32> to vector<1x1x128xf32>
    %286 = vector.shape_cast %285 : vector<1x1x128xf32> to vector<128xf32>
    %287 = vector.shape_cast %286 : vector<128xf32> to vector<1x1x128xf32>
    %288 = vector.broadcast %287 : vector<1x1x128xf32> to vector<8x16x128xf32>
    %289 = arith.mulf %278, %288 : vector<8x16x128xf32>
    %290 = arith.addf %274, %289 : vector<8x16x128xf32>
    %c1_i32_136 = arith.constant 1 : i32
    %291 = arith.addi %60, %c1_i32_136 : i32
    %c2_i32_137 = arith.constant 2 : i32
    %292 = arith.addi %291, %c2_i32_137 : i32
    %293 = arith.index_cast %292 : i32 to index
    %c0_138 = arith.constant 0 : index
    %c0_139 = arith.constant 0 : index
    %294 = vector.load %arg13[%293, %c0_138, %c0_139] : memref<20x16x128xf32, #tpu.memory_space<vmem>>, vector<8x16x128xf32>
    %295 = vector.extract_strided_slice %54 {offsets = [3, 3, 0], sizes = [1, 1, 128], strides = [1, 1, 1]} : vector<5x5x128xf32> to vector<1x1x128xf32>
    %296 = vector.shape_cast %295 : vector<1x1x128xf32> to vector<128xf32>
    %297 = vector.shape_cast %296 : vector<128xf32> to vector<1x1x128xf32>
    %298 = vector.broadcast %297 : vector<1x1x128xf32> to vector<8x16x128xf32>
    %299 = arith.mulf %294, %298 : vector<8x16x128xf32>
    %300 = arith.addf %284, %299 : vector<8x16x128xf32>
    %301 = vector.extract_strided_slice %53 {offsets = [2, 2, 0], sizes = [1, 1, 128], strides = [1, 1, 1]} : vector<3x3x128xf32> to vector<1x1x128xf32>
    %302 = vector.shape_cast %301 : vector<1x1x128xf32> to vector<128xf32>
    %303 = vector.shape_cast %302 : vector<128xf32> to vector<1x1x128xf32>
    %304 = vector.broadcast %303 : vector<1x1x128xf32> to vector<8x16x128xf32>
    %305 = arith.mulf %294, %304 : vector<8x16x128xf32>
    %306 = arith.addf %290, %305 : vector<8x16x128xf32>
    %c1_i32_140 = arith.constant 1 : i32
    %307 = arith.addi %60, %c1_i32_140 : i32
    %c2_i32_141 = arith.constant 2 : i32
    %308 = arith.addi %307, %c2_i32_141 : i32
    %309 = arith.index_cast %308 : i32 to index
    %c0_142 = arith.constant 0 : index
    %c0_143 = arith.constant 0 : index
    %310 = vector.load %arg14[%309, %c0_142, %c0_143] : memref<20x16x128xf32, #tpu.memory_space<vmem>>, vector<8x16x128xf32>
    %311 = vector.extract_strided_slice %54 {offsets = [3, 4, 0], sizes = [1, 1, 128], strides = [1, 1, 1]} : vector<5x5x128xf32> to vector<1x1x128xf32>
    %312 = vector.shape_cast %311 : vector<1x1x128xf32> to vector<128xf32>
    %313 = vector.shape_cast %312 : vector<128xf32> to vector<1x1x128xf32>
    %314 = vector.broadcast %313 : vector<1x1x128xf32> to vector<8x16x128xf32>
    %315 = arith.mulf %310, %314 : vector<8x16x128xf32>
    %316 = arith.addf %300, %315 : vector<8x16x128xf32>
    %c2_i32_144 = arith.constant 2 : i32
    %317 = arith.addi %60, %c2_i32_144 : i32
    %c2_i32_145 = arith.constant 2 : i32
    %318 = arith.addi %317, %c2_i32_145 : i32
    %319 = arith.index_cast %318 : i32 to index
    %c0_146 = arith.constant 0 : index
    %c0_147 = arith.constant 0 : index
    %320 = vector.load %arg10[%319, %c0_146, %c0_147] : memref<20x16x128xf32, #tpu.memory_space<vmem>>, vector<8x16x128xf32>
    %321 = vector.extract_strided_slice %54 {offsets = [4, 0, 0], sizes = [1, 1, 128], strides = [1, 1, 1]} : vector<5x5x128xf32> to vector<1x1x128xf32>
    %322 = vector.shape_cast %321 : vector<1x1x128xf32> to vector<128xf32>
    %323 = vector.shape_cast %322 : vector<128xf32> to vector<1x1x128xf32>
    %324 = vector.broadcast %323 : vector<1x1x128xf32> to vector<8x16x128xf32>
    %325 = arith.mulf %320, %324 : vector<8x16x128xf32>
    %326 = arith.addf %316, %325 : vector<8x16x128xf32>
    %c2_i32_148 = arith.constant 2 : i32
    %327 = arith.addi %60, %c2_i32_148 : i32
    %c2_i32_149 = arith.constant 2 : i32
    %328 = arith.addi %327, %c2_i32_149 : i32
    %329 = arith.index_cast %328 : i32 to index
    %c0_150 = arith.constant 0 : index
    %c0_151 = arith.constant 0 : index
    %330 = vector.load %arg11[%329, %c0_150, %c0_151] : memref<20x16x128xf32, #tpu.memory_space<vmem>>, vector<8x16x128xf32>
    %331 = vector.extract_strided_slice %54 {offsets = [4, 1, 0], sizes = [1, 1, 128], strides = [1, 1, 1]} : vector<5x5x128xf32> to vector<1x1x128xf32>
    %332 = vector.shape_cast %331 : vector<1x1x128xf32> to vector<128xf32>
    %333 = vector.shape_cast %332 : vector<128xf32> to vector<1x1x128xf32>
    %334 = vector.broadcast %333 : vector<1x1x128xf32> to vector<8x16x128xf32>
    %335 = arith.mulf %330, %334 : vector<8x16x128xf32>
    %336 = arith.addf %326, %335 : vector<8x16x128xf32>
    %c2_i32_152 = arith.constant 2 : i32
    %337 = arith.addi %60, %c2_i32_152 : i32
    %c2_i32_153 = arith.constant 2 : i32
    %338 = arith.addi %337, %c2_i32_153 : i32
    %339 = arith.index_cast %338 : i32 to index
    %c0_154 = arith.constant 0 : index
    %c0_155 = arith.constant 0 : index
    %340 = vector.load %arg12[%339, %c0_154, %c0_155] : memref<20x16x128xf32, #tpu.memory_space<vmem>>, vector<8x16x128xf32>
    %341 = vector.extract_strided_slice %54 {offsets = [4, 2, 0], sizes = [1, 1, 128], strides = [1, 1, 1]} : vector<5x5x128xf32> to vector<1x1x128xf32>
    %342 = vector.shape_cast %341 : vector<1x1x128xf32> to vector<128xf32>
    %343 = vector.shape_cast %342 : vector<128xf32> to vector<1x1x128xf32>
    %344 = vector.broadcast %343 : vector<1x1x128xf32> to vector<8x16x128xf32>
    %345 = arith.mulf %340, %344 : vector<8x16x128xf32>
    %346 = arith.addf %336, %345 : vector<8x16x128xf32>
    %c2_i32_156 = arith.constant 2 : i32
    %347 = arith.addi %60, %c2_i32_156 : i32
    %c2_i32_157 = arith.constant 2 : i32
    %348 = arith.addi %347, %c2_i32_157 : i32
    %349 = arith.index_cast %348 : i32 to index
    %c0_158 = arith.constant 0 : index
    %c0_159 = arith.constant 0 : index
    %350 = vector.load %arg13[%349, %c0_158, %c0_159] : memref<20x16x128xf32, #tpu.memory_space<vmem>>, vector<8x16x128xf32>
    %351 = vector.extract_strided_slice %54 {offsets = [4, 3, 0], sizes = [1, 1, 128], strides = [1, 1, 1]} : vector<5x5x128xf32> to vector<1x1x128xf32>
    %352 = vector.shape_cast %351 : vector<1x1x128xf32> to vector<128xf32>
    %353 = vector.shape_cast %352 : vector<128xf32> to vector<1x1x128xf32>
    %354 = vector.broadcast %353 : vector<1x1x128xf32> to vector<8x16x128xf32>
    %355 = arith.mulf %350, %354 : vector<8x16x128xf32>
    %356 = arith.addf %346, %355 : vector<8x16x128xf32>
    %c2_i32_160 = arith.constant 2 : i32
    %357 = arith.addi %60, %c2_i32_160 : i32
    %c2_i32_161 = arith.constant 2 : i32
    %358 = arith.addi %357, %c2_i32_161 : i32
    %359 = arith.index_cast %358 : i32 to index
    %c0_162 = arith.constant 0 : index
    %c0_163 = arith.constant 0 : index
    %360 = vector.load %arg14[%359, %c0_162, %c0_163] : memref<20x16x128xf32, #tpu.memory_space<vmem>>, vector<8x16x128xf32>
    %361 = vector.extract_strided_slice %54 {offsets = [4, 4, 0], sizes = [1, 1, 128], strides = [1, 1, 1]} : vector<5x5x128xf32> to vector<1x1x128xf32>
    %362 = vector.shape_cast %361 : vector<1x1x128xf32> to vector<128xf32>
    %363 = vector.shape_cast %362 : vector<128xf32> to vector<1x1x128xf32>
    %364 = vector.broadcast %363 : vector<1x1x128xf32> to vector<8x16x128xf32>
    %365 = arith.mulf %360, %364 : vector<8x16x128xf32>
    %366 = arith.addf %356, %365 : vector<8x16x128xf32>
    %367 = vector.shape_cast %56 : vector<128xf32> to vector<1x1x128xf32>
    %368 = vector.broadcast %367 : vector<1x1x128xf32> to vector<8x16x128xf32>
    %369 = arith.addf %306, %368 : vector<8x16x128xf32>
    %cst_164 = arith.constant 0.000000e+00 : f32
    %370 = vector.broadcast %cst_164 : f32 to vector<8x16x128xf32>
    %371 = arith.maximumf %369, %370 : vector<8x16x128xf32>
    %372 = vector.shape_cast %58 : vector<128xf32> to vector<1x1x128xf32>
    %373 = vector.broadcast %372 : vector<1x1x128xf32> to vector<8x16x128xf32>
    %374 = arith.addf %366, %373 : vector<8x16x128xf32>
    %cst_165 = arith.constant 0.000000e+00 : f32
    %375 = vector.broadcast %cst_165 : f32 to vector<8x16x128xf32>
    %376 = arith.maximumf %374, %375 : vector<8x16x128xf32>
    %377 = arith.truncf %371 : vector<8x16x128xf32> to vector<8x16x128xbf16>
    %378 = arith.index_cast %60 : i32 to index
    %c0_166 = arith.constant 0 : index
    %c0_167 = arith.constant 0 : index
    %379 = vector.load %arg15[%378, %c0_166, %c0_167] : memref<16x16x128xbf16, #tpu.memory_space<vmem>>, vector<8x16x128xbf16>
    tpu.vector_store %arg15[%378, %c0_166, %c0_167], %377 {strides = array<i32>} : memref<16x16x128xbf16, #tpu.memory_space<vmem>>, vector<8x16x128xbf16>,
    %380 = arith.truncf %376 : vector<8x16x128xf32> to vector<8x16x128xbf16>
    %381 = arith.index_cast %60 : i32 to index
    %c0_168 = arith.constant 0 : index
    %c0_169 = arith.constant 0 : index
    %382 = vector.load %arg16[%381, %c0_168, %c0_169] : memref<16x16x128xbf16, #tpu.memory_space<vmem>>, vector<8x16x128xbf16>
    tpu.vector_store %arg16[%381, %c0_168, %c0_169], %380 {strides = array<i32>} : memref<16x16x128xbf16, #tpu.memory_space<vmem>>, vector<8x16x128xbf16>,
    %383 = arith.addf %371, %376 : vector<8x16x128xf32>
    %cst_170 = arith.constant dense<0.000000e+00> : vector<128xf32>
    %384 = vector.multi_reduction <add>, %383, %cst_170 [0, 1] : vector<8x16x128xf32> to vector<128xf32>
    %385 = vector.shape_cast %384 : vector<128xf32> to vector<1x128xf32>
    %386 = arith.addf %59, %385 : vector<1x128xf32>
    %c1_i32_171 = arith.constant 1 : i32
    %c8_i32_172 = arith.constant 8 : i32
    %387 = arith.muli %c1_i32_171, %c8_i32_172 : i32
    %cst_173 = arith.constant 0.000000e+00 : f32
    %388 = vector.broadcast %cst_173 : f32 to vector<8x16x128xf32>
    %cst_174 = arith.constant 0.000000e+00 : f32
    %389 = vector.broadcast %cst_174 : f32 to vector<8x16x128xf32>
    %c-2_i32_175 = arith.constant -2 : i32
    %390 = arith.addi %387, %c-2_i32_175 : i32
    %c2_i32_176 = arith.constant 2 : i32
    %391 = arith.addi %390, %c2_i32_176 : i32
    %392 = arith.index_cast %391 : i32 to index
    %c0_177 = arith.constant 0 : index
    %c0_178 = arith.constant 0 : index
    %393 = vector.load %arg10[%392, %c0_177, %c0_178] : memref<20x16x128xf32, #tpu.memory_space<vmem>>, vector<8x16x128xf32>
    %394 = vector.extract_strided_slice %54 {offsets = [0, 0, 0], sizes = [1, 1, 128], strides = [1, 1, 1]} : vector<5x5x128xf32> to vector<1x1x128xf32>
    %395 = vector.shape_cast %394 : vector<1x1x128xf32> to vector<128xf32>
    %396 = vector.shape_cast %395 : vector<128xf32> to vector<1x1x128xf32>
    %397 = vector.broadcast %396 : vector<1x1x128xf32> to vector<8x16x128xf32>
    %398 = arith.mulf %393, %397 : vector<8x16x128xf32>
    %399 = arith.addf %389, %398 : vector<8x16x128xf32>
    %c-2_i32_179 = arith.constant -2 : i32
    %400 = arith.addi %387, %c-2_i32_179 : i32
    %c2_i32_180 = arith.constant 2 : i32
    %401 = arith.addi %400, %c2_i32_180 : i32
    %402 = arith.index_cast %401 : i32 to index
    %c0_181 = arith.constant 0 : index
    %c0_182 = arith.constant 0 : index
    %403 = vector.load %arg11[%402, %c0_181, %c0_182] : memref<20x16x128xf32, #tpu.memory_space<vmem>>, vector<8x16x128xf32>
    %404 = vector.extract_strided_slice %54 {offsets = [0, 1, 0], sizes = [1, 1, 128], strides = [1, 1, 1]} : vector<5x5x128xf32> to vector<1x1x128xf32>
    %405 = vector.shape_cast %404 : vector<1x1x128xf32> to vector<128xf32>
    %406 = vector.shape_cast %405 : vector<128xf32> to vector<1x1x128xf32>
    %407 = vector.broadcast %406 : vector<1x1x128xf32> to vector<8x16x128xf32>
    %408 = arith.mulf %403, %407 : vector<8x16x128xf32>
    %409 = arith.addf %399, %408 : vector<8x16x128xf32>
    %c-2_i32_183 = arith.constant -2 : i32
    %410 = arith.addi %387, %c-2_i32_183 : i32
    %c2_i32_184 = arith.constant 2 : i32
    %411 = arith.addi %410, %c2_i32_184 : i32
    %412 = arith.index_cast %411 : i32 to index
    %c0_185 = arith.constant 0 : index
    %c0_186 = arith.constant 0 : index
    %413 = vector.load %arg12[%412, %c0_185, %c0_186] : memref<20x16x128xf32, #tpu.memory_space<vmem>>, vector<8x16x128xf32>
    %414 = vector.extract_strided_slice %54 {offsets = [0, 2, 0], sizes = [1, 1, 128], strides = [1, 1, 1]} : vector<5x5x128xf32> to vector<1x1x128xf32>
    %415 = vector.shape_cast %414 : vector<1x1x128xf32> to vector<128xf32>
    %416 = vector.shape_cast %415 : vector<128xf32> to vector<1x1x128xf32>
    %417 = vector.broadcast %416 : vector<1x1x128xf32> to vector<8x16x128xf32>
    %418 = arith.mulf %413, %417 : vector<8x16x128xf32>
    %419 = arith.addf %409, %418 : vector<8x16x128xf32>
    %c-2_i32_187 = arith.constant -2 : i32
    %420 = arith.addi %387, %c-2_i32_187 : i32
    %c2_i32_188 = arith.constant 2 : i32
    %421 = arith.addi %420, %c2_i32_188 : i32
    %422 = arith.index_cast %421 : i32 to index
    %c0_189 = arith.constant 0 : index
    %c0_190 = arith.constant 0 : index
    %423 = vector.load %arg13[%422, %c0_189, %c0_190] : memref<20x16x128xf32, #tpu.memory_space<vmem>>, vector<8x16x128xf32>
    %424 = vector.extract_strided_slice %54 {offsets = [0, 3, 0], sizes = [1, 1, 128], strides = [1, 1, 1]} : vector<5x5x128xf32> to vector<1x1x128xf32>
    %425 = vector.shape_cast %424 : vector<1x1x128xf32> to vector<128xf32>
    %426 = vector.shape_cast %425 : vector<128xf32> to vector<1x1x128xf32>
    %427 = vector.broadcast %426 : vector<1x1x128xf32> to vector<8x16x128xf32>
    %428 = arith.mulf %423, %427 : vector<8x16x128xf32>
    %429 = arith.addf %419, %428 : vector<8x16x128xf32>
    %c-2_i32_191 = arith.constant -2 : i32
    %430 = arith.addi %387, %c-2_i32_191 : i32
    %c2_i32_192 = arith.constant 2 : i32
    %431 = arith.addi %430, %c2_i32_192 : i32
    %432 = arith.index_cast %431 : i32 to index
    %c0_193 = arith.constant 0 : index
    %c0_194 = arith.constant 0 : index
    %433 = vector.load %arg14[%432, %c0_193, %c0_194] : memref<20x16x128xf32, #tpu.memory_space<vmem>>, vector<8x16x128xf32>
    %434 = vector.extract_strided_slice %54 {offsets = [0, 4, 0], sizes = [1, 1, 128], strides = [1, 1, 1]} : vector<5x5x128xf32> to vector<1x1x128xf32>
    %435 = vector.shape_cast %434 : vector<1x1x128xf32> to vector<128xf32>
    %436 = vector.shape_cast %435 : vector<128xf32> to vector<1x1x128xf32>
    %437 = vector.broadcast %436 : vector<1x1x128xf32> to vector<8x16x128xf32>
    %438 = arith.mulf %433, %437 : vector<8x16x128xf32>
    %439 = arith.addf %429, %438 : vector<8x16x128xf32>
    %c-1_i32_195 = arith.constant -1 : i32
    %440 = arith.addi %387, %c-1_i32_195 : i32
    %c2_i32_196 = arith.constant 2 : i32
    %441 = arith.addi %440, %c2_i32_196 : i32
    %442 = arith.index_cast %441 : i32 to index
    %c0_197 = arith.constant 0 : index
    %c0_198 = arith.constant 0 : index
    %443 = vector.load %arg10[%442, %c0_197, %c0_198] : memref<20x16x128xf32, #tpu.memory_space<vmem>>, vector<8x16x128xf32>
    %444 = vector.extract_strided_slice %54 {offsets = [1, 0, 0], sizes = [1, 1, 128], strides = [1, 1, 1]} : vector<5x5x128xf32> to vector<1x1x128xf32>
    %445 = vector.shape_cast %444 : vector<1x1x128xf32> to vector<128xf32>
    %446 = vector.shape_cast %445 : vector<128xf32> to vector<1x1x128xf32>
    %447 = vector.broadcast %446 : vector<1x1x128xf32> to vector<8x16x128xf32>
    %448 = arith.mulf %443, %447 : vector<8x16x128xf32>
    %449 = arith.addf %439, %448 : vector<8x16x128xf32>
    %c-1_i32_199 = arith.constant -1 : i32
    %450 = arith.addi %387, %c-1_i32_199 : i32
    %c2_i32_200 = arith.constant 2 : i32
    %451 = arith.addi %450, %c2_i32_200 : i32
    %452 = arith.index_cast %451 : i32 to index
    %c0_201 = arith.constant 0 : index
    %c0_202 = arith.constant 0 : index
    %453 = vector.load %arg11[%452, %c0_201, %c0_202] : memref<20x16x128xf32, #tpu.memory_space<vmem>>, vector<8x16x128xf32>
    %454 = vector.extract_strided_slice %54 {offsets = [1, 1, 0], sizes = [1, 1, 128], strides = [1, 1, 1]} : vector<5x5x128xf32> to vector<1x1x128xf32>
    %455 = vector.shape_cast %454 : vector<1x1x128xf32> to vector<128xf32>
    %456 = vector.shape_cast %455 : vector<128xf32> to vector<1x1x128xf32>
    %457 = vector.broadcast %456 : vector<1x1x128xf32> to vector<8x16x128xf32>
    %458 = arith.mulf %453, %457 : vector<8x16x128xf32>
    %459 = arith.addf %449, %458 : vector<8x16x128xf32>
    %460 = vector.extract_strided_slice %53 {offsets = [0, 0, 0], sizes = [1, 1, 128], strides = [1, 1, 1]} : vector<3x3x128xf32> to vector<1x1x128xf32>
    %461 = vector.shape_cast %460 : vector<1x1x128xf32> to vector<128xf32>
    %462 = vector.shape_cast %461 : vector<128xf32> to vector<1x1x128xf32>
    %463 = vector.broadcast %462 : vector<1x1x128xf32> to vector<8x16x128xf32>
    %464 = arith.mulf %453, %463 : vector<8x16x128xf32>
    %465 = arith.addf %388, %464 : vector<8x16x128xf32>
    %c-1_i32_203 = arith.constant -1 : i32
    %466 = arith.addi %387, %c-1_i32_203 : i32
    %c2_i32_204 = arith.constant 2 : i32
    %467 = arith.addi %466, %c2_i32_204 : i32
    %468 = arith.index_cast %467 : i32 to index
    %c0_205 = arith.constant 0 : index
    %c0_206 = arith.constant 0 : index
    %469 = vector.load %arg12[%468, %c0_205, %c0_206] : memref<20x16x128xf32, #tpu.memory_space<vmem>>, vector<8x16x128xf32>
    %470 = vector.extract_strided_slice %54 {offsets = [1, 2, 0], sizes = [1, 1, 128], strides = [1, 1, 1]} : vector<5x5x128xf32> to vector<1x1x128xf32>
    %471 = vector.shape_cast %470 : vector<1x1x128xf32> to vector<128xf32>
    %472 = vector.shape_cast %471 : vector<128xf32> to vector<1x1x128xf32>
    %473 = vector.broadcast %472 : vector<1x1x128xf32> to vector<8x16x128xf32>
    %474 = arith.mulf %469, %473 : vector<8x16x128xf32>
    %475 = arith.addf %459, %474 : vector<8x16x128xf32>
    %476 = vector.extract_strided_slice %53 {offsets = [0, 1, 0], sizes = [1, 1, 128], strides = [1, 1, 1]} : vector<3x3x128xf32> to vector<1x1x128xf32>
    %477 = vector.shape_cast %476 : vector<1x1x128xf32> to vector<128xf32>
    %478 = vector.shape_cast %477 : vector<128xf32> to vector<1x1x128xf32>
    %479 = vector.broadcast %478 : vector<1x1x128xf32> to vector<8x16x128xf32>
    %480 = arith.mulf %469, %479 : vector<8x16x128xf32>
    %481 = arith.addf %465, %480 : vector<8x16x128xf32>
    %c-1_i32_207 = arith.constant -1 : i32
    %482 = arith.addi %387, %c-1_i32_207 : i32
    %c2_i32_208 = arith.constant 2 : i32
    %483 = arith.addi %482, %c2_i32_208 : i32
    %484 = arith.index_cast %483 : i32 to index
    %c0_209 = arith.constant 0 : index
    %c0_210 = arith.constant 0 : index
    %485 = vector.load %arg13[%484, %c0_209, %c0_210] : memref<20x16x128xf32, #tpu.memory_space<vmem>>, vector<8x16x128xf32>
    %486 = vector.extract_strided_slice %54 {offsets = [1, 3, 0], sizes = [1, 1, 128], strides = [1, 1, 1]} : vector<5x5x128xf32> to vector<1x1x128xf32>
    %487 = vector.shape_cast %486 : vector<1x1x128xf32> to vector<128xf32>
    %488 = vector.shape_cast %487 : vector<128xf32> to vector<1x1x128xf32>
    %489 = vector.broadcast %488 : vector<1x1x128xf32> to vector<8x16x128xf32>
    %490 = arith.mulf %485, %489 : vector<8x16x128xf32>
    %491 = arith.addf %475, %490 : vector<8x16x128xf32>
    %492 = vector.extract_strided_slice %53 {offsets = [0, 2, 0], sizes = [1, 1, 128], strides = [1, 1, 1]} : vector<3x3x128xf32> to vector<1x1x128xf32>
    %493 = vector.shape_cast %492 : vector<1x1x128xf32> to vector<128xf32>
    %494 = vector.shape_cast %493 : vector<128xf32> to vector<1x1x128xf32>
    %495 = vector.broadcast %494 : vector<1x1x128xf32> to vector<8x16x128xf32>
    %496 = arith.mulf %485, %495 : vector<8x16x128xf32>
    %497 = arith.addf %481, %496 : vector<8x16x128xf32>
    %c-1_i32_211 = arith.constant -1 : i32
    %498 = arith.addi %387, %c-1_i32_211 : i32
    %c2_i32_212 = arith.constant 2 : i32
    %499 = arith.addi %498, %c2_i32_212 : i32
    %500 = arith.index_cast %499 : i32 to index
    %c0_213 = arith.constant 0 : index
    %c0_214 = arith.constant 0 : index
    %501 = vector.load %arg14[%500, %c0_213, %c0_214] : memref<20x16x128xf32, #tpu.memory_space<vmem>>, vector<8x16x128xf32>
    %502 = vector.extract_strided_slice %54 {offsets = [1, 4, 0], sizes = [1, 1, 128], strides = [1, 1, 1]} : vector<5x5x128xf32> to vector<1x1x128xf32>
    %503 = vector.shape_cast %502 : vector<1x1x128xf32> to vector<128xf32>
    %504 = vector.shape_cast %503 : vector<128xf32> to vector<1x1x128xf32>
    %505 = vector.broadcast %504 : vector<1x1x128xf32> to vector<8x16x128xf32>
    %506 = arith.mulf %501, %505 : vector<8x16x128xf32>
    %507 = arith.addf %491, %506 : vector<8x16x128xf32>
    %c0_i32_215 = arith.constant 0 : i32
    %508 = arith.addi %387, %c0_i32_215 : i32
    %c2_i32_216 = arith.constant 2 : i32
    %509 = arith.addi %508, %c2_i32_216 : i32
    %510 = arith.index_cast %509 : i32 to index
    %c0_217 = arith.constant 0 : index
    %c0_218 = arith.constant 0 : index
    %511 = vector.load %arg10[%510, %c0_217, %c0_218] : memref<20x16x128xf32, #tpu.memory_space<vmem>>, vector<8x16x128xf32>
    %512 = vector.extract_strided_slice %54 {offsets = [2, 0, 0], sizes = [1, 1, 128], strides = [1, 1, 1]} : vector<5x5x128xf32> to vector<1x1x128xf32>
    %513 = vector.shape_cast %512 : vector<1x1x128xf32> to vector<128xf32>
    %514 = vector.shape_cast %513 : vector<128xf32> to vector<1x1x128xf32>
    %515 = vector.broadcast %514 : vector<1x1x128xf32> to vector<8x16x128xf32>
    %516 = arith.mulf %511, %515 : vector<8x16x128xf32>
    %517 = arith.addf %507, %516 : vector<8x16x128xf32>
    %c0_i32_219 = arith.constant 0 : i32
    %518 = arith.addi %387, %c0_i32_219 : i32
    %c2_i32_220 = arith.constant 2 : i32
    %519 = arith.addi %518, %c2_i32_220 : i32
    %520 = arith.index_cast %519 : i32 to index
    %c0_221 = arith.constant 0 : index
    %c0_222 = arith.constant 0 : index
    %521 = vector.load %arg11[%520, %c0_221, %c0_222] : memref<20x16x128xf32, #tpu.memory_space<vmem>>, vector<8x16x128xf32>
    %522 = vector.extract_strided_slice %54 {offsets = [2, 1, 0], sizes = [1, 1, 128], strides = [1, 1, 1]} : vector<5x5x128xf32> to vector<1x1x128xf32>
    %523 = vector.shape_cast %522 : vector<1x1x128xf32> to vector<128xf32>
    %524 = vector.shape_cast %523 : vector<128xf32> to vector<1x1x128xf32>
    %525 = vector.broadcast %524 : vector<1x1x128xf32> to vector<8x16x128xf32>
    %526 = arith.mulf %521, %525 : vector<8x16x128xf32>
    %527 = arith.addf %517, %526 : vector<8x16x128xf32>
    %528 = vector.extract_strided_slice %53 {offsets = [1, 0, 0], sizes = [1, 1, 128], strides = [1, 1, 1]} : vector<3x3x128xf32> to vector<1x1x128xf32>
    %529 = vector.shape_cast %528 : vector<1x1x128xf32> to vector<128xf32>
    %530 = vector.shape_cast %529 : vector<128xf32> to vector<1x1x128xf32>
    %531 = vector.broadcast %530 : vector<1x1x128xf32> to vector<8x16x128xf32>
    %532 = arith.mulf %521, %531 : vector<8x16x128xf32>
    %533 = arith.addf %497, %532 : vector<8x16x128xf32>
    %c0_i32_223 = arith.constant 0 : i32
    %534 = arith.addi %387, %c0_i32_223 : i32
    %c2_i32_224 = arith.constant 2 : i32
    %535 = arith.addi %534, %c2_i32_224 : i32
    %536 = arith.index_cast %535 : i32 to index
    %c0_225 = arith.constant 0 : index
    %c0_226 = arith.constant 0 : index
    %537 = vector.load %arg12[%536, %c0_225, %c0_226] : memref<20x16x128xf32, #tpu.memory_space<vmem>>, vector<8x16x128xf32>
    %538 = vector.extract_strided_slice %54 {offsets = [2, 2, 0], sizes = [1, 1, 128], strides = [1, 1, 1]} : vector<5x5x128xf32> to vector<1x1x128xf32>
    %539 = vector.shape_cast %538 : vector<1x1x128xf32> to vector<128xf32>
    %540 = vector.shape_cast %539 : vector<128xf32> to vector<1x1x128xf32>
    %541 = vector.broadcast %540 : vector<1x1x128xf32> to vector<8x16x128xf32>
    %542 = arith.mulf %537, %541 : vector<8x16x128xf32>
    %543 = arith.addf %527, %542 : vector<8x16x128xf32>
    %544 = vector.extract_strided_slice %53 {offsets = [1, 1, 0], sizes = [1, 1, 128], strides = [1, 1, 1]} : vector<3x3x128xf32> to vector<1x1x128xf32>
    %545 = vector.shape_cast %544 : vector<1x1x128xf32> to vector<128xf32>
    %546 = vector.shape_cast %545 : vector<128xf32> to vector<1x1x128xf32>
    %547 = vector.broadcast %546 : vector<1x1x128xf32> to vector<8x16x128xf32>
    %548 = arith.mulf %537, %547 : vector<8x16x128xf32>
    %549 = arith.addf %533, %548 : vector<8x16x128xf32>
    %c0_i32_227 = arith.constant 0 : i32
    %550 = arith.addi %387, %c0_i32_227 : i32
    %c2_i32_228 = arith.constant 2 : i32
    %551 = arith.addi %550, %c2_i32_228 : i32
    %552 = arith.index_cast %551 : i32 to index
    %c0_229 = arith.constant 0 : index
    %c0_230 = arith.constant 0 : index
    %553 = vector.load %arg13[%552, %c0_229, %c0_230] : memref<20x16x128xf32, #tpu.memory_space<vmem>>, vector<8x16x128xf32>
    %554 = vector.extract_strided_slice %54 {offsets = [2, 3, 0], sizes = [1, 1, 128], strides = [1, 1, 1]} : vector<5x5x128xf32> to vector<1x1x128xf32>
    %555 = vector.shape_cast %554 : vector<1x1x128xf32> to vector<128xf32>
    %556 = vector.shape_cast %555 : vector<128xf32> to vector<1x1x128xf32>
    %557 = vector.broadcast %556 : vector<1x1x128xf32> to vector<8x16x128xf32>
    %558 = arith.mulf %553, %557 : vector<8x16x128xf32>
    %559 = arith.addf %543, %558 : vector<8x16x128xf32>
    %560 = vector.extract_strided_slice %53 {offsets = [1, 2, 0], sizes = [1, 1, 128], strides = [1, 1, 1]} : vector<3x3x128xf32> to vector<1x1x128xf32>
    %561 = vector.shape_cast %560 : vector<1x1x128xf32> to vector<128xf32>
    %562 = vector.shape_cast %561 : vector<128xf32> to vector<1x1x128xf32>
    %563 = vector.broadcast %562 : vector<1x1x128xf32> to vector<8x16x128xf32>
    %564 = arith.mulf %553, %563 : vector<8x16x128xf32>
    %565 = arith.addf %549, %564 : vector<8x16x128xf32>
    %c0_i32_231 = arith.constant 0 : i32
    %566 = arith.addi %387, %c0_i32_231 : i32
    %c2_i32_232 = arith.constant 2 : i32
    %567 = arith.addi %566, %c2_i32_232 : i32
    %568 = arith.index_cast %567 : i32 to index
    %c0_233 = arith.constant 0 : index
    %c0_234 = arith.constant 0 : index
    %569 = vector.load %arg14[%568, %c0_233, %c0_234] : memref<20x16x128xf32, #tpu.memory_space<vmem>>, vector<8x16x128xf32>
    %570 = vector.extract_strided_slice %54 {offsets = [2, 4, 0], sizes = [1, 1, 128], strides = [1, 1, 1]} : vector<5x5x128xf32> to vector<1x1x128xf32>
    %571 = vector.shape_cast %570 : vector<1x1x128xf32> to vector<128xf32>
    %572 = vector.shape_cast %571 : vector<128xf32> to vector<1x1x128xf32>
    %573 = vector.broadcast %572 : vector<1x1x128xf32> to vector<8x16x128xf32>
    %574 = arith.mulf %569, %573 : vector<8x16x128xf32>
    %575 = arith.addf %559, %574 : vector<8x16x128xf32>
    %c1_i32_235 = arith.constant 1 : i32
    %576 = arith.addi %387, %c1_i32_235 : i32
    %c2_i32_236 = arith.constant 2 : i32
    %577 = arith.addi %576, %c2_i32_236 : i32
    %578 = arith.index_cast %577 : i32 to index
    %c0_237 = arith.constant 0 : index
    %c0_238 = arith.constant 0 : index
    %579 = vector.load %arg10[%578, %c0_237, %c0_238] : memref<20x16x128xf32, #tpu.memory_space<vmem>>, vector<8x16x128xf32>
    %580 = vector.extract_strided_slice %54 {offsets = [3, 0, 0], sizes = [1, 1, 128], strides = [1, 1, 1]} : vector<5x5x128xf32> to vector<1x1x128xf32>
    %581 = vector.shape_cast %580 : vector<1x1x128xf32> to vector<128xf32>
    %582 = vector.shape_cast %581 : vector<128xf32> to vector<1x1x128xf32>
    %583 = vector.broadcast %582 : vector<1x1x128xf32> to vector<8x16x128xf32>
    %584 = arith.mulf %579, %583 : vector<8x16x128xf32>
    %585 = arith.addf %575, %584 : vector<8x16x128xf32>
    %c1_i32_239 = arith.constant 1 : i32
    %586 = arith.addi %387, %c1_i32_239 : i32
    %c2_i32_240 = arith.constant 2 : i32
    %587 = arith.addi %586, %c2_i32_240 : i32
    %588 = arith.index_cast %587 : i32 to index
    %c0_241 = arith.constant 0 : index
    %c0_242 = arith.constant 0 : index
    %589 = vector.load %arg11[%588, %c0_241, %c0_242] : memref<20x16x128xf32, #tpu.memory_space<vmem>>, vector<8x16x128xf32>
    %590 = vector.extract_strided_slice %54 {offsets = [3, 1, 0], sizes = [1, 1, 128], strides = [1, 1, 1]} : vector<5x5x128xf32> to vector<1x1x128xf32>
    %591 = vector.shape_cast %590 : vector<1x1x128xf32> to vector<128xf32>
    %592 = vector.shape_cast %591 : vector<128xf32> to vector<1x1x128xf32>
    %593 = vector.broadcast %592 : vector<1x1x128xf32> to vector<8x16x128xf32>
    %594 = arith.mulf %589, %593 : vector<8x16x128xf32>
    %595 = arith.addf %585, %594 : vector<8x16x128xf32>
    %596 = vector.extract_strided_slice %53 {offsets = [2, 0, 0], sizes = [1, 1, 128], strides = [1, 1, 1]} : vector<3x3x128xf32> to vector<1x1x128xf32>
    %597 = vector.shape_cast %596 : vector<1x1x128xf32> to vector<128xf32>
    %598 = vector.shape_cast %597 : vector<128xf32> to vector<1x1x128xf32>
    %599 = vector.broadcast %598 : vector<1x1x128xf32> to vector<8x16x128xf32>
    %600 = arith.mulf %589, %599 : vector<8x16x128xf32>
    %601 = arith.addf %565, %600 : vector<8x16x128xf32>
    %c1_i32_243 = arith.constant 1 : i32
    %602 = arith.addi %387, %c1_i32_243 : i32
    %c2_i32_244 = arith.constant 2 : i32
    %603 = arith.addi %602, %c2_i32_244 : i32
    %604 = arith.index_cast %603 : i32 to index
    %c0_245 = arith.constant 0 : index
    %c0_246 = arith.constant 0 : index
    %605 = vector.load %arg12[%604, %c0_245, %c0_246] : memref<20x16x128xf32, #tpu.memory_space<vmem>>, vector<8x16x128xf32>
    %606 = vector.extract_strided_slice %54 {offsets = [3, 2, 0], sizes = [1, 1, 128], strides = [1, 1, 1]} : vector<5x5x128xf32> to vector<1x1x128xf32>
    %607 = vector.shape_cast %606 : vector<1x1x128xf32> to vector<128xf32>
    %608 = vector.shape_cast %607 : vector<128xf32> to vector<1x1x128xf32>
    %609 = vector.broadcast %608 : vector<1x1x128xf32> to vector<8x16x128xf32>
    %610 = arith.mulf %605, %609 : vector<8x16x128xf32>
    %611 = arith.addf %595, %610 : vector<8x16x128xf32>
    %612 = vector.extract_strided_slice %53 {offsets = [2, 1, 0], sizes = [1, 1, 128], strides = [1, 1, 1]} : vector<3x3x128xf32> to vector<1x1x128xf32>
    %613 = vector.shape_cast %612 : vector<1x1x128xf32> to vector<128xf32>
    %614 = vector.shape_cast %613 : vector<128xf32> to vector<1x1x128xf32>
    %615 = vector.broadcast %614 : vector<1x1x128xf32> to vector<8x16x128xf32>
    %616 = arith.mulf %605, %615 : vector<8x16x128xf32>
    %617 = arith.addf %601, %616 : vector<8x16x128xf32>
    %c1_i32_247 = arith.constant 1 : i32
    %618 = arith.addi %387, %c1_i32_247 : i32
    %c2_i32_248 = arith.constant 2 : i32
    %619 = arith.addi %618, %c2_i32_248 : i32
    %620 = arith.index_cast %619 : i32 to index
    %c0_249 = arith.constant 0 : index
    %c0_250 = arith.constant 0 : index
    %621 = vector.load %arg13[%620, %c0_249, %c0_250] : memref<20x16x128xf32, #tpu.memory_space<vmem>>, vector<8x16x128xf32>
    %622 = vector.extract_strided_slice %54 {offsets = [3, 3, 0], sizes = [1, 1, 128], strides = [1, 1, 1]} : vector<5x5x128xf32> to vector<1x1x128xf32>
    %623 = vector.shape_cast %622 : vector<1x1x128xf32> to vector<128xf32>
    %624 = vector.shape_cast %623 : vector<128xf32> to vector<1x1x128xf32>
    %625 = vector.broadcast %624 : vector<1x1x128xf32> to vector<8x16x128xf32>
    %626 = arith.mulf %621, %625 : vector<8x16x128xf32>
    %627 = arith.addf %611, %626 : vector<8x16x128xf32>
    %628 = vector.extract_strided_slice %53 {offsets = [2, 2, 0], sizes = [1, 1, 128], strides = [1, 1, 1]} : vector<3x3x128xf32> to vector<1x1x128xf32>
    %629 = vector.shape_cast %628 : vector<1x1x128xf32> to vector<128xf32>
    %630 = vector.shape_cast %629 : vector<128xf32> to vector<1x1x128xf32>
    %631 = vector.broadcast %630 : vector<1x1x128xf32> to vector<8x16x128xf32>
    %632 = arith.mulf %621, %631 : vector<8x16x128xf32>
    %633 = arith.addf %617, %632 : vector<8x16x128xf32>
    %c1_i32_251 = arith.constant 1 : i32
    %634 = arith.addi %387, %c1_i32_251 : i32
    %c2_i32_252 = arith.constant 2 : i32
    %635 = arith.addi %634, %c2_i32_252 : i32
    %636 = arith.index_cast %635 : i32 to index
    %c0_253 = arith.constant 0 : index
    %c0_254 = arith.constant 0 : index
    %637 = vector.load %arg14[%636, %c0_253, %c0_254] : memref<20x16x128xf32, #tpu.memory_space<vmem>>, vector<8x16x128xf32>
    %638 = vector.extract_strided_slice %54 {offsets = [3, 4, 0], sizes = [1, 1, 128], strides = [1, 1, 1]} : vector<5x5x128xf32> to vector<1x1x128xf32>
    %639 = vector.shape_cast %638 : vector<1x1x128xf32> to vector<128xf32>
    %640 = vector.shape_cast %639 : vector<128xf32> to vector<1x1x128xf32>
    %641 = vector.broadcast %640 : vector<1x1x128xf32> to vector<8x16x128xf32>
    %642 = arith.mulf %637, %641 : vector<8x16x128xf32>
    %643 = arith.addf %627, %642 : vector<8x16x128xf32>
    %c2_i32_255 = arith.constant 2 : i32
    %644 = arith.addi %387, %c2_i32_255 : i32
    %c2_i32_256 = arith.constant 2 : i32
    %645 = arith.addi %644, %c2_i32_256 : i32
    %646 = arith.index_cast %645 : i32 to index
    %c0_257 = arith.constant 0 : index
    %c0_258 = arith.constant 0 : index
    %647 = vector.load %arg10[%646, %c0_257, %c0_258] : memref<20x16x128xf32, #tpu.memory_space<vmem>>, vector<8x16x128xf32>
    %648 = vector.extract_strided_slice %54 {offsets = [4, 0, 0], sizes = [1, 1, 128], strides = [1, 1, 1]} : vector<5x5x128xf32> to vector<1x1x128xf32>
    %649 = vector.shape_cast %648 : vector<1x1x128xf32> to vector<128xf32>
    %650 = vector.shape_cast %649 : vector<128xf32> to vector<1x1x128xf32>
    %651 = vector.broadcast %650 : vector<1x1x128xf32> to vector<8x16x128xf32>
    %652 = arith.mulf %647, %651 : vector<8x16x128xf32>
    %653 = arith.addf %643, %652 : vector<8x16x128xf32>
    %c2_i32_259 = arith.constant 2 : i32
    %654 = arith.addi %387, %c2_i32_259 : i32
    %c2_i32_260 = arith.constant 2 : i32
    %655 = arith.addi %654, %c2_i32_260 : i32
    %656 = arith.index_cast %655 : i32 to index
    %c0_261 = arith.constant 0 : index
    %c0_262 = arith.constant 0 : index
    %657 = vector.load %arg11[%656, %c0_261, %c0_262] : memref<20x16x128xf32, #tpu.memory_space<vmem>>, vector<8x16x128xf32>
    %658 = vector.extract_strided_slice %54 {offsets = [4, 1, 0], sizes = [1, 1, 128], strides = [1, 1, 1]} : vector<5x5x128xf32> to vector<1x1x128xf32>
    %659 = vector.shape_cast %658 : vector<1x1x128xf32> to vector<128xf32>
    %660 = vector.shape_cast %659 : vector<128xf32> to vector<1x1x128xf32>
    %661 = vector.broadcast %660 : vector<1x1x128xf32> to vector<8x16x128xf32>
    %662 = arith.mulf %657, %661 : vector<8x16x128xf32>
    %663 = arith.addf %653, %662 : vector<8x16x128xf32>
    %c2_i32_263 = arith.constant 2 : i32
    %664 = arith.addi %387, %c2_i32_263 : i32
    %c2_i32_264 = arith.constant 2 : i32
    %665 = arith.addi %664, %c2_i32_264 : i32
    %666 = arith.index_cast %665 : i32 to index
    %c0_265 = arith.constant 0 : index
    %c0_266 = arith.constant 0 : index
    %667 = vector.load %arg12[%666, %c0_265, %c0_266] : memref<20x16x128xf32, #tpu.memory_space<vmem>>, vector<8x16x128xf32>
    %668 = vector.extract_strided_slice %54 {offsets = [4, 2, 0], sizes = [1, 1, 128], strides = [1, 1, 1]} : vector<5x5x128xf32> to vector<1x1x128xf32>
    %669 = vector.shape_cast %668 : vector<1x1x128xf32> to vector<128xf32>
    %670 = vector.shape_cast %669 : vector<128xf32> to vector<1x1x128xf32>
    %671 = vector.broadcast %670 : vector<1x1x128xf32> to vector<8x16x128xf32>
    %672 = arith.mulf %667, %671 : vector<8x16x128xf32>
    %673 = arith.addf %663, %672 : vector<8x16x128xf32>
    %c2_i32_267 = arith.constant 2 : i32
    %674 = arith.addi %387, %c2_i32_267 : i32
    %c2_i32_268 = arith.constant 2 : i32
    %675 = arith.addi %674, %c2_i32_268 : i32
    %676 = arith.index_cast %675 : i32 to index
    %c0_269 = arith.constant 0 : index
    %c0_270 = arith.constant 0 : index
    %677 = vector.load %arg13[%676, %c0_269, %c0_270] : memref<20x16x128xf32, #tpu.memory_space<vmem>>, vector<8x16x128xf32>
    %678 = vector.extract_strided_slice %54 {offsets = [4, 3, 0], sizes = [1, 1, 128], strides = [1, 1, 1]} : vector<5x5x128xf32> to vector<1x1x128xf32>
    %679 = vector.shape_cast %678 : vector<1x1x128xf32> to vector<128xf32>
    %680 = vector.shape_cast %679 : vector<128xf32> to vector<1x1x128xf32>
    %681 = vector.broadcast %680 : vector<1x1x128xf32> to vector<8x16x128xf32>
    %682 = arith.mulf %677, %681 : vector<8x16x128xf32>
    %683 = arith.addf %673, %682 : vector<8x16x128xf32>
    %c2_i32_271 = arith.constant 2 : i32
    %684 = arith.addi %387, %c2_i32_271 : i32
    %c2_i32_272 = arith.constant 2 : i32
    %685 = arith.addi %684, %c2_i32_272 : i32
    %686 = arith.index_cast %685 : i32 to index
    %c0_273 = arith.constant 0 : index
    %c0_274 = arith.constant 0 : index
    %687 = vector.load %arg14[%686, %c0_273, %c0_274] : memref<20x16x128xf32, #tpu.memory_space<vmem>>, vector<8x16x128xf32>
    %688 = vector.extract_strided_slice %54 {offsets = [4, 4, 0], sizes = [1, 1, 128], strides = [1, 1, 1]} : vector<5x5x128xf32> to vector<1x1x128xf32>
    %689 = vector.shape_cast %688 : vector<1x1x128xf32> to vector<128xf32>
    %690 = vector.shape_cast %689 : vector<128xf32> to vector<1x1x128xf32>
    %691 = vector.broadcast %690 : vector<1x1x128xf32> to vector<8x16x128xf32>
    %692 = arith.mulf %687, %691 : vector<8x16x128xf32>
    %693 = arith.addf %683, %692 : vector<8x16x128xf32>
    %694 = vector.shape_cast %56 : vector<128xf32> to vector<1x1x128xf32>
    %695 = vector.broadcast %694 : vector<1x1x128xf32> to vector<8x16x128xf32>
    %696 = arith.addf %633, %695 : vector<8x16x128xf32>
    %cst_275 = arith.constant 0.000000e+00 : f32
    %697 = vector.broadcast %cst_275 : f32 to vector<8x16x128xf32>
    %698 = arith.maximumf %696, %697 : vector<8x16x128xf32>
    %699 = vector.shape_cast %58 : vector<128xf32> to vector<1x1x128xf32>
    %700 = vector.broadcast %699 : vector<1x1x128xf32> to vector<8x16x128xf32>
    %701 = arith.addf %693, %700 : vector<8x16x128xf32>
    %cst_276 = arith.constant 0.000000e+00 : f32
    %702 = vector.broadcast %cst_276 : f32 to vector<8x16x128xf32>
    %703 = arith.maximumf %701, %702 : vector<8x16x128xf32>
    %704 = arith.truncf %698 : vector<8x16x128xf32> to vector<8x16x128xbf16>
    %705 = arith.index_cast %387 : i32 to index
    %c0_277 = arith.constant 0 : index
    %c0_278 = arith.constant 0 : index
    %706 = vector.load %arg15[%705, %c0_277, %c0_278] : memref<16x16x128xbf16, #tpu.memory_space<vmem>>, vector<8x16x128xbf16>
    tpu.vector_store %arg15[%705, %c0_277, %c0_278], %704 {strides = array<i32>} : memref<16x16x128xbf16, #tpu.memory_space<vmem>>, vector<8x16x128xbf16>,
    %707 = arith.truncf %703 : vector<8x16x128xf32> to vector<8x16x128xbf16>
    %708 = arith.index_cast %387 : i32 to index
    %c0_279 = arith.constant 0 : index
    %c0_280 = arith.constant 0 : index
    %709 = vector.load %arg16[%708, %c0_279, %c0_280] : memref<16x16x128xbf16, #tpu.memory_space<vmem>>, vector<8x16x128xbf16>
    tpu.vector_store %arg16[%708, %c0_279, %c0_280], %707 {strides = array<i32>} : memref<16x16x128xbf16, #tpu.memory_space<vmem>>, vector<8x16x128xbf16>,
    %710 = arith.addf %698, %703 : vector<8x16x128xf32>
    %cst_281 = arith.constant dense<0.000000e+00> : vector<128xf32>
    %711 = vector.multi_reduction <add>, %710, %cst_281 [0, 1] : vector<8x16x128xf32> to vector<128xf32>
    %712 = vector.shape_cast %711 : vector<128xf32> to vector<1x128xf32>
    %713 = arith.addf %386, %712 : vector<1x128xf32>
    %c2_i32_282 = arith.constant 2 : i32
    %cst_283 = arith.constant 3.906250e-03 : f32
    %714 = vector.broadcast %cst_283 : f32 to vector<1x128xf32>
    %715 = arith.mulf %713, %714 : vector<1x128xf32>
    %c0_284 = arith.constant 0 : index
    %c0_285 = arith.constant 0 : index
    %716 = vector.load %arg5[%c0_284, %c0_285] : memref<128x128xf32, #tpu.memory_space<vmem>>, vector<128x128xf32>
    %cst_286 = arith.constant dense<0.000000e+00> : vector<1x128xf32>
    %717 = tpu.matmul %715, %716, %cst_286 {dimension_numbers = #tpu.dot_dimension_numbers<[1], [0], [0], [1], [0, 0, 1, 1], [], []>} : vector<1x128xf32>, vector<128x128xf32>, vector<1x128xf32> -> vector<1x128xf32>
    %c0_287 = arith.constant 0 : index
    %c0_288 = arith.constant 0 : index
    %718 = vector.load %arg6[%c0_287, %c0_288] : memref<1x128xf32, #tpu.memory_space<vmem>>, vector<1x128xf32>
    %719 = arith.addf %717, %718 : vector<1x128xf32>
    %cst_289 = arith.constant 0.000000e+00 : f32
    %720 = vector.broadcast %cst_289 : f32 to vector<1x128xf32>
    %721 = arith.maximumf %719, %720 : vector<1x128xf32>
    %c0_290 = arith.constant 0 : index
    %c0_291 = arith.constant 0 : index
    %c0_292 = arith.constant 0 : index
    %722 = vector.load %arg7[%c0_290, %c0_291, %c0_292] : memref<2x128x128xf32, #tpu.memory_space<vmem>>, vector<1x128x128xf32>
    %723 = vector.shape_cast %722 : vector<1x128x128xf32> to vector<128x128xf32>
    %cst_293 = arith.constant dense<0.000000e+00> : vector<1x128xf32>
    %724 = tpu.matmul %721, %723, %cst_293 {dimension_numbers = #tpu.dot_dimension_numbers<[1], [0], [0], [1], [0, 0, 1, 1], [], []>} : vector<1x128xf32>, vector<128x128xf32>, vector<1x128xf32> -> vector<1x128xf32>
    %c0_294 = arith.constant 0 : index
    %c0_295 = arith.constant 0 : index
    %725 = vector.load %arg8[%c0_294, %c0_295] : memref<2x128xf32, #tpu.memory_space<vmem>>, vector<1x128xf32>
    %726 = vector.shape_cast %725 : vector<1x128xf32> to vector<128xf32>
    %727 = vector.shape_cast %726 : vector<128xf32> to vector<1x128xf32>
    %728 = arith.addf %724, %727 : vector<1x128xf32>
    %c1_296 = arith.constant 1 : index
    %c0_297 = arith.constant 0 : index
    %c0_298 = arith.constant 0 : index
    %729 = vector.load %arg7[%c1_296, %c0_297, %c0_298] : memref<2x128x128xf32, #tpu.memory_space<vmem>>, vector<1x128x128xf32>
    %730 = vector.shape_cast %729 : vector<1x128x128xf32> to vector<128x128xf32>
    %cst_299 = arith.constant dense<0.000000e+00> : vector<1x128xf32>
    %731 = tpu.matmul %721, %730, %cst_299 {dimension_numbers = #tpu.dot_dimension_numbers<[1], [0], [0], [1], [0, 0, 1, 1], [], []>} : vector<1x128xf32>, vector<128x128xf32>, vector<1x128xf32> -> vector<1x128xf32>
    %c1_300 = arith.constant 1 : index
    %c0_301 = arith.constant 0 : index
    %732 = vector.load %arg8[%c1_300, %c0_301] : memref<2x128xf32, #tpu.memory_space<vmem>>, vector<1x128xf32>
    %733 = vector.shape_cast %732 : vector<1x128xf32> to vector<128xf32>
    %734 = vector.shape_cast %733 : vector<128xf32> to vector<1x128xf32>
    %735 = arith.addf %731, %734 : vector<1x128xf32>
    %736 = arith.maximumf %728, %735 : vector<1x128xf32>
    %737 = arith.subf %728, %736 : vector<1x128xf32>
    %738 = math.exp %737 : vector<1x128xf32>
    %739 = arith.subf %735, %736 : vector<1x128xf32>
    %740 = math.exp %739 : vector<1x128xf32>
    %741 = arith.addf %738, %740 : vector<1x128xf32>
    %cst_302 = arith.constant 1.000000e+00 : f32
    %742 = vector.broadcast %cst_302 : f32 to vector<1x128xf32>
    %743 = arith.divf %742, %741 : vector<1x128xf32>
    %744 = arith.mulf %738, %743 : vector<1x128xf32>
    %745 = vector.shape_cast %744 : vector<1x128xf32> to vector<128xf32>
    %746 = arith.mulf %740, %743 : vector<1x128xf32>
    %747 = vector.shape_cast %746 : vector<1x128xf32> to vector<128xf32>
    %c0_303 = arith.constant 0 : index
    %c0_304 = arith.constant 0 : index
    %c0_305 = arith.constant 0 : index
    %748 = vector.load %arg15[%c0_303, %c0_304, %c0_305] : memref<16x16x128xbf16, #tpu.memory_space<vmem>>, vector<16x16x128xbf16>
    %749 = arith.extf %748 : vector<16x16x128xbf16> to vector<16x16x128xf32>
    %750 = vector.shape_cast %745 : vector<128xf32> to vector<1x1x128xf32>
    %751 = vector.broadcast %750 : vector<1x1x128xf32> to vector<16x16x128xf32>
    %752 = arith.mulf %749, %751 : vector<16x16x128xf32>
    %c0_306 = arith.constant 0 : index
    %c0_307 = arith.constant 0 : index
    %c0_308 = arith.constant 0 : index
    %753 = vector.load %arg16[%c0_306, %c0_307, %c0_308] : memref<16x16x128xbf16, #tpu.memory_space<vmem>>, vector<16x16x128xbf16>
    %754 = arith.extf %753 : vector<16x16x128xbf16> to vector<16x16x128xf32>
    %755 = vector.shape_cast %747 : vector<128xf32> to vector<1x1x128xf32>
    %756 = vector.broadcast %755 : vector<1x1x128xf32> to vector<16x16x128xf32>
    %757 = arith.mulf %754, %756 : vector<16x16x128xf32>
    %758 = arith.addf %752, %757 : vector<16x16x128xf32>
    %c0_309 = arith.constant 0 : index
    %c0_310 = arith.constant 0 : index
    %c0_311 = arith.constant 0 : index
    %c0_312 = arith.constant 0 : index
    %759 = vector.load %arg9[%c0_309, %c0_310, %c0_311, %c0_312] : memref<1x16x16x128xf32, #tpu.memory_space<vmem>>, vector<1x16x16x128xf32>
    %760 = vector.shape_cast %759 : vector<1x16x16x128xf32> to vector<16x16x128xf32>
    %761 = vector.shape_cast %758 : vector<16x16x128xf32> to vector<1x16x16x128xf32>
    tpu.vector_store %arg9[%c0_309, %c0_310, %c0_311, %c0_312], %761 {strides = array<i32>} : memref<1x16x16x128xf32, #tpu.memory_space<vmem>>, vector<1x16x16x128xf32>,
    return
  }
  func.func @transform_0(%arg0: i32) -> (i32, i32, i32, i32) {
    %c0_i32 = arith.constant 0 : i32
    %c0_i32_0 = arith.constant 0 : i32
    %c0_i32_1 = arith.constant 0 : i32
    %c0_i32_2 = arith.constant 0 : i32
    return %arg0, %c0_i32, %c0_i32_0, %c0_i32_1 : i32, i32, i32, i32
  }
  func.func @transform_1(%arg0: i32) -> (i32, i32, i32) {
    %c0_i32 = arith.constant 0 : i32
    %c0_i32_0 = arith.constant 0 : i32
    %c0_i32_1 = arith.constant 0 : i32
    %c0_i32_2 = arith.constant 0 : i32
    return %c0_i32, %c0_i32_0, %c0_i32_1 : i32, i32, i32
  }
  func.func @transform_2(%arg0: i32) -> (i32, i32, i32) {
    %c0_i32 = arith.constant 0 : i32
    %c0_i32_0 = arith.constant 0 : i32
    %c0_i32_1 = arith.constant 0 : i32
    %c0_i32_2 = arith.constant 0 : i32
    return %c0_i32, %c0_i32_0, %c0_i32_1 : i32, i32, i32
  }
  func.func @transform_3(%arg0: i32) -> (i32, i32) {
    %c0_i32 = arith.constant 0 : i32
    %c0_i32_0 = arith.constant 0 : i32
    %c0_i32_1 = arith.constant 0 : i32
    return %c0_i32, %c0_i32_0 : i32, i32
  }
  func.func @transform_4(%arg0: i32) -> (i32, i32) {
    %c0_i32 = arith.constant 0 : i32
    %c0_i32_0 = arith.constant 0 : i32
    %c0_i32_1 = arith.constant 0 : i32
    return %c0_i32, %c0_i32_0 : i32, i32
  }
  func.func @transform_5(%arg0: i32) -> (i32, i32) {
    %c0_i32 = arith.constant 0 : i32
    %c0_i32_0 = arith.constant 0 : i32
    %c0_i32_1 = arith.constant 0 : i32
    return %c0_i32, %c0_i32_0 : i32, i32
  }
  func.func @transform_6(%arg0: i32) -> (i32, i32, i32) {
    %c0_i32 = arith.constant 0 : i32
    %c0_i32_0 = arith.constant 0 : i32
    %c0_i32_1 = arith.constant 0 : i32
    %c0_i32_2 = arith.constant 0 : i32
    return %c0_i32, %c0_i32_0, %c0_i32_1 : i32, i32, i32
  }
  func.func @transform_7(%arg0: i32) -> (i32, i32) {
    %c0_i32 = arith.constant 0 : i32
    %c0_i32_0 = arith.constant 0 : i32
    %c0_i32_1 = arith.constant 0 : i32
    return %c0_i32, %c0_i32_0 : i32, i32
  }
  func.func @transform_8(%arg0: i32) -> (i32, i32, i32, i32) {
    %c0_i32 = arith.constant 0 : i32
    %c0_i32_0 = arith.constant 0 : i32
    %c0_i32_1 = arith.constant 0 : i32
    %c0_i32_2 = arith.constant 0 : i32
    return %arg0, %c0_i32, %c0_i32_0, %c0_i32_1 : i32, i32, i32, i32
  }
}

</mosaic_0001>

<bundles_post_ra>
// kernel: tpu_custom_call.1
= control target key start
LH: loop header
LB: loop body
LE: loop exit
PB: predicated region body
PF: predicated region fallthrough
CT: control target
= control target key end

     0   :  { %s11360_s0 = inlined_call_operand.hbm [shape: f32[2,16,16,128], index: 0, kind: input, shape index: {}]   ;;  %s11361_s1 = inlined_call_operand.hbm [shape: f32[3,3,128], index: 1, kind: input, shape index: {}]   ;;  %s11362_s2 = inlined_call_operand.hbm [shape: f32[5,5,128], index: 2, kind: input, shape index: {}]   ;;  %s11363_s3 = inlined_call_operand.vmem [shape: f32[2,128], index: 3, kind: input, shape index: {}]   ;;  %s11364_s4 = inlined_call_operand.hbm [shape: f32[128,128], index: 4, kind: input, shape index: {}]   ;;  %s11365_s5 = inlined_call_operand.vmem [shape: f32[1,128], index: 5, kind: input, shape index: {}]   ;;  %s11366_s6 = inlined_call_operand.hbm [shape: f32[2,128,128], index: 6, kind: input, shape index: {}]   ;;  %s11367_s7 = inlined_call_operand.vmem [shape: f32[2,128], index: 7, kind: input, shape index: {}]   ;;  %s11368_s8 = inlined_call_operand.hbm [shape: f32[2,16,16,128], index: 8, kind: output, shape index: {}]  }
   0x1   :  { %11935 = sst [smem:[#allocation206_spill]] %s11368_s8 }
   0x2   :  { %13 = vsyncpa [#allocation10], 0 }
   0x3   :  { %15 = vsyncpa [#allocation10 + $0x1], 0 }
   0x4   :  { %16 = vsyncpa [#allocation13], 0 }
   0x5   :  { %17 = vsyncpa [#allocation16], 0 }
   0x6   :  { %18 = vsyncpa [#allocation11], 0 }
   0x7   :  { %20 = vsyncpa [#allocation11 + $0x1], 0  ;;  %s5946_s27 = smov 0   ;;  %s5948_s28 = smov 0  }
   0x8   :  { %s5950_s29 = smov 0   ;;  %s5952_s30 = smov 0  }
   0x9 LB: > { %11936 = sst [smem:[#allocation23_spill]] %s5872_s27  ;;  %s5967_s9 = sadd.s32 4294967295, %s5884_s30   ;;  %s5884_s30 = sphi %s5952_s30, %s13474_s30   ;;  %s5880_s29 = sphi %s5950_s29, %s13473_s29   ;;  %s5876_s28 = sphi %s5948_s28, %s13472_s28   ;;  %s5872_s27 = sphi %s5946_s27, %s13471_s27  }
   0xa   : > { %s5304_s10 = sadd.s32 4294967294, %s5884_s30   ;;  %p46_p0 = scmp.ne.s32.totalorder %s5876_s28, %s5872_s27 }
   0xb   : > { %p11369_p1 = scmp.eq.s32.totalorder %s5967_s9, 0  ;;  %p223_p3 = scmp.eq.s32.totalorder %s5304_s10, 1 }
   0xc   : > { %p5305_p5 = scmp.ge.s32.totalorder %s5884_s30, 1  ;;  %p230_p7 = scmp.lt.s32.totalorder %s5884_s30, 3 }
   0xd   : > { %p5976_p4 = por %p11369_p1, %p46_p0  ;;  %p5981_p6 = por %p223_p3, %p46_p0 }
   0xe   : > { %p5986_p8 = pnand %p5305_p5, %p230_p7  ;;  %s5886_s14 = smov [#allocation12]  }
   0xf   : > { %s11937_s11 = scalar_select %p5976_p4, 1, 0 }
  0x10   : > { %s11938_s12 = scalar_select %p5981_p6, 1, 0 }
  0x11   : > { %s11940_s13 = scalar_select %p5986_p8, 1, 0 }
  0x12   : > { %11939 = sst [smem:[#allocation24_spill]] %s11938_s12  ;;  %s242_s15 = sshll.u32 %s5886_s14, 4  ;;  %s243_s15 = int_to_ptr.vmem [resolvable:$true] %s242_s15 }
  0x13   : > { %p5578_p9 = pneg %p5986_p8  ;;  %s5887_s17 = smov [#allocation15]  }
  0x14   : > { %s271_s18 = sshll.u32 %s5887_s17, 4  ;;  %s5668_s21 = scalar_lea.hbm %s11361_s1, 192  ;;  %s272_s18 = int_to_ptr.vmem [resolvable:$true] %s271_s18 }
  0x15   : > { %p5995_p11 = pnand %p5578_p9, %p11369_p1  ;;  %p5669_p12 = scmp.ne.s32.totalorder %s11361_s1, %s5668_s21 }
  0x16   : > { %p5675_p5 = scmp.lt.u32.totalorder %s5668_s21, %s11361_s1 }
  0x17   : > { %p6007_p13 = pneg %p5995_p11 }
  0x19   : > { %p5671_p0 = pnand %p6007_p13, %p5669_p12 }
  0x1b   : > { %p5672_p3 = pneg %p5671_p0 }
  0x1d   : > { %p5677_p7 = pnand %p5675_p5, %p5672_p3 }
  0x1f   : > { %5680 = shalt.err (!%p5677_p7)
}
  0x20   : > { %s5681_s10 = scalar_lea.vmem %s243_s15, 192  ;;  %p5689_p2 = scmp.lt.s32.totalorder %s243_s15, %s243_s15 }
  0x21   : > { %p5682_p9 = scmp.ne.s32.totalorder %s243_s15, %s5681_s10  ;;  %p5690_p6 = scmp.lt.s32.totalorder %s5681_s10, %s5681_s10 }
  0x23   : > { %p5684_p10 = pnand %p5682_p9, %p6007_p13  ;;  %p5691_p4 = por %p5690_p6, %p5689_p2 }
  0x25   : > { %p5685_p1 = pneg %p5684_p10 }
  0x27   : > { %p5692_p8 = pnand %p5691_p4, %p5685_p1 }
  0x29   : > { %5695 = shalt.err (!%p5692_p8)
}
  0x2a   : > { %s5888_s14 = smov 64   ;;  %s5889_s17 = smov 4  }
  0x2b   : > { %5581 = dma.hbm_to_vmem [thread:$0]  (!%p5995_p11), %s11361_s1, 192, %s243_s15, [#allocation13], %s5888_s14, %s5888_s14, %s5889_s17  }
  0x2c   : > { %s5890_s21 = smov [#allocation14]   ;;  %s5696_s26 = scalar_lea.hbm %s11364_s4, 2048 }
  0x2d   : > { %s255_s22 = sshll.u32 %s5890_s21, 4  ;;  %p5697_p1 = scmp.ne.s32.totalorder %s11364_s4, %s5696_s26  ;;  %s256_s22 = int_to_ptr.vmem [resolvable:$true] %s255_s22 }
  0x2e   : > { %p5703_p6 = scmp.lt.u32.totalorder %s5696_s26, %s11364_s4 }
  0x2f   : > { %p5699_p2 = pnand %p5697_p1, %p6007_p13 }
  0x31   : > { %p5700_p4 = pneg %p5699_p2 }
  0x33   : > { %p5705_p8 = pnand %p5703_p6, %p5700_p4 }
  0x35   : > { %5708 = shalt.err (!%p5705_p8)
}
  0x36   : > { %s5709_s15 = scalar_lea.vmem %s272_s18, 2048  ;;  %p5717_p3 = scmp.lt.s32.totalorder %s272_s18, %s272_s18 }
  0x37   : > { %p5710_p10 = scmp.ne.s32.totalorder %s272_s18, %s5709_s15  ;;  %p5718_p5 = scmp.lt.s32.totalorder %s5709_s15, %s5709_s15 }
  0x39   : > { %p5712_p12 = pnand %p5710_p10, %p6007_p13  ;;  %p5719_p7 = por %p5718_p5, %p5717_p3 }
  0x3b   : > { %p5713_p0 = pneg %p5712_p12 }
  0x3d   : > { %p5720_p9 = pnand %p5719_p7, %p5713_p0 }
  0x3f   : > { %5723 = shalt.err (!%p5720_p9)
}
  0x40   : > { %s5891_s12 = smov 128   ;;  %s5892_s14 = smov 8  }
  0x41   : > { %5587 = dma.hbm_to_vmem [thread:$0]  (!%p5995_p11), %s11364_s4, 2048, %s272_s18, [#allocation16], %s5891_s12, %s5891_s12, %s5892_s14  }
  0x42   : > { %s5724_s20 = scalar_lea.hbm %s11362_s2, 640 }
  0x43   : > { %p5725_p1 = scmp.ne.s32.totalorder %s11362_s2, %s5724_s20  ;;  %p5731_p6 = scmp.lt.u32.totalorder %s5724_s20, %s11362_s2 }
  0x45   : > { %p5727_p2 = pnand %p5725_p1, %p6007_p13 }
  0x47   : > { %p5728_p4 = pneg %p5727_p2 }
  0x49   : > { %p5733_p8 = pnand %p5731_p6, %p5728_p4 }
  0x4b   : > { %5736 = shalt.err (!%p5733_p8)
}
  0x4c   : > { %s5737_s10 = scalar_lea.vmem %s256_s22, 640  ;;  %p5745_p3 = scmp.lt.s32.totalorder %s256_s22, %s256_s22 }
  0x4d   : > { %p5738_p10 = scmp.ne.s32.totalorder %s256_s22, %s5737_s10  ;;  %p5746_p5 = scmp.lt.s32.totalorder %s5737_s10, %s5737_s10 }
  0x4f   : > { %p5740_p12 = pnand %p5738_p10, %p6007_p13  ;;  %p5747_p7 = por %p5746_p5, %p5745_p3 }
  0x51   : > { %p5741_p0 = pneg %p5740_p12 }
  0x53   : > { %p5748_p9 = pnand %p5747_p7, %p5741_p0 }
  0x55   : > { %5751 = shalt.err (!%p5748_p9)
}
  0x56   : > { %5584 = dma.hbm_to_vmem [thread:$0]  (!%p5995_p11), %s11362_s2, 640, %s256_s22, [#allocation13], %s5891_s12, %s5891_s12, %s5892_s14  }
  0x57   : > { %s5893_s8 = smov [#allocation17]   ;;  %s5752_s20 = scalar_lea.hbm %s11366_s6, 4096 }
  0x58   : > { %s287_s27 = sshll.u32 %s5893_s8, 4  ;;  %p5753_p1 = scmp.ne.s32.totalorder %s11366_s6, %s5752_s20  ;;  %s288_s27 = int_to_ptr.vmem [resolvable:$true] %s287_s27 }
  0x59   : > { %p5759_p6 = scmp.lt.u32.totalorder %s5752_s20, %s11366_s6 }
  0x5a   : > { %p5755_p2 = pnand %p5753_p1, %p6007_p13 }
  0x5c   : > { %p5756_p4 = pneg %p5755_p2 }
  0x5e   : > { %p5761_p8 = pnand %p5759_p6, %p5756_p4 }
  0x60   : > { %5764 = shalt.err (!%p5761_p8)
}
  0x61   : > { %s5765_s22 = scalar_lea.vmem %s288_s27, 4096  ;;  %p5773_p3 = scmp.lt.s32.totalorder %s288_s27, %s288_s27 }
  0x62   : > { %p5766_p10 = scmp.ne.s32.totalorder %s288_s27, %s5765_s22  ;;  %p5774_p5 = scmp.lt.s32.totalorder %s5765_s22, %s5765_s22 }
  0x64   : > { %p5768_p12 = pnand %p5766_p10, %p6007_p13  ;;  %p5775_p7 = por %p5774_p5, %p5773_p3 }
  0x66   : > { %p5769_p0 = pneg %p5768_p12 }
  0x68   : > { %p5776_p9 = pnand %p5775_p7, %p5769_p0 }
  0x6a   : > { %5779 = shalt.err (!%p5776_p9)
}
  0x6b   : > { %5590 = dma.hbm_to_vmem [thread:$0]  (!%p5995_p11), %s11366_s6, 4096, %s288_s27, [#allocation16], %s5891_s12, %s5891_s12, %s5892_s14  }
  0x6c   : > { %s6087_s24 = sadd.s32 1, %s5884_s30   ;;  %s33_s16 = sadd.s32 1, %s5880_s29 }
  0x6d   : > { %s30_s15 = ssub.s32 %s5884_s30, %s6087_s24  ;;  %p40_p13 = scmp.ne.s32.totalorder %s5880_s29, %s5876_s28 }
  0x6e   : > { %p31_p1 = scmp.eq.s32.totalorder %s30_s15, 0  ;;  %p41_p2 = scmp.eq.s32.totalorder %s5884_s30, 0 }
  0x6f   : > { %p11943_p4 = scmp.eq.s32.totalorder %s5967_s9, 1  ;;  %p5603_p8 = scmp.lt.s32.totalorder %s5884_s30, 2 }
  0x70   : > { %s6103_s17 = scalar_select %p31_p1, %s5880_s29, %s33_s16  }
  0x71   : > { %p6097_p6 = por %p11943_p4, %p40_p13  ;;  %p42_p10 = por %p41_p2, %p40_p13 }
  0x72   : > { %s304_s19 = sand.u32 1, %s5880_s29   ;;  %s5328_s27 = sshll.u32 %s5884_s30, 12 }
  0x73   : > { %s5311_s20 = sshll.u32 %s304_s19, 8  ;;  %s6110_s25 = scalar_lea.hbm %s11360_s0, %s5328_s27 }
  0x74   : > { %s308_s26 = scalar_lea.vmem [#allocation9], %s5311_s20  ;;  %p6114_p11 = pnand %p5603_p8, %p42_p10 }
  0x75   : > { %s315_s22 = sshll.u32 %s308_s26, 4  ;;  %s6118_s18 = scalar_lea.sflag [#allocation10], %s304_s19  ;;  %s6112_s22 = int_to_ptr.vmem [resolvable:$true] %s315_s22 }
  0x76   : > { %s5780_s16 = scalar_lea.hbm %s6110_s25, 4096  ;;  %p5782_p0 = pneg %p6114_p11 }
  0x77   : > { %p5781_p12 = scmp.ne.s32.totalorder %s6110_s25, %s5780_s16  ;;  %s5785_s27 = scalar_lea.hbm %s11360_s0, 8192 }
  0x78   : > { %p5786_p7 = scmp.lt.u32.totalorder %s6110_s25, %s11360_s0  ;;  %p5787_p9 = scmp.lt.u32.totalorder %s5785_s27, %s5780_s16 }
  0x79   : > { %p5783_p3 = pnand %p5782_p0, %p5781_p12  ;;  %p5789_p1 = scmp.lt.u32.totalorder %s5780_s16, %s6110_s25 }
  0x7a   : > { %p5788_p13 = por %p5787_p9, %p5786_p7 }
  0x7b   : > { %p5784_p5 = pneg %p5783_p3 }
  0x7c   : > { %p5790_p2 = por %p5789_p1, %p5788_p13 }
  0x7e   : > { %p5791_p4 = pnand %p5790_p2, %p5784_p5 }
  0x80   : > { %5794 = shalt.err (!%p5791_p4)
}
  0x81   : > { %s5795_s19 = scalar_lea.vmem %s6112_s22, 4096  ;;  %s5894_s26 = smov [#allocation9]  }
  0x82   : > { %p5796_p8 = scmp.ne.s32.totalorder %s6112_s22, %s5795_s19  ;;  %s5800_s15 = sshll.u32 %s5894_s26, 4  ;;  %s5801_s15 = int_to_ptr.vmem [resolvable:$false] %s5800_s15 }
  0x83   : > { %s5802_s20 = scalar_lea.vmem %s5801_s15, 8192  ;;  %p5803_p3 = scmp.lt.s32.totalorder %s6112_s22, %s5801_s15 }
  0x84   : > { %p5798_p10 = pnand %p5796_p8, %p5782_p0  ;;  %p5804_p7 = scmp.lt.s32.totalorder %s5802_s20, %s5795_s19 }
  0x86   : > { %p5799_p12 = pneg %p5798_p10  ;;  %p5805_p9 = por %p5804_p7, %p5803_p3 }
  0x88   : > { %p5806_p13 = pnand %p5805_p9, %p5799_p12 }
  0x8a   : > { %5809 = shalt.err (!%p5806_p13)
}
  0x8b   : > { %5594 = dma.hbm_to_vmem [thread:$0]  (!%p6114_p11), %s6110_s25, 4096, %s6112_s22, %s6118_s18, %s5891_s12, %s5891_s12, %s5892_s14  }
  0x8c   : > { %p11946_p0 = scmp.ne.s32.totalorder %s11940_s13, 0 }
  0x8e   : > { %327 = sbr.rel (%p11946_p0) target bundleno = 1523 (0x5f3), region = 52 }
  0x95   : > { %s6152_s16 = sand.u32 1, %s5876_s28   ;;  %p11947_p5 = scmp.ne.s32.totalorder %s11937_s11, 0 }
  0x96   : > { %s5315_s27 = sshll.u32 %s6152_s16, 8  ;;  %s330_s21 = scalar_lea.sflag [#allocation10], %s6152_s16 }
  0x97   : > { %s6158_s10 = scalar_lea.vmem [#allocation9], %s5315_s27 }
  0x98   : > { %5855 = dma.done.wait (%p11947_p5), %s330_s21, 4096  }
  0x99   : > { %5857 = vsyncadd (%p11947_p5), %s330_s21, 4294963200  ;;  %p11948_p11 = scmp.eq.s32.totalorder %s5967_s9, 0 }
  0x9b   : > { %5859 = dma.done.wait (%p11948_p11), [#allocation13], 832   ;;  %p11949_p1 = pmov %p11948_p11 }
  0x9d   : > { %5861 = vsyncadd (%p11949_p1), [#allocation13], 4294966464  ;;  %p11950_p2 = pmov %p11949_p1 }
  0x9e   : > { %p11951_p4 = pmov %p11949_p1 }
  0x9f   : > { %5863 = dma.done.wait (%p11950_p2), [#allocation16], 6144  }
  0xa0   : > { %5865 = vsyncadd (%p11951_p4), [#allocation16], 4294961152  ;;  %v11376_v0 = vmov 0.0|0.0   ;;  %vm5896_vm0 = vmmov 0   ;;  %v11375_v1 = vmov 0.0   ;;  %v4672_v2 = vld [vmem:[#allocation15] sm:$0xff] }
  0xa1   : > { %5486 = vmatprep.subr.bf16.mxu0 %v11376_v0  ;;  %5413 = vmatprep.mubr.msk.f32.mxu0 %vm5896_vm0, %v11375_v1  ;;  %v4673_v3 = vld [vmem:[#allocation15 + $0x8] sm:$0xff]  ;;  %v4674_v4 = vld [vmem:[#allocation15 + $0x10] sm:$0xff]  ;;  %v4675_v6 = vld [vmem:[#allocation15 + $0x18] sm:$0xff]  ;;  %vm633_vm3 = vcmask 1041408   ;;  %vm772_vm4 = vcmask 1040384   ;;  %vm953_vm5 = vcmask 1046528  }
  0xa2   : > { %5510 = vmatprep.subr.bf16.mxu1 %v11376_v0  ;;  %5448 = vmatprep.mubr.msk.f32.mxu1 %vm5896_vm0, %v11375_v1  ;;  %v5487_v5 = vpack.c.bf16 %v4673_v3, %v4672_v2  ;;  %v5490_v7 = vpack.c.bf16 %v4675_v6, %v4674_v4  ;;  %v4676_v8 = vld [vmem:[#allocation15 + $0x20] sm:$0xff]  ;;  %v4677_v9 = vld [vmem:[#allocation15 + $0x28] sm:$0xff]  ;;  %v6183_v11 = vld [vmem:[%s6158_s10 + $0x8] sm:$0xff]  ;;  %vm1092_vm6 = vcmask 1045504   ;;  %s11255_s11 = scalar_lea.vmem [#allocation18], %s5315_s27  ;;  %s5329_s27 = sshll.u32 %s5967_s9, 12 }
  0xa3   : > { %v6180_v10 = vld [vmem:[%s6158_s10] sm:$0xff]  ;;  %v6186_v12 = vld [vmem:[%s6158_s10 + $0x10] sm:$0xff]  ;;  %v452_v15 = vmul.f32 %v6183_v11, %v6183_v11  ;;  %v5493_v16 = vpack.c.bf16 %v4677_v9, %v4676_v8  ;;  %v6195_v17 = vld [vmem:[%s6158_s10 + $0x18] sm:$0xff]  ;;  %s5193_s13 = sshll.u32 %s11255_s11, 4  ;;  %s13462_s14 = sld [smem:[#allocation206_spill]]  ;;  %s11300_s13 = int_to_ptr.vmem [resolvable:$true] %s5193_s13 }
  0xa4   : > { %5488 = vmatpush3.bf16.msra.mxu0 %v5487_v5  ;;  %v414_v13 = vadd.f32 %v6183_v11, %v6180_v10  ;;  %v451_v14 = vmul.f32 %v6180_v10, %v6180_v10  ;;  %v453_v18 = vmul.f32 %v6186_v12, %v6186_v12  ;;  %v4678_v19 = vld [vmem:[#allocation15 + $0x30] sm:$0xff]  ;;  %v4679_v20 = vld [vmem:[#allocation15 + $0x38] sm:$0xff]  ;;  %v454_v23 = vmul.f32 %v6195_v17, %v6195_v17  ;;  %v4680_v30 = vld [vmem:[#allocation15 + $0x40] sm:$0xff]  ;;  %s5180_s22 = scalar_lea.sflag [#allocation11], %s6152_s16  ;;  %s5810_s18 = scalar_lea.vmem %s11300_s13, 4096 }
  0xa5   : > { %5489 = vmatprep.subr.bf16.mxu0 %v11376_v0  ;;  %v6202_v22 = vld [vmem:[%s6158_s10 + $0x20] sm:$0xff]  ;;  %v5496_v26 = vpack.c.bf16 %v4679_v20, %v4678_v19  ;;  %v6208_v27 = vld [vmem:[%s6158_s10 + $0x28] sm:$0xff]  ;;  %v6215_v33 = vld [vmem:[%s6158_s10 + $0x30] sm:$0xff]  ;;  %p5811_p8 = scmp.ne.s32.totalorder %s11300_s13, %s5810_s18  ;;  %s5898_s23 = smov [#allocation18]  }
  0xa6   : > { %v415_v21 = vadd.f32 %v414_v13, %v6186_v12  ;;  %v483_v24 = vadd.f32 %v452_v15, %v451_v14  ;;  %v455_v28 = vmul.f32 %v6202_v22, %v6202_v22  ;;  %v4681_v31 = vld [vmem:[#allocation15 + $0x48] sm:$0xff]  ;;  %v456_v34 = vmul.f32 %v6208_v27, %v6208_v27  ;;  %v4682_v41 = vld [vmem:[#allocation15 + $0x50] sm:$0xff]  ;;  %v4683_v42 = vld [vmem:[#allocation15 + $0x58] sm:$0xff]  ;;  %s5814_s19 = sshll.u32 %s5898_s23, 4  ;;  %s5815_s19 = int_to_ptr.vmem [resolvable:$false] %s5814_s19 }
  0xa7   : > { %v5499_v37 = vpack.c.bf16 %v4681_v31, %v4680_v30  ;;  %v6221_v38 = vld [vmem:[%s6158_s10 + $0x38] sm:$0xff]  ;;  %v457_v39 = vmul.f32 %v6215_v33, %v6215_v33  ;;  %v6228_v44 = vld [vmem:[%s6158_s10 + $0x40] sm:$0xff]  ;;  %v5502_v48 = vpack.c.bf16 %v4683_v42, %v4682_v41  ;;  %v6234_v49 = vld [vmem:[%s6158_s10 + $0x48] sm:$0xff]  ;;  %p5812_p10 = pnand %p5811_p8, %p6097_p6  ;;  %s5816_s26 = scalar_lea.vmem %s5815_s19, 8192 }
  0xa8   : > { %5491 = vmatpush3.bf16.msra.mxu0 %v5490_v7  ;;  %v416_v25 = vadd.f32 %v415_v21, %v6195_v17  ;;  %v484_v29 = vadd.f32 %v483_v24, %v453_v18  ;;  %v458_v45 = vmul.f32 %v6221_v38, %v6221_v38  ;;  %v459_v50 = vmul.f32 %v6228_v44, %v6228_v44  ;;  %v4684_v52 = vld [vmem:[#allocation15 + $0x60] sm:$0xff]  ;;  %v4685_v53 = vld [vmem:[#allocation15 + $0x68] sm:$0xff]  ;;  %v4686_v63 = vld [vmem:[#allocation15 + $0x70] sm:$0xff]  ;;  %p5817_p3 = scmp.lt.s32.totalorder %s11300_s13, %s5815_s19  ;;  %p5818_p7 = scmp.lt.s32.totalorder %s5816_s26, %s5810_s18 }
  0xa9   : > { %5492 = vmatprep.subr.bf16.mxu0 %v11376_v0  ;;  %v6241_v55 = vld [vmem:[%s6158_s10 + $0x50] sm:$0xff]  ;;  %v460_v56 = vmul.f32 %v6234_v49, %v6234_v49  ;;  %v5505_v59 = vpack.c.bf16 %v4685_v53, %v4684_v52  ;;  %v6247_v60 = vld [vmem:[%s6158_s10 + $0x58] sm:$0xff]  ;;  %v6254_v4 = vld [vmem:[%s6158_s10 + $0x60] sm:$0xff]  ;;  %s11298_s25 = scalar_lea.hbm %s13462_s14, %s5329_s27  ;;  %p5813_p12 = pneg %p5812_p10 }
  0xaa   : > { %v417_v32 = vadd.f32 %v416_v25, %v6202_v22  ;;  %v485_v35 = vadd.f32 %v484_v29, %v454_v23  ;;  %v461_v61 = vmul.f32 %v6241_v55, %v6241_v55  ;;  %v4687_v2 = vld [vmem:[#allocation15 + $0x78] sm:$0xff]  ;;  %v462_v5 = vmul.f32 %v6247_v60, %v6247_v60  ;;  %v6273_v21 = vld [vmem:[%s6158_s10 + $0x78] sm:$0xff]  ;;  %p5819_p9 = por %p5818_p7, %p5817_p3 }
  0xab   : > { %v5508_v8 = vpack.c.bf16 %v4687_v2, %v4686_v63  ;;  %v6260_v9 = vld [vmem:[%s6158_s10 + $0x68] sm:$0xff]  ;;  %v463_v13 = vmul.f32 %v6254_v4, %v6254_v4  ;;  %v6298_v41 = vld [vmem:[%s6158_s10 + $0x98] sm:$0xff] }
  0xac   : > { %5494 = vmatpush3.bf16.msra.mxu0 %v5493_v16  ;;  %v418_v36 = vadd.f32 %v417_v32, %v6208_v27  ;;  %v486_v40 = vadd.f32 %v485_v35, %v455_v28  ;;  %v6267_v16 = vld [vmem:[%s6158_s10 + $0x70] sm:$0xff]  ;;  %v464_v18 = vmul.f32 %v6260_v9, %v6260_v9  ;;  %v466_v28 = vmul.f32 %v6273_v21, %v6273_v21  ;;  %v6286_v31 = vld [vmem:[%s6158_s10 + $0x88] sm:$0xff]  ;;  %p5820_p13 = pnand %p5819_p9, %p5813_p12 }
  0xad   : > { %5495 = vmatprep.subr.bf16.mxu0 %v11376_v0  ;;  %v465_v23 = vmul.f32 %v6267_v16, %v6267_v16 }
  0xae   : > { %v419_v43 = vadd.f32 %v418_v36, %v6215_v33  ;;  %v487_v46 = vadd.f32 %v486_v40, %v456_v34  ;;  %v6292_v36 = vld [vmem:[%s6158_s10 + $0x90] sm:$0xff] }
  0xaf   : > { %v469_v42 = vmul.f32 %v6292_v36, %v6292_v36 }
  0xb0   : > { %5497 = vmatpush3.bf16.msra.mxu0 %v5496_v26  ;;  %v420_v47 = vadd.f32 %v419_v43, %v6221_v38  ;;  %v488_v51 = vadd.f32 %v487_v46, %v457_v39  ;;  %v6280_v26 = vld [vmem:[%s6158_s10 + $0x80] sm:$0xff] }
  0xb1   : > { %5498 = vmatprep.subr.bf16.mxu0 %v11376_v0  ;;  %v467_v32 = vmul.f32 %v6280_v26, %v6280_v26  ;;  %v6304_v46 = vld [vmem:[%s6158_s10 + $0xa0] sm:$0xff] }
  0xb2   : > { %v421_v54 = vadd.f32 %v420_v47, %v6228_v44  ;;  %v489_v57 = vadd.f32 %v488_v51, %v458_v45  ;;  %v470_v47 = vmul.f32 %v6298_v41, %v6298_v41  ;;  %v6310_v51 = vld [vmem:[%s6158_s10 + $0xa8] sm:$0xff]  ;;  %v471_v52 = vmul.f32 %v6304_v46, %v6304_v46 }
  0xb4   : > { %5500 = vmatpush3.bf16.msra.mxu0 %v5499_v37  ;;  %v422_v58 = vadd.f32 %v421_v54, %v6234_v49  ;;  %v490_v62 = vadd.f32 %v489_v57, %v459_v50  ;;  %v468_v37 = vmul.f32 %v6286_v31, %v6286_v31  ;;  %v472_v57 = vmul.f32 %v6310_v51, %v6310_v51 }
  0xb5   : > { %5501 = vmatprep.subr.bf16.mxu0 %v11376_v0 }
  0xb6   : > { %v423_v3 = vadd.f32 %v422_v58, %v6241_v55  ;;  %v491_v6 = vadd.f32 %v490_v62, %v460_v56  ;;  %v6316_v56 = vld [vmem:[%s6158_s10 + $0xb0] sm:$0xff] }
  0xb7   : > { %v473_v62 = vmul.f32 %v6316_v56, %v6316_v56 }
  0xb8   : > { %5503 = vmatpush3.bf16.msra.mxu0 %v5502_v48  ;;  %v424_v7 = vadd.f32 %v423_v3, %v6247_v60  ;;  %v492_v14 = vadd.f32 %v491_v6, %v461_v61  ;;  %v6322_v61 = vld [vmem:[%s6158_s10 + $0xb8] sm:$0xff]  ;;  %v6328_v3 = vld [vmem:[%s6158_s10 + $0xc0] sm:$0xff] }
  0xb9   : > { %5504 = vmatprep.subr.bf16.mxu0 %v11376_v0 }
  0xba   : > { %v425_v15 = vadd.f32 %v424_v7, %v6254_v4  ;;  %v493_v19 = vadd.f32 %v492_v14, %v462_v5  ;;  %v474_v5 = vmul.f32 %v6322_v61, %v6322_v61 }
  0xbc   : > { %5506 = vmatpush3.bf16.msra.mxu0 %v5505_v59  ;;  %v426_v20 = vadd.f32 %v425_v15, %v6260_v9  ;;  %v494_v24 = vadd.f32 %v493_v19, %v463_v13  ;;  %v475_v13 = vmul.f32 %v6328_v3, %v6328_v3 }
  0xbd   : > { %5507 = vmatprep.subr.bf16.mxu0 %v11376_v0 }
  0xbe   : > { %v427_v25 = vadd.f32 %v426_v20, %v6267_v16  ;;  %v495_v29 = vadd.f32 %v494_v24, %v464_v18  ;;  %v6340_v18 = vld [vmem:[%s6158_s10 + $0xd0] sm:$0xff]  ;;  %v6346_v24 = vld [vmem:[%s6158_s10 + $0xd8] sm:$0xff] }
  0xc0   : > { %5509 = vmatpush3.bf16.msra.mxu0 %v5508_v8  ;;  %v428_v30 = vadd.f32 %v427_v25, %v6273_v21  ;;  %v496_v34 = vadd.f32 %v495_v29, %v465_v23  ;;  %v6334_v8 = vld [vmem:[%s6158_s10 + $0xc8] sm:$0xff]  ;;  %v477_v25 = vmul.f32 %v6340_v18, %v6340_v18 }
  0xc1   : > { %5534 = vmatprep.subr.bf16.mxu0 %v11376_v0  ;;  %v476_v19 = vmul.f32 %v6334_v8, %v6334_v8 }
  0xc2   : > { %v429_v35 = vadd.f32 %v428_v30, %v6280_v26  ;;  %v497_v39 = vadd.f32 %v496_v34, %v466_v28  ;;  %v6352_v30 = vld [vmem:[%s6158_s10 + $0xe0] sm:$0xff] }
  0xc4   : > { %v430_v40 = vadd.f32 %v429_v35, %v6286_v31  ;;  %v498_v43 = vadd.f32 %v497_v39, %v467_v32  ;;  %v478_v32 = vmul.f32 %v6346_v24, %v6346_v24  ;;  %v479_v39 = vmul.f32 %v6352_v30, %v6352_v30 }
  0xc6   : > { %v431_v45 = vadd.f32 %v430_v40, %v6292_v36  ;;  %v499_v48 = vadd.f32 %v498_v43, %v468_v37  ;;  %v6358_v37 = vld [vmem:[%s6158_s10 + $0xe8] sm:$0xff]  ;;  %v6364_v43 = vld [vmem:[%s6158_s10 + $0xf0] sm:$0xff] }
  0xc8   : > { %v432_v50 = vadd.f32 %v431_v45, %v6298_v41  ;;  %v500_v53 = vadd.f32 %v499_v48, %v469_v42  ;;  %v480_v45 = vmul.f32 %v6358_v37, %v6358_v37 }
  0xca   : > { %v433_v54 = vadd.f32 %v432_v50, %v6304_v46  ;;  %v501_v58 = vadd.f32 %v500_v53, %v470_v47  ;;  %v6370_v50 = vld [vmem:[%s6158_s10 + $0xf8] sm:$0xff] }
  0xcc   : > { %v434_v59 = vadd.f32 %v433_v54, %v6310_v51  ;;  %v502_v63 = vadd.f32 %v501_v58, %v471_v52  ;;  %v481_v52 = vmul.f32 %v6364_v43, %v6364_v43 }
  0xce   : > { %v435_v2 = vadd.f32 %v434_v59, %v6316_v56  ;;  %v503_v6 = vadd.f32 %v502_v63, %v472_v57  ;;  %v482_v57 = vmul.f32 %v6370_v50, %v6370_v50 }
  0xd0   : > { %v436_v7 = vadd.f32 %v435_v2, %v6322_v61  ;;  %v504_v14 = vadd.f32 %v503_v6, %v473_v62 }
  0xd2   : > { %v437_v15 = vadd.f32 %v436_v7, %v6328_v3  ;;  %v505_v20 = vadd.f32 %v504_v14, %v474_v5 }
  0xd4   : > { %v438_v23 = vadd.f32 %v437_v15, %v6334_v8  ;;  %v506_v28 = vadd.f32 %v505_v20, %v475_v13 }
  0xd6   : > { %v439_v29 = vadd.f32 %v438_v23, %v6340_v18  ;;  %v507_v34 = vadd.f32 %v506_v28, %v476_v19 }
  0xd8   : > { %v440_v35 = vadd.f32 %v439_v29, %v6346_v24  ;;  %v508_v40 = vadd.f32 %v507_v34, %v477_v25  ;;  %v1257_v29 = vlaneseq }
  0xda   : > { %v441_v42 = vadd.f32 %v440_v35, %v6352_v30  ;;  %v509_v47 = vadd.f32 %v508_v40, %v478_v32 }
  0xdc   : > { %v442_v48 = vadd.f32 %v441_v42, %v6358_v37  ;;  %v510_v53 = vadd.f32 %v509_v47, %v479_v39  ;;  %v1258_v39 = vshrl.u32 %v1257_v29, 7  ;;  %v1235_v29 = vld [vmem:[#allocation14 + $0x8] sm:$0x1f] }
  0xde   : > { %v443_v54 = vadd.f32 %v442_v48, %v6364_v43  ;;  %v511_v58 = vadd.f32 %v510_v53, %v480_v45  ;;  %v6382_v45 = vsub.s32 0, %v1258_v39  ;;  %v6384_v47 = vsub.s32 1, %v1258_v39  ;;  %v1234_v48 = vld [vmem:[#allocation14] sm:$0x1f] }
  0xe0   : > { %v444_v59 = vadd.f32 %v443_v54, %v6370_v50  ;;  %v512_v62 = vadd.f32 %v511_v58, %v481_v52  ;;  %11952 = vst [vmem:[#allocation25_spill] sm:$0xff] %v6382_v45  ;;  %11953 = vst [vmem:[#allocation26_spill] sm:$0xff] %v6384_v47  ;;  %v6387_v53 = vrot.slane %v1234_v48, %v6382_v45 }
  0xe1   : > { %v6390_v54 = vrot.slane %v1234_v48, %v6384_v47 }
  0xe2   : > { %v445_v63 = vrot.slane %v444_v59, 4  ;;  %v513_v2 = vadd.f32 %v512_v62, %v482_v57  ;;  %11954 = vst [vmem:[#allocation27_spill] sm:$0xff] %v6387_v53  ;;  %v6392_v57 = vsub.s32 2, %v1258_v39  ;;  %v1261_v58 = vmul.f32 0.0, %v6387_v53 }
  0xe3   : > { %11955 = vst [vmem:[#allocation28_spill] sm:$0xff] %v6390_v54 }
  0xe4   : > { %v446_v5 = vadd.f32 %v445_v63, %v444_v59  ;;  %v514_v6 = vrot.slane %v513_v2, 4  ;;  %11956 = vst [vmem:[#allocation29_spill] sm:$0xff] %v6392_v57  ;;  %v1313_v59 = vmul.f32 0.0, %v6390_v54  ;;  %v6397_v62 = vrot.slane %v1234_v48, %v6392_v57 }
  0xe5   : > { %v6399_v63 = vsub.s32 3, %v1258_v39 }
  0xe6   : > { %v447_v7 = vrot.slane %v446_v5, 2  ;;  %v515_v13 = vadd.f32 %v514_v6, %v513_v2  ;;  %11957 = vst [vmem:[#allocation30_spill] sm:$0xff] %v6397_v62  ;;  %v1329_v2 = vadd.f32 %v1313_v59, %v1261_v58  ;;  %v6419_v59 = vrot.slane %v1235_v29, %v6384_v47 }
  0xe7   : > { %11958 = vst [vmem:[#allocation31_spill] sm:$0xff] %v6399_v63  ;;  %v6403_v6 = vrot.slane %v1234_v48, %v6399_v63 }
  0xe8   : > { %v448_v14 = vadd.f32 %v447_v7, %v446_v5  ;;  %v516_v15 = vrot.slane %v515_v13, 2  ;;  %v1365_v5 = vmul.f32 0.0, %v6397_v62  ;;  %v6405_v7 = vsub.s32 4, %v1258_v39  ;;  %11964 = vst [vmem:[#allocation37_spill] sm:$0xff] %v6419_v59 }
  0xe9   : > { %11959 = vst [vmem:[#allocation32_spill] sm:$0xff] %v6403_v6  ;;  %v6413_v39 = vrot.slane %v1235_v29, %v6382_v45 }
  0xea   : > { %v449_v19 = vrot.slane %v448_v14, 1  ;;  %v517_v20 = vadd.f32 %v516_v15, %v515_v13  ;;  %11960 = vst [vmem:[#allocation33_spill] sm:$0xff] %v6405_v7 }
  0xeb   : > { %11962 = vst [vmem:[#allocation35_spill] sm:$0xff] %v6413_v39  ;;  %v1522_v58 = vmul.f32 0.0, %v6413_v39 }
  0xec   : > { %v450_v23 = vadd.f32 %v449_v19, %v448_v14  ;;  %v518_v25 = vrot.slane %v517_v20, 1  ;;  %v1381_v19 = vadd.f32 %v1365_v5, %v1329_v2  ;;  %v6424_v2 = vrot.slane %v1235_v29, %v6392_v57  ;;  %v1231_v5 = vld [vmem:[#allocation12] sm:$0x7] }
  0xee   : > { %v6378_v28 = vmul.f32 0.00390625, %v450_v23  ;;  %v519_v32 = vadd.f32 %v518_v25, %v517_v20  ;;  %v1417_v20 = vmul.f32 0.0, %v6403_v6  ;;  %v6409_v23 = vrot.slane %v1234_v48, %v6405_v7  ;;  %11965 = vst [vmem:[#allocation38_spill] sm:$0xff] %v6424_v2 }
  0xf0   : > { %v521_v34 = vmul.f32 256.0, %v6378_v28  ;;  %11961 = vst [vmem:[#allocation34_spill] sm:$0xff] %v6409_v23 }
  0xf2   : > { %v522_v35 = vmul.f32 %v521_v34, %v6378_v28  ;;  %v1433_v34 = vadd.f32 %v1417_v20, %v1381_v19 }
  0xf4   : > { %v523_v40 = vsub.f32 %v519_v32, %v522_v35  ;;  %v1469_v35 = vmul.f32 0.0, %v6409_v23 }
  0xf6   : > { %v524_v42 = vmul.f32 0.003921569, %v523_v40 }
  0xf8   : > { %v525_v52 = vmax.f32 %v524_v42, 0.0  ;;  %v6415_v42 = vadd.f32 %v1469_v35, %v1433_v34 }
  0xfa   : > { %5654 = vrsqrt.f32 %v525_v52  ;;  %vm528_vm1 = vcmp.eq.f32.partialorder %v525_v52, inf  ;;  %v531_v15 = vand.u32 2147483648, %v525_v52  ;;  %vm530_vm2 = vcmp.eq.f32.partialorder %v525_v52, 0.0  ;;  %11963 = vst [vmem:[#allocation36_spill] sm:$0xff] %v6415_v42 }
  0xfb   : > { %v1538_v48 = vadd.f32 %v1522_v58, %v6415_v42 }
 0x104   : > { %v5655_v13 = vpop.eup %5654 }
 0x105   : > { %v527_v14 = vmul.f32 %v5655_v13, %v525_v52 }
 0x107   : > { %v529_v25 = vsel %vm528_vm1, %v525_v52, %v527_v14  ;;  %v1575_v52 = vmul.f32 0.0, %v6419_v59  ;;  %v6427_v14 = vrot.slane %v1231_v5, %v6382_v45 }
 0x108   : > { %v532_v32 = vsel %vm530_vm2, %v531_v15, %v529_v25  ;;  %v1664_v15 = vmul.f32 0.0, %v6424_v2 }
 0x109   : > { %v533_v40 = vadd.f32 1e-08, %v532_v32  ;;  %v1591_v13 = vadd.f32 %v1575_v52, %v1538_v48  ;;  %11966 = vst [vmem:[#allocation39_spill] sm:$0xff] %v6427_v14  ;;  %v6431_v20 = vmul.f32 0.0, %v6427_v14  ;;  %v6436_v32 = vrot.slane %v1235_v29, %v6399_v63 }
 0x10b   : > { %5656 = vrcp.f32 %v533_v40  ;;  %11967 = vst [vmem:[#allocation40_spill] sm:$0xff] %v6431_v20  ;;  %v6433_v25 = vadd.f32 %v1664_v15, %v1591_v13  ;;  %11969 = vst [vmem:[#allocation42_spill] sm:$0xff] %v6436_v32 }
 0x10d   : > { %11968 = vst [vmem:[#allocation41_spill] sm:$0xff] %v6433_v25 }
 0x115   : > { %v5657_v19 = vpop.eup %5656 }
 0x116   : > { %v536_v34 = vmul.f32 %v5657_v19, %v6180_v10  ;;  %v537_v35 = vmul.f32 %v5657_v19, %v6183_v11  ;;  %v538_v40 = vmul.f32 %v5657_v19, %v6186_v12  ;;  %v539_v58 = vmul.f32 %v5657_v19, %v6195_v17 }
 0x117   : > { %v540_v48 = vmul.f32 %v5657_v19, %v6202_v22  ;;  %v541_v52 = vmul.f32 %v5657_v19, %v6208_v27  ;;  %v542_v1 = vmul.f32 %v5657_v19, %v6215_v33  ;;  %v543_v13 = vmul.f32 %v5657_v19, %v6221_v38 }
 0x118   : > { %v544_v15 = vmul.f32 %v5657_v19, %v6228_v44  ;;  %v545_v29 = vmul.f32 %v5657_v19, %v6234_v49  ;;  %v546_v10 = vmul.f32 %v5657_v19, %v6241_v55  ;;  %v547_v11 = vmul.f32 %v5657_v19, %v6247_v60 }
 0x119   : > { %v548_v12 = vmul.f32 %v5657_v19, %v6254_v4  ;;  %v549_v17 = vmul.f32 %v5657_v19, %v6260_v9  ;;  %v550_v22 = vmul.f32 %v5657_v19, %v6267_v16  ;;  %v551_v27 = vmul.f32 %v5657_v19, %v6273_v21 }
 0x11a   : > { %v552_v33 = vmul.f32 %v5657_v19, %v6280_v26  ;;  %v553_v38 = vmul.f32 %v5657_v19, %v6286_v31  ;;  %v554_v44 = vmul.f32 %v5657_v19, %v6292_v36  ;;  %v555_v49 = vmul.f32 %v5657_v19, %v6298_v41 }
 0x11b   : > { %v556_v55 = vmul.f32 %v5657_v19, %v6304_v46  ;;  %v557_v60 = vmul.f32 %v5657_v19, %v6310_v51  ;;  %v558_v4 = vmul.f32 %v5657_v19, %v6316_v56  ;;  %v559_v9 = vmul.f32 %v5657_v19, %v6322_v61 }
 0x11c   : > { %v560_v16 = vmul.f32 %v5657_v19, %v6328_v3  ;;  %v561_v21 = vmul.f32 %v5657_v19, %v6334_v8  ;;  %v562_v26 = vmul.f32 %v5657_v19, %v6340_v18  ;;  %v568_v31 = vmul.f32 %v5657_v19, %v6378_v28 }
 0x11d   : > { %v563_v36 = vmul.f32 %v5657_v19, %v6346_v24  ;;  %v564_v41 = vmul.f32 %v5657_v19, %v6352_v30  ;;  %v565_v46 = vmul.f32 %v5657_v19, %v6358_v37  ;;  %v566_v51 = vmul.f32 %v5657_v19, %v6364_v43 }
 0x11e   : > { %v567_v56 = vmul.f32 %v5657_v19, %v6370_v50  ;;  %v6471_v0 = vsub.f32 %v536_v34, %v568_v31  ;;  %v6474_v61 = vrot.slane %v1231_v5, %v6384_v47  ;;  %v6477_v3 = vmul.f32 0.0, %v6436_v32 }
 0x11f   : > { %v6479_v8 = vsub.f32 %v537_v35, %v568_v31  ;;  %v6481_v18 = vsub.f32 %v538_v40, %v568_v31  ;;  %v6483_v24 = vsub.f32 %v539_v58, %v568_v31  ;;  %v6485_v30 = vsub.f32 %v540_v48, %v568_v31 }
 0x120   : > { %11970 = vst [vmem:[#allocation43_spill] sm:$0xff] %v6471_v0  ;;  %11971 = vst [vmem:[#allocation44_spill] sm:$0xff] %v6474_v61  ;;  %v6487_v37 = vsub.f32 %v541_v52, %v568_v31  ;;  %v6489_v43 = vsub.f32 %v542_v1, %v568_v31  ;;  %v6491_v50 = vsub.f32 %v543_v13, %v568_v31 }
 0x121   : > { %11972 = vst [vmem:[#allocation45_spill] sm:$0xff] %v6477_v3  ;;  %11973 = vst [vmem:[#allocation46_spill] sm:$0xff] %v6479_v8  ;;  %v6493_v28 = vsub.f32 %v544_v15, %v568_v31  ;;  %v6495_v5 = vsub.f32 %v545_v29, %v568_v31  ;;  %v6497_v19 = vsub.f32 %v546_v10, %v568_v31 }
 0x122   : > { %11974 = vst [vmem:[#allocation47_spill] sm:$0xff] %v6481_v18  ;;  %11975 = vst [vmem:[#allocation48_spill] sm:$0xff] %v6483_v24  ;;  %v6499_v34 = vsub.f32 %v547_v11, %v568_v31  ;;  %v6501_v35 = vsub.f32 %v548_v12, %v568_v31  ;;  %v6503_v40 = vsub.f32 %v549_v17, %v568_v31  ;;  %v643_v63 = vrot.slane %v6489_v43, 6 }
 0x123   : > { %11976 = vst [vmem:[#allocation49_spill] sm:$0xff] %v6485_v30  ;;  %11977 = vst [vmem:[#allocation50_spill] sm:$0xff] %v6487_v37  ;;  %v6505_v58 = vsub.f32 %v550_v22, %v568_v31  ;;  %v6507_v48 = vsub.f32 %v551_v27, %v568_v31  ;;  %v6509_v1 = vsub.f32 %v552_v33, %v568_v31  ;;  %v646_v47 = vrot.slane %v6493_v28, 6 }
 0x124   : > { %11978 = vst [vmem:[#allocation51_spill] sm:$0xff] %v6489_v43  ;;  %11979 = vst [vmem:[#allocation52_spill] sm:$0xff] %v6491_v50  ;;  %v6511_v52 = vsub.f32 %v553_v38, %v568_v31  ;;  %v6513_v13 = vsub.f32 %v554_v44, %v568_v31  ;;  %v6515_v15 = vsub.f32 %v555_v49, %v568_v31  ;;  %v635_v49 = vrot.slane %v6479_v8, 6 }
 0x125   : > { %11980 = vst [vmem:[#allocation53_spill] sm:$0xff] %v6493_v28  ;;  %11981 = vst [vmem:[#allocation54_spill] sm:$0xff] %v6495_v5  ;;  %v6517_v29 = vsub.f32 %v556_v55, %v568_v31  ;;  %v6519_v10 = vsub.f32 %v557_v60, %v568_v31  ;;  %v6521_v11 = vsub.f32 %v558_v4, %v568_v31  ;;  %v638_v55 = vrot.slane %v6483_v24, 6 }
 0x126   : > { %11982 = vst [vmem:[#allocation55_spill] sm:$0xff] %v6497_v19  ;;  %11983 = vst [vmem:[#allocation56_spill] sm:$0xff] %v6499_v34  ;;  %v6523_v12 = vsub.f32 %v559_v9, %v568_v31  ;;  %v6525_v17 = vsub.f32 %v560_v16, %v568_v31  ;;  %v6527_v22 = vsub.f32 %v561_v21, %v568_v31  ;;  %v641_v60 = vrot.slane %v6487_v37, 6 }
 0x127   : > { %11984 = vst [vmem:[#allocation57_spill] sm:$0xff] %v6501_v35  ;;  %11985 = vst [vmem:[#allocation58_spill] sm:$0xff] %v6503_v40  ;;  %v6529_v27 = vsub.f32 %v562_v26, %v568_v31  ;;  %v6531_v33 = vsub.f32 %v563_v36, %v568_v31  ;;  %v6533_v38 = vsub.f32 %v564_v41, %v568_v31  ;;  %v644_v16 = vrot.slane %v6491_v50, 6 }
 0x128   : > { %11986 = vst [vmem:[#allocation59_spill] sm:$0xff] %v6505_v58  ;;  %11987 = vst [vmem:[#allocation60_spill] sm:$0xff] %v6507_v48  ;;  %v6535_v44 = vsub.f32 %v565_v46, %v568_v31  ;;  %v6540_v4 = vsub.f32 %v566_v51, %v568_v31  ;;  %v6542_v9 = vsub.f32 %v567_v56, %v568_v31  ;;  %v647_v21 = vrot.slane %v6495_v5, 6 }
 0x129   : > { %11988 = vst [vmem:[#allocation61_spill] sm:$0xff] %v6509_v1  ;;  %11989 = vst [vmem:[#allocation62_spill] sm:$0xff] %v6511_v52  ;;  %v634_v26 = vrot.slane %v6471_v0, 6  ;;  %v637_v36 = vrot.slane %v6481_v18, 6  ;;  %v640_v41 = vrot.slane %v6485_v30, 6  ;;  %v650_v46 = vrot.slane %v6499_v34, 6 }
 0x12a   : > { %11990 = vst [vmem:[#allocation63_spill] sm:$0xff] %v6513_v13  ;;  %11991 = vst [vmem:[#allocation64_spill] sm:$0xff] %v6515_v15  ;;  %v652_v51 = vrot.slane %v6501_v35, 6  ;;  %v653_v31 = vrot.slane %v6503_v40, 6  ;;  %v649_v57 = vrot.slane %v6497_v19, 6  ;;  %v6565_v3 = vsel %vm633_vm3, %v643_v63, %v644_v16 }
 0x12b   : > { %11992 = vst [vmem:[#allocation65_spill] sm:$0xff] %v6517_v29  ;;  %11993 = vst [vmem:[#allocation66_spill] sm:$0xff] %v6519_v10  ;;  %v6555_v56 = vsel %vm633_vm3, %v634_v26, %v635_v49  ;;  %v6558_v45 = vsel %vm633_vm3, %v637_v36, %v638_v55  ;;  %v6561_v7 = vsel %vm633_vm3, %v640_v41, %v641_v60  ;;  %v655_v32 = vrot.slane %v6505_v58, 6 }
 0x12c   : > { %11994 = vst [vmem:[#allocation67_spill] sm:$0xff] %v6521_v11  ;;  %11995 = vst [vmem:[#allocation68_spill] sm:$0xff] %v6523_v12  ;;  %v6568_v25 = vsel %vm633_vm3, %v646_v47, %v647_v21  ;;  %v656_v20 = vrot.slane %v6507_v48, 6  ;;  %v6573_v49 = vsel %vm633_vm3, %v649_v57, %v650_v46  ;;  %v658_v55 = vrot.slane %v6509_v1, 6 }
 0x12d   : > { %11996 = vst [vmem:[#allocation69_spill] sm:$0xff] %v6525_v17  ;;  %11997 = vst [vmem:[#allocation70_spill] sm:$0xff] %v6527_v22  ;;  %v659_v60 = vrot.slane %v6511_v52, 6  ;;  %v662_v61 = vrot.slane %v6515_v15, 6  ;;  %v6579_v2 = vsel %vm633_vm3, %v652_v51, %v653_v31  ;;  %v665_v16 = vrot.slane %v6519_v10, 6 }
 0x12e   : > { %11998 = vst [vmem:[#allocation71_spill] sm:$0xff] %v6529_v27  ;;  %11999 = vst [vmem:[#allocation72_spill] sm:$0xff] %v6531_v33  ;;  %v668_v21 = vrot.slane %v6523_v12, 6  ;;  %v671_v14 = vrot.slane %v6527_v22, 6  ;;  %v661_v59 = vrot.slane %v6513_v13, 6  ;;  %v664_v46 = vrot.slane %v6517_v29, 6 }
 0x12f   : > { %12000 = vst [vmem:[#allocation73_spill] sm:$0xff] %v6533_v38  ;;  %12001 = vst [vmem:[#allocation74_spill] sm:$0xff] %v6535_v44  ;;  %v674_v42 = vrot.slane %v6531_v33, 6  ;;  %v677_v39 = vrot.slane %v6535_v44, 6  ;;  %v6589_v23 = vsel %vm633_vm3, %v655_v32, %v656_v20  ;;  %v667_v31 = vrot.slane %v6521_v11, 6 }
 0x130   : > { %12002 = vst [vmem:[#allocation75_spill] sm:$0xff] %v6540_v4  ;;  %12003 = vst [vmem:[#allocation76_spill] sm:$0xff] %v6542_v9  ;;  %v680_v6 = vrot.slane %v6542_v9, 6  ;;  %v6595_v62 = vsel %vm633_vm3, %v658_v55, %v659_v60  ;;  %v6598_v54 = vsel %vm633_vm3, %v661_v59, %v662_v61 }
 0x131   : > { %12004 = vst [vmem:[#allocation77_spill] sm:$0xff] %v6555_v56  ;;  %12005 = vst [vmem:[#allocation78_spill] sm:$0xff] %v6558_v45  ;;  %v6606_v20 = vsel %vm633_vm3, %v667_v31, %v668_v21  ;;  %v999_v56 = vrot.slane %v6540_v4, 1 }
 0x132   : > { %12006 = vst [vmem:[#allocation79_spill] sm:$0xff] %v6561_v7  ;;  %12007 = vst [vmem:[#allocation80_spill] sm:$0xff] %v6565_v3  ;;  %v6603_v3 = vsel %vm633_vm3, %v664_v46, %v665_v16  ;;  %v679_v7 = vrot.slane %v6540_v4, 6  ;;  %v6622_v16 = vsel %vm633_vm3, 0.0, %v637_v36  ;;  %v6643_v36 = vsel %vm633_vm3, 0.0, %v655_v32 }
 0x133   : > { %12008 = vst [vmem:[#allocation81_spill] sm:$0xff] %v6568_v25  ;;  %12009 = vst [vmem:[#allocation82_spill] sm:$0xff] %v6573_v49  ;;  %v673_v49 = vrot.slane %v6529_v27, 6  ;;  %v676_v25 = vrot.slane %v6533_v38, 6  ;;  %v774_v32 = vrot.slane %v6479_v8, 7 }
 0x134   : > { %12010 = vst [vmem:[#allocation83_spill] sm:$0xff] %v6579_v2  ;;  %12011 = vst [vmem:[#allocation84_spill] sm:$0xff] %v6589_v23  ;;  %v670_v2 = vrot.slane %v6525_v17, 6  ;;  %v6625_v21 = vsel %vm633_vm3, %v679_v7, %v680_v6  ;;  %v6646_v6 = vsel %vm633_vm3, 0.0, %v658_v55  ;;  %v777_v55 = vrot.slane %v6483_v24, 7 }
 0x135   : > { %12012 = vst [vmem:[#allocation85_spill] sm:$0xff] %v6595_v62  ;;  %12013 = vst [vmem:[#allocation86_spill] sm:$0xff] %v6598_v54  ;;  %v6613_v60 = vsel %vm633_vm3, %v673_v49, %v674_v42  ;;  %v6616_v61 = vsel %vm633_vm3, %v676_v25, %v677_v39  ;;  %v6619_v54 = vsel %vm633_vm3, 0.0, %v634_v26  ;;  %v6634_v42 = vsel %vm633_vm3, 0.0, %v646_v47 }
 0x136   : > { %12014 = vst [vmem:[#allocation87_spill] sm:$0xff] %v6603_v3  ;;  %12015 = vst [vmem:[#allocation88_spill] sm:$0xff] %v6606_v20  ;;  %v6609_v23 = vsel %vm633_vm3, %v670_v2, %v671_v14  ;;  %v6628_v14 = vsel %vm633_vm3, 0.0, %v640_v41  ;;  %v6637_v39 = vsel %vm633_vm3, 0.0, %v649_v57  ;;  %v6640_v26 = vsel %vm633_vm3, 0.0, %v652_v51 }
 0x137   : > { %12016 = vst [vmem:[#allocation89_spill] sm:$0xff] %v6609_v23  ;;  %12017 = vst [vmem:[#allocation90_spill] sm:$0xff] %v6613_v60  ;;  %v6631_v23 = vsel %vm633_vm3, 0.0, %v643_v63  ;;  %v6649_v41 = vsel %vm633_vm3, 0.0, %v661_v59  ;;  %v6652_v63 = vsel %vm633_vm3, 0.0, %v664_v46  ;;  %v6655_v47 = vsel %vm633_vm3, 0.0, %v667_v31 }
 0x138   : > { %12018 = vst [vmem:[#allocation91_spill] sm:$0xff] %v6616_v61  ;;  %12019 = vst [vmem:[#allocation92_spill] sm:$0xff] %v6619_v54  ;;  %v6658_v57 = vsel %vm633_vm3, 0.0, %v670_v2  ;;  %v6661_v51 = vsel %vm633_vm3, 0.0, %v673_v49  ;;  %v6667_v59 = vsel %vm633_vm3, 0.0, %v676_v25  ;;  %v6670_v46 = vsel %vm633_vm3, 0.0, %v679_v7 }
 0x139   : > { %12020 = vst [vmem:[#allocation93_spill] sm:$0xff] %v6622_v16  ;;  %12021 = vst [vmem:[#allocation94_spill] sm:$0xff] %v6625_v21  ;;  %v780_v21 = vrot.slane %v6487_v37, 7  ;;  %v783_v31 = vrot.slane %v6491_v50, 7  ;;  %v786_v2 = vrot.slane %v6495_v5, 7  ;;  %v773_v61 = vrot.slane %v6471_v0, 7 }
 0x13a   : > { %12022 = vst [vmem:[#allocation95_spill] sm:$0xff] %v6628_v14  ;;  %12023 = vst [vmem:[#allocation96_spill] sm:$0xff] %v6631_v23  ;;  %v776_v49 = vrot.slane %v6481_v18, 7  ;;  %v779_v60 = vrot.slane %v6485_v30, 7  ;;  %v785_v25 = vrot.slane %v6493_v28, 7  ;;  %v792_v7 = vrot.slane %v6503_v40, 7 }
 0x13b   : > { %12024 = vst [vmem:[#allocation97_spill] sm:$0xff] %v6634_v42  ;;  %12025 = vst [vmem:[#allocation98_spill] sm:$0xff] %v6637_v39  ;;  %v788_v3 = vrot.slane %v6497_v19, 7  ;;  %v794_v62 = vrot.slane %v6505_v58, 7  ;;  %v812_v23 = vrot.slane %v6529_v27, 7  ;;  %v815_v14 = vrot.slane %v6533_v38, 7 }
 0x13c   : > { %12026 = vst [vmem:[#allocation99_spill] sm:$0xff] %v6640_v26  ;;  %12027 = vst [vmem:[#allocation100_spill] sm:$0xff] %v6643_v36  ;;  %v6686_v20 = vsel %vm772_vm4, %v776_v49, %v777_v55  ;;  %v797_v55 = vrot.slane %v6509_v1, 7  ;;  %v801_v36 = vrot.slane %v6515_v15, 7  ;;  %v818_v16 = vrot.slane %v6540_v4, 7 }
 0x13d   : > { %12028 = vst [vmem:[#allocation101_spill] sm:$0xff] %v6646_v6  ;;  %12029 = vst [vmem:[#allocation102_spill] sm:$0xff] %v6649_v41  ;;  %v6696_v41 = vsel %vm772_vm4, %v785_v25, %v786_v2  ;;  %v795_v6 = vrot.slane %v6507_v48, 7  ;;  %v807_v2 = vrot.slane %v6523_v12, 7 }
 0x13e   : > { %12030 = vst [vmem:[#allocation103_spill] sm:$0xff] %v6652_v63  ;;  %12031 = vst [vmem:[#allocation104_spill] sm:$0xff] %v6655_v47  ;;  %v6689_v47 = vsel %vm772_vm4, %v779_v60, %v780_v21  ;;  %v798_v21 = vrot.slane %v6511_v52, 7 }
 0x13f   : > { %12032 = vst [vmem:[#allocation105_spill] sm:$0xff] %v6658_v57  ;;  %12033 = vst [vmem:[#allocation106_spill] sm:$0xff] %v6661_v51  ;;  %v789_v51 = vrot.slane %v6499_v34, 7  ;;  %v782_v57 = vrot.slane %v6489_v43, 7 }
 0x140   : > { %12034 = vst [vmem:[#allocation107_spill] sm:$0xff] %v6667_v59  ;;  %12035 = vst [vmem:[#allocation108_spill] sm:$0xff] %v6670_v46  ;;  %v791_v59 = vrot.slane %v6501_v35, 7  ;;  %v6683_v46 = vsel %vm772_vm4, %v773_v61, %v774_v32  ;;  %v6723_v39 = vsel %vm772_vm4, %v797_v55, %v798_v21 }
 0x141   : > { %12036 = vst [vmem:[#allocation109_spill] sm:$0xff] %v6683_v46  ;;  %12037 = vst [vmem:[#allocation110_spill] sm:$0xff] %v6686_v20  ;;  %v6693_v63 = vsel %vm772_vm4, %v782_v57, %v783_v31  ;;  %v6701_v32 = vsel %vm772_vm4, %v788_v3, %v789_v51  ;;  %v804_v31 = vrot.slane %v6519_v10, 7  ;;  %v803_v51 = vrot.slane %v6517_v29, 7 }
 0x142   : > { %12038 = vst [vmem:[#allocation111_spill] sm:$0xff] %v6689_v47  ;;  %12039 = vst [vmem:[#allocation112_spill] sm:$0xff] %v6693_v63  ;;  %v6707_v26 = vsel %vm772_vm4, %v791_v59, %v792_v7  ;;  %v800_v63 = vrot.slane %v6513_v13, 7  ;;  %v816_v47 = vrot.slane %v6535_v44, 7  ;;  %v6717_v20 = vsel %vm772_vm4, %v794_v62, %v795_v6 }
 0x143   : > { %12040 = vst [vmem:[#allocation113_spill] sm:$0xff] %v6696_v41  ;;  %12041 = vst [vmem:[#allocation114_spill] sm:$0xff] %v6701_v32  ;;  %v810_v41 = vrot.slane %v6527_v22, 7  ;;  %v813_v32 = vrot.slane %v6531_v33, 7  ;;  %v806_v7 = vrot.slane %v6521_v11, 7  ;;  %v819_v46 = vrot.slane %v6542_v9, 7 }
 0x144   : > { %12042 = vst [vmem:[#allocation115_spill] sm:$0xff] %v6707_v26  ;;  %12043 = vst [vmem:[#allocation116_spill] sm:$0xff] %v6717_v20  ;;  %v809_v26 = vrot.slane %v6525_v17, 7  ;;  %v6726_v42 = vsel %vm772_vm4, %v800_v63, %v801_v36  ;;  %v6731_v6 = vsel %vm772_vm4, %v803_v51, %v804_v31  ;;  %v6744_v36 = vsel %vm772_vm4, %v815_v14, %v816_v47 }
 0x145   : > { %12044 = vst [vmem:[#allocation117_spill] sm:$0xff] %v6723_v39  ;;  %12045 = vst [vmem:[#allocation118_spill] sm:$0xff] %v6726_v42  ;;  %v6734_v20 = vsel %vm772_vm4, %v806_v7, %v807_v2  ;;  %v6741_v21 = vsel %vm772_vm4, %v812_v23, %v813_v32  ;;  %v6747_v42 = vsel %vm772_vm4, 0.0, %v773_v61  ;;  %v6750_v31 = vsel %vm772_vm4, 0.0, %v776_v49 }
 0x146   : > { %12046 = vst [vmem:[#allocation119_spill] sm:$0xff] %v6731_v6  ;;  %12047 = vst [vmem:[#allocation120_spill] sm:$0xff] %v6734_v20  ;;  %v6737_v45 = vsel %vm772_vm4, %v809_v26, %v810_v41  ;;  %v6753_v2 = vsel %vm772_vm4, %v818_v16, %v819_v46  ;;  %v6756_v41 = vsel %vm772_vm4, 0.0, %v779_v60  ;;  %v6762_v32 = vsel %vm772_vm4, 0.0, %v785_v25 }
 0x147   : > { %12048 = vst [vmem:[#allocation121_spill] sm:$0xff] %v6737_v45  ;;  %12049 = vst [vmem:[#allocation122_spill] sm:$0xff] %v6741_v21  ;;  %v6759_v45 = vsel %vm772_vm4, 0.0, %v782_v57  ;;  %v6765_v47 = vsel %vm772_vm4, 0.0, %v788_v3  ;;  %v6768_v61 = vsel %vm772_vm4, 0.0, %v791_v59  ;;  %v954_v49 = vrot.slane %v6471_v0, 1 }
 0x148   : > { %12050 = vst [vmem:[#allocation123_spill] sm:$0xff] %v6744_v36  ;;  %12051 = vst [vmem:[#allocation124_spill] sm:$0xff] %v6747_v42  ;;  %v955_v46 = vrot.slane %v6479_v8, 1  ;;  %v958_v60 = vrot.slane %v6483_v24, 1  ;;  %v960_v57 = vrot.slane %v6485_v30, 1  ;;  %v961_v36 = vrot.slane %v6487_v37, 1 }
 0x149   : > { %12052 = vst [vmem:[#allocation125_spill] sm:$0xff] %v6750_v31  ;;  %12053 = vst [vmem:[#allocation126_spill] sm:$0xff] %v6753_v2  ;;  %v957_v2 = vrot.slane %v6481_v18, 1  ;;  %v6777_v25 = vsel %vm772_vm4, 0.0, %v794_v62  ;;  %v6780_v3 = vsel %vm772_vm4, 0.0, %v797_v55  ;;  %v6783_v59 = vsel %vm772_vm4, 0.0, %v800_v63 }
 0x14a   : > { %12054 = vst [vmem:[#allocation127_spill] sm:$0xff] %v6756_v41  ;;  %12055 = vst [vmem:[#allocation128_spill] sm:$0xff] %v6759_v45  ;;  %v6786_v21 = vsel %vm772_vm4, 0.0, %v803_v51  ;;  %v6789_v20 = vsel %vm772_vm4, 0.0, %v806_v7  ;;  %v6792_v6 = vsel %vm772_vm4, 0.0, %v809_v26  ;;  %v6795_v39 = vsel %vm772_vm4, 0.0, %v812_v23 }
 0x14b   : > { %12056 = vst [vmem:[#allocation129_spill] sm:$0xff] %v6762_v32  ;;  %12057 = vst [vmem:[#allocation130_spill] sm:$0xff] %v6765_v47  ;;  %v6798_v62 = vsel %vm772_vm4, 0.0, %v815_v14  ;;  %v6801_v55 = vsel %vm772_vm4, 0.0, %v818_v16  ;;  %v6804_v63 = vsel %vm953_vm5, %v954_v49, %v955_v46  ;;  %v963_v51 = vrot.slane %v6489_v43, 1 }
 0x14c   : > { %12058 = vst [vmem:[#allocation131_spill] sm:$0xff] %v6768_v61  ;;  %12059 = vst [vmem:[#allocation132_spill] sm:$0xff] %v6777_v25  ;;  %v964_v7 = vrot.slane %v6491_v50, 1  ;;  %v6812_v26 = vsel %vm953_vm5, %v960_v57, %v961_v36  ;;  %v966_v23 = vrot.slane %v6493_v28, 1  ;;  %v967_v14 = vrot.slane %v6495_v5, 1 }
 0x14d   : > { %12060 = vst [vmem:[#allocation133_spill] sm:$0xff] %v6780_v3  ;;  %12061 = vst [vmem:[#allocation134_spill] sm:$0xff] %v6783_v59  ;;  %v969_v16 = vrot.slane %v6497_v19, 1  ;;  %v972_v49 = vrot.slane %v6501_v35, 1  ;;  %v979_v57 = vrot.slane %v6511_v52, 1  ;;  %v982_v59 = vrot.slane %v6515_v15, 1 }
 0x14e   : > { %12062 = vst [vmem:[#allocation135_spill] sm:$0xff] %v6786_v21  ;;  %12063 = vst [vmem:[#allocation136_spill] sm:$0xff] %v6789_v20  ;;  %v6809_v20 = vsel %vm953_vm5, %v957_v2, %v958_v60  ;;  %v976_v2 = vrot.slane %v6507_v48, 1  ;;  %v981_v21 = vrot.slane %v6513_v13, 1  ;;  %v984_v3 = vrot.slane %v6517_v29, 1 }
 0x14f   : > { %12064 = vst [vmem:[#allocation137_spill] sm:$0xff] %v6792_v6  ;;  %12065 = vst [vmem:[#allocation138_spill] sm:$0xff] %v6795_v39  ;;  %v975_v39 = vrot.slane %v6505_v58, 1  ;;  %v978_v6 = vrot.slane %v6509_v1, 1  ;;  %v985_v25 = vrot.slane %v6519_v10, 1  ;;  %v987_v61 = vrot.slane %v6521_v11, 1 }
 0x150   : > { %12066 = vst [vmem:[#allocation139_spill] sm:$0xff] %v6798_v62  ;;  %12067 = vst [vmem:[#allocation140_spill] sm:$0xff] %v6801_v55  ;;  %v970_v55 = vrot.slane %v6499_v34, 1  ;;  %v973_v62 = vrot.slane %v6503_v40, 1  ;;  %v993_v47 = vrot.slane %v6529_v27, 1  ;;  %v996_v45 = vrot.slane %v6533_v38, 1 }
 0x151   : > { %12068 = vst [vmem:[#allocation141_spill] sm:$0xff] %v6804_v63  ;;  %12069 = vst [vmem:[#allocation142_spill] sm:$0xff] %v6809_v20  ;;  %v990_v20 = vrot.slane %v6525_v17, 1  ;;  %v991_v63 = vrot.slane %v6527_v22, 1  ;;  %v6837_v31 = vsel %vm953_vm5, %v963_v51, %v964_v7  ;;  %v6840_v42 = vsel %vm953_vm5, %v966_v23, %v967_v14  ;;  %v12129_v11 = vld [vmem:[#allocation80_spill] sm:$0xff]  ;;  %v12130_v10 = vld [vmem:[#allocation97_spill] sm:$0xff] }
 0x152   : > { %12070 = vst [vmem:[#allocation143_spill] sm:$0xff] %v6812_v26  ;;  %v988_v26 = vrot.slane %v6523_v12, 1  ;;  %12071 = vst [vmem:[#allocation144_spill] sm:$0xff] %v6837_v31  ;;  %v6845_v54 = vsel %vm953_vm5, %v969_v16, %v970_v55  ;;  %v6848_v27 = vsel %vm953_vm5, %v972_v49, %v973_v62  ;;  %v6851_v32 = vsel %vm953_vm5, %v975_v39, %v976_v2 }
 0x153   : > { %12072 = vst [vmem:[#allocation145_spill] sm:$0xff] %v6840_v42  ;;  %12073 = vst [vmem:[#allocation146_spill] sm:$0xff] %v6845_v54  ;;  %v6854_v41 = vsel %vm953_vm5, %v978_v6, %v979_v57  ;;  %v6857_v51 = vsel %vm953_vm5, %v981_v21, %v982_v59  ;;  %v6860_v23 = vsel %vm953_vm5, %v984_v3, %v985_v25  ;;  %v12081_v49 = vrot.slane %v6531_v33, 1 }
 0x154   : > { %12074 = vst [vmem:[#allocation147_spill] sm:$0xff] %v6848_v27  ;;  %12075 = vst [vmem:[#allocation148_spill] sm:$0xff] %v6851_v32  ;;  %v6863_v53 = vsel %vm953_vm5, %v987_v61, %v988_v26  ;;  %v6866_v16 = vsel %vm953_vm5, %v990_v20, %v991_v63  ;;  %v12083_v6 = vrot.slane %v6535_v44, 1  ;;  %v6879_v3 = vsel %vm953_vm5, %v955_v46, 0.0  ;;  %v12131_v44 = vld [vmem:[#allocation81_spill] sm:$0xff] }
 0x155   : > { %12076 = vst [vmem:[#allocation149_spill] sm:$0xff] %v6854_v41  ;;  %12077 = vst [vmem:[#allocation150_spill] sm:$0xff] %v6857_v51  ;;  %v6871_v39 = vsel %vm953_vm5, %v993_v47, %v12081_v49  ;;  %v6882_v61 = vsel %vm953_vm5, %v958_v60, 0.0  ;;  %v12087_v20 = vrot.slane %v6542_v9, 1  ;;  %v6893_v47 = vsel %vm953_vm5, %v964_v7, 0.0 }
 0x156   : > { %12078 = vst [vmem:[#allocation151_spill] sm:$0xff] %v6860_v23  ;;  %12079 = vst [vmem:[#allocation152_spill] sm:$0xff] %v6863_v53  ;;  %v6876_v21 = vsel %vm953_vm5, %v996_v45, %v12083_v6  ;;  %v6890_v53 = vsel %vm953_vm5, %v961_v36, 0.0  ;;  %v6896_v45 = vsel %vm953_vm5, %v967_v14, 0.0  ;;  %v6899_v46 = vsel %vm953_vm5, %v970_v55, 0.0 }
 0x157   : > { %12080 = vst [vmem:[#allocation153_spill] sm:$0xff] %v6866_v16  ;;  %12082 = vst [vmem:[#allocation154_spill] sm:$0xff] %v6871_v39  ;;  %v6887_v16 = vsel %vm953_vm5, %v999_v56, %v12087_v20  ;;  %v6902_v60 = vsel %vm953_vm5, %v973_v62, 0.0  ;;  %v6905_v49 = vsel %vm953_vm5, %v976_v2, 0.0  ;;  %v6908_v56 = vsel %vm953_vm5, %v979_v57, 0.0 }
 0x158   : > { %12084 = vst [vmem:[#allocation155_spill] sm:$0xff] %v6876_v21  ;;  %12085 = vst [vmem:[#allocation156_spill] sm:$0xff] %v6879_v3  ;;  %v6911_v36 = vsel %vm953_vm5, %v982_v59, 0.0  ;;  %v6914_v7 = vsel %vm953_vm5, %v985_v25, 0.0  ;;  %v1093_v14 = vrot.slane %v6471_v0, 2  ;;  %v1094_v55 = vrot.slane %v6479_v8, 2 }
 0x159   : > { %12086 = vst [vmem:[#allocation157_spill] sm:$0xff] %v6882_v61  ;;  %12088 = vst [vmem:[#allocation158_spill] sm:$0xff] %v6887_v16  ;;  %v1096_v6 = vrot.slane %v6481_v18, 2  ;;  %v1097_v62 = vrot.slane %v6483_v24, 2  ;;  %v1099_v2 = vrot.slane %v6485_v30, 2  ;;  %v1100_v20 = vrot.slane %v6487_v37, 2 }
 0x15a   : > { %12089 = vst [vmem:[#allocation159_spill] sm:$0xff] %v6890_v53  ;;  %12090 = vst [vmem:[#allocation160_spill] sm:$0xff] %v6893_v47  ;;  %v1102_v57 = vrot.slane %v6489_v43, 2  ;;  %v1103_v59 = vrot.slane %v6491_v50, 2  ;;  %v1105_v16 = vrot.slane %v6493_v28, 2  ;;  %v1106_v25 = vrot.slane %v6495_v5, 2 }
 0x15b   : > { %12091 = vst [vmem:[#allocation161_spill] sm:$0xff] %v6896_v45  ;;  %12092 = vst [vmem:[#allocation162_spill] sm:$0xff] %v6899_v46  ;;  %v1108_v21 = vrot.slane %v6497_v19, 2  ;;  %v1109_v39 = vrot.slane %v6499_v34, 2  ;;  %v1112_v23 = vrot.slane %v6503_v40, 2  ;;  %v1115_v51 = vrot.slane %v6507_v48, 2 }
 0x15c   : > { %12093 = vst [vmem:[#allocation163_spill] sm:$0xff] %v6902_v60  ;;  %12094 = vst [vmem:[#allocation164_spill] sm:$0xff] %v6905_v49  ;;  %v1118_v41 = vrot.slane %v6511_v52, 2  ;;  %v6935_v49 = vsel %vm953_vm5, %v988_v26, 0.0  ;;  %v6938_v32 = vsel %vm953_vm5, %v991_v63, 0.0  ;;  %v1120_v60 = vrot.slane %v6513_v13, 2 }
 0x15d   : > { %12095 = vst [vmem:[#allocation165_spill] sm:$0xff] %v6908_v56  ;;  %12096 = vst [vmem:[#allocation166_spill] sm:$0xff] %v6911_v36  ;;  %v1114_v36 = vrot.slane %v6505_v58, 2  ;;  %v1117_v56 = vrot.slane %v6509_v1, 2  ;;  %v1121_v27 = vrot.slane %v6515_v15, 2  ;;  %v6943_v40 = vsel %vm1092_vm6, %v1093_v14, %v1094_v55 }
 0x15e   : > { %12097 = vst [vmem:[#allocation167_spill] sm:$0xff] %v6914_v7  ;;  %v1111_v7 = vrot.slane %v6501_v35, 2  ;;  %12098 = vst [vmem:[#allocation168_spill] sm:$0xff] %v6935_v49  ;;  %v6946_v58 = vsel %vm1092_vm6, %v1096_v6, %v1097_v62  ;;  %v6949_v1 = vsel %vm1092_vm6, %v1099_v2, %v1100_v20  ;;  %v6952_v52 = vsel %vm1092_vm6, %v1102_v57, %v1103_v59  ;;  %v12122_v49 = vld [vmem:[#allocation27_spill] sm:$0xff]  ;;  %v12137_v35 = vld [vmem:[#allocation125_spill] sm:$0xff] }
 0x15f   : > { %12099 = vst [vmem:[#allocation169_spill] sm:$0xff] %v6938_v32  ;;  %12100 = vst [vmem:[#allocation170_spill] sm:$0xff] %v6943_v40  ;;  %v6955_v26 = vsel %vm1092_vm6, %v1105_v16, %v1106_v25  ;;  %v6958_v63 = vsel %vm1092_vm6, %v1108_v21, %v1109_v39  ;;  %v6965_v6 = vsel %vm1092_vm6, %v1114_v36, %v1115_v51  ;;  %v6988_v21 = vsel %vm1092_vm6, %v1097_v62, 0.0 }
 0x160   : > { %12101 = vst [vmem:[#allocation171_spill] sm:$0xff] %v6946_v58  ;;  %12102 = vst [vmem:[#allocation172_spill] sm:$0xff] %v6949_v1  ;;  %v6961_v32 = vsel %vm1092_vm6, %v1111_v7, %v1112_v23  ;;  %v6968_v2 = vsel %vm1092_vm6, %v1117_v56, %v1118_v41  ;;  %v6973_v16 = vsel %vm1092_vm6, %v1120_v60, %v1121_v27  ;;  %v6985_v60 = vsel %vm1092_vm6, %v1094_v55, 0.0 }
 0x161   : > { %12103 = vst [vmem:[#allocation173_spill] sm:$0xff] %v6952_v52  ;;  %12104 = vst [vmem:[#allocation174_spill] sm:$0xff] %v6955_v26  ;;  %v6991_v7 = vsel %vm1092_vm6, %v1100_v20, 0.0  ;;  %v6994_v29 = vsel %vm1092_vm6, %v1103_v59, 0.0  ;;  %v6997_v56 = vsel %vm1092_vm6, %v1106_v25, 0.0  ;;  %v7000_v13 = vsel %vm1092_vm6, %v1109_v39, 0.0 }
 0x162   : > { %12105 = vst [vmem:[#allocation175_spill] sm:$0xff] %v6958_v63  ;;  %12106 = vst [vmem:[#allocation176_spill] sm:$0xff] %v6961_v32  ;;  %v7003_v57 = vsel %vm1092_vm6, %v1112_v23, 0.0  ;;  %v7006_v55 = vsel %vm1092_vm6, %v1115_v51, 0.0  ;;  %v7009_v62 = vsel %vm1092_vm6, %v1118_v41, 0.0  ;;  %v7012_v20 = vsel %vm1092_vm6, %v1121_v27, 0.0 }
 0x163   : > { %12107 = vst [vmem:[#allocation177_spill] sm:$0xff] %v6965_v6  ;;  %12108 = vst [vmem:[#allocation178_spill] sm:$0xff] %v6968_v2  ;;  %v12121_v59 = vld [vmem:[#allocation92_spill] sm:$0xff]  ;;  %v12123_v25 = vld [vmem:[#allocation77_spill] sm:$0xff]  ;;  %v1272_v12 = vmul.f32 %v12122_v49, %v12129_v11  ;;  %v1273_v9 = vmul.f32 %v12122_v49, %v12130_v10  ;;  %v1274_v33 = vmul.f32 %v12122_v49, %v12131_v44 }
 0x164   : > { %12109 = vst [vmem:[#allocation179_spill] sm:$0xff] %v6973_v16  ;;  %12111 = vst [vmem:[#allocation180_spill] sm:$0xff] %v6985_v60  ;;  %v1265_v36 = vmul.f32 %v12122_v49, %v12121_v59  ;;  %v1266_v15 = vmul.f32 %v12122_v49, %v12123_v25  ;;  %v12124_v39 = vld [vmem:[#allocation93_spill] sm:$0xff]  ;;  %v12125_v23 = vld [vmem:[#allocation78_spill] sm:$0xff] }
 0x165   : > { %12112 = vst [vmem:[#allocation181_spill] sm:$0xff] %v6988_v21  ;;  %12113 = vst [vmem:[#allocation182_spill] sm:$0xff] %v6991_v7  ;;  %v1267_v4 = vmul.f32 %v12122_v49, %v12124_v39  ;;  %v1268_v38 = vmul.f32 %v12122_v49, %v12125_v23  ;;  %v12126_v51 = vld [vmem:[#allocation95_spill] sm:$0xff]  ;;  %v12128_v27 = vld [vmem:[#allocation96_spill] sm:$0xff] }
 0x166   : > { %12114 = vst [vmem:[#allocation183_spill] sm:$0xff] %v6994_v29  ;;  %12115 = vst [vmem:[#allocation184_spill] sm:$0xff] %v6997_v56  ;;  %v1269_v14 = vmul.f32 %v12122_v49, %v12126_v51  ;;  %v12127_v41 = vld [vmem:[#allocation79_spill] sm:$0xff]  ;;  %v1271_v22 = vmul.f32 %v12122_v49, %v12128_v27  ;;  %v12135_v6 = vld [vmem:[#allocation28_spill] sm:$0xff] }
 0x167   : > { %12116 = vst [vmem:[#allocation185_spill] sm:$0xff] %v7000_v13  ;;  %12117 = vst [vmem:[#allocation186_spill] sm:$0xff] %v7003_v57  ;;  %v1270_v17 = vmul.f32 %v12122_v49, %v12127_v41  ;;  %v12136_v57 = vld [vmem:[#allocation109_spill] sm:$0xff]  ;;  %v1319_v11 = vmul.f32 %v12135_v6, %v12137_v35  ;;  %v12138_v27 = vld [vmem:[#allocation110_spill] sm:$0xff] }
 0x168   : > { %12118 = vst [vmem:[#allocation187_spill] sm:$0xff] %v7006_v55  ;;  %12119 = vst [vmem:[#allocation188_spill] sm:$0xff] %v7009_v62  ;;  %v12133_v62 = vld [vmem:[#allocation82_spill] sm:$0xff]  ;;  %v12134_v55 = vld [vmem:[#allocation124_spill] sm:$0xff]  ;;  %v1318_v32 = vmul.f32 %v12135_v6, %v12136_v57  ;;  %v1320_v10 = vmul.f32 %v12135_v6, %v12138_v27 }
 0x169   : > { %12120 = vst [vmem:[#allocation189_spill] sm:$0xff] %v7012_v20  ;;  %v12132_v20 = vld [vmem:[#allocation98_spill] sm:$0xff]  ;;  %v1276_v2 = vmul.f32 %v12122_v49, %v12133_v62  ;;  %v1317_v48 = vmul.f32 %v12135_v6, %v12134_v55  ;;  %v12139_v41 = vld [vmem:[#allocation127_spill] sm:$0xff]  ;;  %v12141_v23 = vld [vmem:[#allocation128_spill] sm:$0xff]  ;;  %v1335_v56 = vadd.f32 %v1319_v11, %v1267_v4 }
 0x16a   : > { %v1275_v16 = vmul.f32 %v12122_v49, %v12132_v20  ;;  %v1321_v44 = vmul.f32 %v12135_v6, %v12139_v41  ;;  %v12140_v51 = vld [vmem:[#allocation111_spill] sm:$0xff]  ;;  %v1323_v49 = vmul.f32 %v12135_v6, %v12141_v23  ;;  %v12142_v62 = vld [vmem:[#allocation112_spill] sm:$0xff]  ;;  %v12143_v39 = vld [vmem:[#allocation129_spill] sm:$0xff]  ;;  %v1336_v26 = vadd.f32 %v1320_v10, %v1268_v38 }
 0x16b   : > { %v1322_v20 = vmul.f32 %v12135_v6, %v12140_v51  ;;  %v1324_v55 = vmul.f32 %v12135_v6, %v12142_v62  ;;  %v1325_v57 = vmul.f32 %v12135_v6, %v12143_v39  ;;  %v12144_v25 = vld [vmem:[#allocation113_spill] sm:$0xff]  ;;  %v12145_v59 = vld [vmem:[#allocation130_spill] sm:$0xff]  ;;  %v1333_v63 = vadd.f32 %v1317_v48, %v1265_v36 }
 0x16c   : > { %v1326_v35 = vmul.f32 %v12135_v6, %v12144_v25  ;;  %v1327_v27 = vmul.f32 %v12135_v6, %v12145_v59  ;;  %v12146_v13 = vld [vmem:[#allocation114_spill] sm:$0xff]  ;;  %v1334_v51 = vadd.f32 %v1318_v32, %v1266_v15  ;;  %v1337_v23 = vadd.f32 %v1321_v44, %v1269_v14 }
 0x16d   : > { %v1328_v41 = vmul.f32 %v12135_v6, %v12146_v13  ;;  %v1338_v29 = vadd.f32 %v1322_v20, %v1270_v17  ;;  %v1339_v52 = vadd.f32 %v1323_v49, %v1271_v22  ;;  %v1340_v62 = vadd.f32 %v1324_v55, %v1272_v12  ;;  %v12147_v25 = vld [vmem:[#allocation30_spill] sm:$0xff] }
 0x16e   : > { %v1341_v7 = vadd.f32 %v1325_v57, %v1273_v9  ;;  %v1342_v1 = vadd.f32 %v1326_v35, %v1274_v33  ;;  %v1343_v39 = vadd.f32 %v1327_v27, %v1275_v16  ;;  %v1369_v58 = vmul.f32 %v12147_v25, %v6471_v0  ;;  %v12149_v27 = vld [vmem:[#allocation32_spill] sm:$0xff] }
 0x16f   : > { %v1344_v21 = vadd.f32 %v1328_v41, %v1276_v2  ;;  %v1370_v59 = vmul.f32 %v12147_v25, %v6479_v8  ;;  %v1371_v48 = vmul.f32 %v12147_v25, %v6481_v18  ;;  %v1372_v15 = vmul.f32 %v12147_v25, %v6483_v24  ;;  %v12148_v41 = vld [vmem:[#allocation141_spill] sm:$0xff] }
 0x170   : > { %v1373_v10 = vmul.f32 %v12147_v25, %v6485_v30  ;;  %v1374_v35 = vmul.f32 %v12147_v25, %v6487_v37  ;;  %v1375_v11 = vmul.f32 %v12147_v25, %v6489_v43  ;;  %v1376_v12 = vmul.f32 %v12147_v25, %v6491_v50  ;;  %v12193_v43 = vld [vmem:[#allocation39_spill] sm:$0xff] }
 0x171   : > { %v1377_v17 = vmul.f32 %v12147_v25, %v6493_v28  ;;  %v1378_v22 = vmul.f32 %v12147_v25, %v6495_v5  ;;  %v1379_v33 = vmul.f32 %v12147_v25, %v6497_v19  ;;  %v1380_v38 = vmul.f32 %v12147_v25, %v6499_v34  ;;  %v12150_v5 = vld [vmem:[#allocation142_spill] sm:$0xff] }
 0x172   : > { %v1385_v44 = vadd.f32 %v1369_v58, %v1333_v63  ;;  %v1386_v4 = vadd.f32 %v1370_v59, %v1334_v51  ;;  %v1387_v9 = vadd.f32 %v1371_v48, %v1335_v56  ;;  %v1388_v32 = vadd.f32 %v1372_v15, %v1336_v26  ;;  %v12151_v63 = vld [vmem:[#allocation143_spill] sm:$0xff] }
 0x173   : > { %v1389_v49 = vadd.f32 %v1373_v10, %v1337_v23  ;;  %v1390_v14 = vadd.f32 %v1374_v35, %v1338_v29  ;;  %v1391_v2 = vadd.f32 %v1375_v11, %v1339_v52  ;;  %v1392_v57 = vadd.f32 %v1376_v12, %v1340_v62 }
 0x174   : > { %v1393_v16 = vadd.f32 %v1377_v17, %v1341_v7  ;;  %v1394_v36 = vadd.f32 %v1378_v22, %v1342_v1  ;;  %v1395_v55 = vadd.f32 %v1379_v33, %v1343_v39  ;;  %v1396_v20 = vadd.f32 %v1380_v38, %v1344_v21  ;;  %v12152_v38 = vld [vmem:[#allocation34_spill] sm:$0xff] }
 0x175   : > { %v1421_v6 = vmul.f32 %v12149_v27, %v12148_v41  ;;  %v1422_v19 = vmul.f32 %v12149_v27, %v6879_v3  ;;  %v1423_v58 = vmul.f32 %v12149_v27, %v12150_v5  ;;  %v1424_v26 = vmul.f32 %v12149_v27, %v6882_v61 }
 0x176   : > { %v1425_v52 = vmul.f32 %v12149_v27, %v12151_v63  ;;  %v1426_v1 = vmul.f32 %v12149_v27, %v6890_v53  ;;  %v1427_v29 = vmul.f32 %v12149_v27, %v6837_v31  ;;  %v1428_v21 = vmul.f32 %v12149_v27, %v6893_v47 }
 0x177   : > { %v1429_v7 = vmul.f32 %v12149_v27, %v6840_v42  ;;  %v1430_v56 = vmul.f32 %v12149_v27, %v6896_v45  ;;  %v1431_v62 = vmul.f32 %v12149_v27, %v6845_v54  ;;  %v1432_v59 = vmul.f32 %v12149_v27, %v6899_v46  ;;  %v12153_v45 = vld [vmem:[#allocation171_spill] sm:$0xff]  ;;  %v12166_v46 = vld [vmem:[#allocation93_spill] sm:$0xff] }
 0x178   : > { %v1437_v39 = vadd.f32 %v1421_v6, %v1385_v44  ;;  %v1438_v23 = vadd.f32 %v1422_v19, %v1386_v4  ;;  %v1439_v51 = vadd.f32 %v1423_v58, %v1387_v9  ;;  %v1440_v48 = vadd.f32 %v1424_v26, %v1388_v32  ;;  %v12154_v19 = vld [vmem:[#allocation181_spill] sm:$0xff]  ;;  %v12155_v4 = vld [vmem:[#allocation172_spill] sm:$0xff]  ;;  %v12156_v32 = vld [vmem:[#allocation182_spill] sm:$0xff] }
 0x179   : > { %v1441_v15 = vadd.f32 %v1425_v52, %v1389_v49  ;;  %v1442_v10 = vadd.f32 %v1426_v1, %v1390_v14  ;;  %v1443_v35 = vadd.f32 %v1427_v29, %v1391_v2  ;;  %v1444_v11 = vadd.f32 %v1428_v21, %v1392_v57  ;;  %v12157_v14 = vld [vmem:[#allocation173_spill] sm:$0xff]  ;;  %v12158_v57 = vld [vmem:[#allocation183_spill] sm:$0xff] }
 0x17a   : > { %v1445_v12 = vadd.f32 %v1429_v7, %v1393_v16  ;;  %v1446_v17 = vadd.f32 %v1430_v56, %v1394_v36  ;;  %v1447_v22 = vadd.f32 %v1431_v62, %v1395_v55  ;;  %v1448_v33 = vadd.f32 %v1432_v59, %v1396_v20  ;;  %v12159_v36 = vld [vmem:[#allocation174_spill] sm:$0xff]  ;;  %v12160_v20 = vld [vmem:[#allocation184_spill] sm:$0xff]  ;;  %v12161_v26 = vld [vmem:[#allocation175_spill] sm:$0xff] }
 0x17b   : > { %v1473_v25 = vmul.f32 %v12152_v38, %v6943_v40  ;;  %v1474_v54 = vmul.f32 %v12152_v38, %v6985_v60  ;;  %v1475_v6 = vmul.f32 %v12152_v38, %v12153_v45  ;;  %v1476_v44 = vmul.f32 %v12152_v38, %v12154_v19  ;;  %v12162_v1 = vld [vmem:[#allocation185_spill] sm:$0xff]  ;;  %v12163_v45 = vld [vmem:[#allocation92_spill] sm:$0xff] }
 0x17c   : > { %v1477_v9 = vmul.f32 %v12152_v38, %v12155_v4  ;;  %v1478_v49 = vmul.f32 %v12152_v38, %v12156_v32  ;;  %v1479_v2 = vmul.f32 %v12152_v38, %v12157_v14  ;;  %v1480_v16 = vmul.f32 %v12152_v38, %v12158_v57  ;;  %v12165_v40 = vld [vmem:[#allocation77_spill] sm:$0xff] }
 0x17d   : > { %v1481_v55 = vmul.f32 %v12152_v38, %v12159_v36  ;;  %v1482_v58 = vmul.f32 %v12152_v38, %v12160_v20  ;;  %v1483_v52 = vmul.f32 %v12152_v38, %v12161_v26  ;;  %v1484_v29 = vmul.f32 %v12152_v38, %v12162_v1  ;;  %v12164_v20 = vld [vmem:[#allocation35_spill] sm:$0xff]  ;;  %v12180_v42 = vld [vmem:[#allocation37_spill] sm:$0xff] }
 0x17e   : > { %v1489_v21 = vadd.f32 %v1473_v25, %v1437_v39  ;;  %v1490_v7 = vadd.f32 %v1474_v54, %v1438_v23  ;;  %v1491_v56 = vadd.f32 %v1475_v6, %v1439_v51  ;;  %v1492_v62 = vadd.f32 %v1476_v44, %v1440_v48  ;;  %v12167_v54 = vld [vmem:[#allocation78_spill] sm:$0xff]  ;;  %v12168_v23 = vld [vmem:[#allocation95_spill] sm:$0xff] }
 0x17f   : > { %v1493_v59 = vadd.f32 %v1477_v9, %v1441_v15  ;;  %v1494_v27 = vadd.f32 %v1478_v49, %v1442_v10  ;;  %v1495_v14 = vadd.f32 %v1479_v2, %v1443_v35  ;;  %v1496_v57 = vadd.f32 %v1480_v16, %v1444_v11  ;;  %v12169_v48 = vld [vmem:[#allocation79_spill] sm:$0xff]  ;;  %v12170_v10 = vld [vmem:[#allocation96_spill] sm:$0xff]  ;;  %v12174_v44 = vld [vmem:[#allocation98_spill] sm:$0xff] }
 0x180   : > { %v1497_v32 = vadd.f32 %v1481_v55, %v1445_v12  ;;  %v1498_v4 = vadd.f32 %v1482_v58, %v1446_v17  ;;  %v1499_v36 = vadd.f32 %v1483_v52, %v1447_v22  ;;  %v1500_v19 = vadd.f32 %v1484_v29, %v1448_v33  ;;  %v12171_v11 = vld [vmem:[#allocation80_spill] sm:$0xff]  ;;  %v12172_v17 = vld [vmem:[#allocation97_spill] sm:$0xff]  ;;  %v12175_v49 = vld [vmem:[#allocation82_spill] sm:$0xff] }
 0x181   : > { %v1524_v60 = vmul.f32 %v12164_v20, %v12163_v45  ;;  %v1525_v26 = vmul.f32 %v12164_v20, %v12165_v40  ;;  %v1526_v25 = vmul.f32 %v12164_v20, %v12166_v46  ;;  %v1527_v39 = vmul.f32 %v12164_v20, %v12167_v54  ;;  %v12173_v33 = vld [vmem:[#allocation81_spill] sm:$0xff]  ;;  %v12176_v16 = vld [vmem:[#allocation99_spill] sm:$0xff]  ;;  %v12178_v29 = vld [vmem:[#allocation36_spill] sm:$0xff] }
 0x182   : > { %v1528_v51 = vmul.f32 %v12164_v20, %v12168_v23  ;;  %v1529_v15 = vmul.f32 %v12164_v20, %v12169_v48  ;;  %v1530_v35 = vmul.f32 %v12164_v20, %v12170_v10  ;;  %v1531_v12 = vmul.f32 %v12164_v20, %v12171_v11  ;;  %v12177_v58 = vld [vmem:[#allocation83_spill] sm:$0xff] }
 0x183   : > { %v1532_v22 = vmul.f32 %v12164_v20, %v12172_v17  ;;  %v1533_v6 = vmul.f32 %v12164_v20, %v12173_v33  ;;  %v1534_v9 = vmul.f32 %v12164_v20, %v12174_v44  ;;  %v1535_v2 = vmul.f32 %v12164_v20, %v12175_v49 }
 0x184   : > { %v1536_v55 = vmul.f32 %v12164_v20, %v12176_v16  ;;  %v1537_v52 = vmul.f32 %v12164_v20, %v12177_v58  ;;  %v1540_v38 = vadd.f32 %v1524_v60, %v12178_v29  ;;  %v1541_v11 = vadd.f32 %v1525_v26, %v12178_v29  ;;  %v12179_v16 = vld [vmem:[#allocation124_spill] sm:$0xff]  ;;  %v12181_v20 = vld [vmem:[#allocation109_spill] sm:$0xff] }
 0x185   : > { %v1542_v17 = vadd.f32 %v1526_v25, %v1489_v21  ;;  %v1543_v10 = vadd.f32 %v1527_v39, %v1490_v7  ;;  %v1544_v48 = vadd.f32 %v1528_v51, %v1491_v56  ;;  %v1545_v33 = vadd.f32 %v1529_v15, %v1492_v62  ;;  %v12182_v58 = vld [vmem:[#allocation125_spill] sm:$0xff]  ;;  %v12183_v21 = vld [vmem:[#allocation110_spill] sm:$0xff]  ;;  %v12184_v56 = vld [vmem:[#allocation127_spill] sm:$0xff] }
 0x186   : > { %v1546_v23 = vadd.f32 %v1530_v35, %v1493_v59  ;;  %v1547_v54 = vadd.f32 %v1531_v12, %v1494_v27  ;;  %v1548_v44 = vadd.f32 %v1532_v22, %v1495_v14  ;;  %v1549_v46 = vadd.f32 %v1533_v6, %v1496_v57  ;;  %v12185_v14 = vld [vmem:[#allocation111_spill] sm:$0xff]  ;;  %v12187_v57 = vld [vmem:[#allocation112_spill] sm:$0xff]  ;;  %v12188_v62 = vld [vmem:[#allocation129_spill] sm:$0xff] }
 0x187   : > { %v1550_v40 = vadd.f32 %v1534_v9, %v1497_v32  ;;  %v1551_v49 = vadd.f32 %v1535_v2, %v1498_v4  ;;  %v1552_v45 = vadd.f32 %v1536_v55, %v1499_v36  ;;  %v1553_v1 = vadd.f32 %v1537_v52, %v1500_v19  ;;  %v12186_v32 = vld [vmem:[#allocation128_spill] sm:$0xff]  ;;  %v12189_v25 = vld [vmem:[#allocation113_spill] sm:$0xff]  ;;  %v12190_v51 = vld [vmem:[#allocation130_spill] sm:$0xff] }
 0x188   : > { %v1577_v47 = vmul.f32 %v12180_v42, %v12179_v16  ;;  %v1578_v60 = vmul.f32 %v12180_v42, %v12181_v20  ;;  %v1579_v26 = vmul.f32 %v12180_v42, %v12182_v58  ;;  %v1580_v7 = vmul.f32 %v12180_v42, %v12183_v21  ;;  %v12191_v12 = vld [vmem:[#allocation131_spill] sm:$0xff] }
 0x189   : > { %v1581_v27 = vmul.f32 %v12180_v42, %v12184_v56  ;;  %v1582_v4 = vmul.f32 %v12180_v42, %v12185_v14  ;;  %v1583_v19 = vmul.f32 %v12180_v42, %v12186_v32  ;;  %v1584_v36 = vmul.f32 %v12180_v42, %v12187_v57  ;;  %v12192_v6 = vld [vmem:[#allocation115_spill] sm:$0xff] }
 0x18a   : > { %v1585_v59 = vmul.f32 %v12180_v42, %v12188_v62  ;;  %v1586_v39 = vmul.f32 %v12180_v42, %v12189_v25  ;;  %v1587_v15 = vmul.f32 %v12180_v42, %v12190_v51  ;;  %v1588_v35 = vmul.f32 %v12180_v42, %v12146_v13 }
 0x18b   : > { %v1589_v22 = vmul.f32 %v12180_v42, %v12191_v12  ;;  %v1590_v9 = vmul.f32 %v12180_v42, %v12192_v6  ;;  %v1593_v2 = vadd.f32 %v1577_v47, %v1540_v38  ;;  %v1594_v55 = vadd.f32 %v1578_v60, %v1541_v11 }
 0x18c   : > { %v1595_v52 = vadd.f32 %v1579_v26, %v1542_v17  ;;  %v1596_v29 = vadd.f32 %v1580_v7, %v1543_v10  ;;  %v1597_v31 = vadd.f32 %v1581_v27, %v1544_v48  ;;  %v1598_v53 = vadd.f32 %v1582_v4, %v1545_v33  ;;  %v12194_v33 = vld [vmem:[#allocation38_spill] sm:$0xff] }
 0x18d   : > { %v1599_v63 = vadd.f32 %v1583_v19, %v1546_v23  ;;  %v1600_v61 = vadd.f32 %v1584_v36, %v1547_v54  ;;  %v1601_v5 = vadd.f32 %v1585_v59, %v1548_v44  ;;  %v1602_v3 = vadd.f32 %v1586_v39, %v1549_v46  ;;  %v12195_v27 = vld [vmem:[#allocation50_spill] sm:$0xff]  ;;  %v12196_v19 = vld [vmem:[#allocation51_spill] sm:$0xff]  ;;  %v12197_v59 = vld [vmem:[#allocation52_spill] sm:$0xff] }
 0x18e   : > { %v1603_v41 = vadd.f32 %v1587_v15, %v1550_v40  ;;  %v1604_v34 = vadd.f32 %v1588_v35, %v1551_v49  ;;  %v1605_v28 = vadd.f32 %v1589_v22, %v1552_v45  ;;  %v1606_v50 = vadd.f32 %v1590_v9, %v1553_v1  ;;  %v12198_v15 = vld [vmem:[#allocation53_spill] sm:$0xff]  ;;  %v12199_v22 = vld [vmem:[#allocation54_spill] sm:$0xff] }
 0x18f   : > { %v1613_v37 = vmul.f32 %v12193_v43, %v12179_v16  ;;  %v1614_v42 = vmul.f32 %v12193_v43, %v12181_v20  ;;  %v1615_v47 = vmul.f32 %v12193_v43, %v12182_v58  ;;  %v1616_v38 = vmul.f32 %v12193_v43, %v12183_v21 }
 0x190   : > { %v1617_v54 = vmul.f32 %v12193_v43, %v12184_v56  ;;  %v1618_v40 = vmul.f32 %v12193_v43, %v12185_v14  ;;  %v1619_v45 = vmul.f32 %v12193_v43, %v12186_v32  ;;  %v1620_v46 = vmul.f32 %v12193_v43, %v12187_v57 }
 0x191   : > { %v1621_v1 = vmul.f32 %v12193_v43, %v12188_v62  ;;  %v1622_v23 = vmul.f32 %v12193_v43, %v12189_v25  ;;  %v1623_v48 = vmul.f32 %v12193_v43, %v12190_v51  ;;  %v1624_v10 = vmul.f32 %v12193_v43, %v12146_v13  ;;  %v12202_v51 = vld [vmem:[#allocation57_spill] sm:$0xff]  ;;  %v12203_v62 = vld [vmem:[#allocation58_spill] sm:$0xff] }
 0x192   : > { %v1625_v11 = vmul.f32 %v12193_v43, %v12191_v12  ;;  %v1626_v17 = vmul.f32 %v12193_v43, %v12192_v6  ;;  %v1666_v44 = vmul.f32 %v12194_v33, %v6471_v0  ;;  %v1667_v49 = vmul.f32 %v12194_v33, %v6479_v8  ;;  %v12200_v43 = vld [vmem:[#allocation55_spill] sm:$0xff]  ;;  %v12201_v12 = vld [vmem:[#allocation56_spill] sm:$0xff] }
 0x193   : > { %v1668_v60 = vmul.f32 %v12194_v33, %v6481_v18  ;;  %v1669_v26 = vmul.f32 %v12194_v33, %v6483_v24  ;;  %v1670_v7 = vmul.f32 %v12194_v33, %v6485_v30  ;;  %v1671_v4 = vmul.f32 %v12194_v33, %v12195_v27  ;;  %v12204_v30 = vld [vmem:[#allocation44_spill] sm:$0xff] }
 0x194   : > { %v1672_v36 = vmul.f32 %v12194_v33, %v12196_v19  ;;  %v1673_v39 = vmul.f32 %v12194_v33, %v12197_v59  ;;  %v1674_v35 = vmul.f32 %v12194_v33, %v12198_v15  ;;  %v1675_v9 = vmul.f32 %v12194_v33, %v12199_v22 }
 0x195   : > { %v1676_v6 = vmul.f32 %v12194_v33, %v12200_v43  ;;  %v1677_v13 = vmul.f32 %v12194_v33, %v12201_v12  ;;  %v1678_v25 = vmul.f32 %v12194_v33, %v12202_v51  ;;  %v1679_v57 = vmul.f32 %v12194_v33, %v12203_v62 }
 0x196   : > { %v1682_v32 = vadd.f32 %v1666_v44, %v1593_v2  ;;  %v1683_v14 = vadd.f32 %v1667_v49, %v1594_v55  ;;  %v1684_v56 = vadd.f32 %v1668_v60, %v1595_v52  ;;  %v1685_v21 = vadd.f32 %v1669_v26, %v1596_v29  ;;  %v12212_v52 = vld [vmem:[#allocation55_spill] sm:$0xff]  ;;  %v12213_v44 = vld [vmem:[#allocation56_spill] sm:$0xff]  ;;  %v12214_v60 = vld [vmem:[#allocation57_spill] sm:$0xff] }
 0x197   : > { %v1686_v58 = vadd.f32 %v1670_v7, %v1597_v31  ;;  %v1687_v20 = vadd.f32 %v1671_v4, %v1598_v53  ;;  %v1688_v16 = vadd.f32 %v1672_v36, %v1599_v63  ;;  %v1689_v22 = vadd.f32 %v1673_v39, %v1600_v61  ;;  %v12205_v53 = vld [vmem:[#allocation48_spill] sm:$0xff] }
 0x198   : > { %v1690_v15 = vadd.f32 %v1674_v35, %v1601_v5  ;;  %v1691_v59 = vadd.f32 %v1675_v9, %v1602_v3  ;;  %v1692_v43 = vadd.f32 %v1676_v6, %v1603_v41  ;;  %v1693_v19 = vadd.f32 %v1677_v13, %v1604_v34  ;;  %v12206_v5 = vld [vmem:[#allocation49_spill] sm:$0xff]  ;;  %v12207_v34 = vld [vmem:[#allocation50_spill] sm:$0xff]  ;;  %v12209_v41 = vld [vmem:[#allocation52_spill] sm:$0xff] }
 0x199   : > { %v1694_v27 = vadd.f32 %v1678_v25, %v1605_v28  ;;  %v1695_v12 = vadd.f32 %v1679_v57, %v1606_v50  ;;  %v1700_v24 = vmul.f32 0.0, %v12204_v30  ;;  %v1702_v51 = vmul.f32 %v12204_v30, %v6471_v0  ;;  %v12208_v28 = vld [vmem:[#allocation51_spill] sm:$0xff]  ;;  %v12210_v57 = vld [vmem:[#allocation53_spill] sm:$0xff]  ;;  %v12211_v6 = vld [vmem:[#allocation54_spill] sm:$0xff] }
 0x19a   : > { %v1703_v2 = vmul.f32 %v12204_v30, %v6479_v8  ;;  %v1704_v31 = vmul.f32 %v12204_v30, %v6481_v18  ;;  %v1705_v61 = vmul.f32 %v12204_v30, %v12205_v53  ;;  %v1706_v3 = vmul.f32 %v12204_v30, %v12206_v5  ;;  %v12215_v4 = vld [vmem:[#allocation40_spill] sm:$0xff]  ;;  %v12237_v5 = vld [vmem:[#allocation45_spill] sm:$0xff]  ;;  %v7342_v8 = vld [vmem:[#allocation14 + $0x10] sm:$0x1f] }
 0x19b   : > { %v1707_v50 = vmul.f32 %v12204_v30, %v12207_v34  ;;  %v1708_v13 = vmul.f32 %v12204_v30, %v12208_v28  ;;  %v1709_v63 = vmul.f32 %v12204_v30, %v12209_v41  ;;  %v1710_v25 = vmul.f32 %v12204_v30, %v12210_v57  ;;  %v12235_v41 = vld [vmem:[#allocation163_spill] sm:$0xff]  ;;  %v12236_v34 = vld [vmem:[#allocation41_spill] sm:$0xff] }
 0x19c   : > { %v1711_v55 = vmul.f32 %v12204_v30, %v12211_v6  ;;  %v1712_v29 = vmul.f32 %v12204_v30, %v12212_v52  ;;  %v1713_v49 = vmul.f32 %v12204_v30, %v12213_v44  ;;  %v1714_v26 = vmul.f32 %v12204_v30, %v12214_v60  ;;  %12238 = vst [vmem:[#allocation41_spill] sm:$0xff] %v7342_v8 }
 0x19d   : > { %v1715_v7 = vmul.f32 %v12204_v30, %v12203_v62  ;;  %v7278_v36 = vadd.f32 %v1700_v24, %v12215_v4  ;;  %v7280_v39 = vadd.f32 %v1702_v51, %v1613_v37  ;;  %v7282_v35 = vadd.f32 %v1703_v2, %v1614_v42  ;;  %v12223_v2 = vld [vmem:[#allocation156_spill] sm:$0xff]  ;;  %v12234_v62 = vld [vmem:[#allocation147_spill] sm:$0xff] }
 0x19e   : > { %v7284_v9 = vadd.f32 %v1704_v31, %v1615_v47  ;;  %v7286_v33 = vadd.f32 %v1705_v61, %v1616_v38  ;;  %v7288_v52 = vadd.f32 %v1706_v3, %v1617_v54  ;;  %v7290_v44 = vadd.f32 %v1707_v50, %v1618_v40  ;;  %v12221_v38 = vld [vmem:[#allocation141_spill] sm:$0xff]  ;;  %v12222_v54 = vld [vmem:[#allocation42_spill] sm:$0xff]  ;;  %v12227_v61 = vld [vmem:[#allocation159_spill] sm:$0xff] }
 0x19f   : > { %v7292_v6 = vadd.f32 %v1708_v13, %v1619_v45  ;;  %v7294_v60 = vadd.f32 %v1709_v63, %v1620_v46  ;;  %v7296_v30 = vadd.f32 %v1710_v25, %v1621_v1  ;;  %v7298_v24 = vadd.f32 %v1711_v55, %v1622_v23  ;;  %v12224_v46 = vld [vmem:[#allocation142_spill] sm:$0xff]  ;;  %v12225_v31 = vld [vmem:[#allocation157_spill] sm:$0xff]  ;;  %v12229_v50 = vld [vmem:[#allocation160_spill] sm:$0xff] }
 0x1a0   : > { %v7300_v37 = vadd.f32 %v1712_v29, %v1623_v48  ;;  %v7302_v42 = vadd.f32 %v1713_v49, %v1624_v10  ;;  %v7304_v51 = vadd.f32 %v1714_v26, %v1625_v11  ;;  %v7306_v47 = vadd.f32 %v1715_v7, %v1626_v17  ;;  %v12226_v48 = vld [vmem:[#allocation143_spill] sm:$0xff]  ;;  %v12228_v17 = vld [vmem:[#allocation144_spill] sm:$0xff]  ;;  %v12230_v63 = vld [vmem:[#allocation145_spill] sm:$0xff] }
 0x1a1   : > { %12216 = vst [vmem:[#allocation36_spill] sm:$0xff] %v7298_v24  ;;  %v1755_v40 = vmul.f32 %v12222_v54, %v12221_v38  ;;  %v1756_v45 = vmul.f32 %v12222_v54, %v12223_v2  ;;  %v1757_v1 = vmul.f32 %v12222_v54, %v12224_v46  ;;  %v1758_v23 = vmul.f32 %v12222_v54, %v12225_v31  ;;  %v12231_v55 = vld [vmem:[#allocation161_spill] sm:$0xff]  ;;  %v12232_v49 = vld [vmem:[#allocation146_spill] sm:$0xff] }
 0x1a2   : > { %12217 = vst [vmem:[#allocation40_spill] sm:$0xff] %v7300_v37  ;;  %12218 = vst [vmem:[#allocation190_spill] sm:$0xff] %v7302_v42  ;;  %v1759_v10 = vmul.f32 %v12222_v54, %v12226_v48  ;;  %v1760_v11 = vmul.f32 %v12222_v54, %v12227_v61  ;;  %v1761_v3 = vmul.f32 %v12222_v54, %v12228_v17  ;;  %v12233_v7 = vld [vmem:[#allocation162_spill] sm:$0xff]  ;;  %v7352_v37 = vld [vmem:[#allocation12 + $0x4] sm:$0x7] }
 0x1a3   : > { %12219 = vst [vmem:[#allocation191_spill] sm:$0xff] %v7304_v51  ;;  %12220 = vst [vmem:[#allocation192_spill] sm:$0xff] %v7306_v47  ;;  %v1762_v13 = vmul.f32 %v12222_v54, %v12229_v50  ;;  %v1763_v25 = vmul.f32 %v12222_v54, %v12230_v63  ;;  %v1764_v29 = vmul.f32 %v12222_v54, %v12231_v55 }
 0x1a4   : > { %v1765_v26 = vmul.f32 %v12222_v54, %v12232_v49  ;;  %v1766_v4 = vmul.f32 %v12222_v54, %v12233_v7  ;;  %v1767_v57 = vmul.f32 %v12222_v54, %v12234_v62  ;;  %v1768_v28 = vmul.f32 %v12222_v54, %v12235_v41  ;;  %12239 = vst [vmem:[#allocation45_spill] sm:$0xff] %v7352_v37 }
 0x1a5   : > { %v7338_v53 = vadd.f32 %v12237_v5, %v12236_v34  ;;  %v7340_v18 = vadd.f32 %v1755_v40, %v1682_v32  ;;  %v7344_v0 = vadd.f32 %v1756_v45, %v1683_v14  ;;  %v7346_v47 = vadd.f32 %v1757_v1, %v1684_v56  ;;  %v5664_v40 = vld [vmem:[#allocation12] sm:$0x7]  ;;  %v12240_v45 = vld [vmem:[#allocation29_spill] sm:$0xff] }
 0x1a6   : > { %v7348_v51 = vadd.f32 %v1758_v23, %v1685_v21  ;;  %v7350_v42 = vadd.f32 %v1759_v10, %v1686_v58  ;;  %v7354_v24 = vadd.f32 %v1760_v11, %v1687_v20  ;;  %v7356_v54 = vadd.f32 %v1761_v3, %v1688_v16  ;;  %v5665_v16 = vld [vmem:[#allocation14 + $0x8] sm:$0x1f] }
 0x1a7   : > { %v7358_v5 = vadd.f32 %v1762_v13, %v1689_v22  ;;  %v7360_v32 = vadd.f32 %v1763_v25, %v1690_v15  ;;  %v7362_v34 = vadd.f32 %v1764_v29, %v1691_v59  ;;  %v7364_v14 = vadd.f32 %v1765_v26, %v1692_v43  ;;  %v12242_v1 = vld [vmem:[#allocation33_spill] sm:$0xff]  ;;  %v12246_v43 = vld [vmem:[#allocation26_spill] sm:$0xff] }
 0x1a8   : > { %v7366_v56 = vadd.f32 %v1766_v4, %v1693_v19  ;;  %v7368_v21 = vadd.f32 %v1767_v57, %v1694_v27  ;;  %v7370_v58 = vadd.f32 %v1768_v28, %v1695_v12  ;;  %v7373_v20 = vrot.slane %v5664_v40, %v12240_v45  ;;  %v12244_v15 = vld [vmem:[#allocation25_spill] sm:$0xff] }
 0x1a9   : > { %v7376_v22 = vrot.slane %v5665_v16, %v12242_v1  ;;  %v7380_v59 = vrot.slane %v7342_v8, %v12244_v15  ;;  %v7384_v19 = vrot.slane %v7342_v8, %v12246_v43  ;;  %v7388_v12 = vrot.slane %v7352_v37, %v12244_v15 }
 0x1aa   : > { %12241 = vst [vmem:[#allocation193_spill] sm:$0xff] %v7373_v20  ;;  %v7392_v27 = vrot.slane %v7342_v8, %v12240_v45  ;;  %v7396_v28 = vrot.slane %v7352_v37, %v12246_v43  ;;  %v1789_v57 = vmul.f32 0.0, %v7373_v20  ;;  %v1791_v23 = vmul.f32 %v7373_v20, %v12221_v38  ;;  %v12280_v38 = vld [vmem:[#allocation186_spill] sm:$0xff] }
 0x1ab   : > { %12243 = vst [vmem:[#allocation194_spill] sm:$0xff] %v7376_v22  ;;  %12245 = vst [vmem:[#allocation195_spill] sm:$0xff] %v7380_v59  ;;  %v1792_v10 = vmul.f32 %v7373_v20, %v12223_v2  ;;  %v1793_v11 = vmul.f32 %v7373_v20, %v12224_v46  ;;  %v1794_v3 = vmul.f32 %v7373_v20, %v12225_v31  ;;  %v12277_v31 = vld [vmem:[#allocation175_spill] sm:$0xff]  ;;  %v12278_v46 = vld [vmem:[#allocation185_spill] sm:$0xff] }
 0x1ac   : > { %12247 = vst [vmem:[#allocation196_spill] sm:$0xff] %v7384_v19  ;;  %12248 = vst [vmem:[#allocation197_spill] sm:$0xff] %v7388_v12  ;;  %v1795_v13 = vmul.f32 %v7373_v20, %v12226_v48  ;;  %v1796_v25 = vmul.f32 %v7373_v20, %v12227_v61  ;;  %v1797_v29 = vmul.f32 %v7373_v20, %v12228_v17  ;;  %v12279_v2 = vld [vmem:[#allocation176_spill] sm:$0xff] }
 0x1ad   : > { %12249 = vst [vmem:[#allocation198_spill] sm:$0xff] %v7392_v27  ;;  %12250 = vst [vmem:[#allocation199_spill] sm:$0xff] %v7396_v28  ;;  %v1798_v26 = vmul.f32 %v7373_v20, %v12229_v50  ;;  %v1799_v4 = vmul.f32 %v7373_v20, %v12230_v63  ;;  %v1800_v40 = vmul.f32 %v7373_v20, %v12231_v55 }
 0x1ae   : > { %v1801_v16 = vmul.f32 %v7373_v20, %v12232_v49  ;;  %v1802_v48 = vmul.f32 %v7373_v20, %v12233_v7  ;;  %v1803_v61 = vmul.f32 %v7373_v20, %v12234_v62  ;;  %v1804_v17 = vmul.f32 %v7373_v20, %v12235_v41  ;;  %v12276_v41 = vld [vmem:[#allocation184_spill] sm:$0xff] }
 0x1af   : > { %v7428_v50 = vadd.f32 %v1789_v57, %v7278_v36  ;;  %v7431_v63 = vadd.f32 %v1791_v23, %v7280_v39  ;;  %v7434_v55 = vadd.f32 %v1792_v10, %v7282_v35  ;;  %v7437_v49 = vadd.f32 %v1793_v11, %v7284_v9  ;;  %v12257_v9 = vld [vmem:[#allocation36_spill] sm:$0xff] }
 0x1b0   : > { %v7440_v7 = vadd.f32 %v1794_v3, %v7286_v33  ;;  %v7443_v62 = vadd.f32 %v1795_v13, %v7288_v52  ;;  %v7446_v20 = vadd.f32 %v1796_v25, %v7290_v44  ;;  %v7449_v36 = vadd.f32 %v1797_v29, %v7292_v6  ;;  %v12259_v33 = vld [vmem:[#allocation40_spill] sm:$0xff]  ;;  %v12261_v52 = vld [vmem:[#allocation190_spill] sm:$0xff]  ;;  %v12263_v44 = vld [vmem:[#allocation191_spill] sm:$0xff] }
 0x1b1   : > { %v7452_v39 = vadd.f32 %v1798_v26, %v7294_v60  ;;  %v7455_v35 = vadd.f32 %v1799_v4, %v7296_v30  ;;  %v7458_v57 = vadd.f32 %v1800_v40, %v12257_v9  ;;  %v7461_v23 = vadd.f32 %v1801_v16, %v12259_v33  ;;  %v12265_v6 = vld [vmem:[#allocation192_spill] sm:$0xff]  ;;  %v12267_v13 = vld [vmem:[#allocation170_spill] sm:$0xff]  ;;  %v12269_v26 = vld [vmem:[#allocation171_spill] sm:$0xff] }
 0x1b2   : > { %12251 = vst [vmem:[#allocation200_spill] sm:$0xff] %v7440_v7  ;;  %12252 = vst [vmem:[#allocation201_spill] sm:$0xff] %v7443_v62  ;;  %v7464_v10 = vadd.f32 %v1802_v48, %v12261_v52  ;;  %v7467_v11 = vadd.f32 %v1803_v61, %v12263_v44  ;;  %v7470_v3 = vadd.f32 %v1804_v17, %v12265_v6  ;;  %v1842_v60 = vmul.f32 0.0, %v7376_v22  ;;  %v12268_v25 = vld [vmem:[#allocation180_spill] sm:$0xff]  ;;  %v12270_v40 = vld [vmem:[#allocation181_spill] sm:$0xff] }
 0x1b3   : > { %12253 = vst [vmem:[#allocation202_spill] sm:$0xff] %v7446_v20  ;;  %12254 = vst [vmem:[#allocation203_spill] sm:$0xff] %v7449_v36  ;;  %v1844_v30 = vmul.f32 %v7376_v22, %v12267_v13  ;;  %v1845_v29 = vmul.f32 %v7376_v22, %v12268_v25  ;;  %v1846_v4 = vmul.f32 %v7376_v22, %v12269_v26  ;;  %v12271_v16 = vld [vmem:[#allocation172_spill] sm:$0xff]  ;;  %v12272_v9 = vld [vmem:[#allocation182_spill] sm:$0xff] }
 0x1b4   : > { %12255 = vst [vmem:[#allocation204_spill] sm:$0xff] %v7452_v39  ;;  %12256 = vst [vmem:[#allocation205_spill] sm:$0xff] %v7455_v35  ;;  %v1847_v48 = vmul.f32 %v7376_v22, %v12270_v40  ;;  %v1848_v61 = vmul.f32 %v7376_v22, %v12271_v16  ;;  %v1849_v17 = vmul.f32 %v7376_v22, %v12272_v9  ;;  %v12273_v33 = vld [vmem:[#allocation173_spill] sm:$0xff]  ;;  %v12274_v44 = vld [vmem:[#allocation183_spill] sm:$0xff] }
 0x1b5   : > { %12258 = vst [vmem:[#allocation36_spill] sm:$0xff] %v7458_v57  ;;  %12260 = vst [vmem:[#allocation40_spill] sm:$0xff] %v7461_v23  ;;  %v1850_v52 = vmul.f32 %v7376_v22, %v12273_v33  ;;  %v1851_v6 = vmul.f32 %v7376_v22, %v12274_v44  ;;  %v12275_v13 = vld [vmem:[#allocation174_spill] sm:$0xff]  ;;  %v1853_v26 = vmul.f32 %v7376_v22, %v12276_v41 }
 0x1b6   : > { %12262 = vst [vmem:[#allocation190_spill] sm:$0xff] %v7464_v10  ;;  %12264 = vst [vmem:[#allocation191_spill] sm:$0xff] %v7467_v11  ;;  %v1852_v25 = vmul.f32 %v7376_v22, %v12275_v13  ;;  %v1854_v40 = vmul.f32 %v7376_v22, %v12277_v31  ;;  %v1855_v16 = vmul.f32 %v7376_v22, %v12278_v46 }
 0x1b7   : > { %12266 = vst [vmem:[#allocation192_spill] sm:$0xff] %v7470_v3  ;;  %v1856_v9 = vmul.f32 %v7376_v22, %v12279_v2  ;;  %v1857_v33 = vmul.f32 %v7376_v22, %v12280_v38  ;;  %v1858_v44 = vadd.f32 %v1842_v60, %v7338_v53  ;;  %v1860_v43 = vadd.f32 %v1844_v30, %v7340_v18  ;;  %v12281_v60 = vld [vmem:[#allocation92_spill] sm:$0xff]  ;;  %v12283_v30 = vld [vmem:[#allocation93_spill] sm:$0xff] }
 0x1b8   : > { %v1861_v13 = vadd.f32 %v1845_v29, %v7344_v0  ;;  %v1862_v41 = vadd.f32 %v1846_v4, %v7346_v47  ;;  %v1863_v15 = vadd.f32 %v1847_v48, %v7348_v51  ;;  %v1864_v31 = vadd.f32 %v1848_v61, %v7350_v42  ;;  %v12287_v29 = vld [vmem:[#allocation96_spill] sm:$0xff] }
 0x1b9   : > { %v1865_v46 = vadd.f32 %v1849_v17, %v7354_v24  ;;  %v1866_v1 = vadd.f32 %v1850_v52, %v7356_v54  ;;  %v1867_v2 = vadd.f32 %v1851_v6, %v7358_v5  ;;  %v1868_v22 = vadd.f32 %v1852_v25, %v7360_v32  ;;  %v12282_v24 = vld [vmem:[#allocation77_spill] sm:$0xff]  ;;  %v12284_v32 = vld [vmem:[#allocation78_spill] sm:$0xff]  ;;  %v12285_v25 = vld [vmem:[#allocation95_spill] sm:$0xff] }
 0x1ba   : > { %v1869_v53 = vadd.f32 %v1853_v26, %v7362_v34  ;;  %v1870_v18 = vadd.f32 %v1854_v40, %v7364_v14  ;;  %v1871_v0 = vadd.f32 %v1855_v16, %v7366_v56  ;;  %v1872_v47 = vadd.f32 %v1856_v9, %v7368_v21  ;;  %v12286_v56 = vld [vmem:[#allocation79_spill] sm:$0xff]  ;;  %v12288_v26 = vld [vmem:[#allocation80_spill] sm:$0xff]  ;;  %v12289_v40 = vld [vmem:[#allocation97_spill] sm:$0xff] }
 0x1bb   : > { %v1873_v51 = vadd.f32 %v1857_v33, %v7370_v58  ;;  %v1894_v42 = vmul.f32 %v7380_v59, %v12281_v60  ;;  %v1895_v54 = vmul.f32 %v7380_v59, %v12282_v24  ;;  %v1896_v5 = vmul.f32 %v7380_v59, %v12283_v30  ;;  %v12290_v16 = vld [vmem:[#allocation81_spill] sm:$0xff]  ;;  %v12291_v9 = vld [vmem:[#allocation98_spill] sm:$0xff]  ;;  %v12293_v6 = vld [vmem:[#allocation99_spill] sm:$0xff] }
 0x1bc   : > { %v1897_v34 = vmul.f32 %v7380_v59, %v12284_v32  ;;  %v1898_v14 = vmul.f32 %v7380_v59, %v12285_v25  ;;  %v1899_v21 = vmul.f32 %v7380_v59, %v12286_v56  ;;  %v1900_v58 = vmul.f32 %v7380_v59, %v12287_v29  ;;  %v12292_v33 = vld [vmem:[#allocation82_spill] sm:$0xff]  ;;  %v12294_v24 = vld [vmem:[#allocation83_spill] sm:$0xff]  ;;  %v12295_v56 = vld [vmem:[#allocation100_spill] sm:$0xff] }
 0x1bd   : > { %v1901_v4 = vmul.f32 %v7380_v59, %v12288_v26  ;;  %v1902_v48 = vmul.f32 %v7380_v59, %v12289_v40  ;;  %v1903_v61 = vmul.f32 %v7380_v59, %v12290_v16  ;;  %v1904_v17 = vmul.f32 %v7380_v59, %v12291_v9  ;;  %v12296_v25 = vld [vmem:[#allocation84_spill] sm:$0xff] }
 0x1be   : > { %v1905_v52 = vmul.f32 %v7380_v59, %v12292_v33  ;;  %v1906_v60 = vmul.f32 %v7380_v59, %v12293_v6  ;;  %v1907_v29 = vmul.f32 %v7380_v59, %v12294_v24  ;;  %v1908_v26 = vmul.f32 %v7380_v59, %v12295_v56  ;;  %v12297_v56 = vld [vmem:[#allocation124_spill] sm:$0xff] }
 0x1bf   : > { %v1909_v40 = vmul.f32 %v7380_v59, %v12296_v25  ;;  %v1910_v32 = vadd.f32 %v1894_v42, %v1858_v44  ;;  %v1911_v16 = vadd.f32 %v1895_v54, %v1858_v44  ;;  %v1912_v30 = vadd.f32 %v1896_v5, %v1860_v43  ;;  %v12298_v59 = vld [vmem:[#allocation109_spill] sm:$0xff]  ;;  %v12307_v5 = vld [vmem:[#allocation130_spill] sm:$0xff] }
 0x1c0   : > { %v1913_v38 = vadd.f32 %v1897_v34, %v1861_v13  ;;  %v1914_v9 = vadd.f32 %v1898_v14, %v1862_v41  ;;  %v1915_v37 = vadd.f32 %v1899_v21, %v1863_v15  ;;  %v1916_v45 = vadd.f32 %v1900_v58, %v1864_v31  ;;  %v12299_v43 = vld [vmem:[#allocation125_spill] sm:$0xff]  ;;  %v12300_v15 = vld [vmem:[#allocation110_spill] sm:$0xff]  ;;  %v12301_v31 = vld [vmem:[#allocation127_spill] sm:$0xff] }
 0x1c1   : > { %v1917_v33 = vadd.f32 %v1901_v4, %v1865_v46  ;;  %v1918_v8 = vadd.f32 %v1902_v48, %v1866_v1  ;;  %v1919_v28 = vadd.f32 %v1903_v61, %v1867_v2  ;;  %v1920_v6 = vadd.f32 %v1904_v17, %v1868_v22  ;;  %v12302_v1 = vld [vmem:[#allocation111_spill] sm:$0xff]  ;;  %v12303_v13 = vld [vmem:[#allocation128_spill] sm:$0xff]  ;;  %v12306_v42 = vld [vmem:[#allocation113_spill] sm:$0xff] }
 0x1c2   : > { %v1921_v27 = vadd.f32 %v1905_v52, %v1869_v53  ;;  %v1922_v3 = vadd.f32 %v1906_v60, %v1870_v18  ;;  %v1923_v24 = vadd.f32 %v1907_v29, %v1871_v0  ;;  %v1924_v11 = vadd.f32 %v1908_v26, %v1872_v47  ;;  %v12304_v18 = vld [vmem:[#allocation112_spill] sm:$0xff]  ;;  %v12305_v47 = vld [vmem:[#allocation129_spill] sm:$0xff]  ;;  %v12308_v14 = vld [vmem:[#allocation114_spill] sm:$0xff] }
 0x1c3   : > { %v1925_v10 = vadd.f32 %v1909_v40, %v1873_v51  ;;  %v1946_v23 = vmul.f32 %v7384_v19, %v12297_v56  ;;  %v1947_v44 = vmul.f32 %v7384_v19, %v12298_v59  ;;  %v1948_v41 = vmul.f32 %v7384_v19, %v12299_v43  ;;  %v12309_v29 = vld [vmem:[#allocation131_spill] sm:$0xff]  ;;  %v12311_v40 = vld [vmem:[#allocation132_spill] sm:$0xff] }
 0x1c4   : > { %v1949_v46 = vmul.f32 %v7384_v19, %v12300_v15  ;;  %v1950_v2 = vmul.f32 %v7384_v19, %v12301_v31  ;;  %v1951_v22 = vmul.f32 %v7384_v19, %v12302_v1  ;;  %v1952_v53 = vmul.f32 %v7384_v19, %v12303_v13  ;;  %v12310_v26 = vld [vmem:[#allocation115_spill] sm:$0xff]  ;;  %v12312_v61 = vld [vmem:[#allocation116_spill] sm:$0xff] }
 0x1c5   : > { %v1953_v0 = vmul.f32 %v7384_v19, %v12304_v18  ;;  %v1954_v51 = vmul.f32 %v7384_v19, %v12305_v47  ;;  %v1955_v54 = vmul.f32 %v7384_v19, %v12306_v42  ;;  %v1956_v34 = vmul.f32 %v7384_v19, %v12307_v5 }
 0x1c6   : > { %v1957_v21 = vmul.f32 %v7384_v19, %v12308_v14  ;;  %v1958_v58 = vmul.f32 %v7384_v19, %v12309_v29  ;;  %v1959_v4 = vmul.f32 %v7384_v19, %v12310_v26  ;;  %v1960_v48 = vmul.f32 %v7384_v19, %v12311_v40 }
 0x1c7   : > { %v1961_v17 = vmul.f32 %v7384_v19, %v12312_v61  ;;  %v7580_v52 = vadd.f32 %v1946_v23, %v1910_v32  ;;  %v7582_v60 = vadd.f32 %v1947_v44, %v1911_v16  ;;  %v7584_v25 = vadd.f32 %v1948_v41, %v1912_v30  ;;  %v12340_v19 = vld [vmem:[#allocation53_spill] sm:$0xff] }
 0x1c8   : > { %v7586_v57 = vadd.f32 %v1949_v46, %v1913_v38  ;;  %v7588_v35 = vadd.f32 %v1950_v2, %v1914_v9  ;;  %v7590_v39 = vadd.f32 %v1951_v22, %v1915_v37  ;;  %v7592_v36 = vadd.f32 %v1952_v53, %v1916_v45 }
 0x1c9   : > { %v7594_v20 = vadd.f32 %v1953_v0, %v1917_v33  ;;  %v7596_v62 = vadd.f32 %v1954_v51, %v1918_v8  ;;  %v7598_v7 = vadd.f32 %v1955_v54, %v1919_v28  ;;  %v7600_v23 = vadd.f32 %v1956_v34, %v1920_v6  ;;  %v12313_v54 = vld [vmem:[#allocation200_spill] sm:$0xff] }
 0x1ca   : > { %v7602_v32 = vadd.f32 %v1957_v21, %v1921_v27  ;;  %v7604_v30 = vadd.f32 %v1958_v58, %v1922_v3  ;;  %v7606_v38 = vadd.f32 %v1959_v4, %v1923_v24  ;;  %v7608_v16 = vadd.f32 %v1960_v48, %v1924_v11  ;;  %v12314_v21 = vld [vmem:[#allocation201_spill] sm:$0xff]  ;;  %v12315_v4 = vld [vmem:[#allocation202_spill] sm:$0xff] }
 0x1cb   : > { %v7610_v37 = vadd.f32 %v1961_v17, %v1925_v10  ;;  %v1982_v45 = vmul.f32 %v7388_v12, %v12297_v56  ;;  %v1983_v8 = vmul.f32 %v7388_v12, %v12298_v59  ;;  %v1984_v28 = vmul.f32 %v7388_v12, %v12299_v43  ;;  %v12347_v43 = vld [vmem:[#allocation60_spill] sm:$0xff] }
 0x1cc   : > { %v1985_v27 = vmul.f32 %v7388_v12, %v12300_v15  ;;  %v1986_v3 = vmul.f32 %v7388_v12, %v12301_v31  ;;  %v1987_v11 = vmul.f32 %v7388_v12, %v12302_v1  ;;  %v1988_v10 = vmul.f32 %v7388_v12, %v12303_v13  ;;  %v12345_v13 = vld [vmem:[#allocation58_spill] sm:$0xff]  ;;  %v12346_v31 = vld [vmem:[#allocation59_spill] sm:$0xff] }
 0x1cd   : > { %v1989_v56 = vmul.f32 %v7388_v12, %v12304_v18  ;;  %v1990_v59 = vmul.f32 %v7388_v12, %v12305_v47  ;;  %v1991_v9 = vmul.f32 %v7388_v12, %v12306_v42  ;;  %v1992_v33 = vmul.f32 %v7388_v12, %v12307_v5  ;;  %v12343_v5 = vld [vmem:[#allocation56_spill] sm:$0xff]  ;;  %v12344_v47 = vld [vmem:[#allocation57_spill] sm:$0xff] }
 0x1ce   : > { %v1993_v6 = vmul.f32 %v7388_v12, %v12308_v14  ;;  %v1994_v24 = vmul.f32 %v7388_v12, %v12309_v29  ;;  %v1995_v44 = vmul.f32 %v7388_v12, %v12310_v26  ;;  %v1996_v41 = vmul.f32 %v7388_v12, %v12311_v40  ;;  %v12341_v40 = vld [vmem:[#allocation54_spill] sm:$0xff]  ;;  %v12342_v29 = vld [vmem:[#allocation55_spill] sm:$0xff] }
 0x1cf   : > { %v1997_v46 = vmul.f32 %v7388_v12, %v12312_v61  ;;  %v7645_v2 = vadd.f32 %v1982_v45, %v7428_v50  ;;  %v7648_v22 = vadd.f32 %v1983_v8, %v7428_v50  ;;  %v7651_v53 = vadd.f32 %v1984_v28, %v7431_v63  ;;  %v12316_v50 = vld [vmem:[#allocation203_spill] sm:$0xff]  ;;  %v12317_v63 = vld [vmem:[#allocation204_spill] sm:$0xff] }
 0x1d0   : > { %v7654_v0 = vadd.f32 %v1985_v27, %v7434_v55  ;;  %v7657_v51 = vadd.f32 %v1986_v3, %v7437_v49  ;;  %v7660_v34 = vadd.f32 %v1987_v11, %v12313_v54  ;;  %v7663_v58 = vadd.f32 %v1988_v10, %v12314_v21  ;;  %v12319_v55 = vld [vmem:[#allocation205_spill] sm:$0xff]  ;;  %v12321_v49 = vld [vmem:[#allocation36_spill] sm:$0xff]  ;;  %v12325_v11 = vld [vmem:[#allocation190_spill] sm:$0xff] }
 0x1d1   : > { %v7666_v48 = vadd.f32 %v1989_v56, %v12315_v4  ;;  %v7669_v17 = vadd.f32 %v1990_v59, %v12316_v50  ;;  %v7672_v45 = vadd.f32 %v1991_v9, %v12317_v63  ;;  %v7675_v8 = vadd.f32 %v1992_v33, %v12319_v55  ;;  %v12323_v27 = vld [vmem:[#allocation40_spill] sm:$0xff]  ;;  %v12327_v56 = vld [vmem:[#allocation191_spill] sm:$0xff]  ;;  %v12332_v4 = vld [vmem:[#allocation198_spill] sm:$0xff] }
 0x1d2   : > { %v7678_v28 = vadd.f32 %v1993_v6, %v12321_v49  ;;  %v7681_v3 = vadd.f32 %v1994_v24, %v12323_v27  ;;  %v7684_v10 = vadd.f32 %v1995_v44, %v12325_v11  ;;  %v7687_v54 = vadd.f32 %v1996_v41, %v12327_v56  ;;  %v12329_v59 = vld [vmem:[#allocation192_spill] sm:$0xff]  ;;  %v12331_v9 = vld [vmem:[#allocation43_spill] sm:$0xff]  ;;  %v12333_v33 = vld [vmem:[#allocation46_spill] sm:$0xff] }
 0x1d3   : > { %12318 = vst [vmem:[#allocation92_spill] sm:$0xff] %v7672_v45  ;;  %12320 = vst [vmem:[#allocation77_spill] sm:$0xff] %v7675_v8  ;;  %v7690_v21 = vadd.f32 %v1997_v46, %v12329_v59  ;;  %v2034_v50 = vmul.f32 %v12332_v4, %v12331_v9  ;;  %v2035_v63 = vmul.f32 %v12332_v4, %v12333_v33  ;;  %v12334_v6 = vld [vmem:[#allocation47_spill] sm:$0xff]  ;;  %v12335_v24 = vld [vmem:[#allocation48_spill] sm:$0xff] }
 0x1d4   : > { %12322 = vst [vmem:[#allocation124_spill] sm:$0xff] %v7678_v28  ;;  %12324 = vst [vmem:[#allocation109_spill] sm:$0xff] %v7681_v3  ;;  %v2036_v55 = vmul.f32 %v12332_v4, %v12334_v6  ;;  %v2037_v49 = vmul.f32 %v12332_v4, %v12335_v24  ;;  %v12336_v44 = vld [vmem:[#allocation49_spill] sm:$0xff]  ;;  %v12337_v41 = vld [vmem:[#allocation50_spill] sm:$0xff]  ;;  %v2042_v61 = vmul.f32 %v12332_v4, %v12340_v19 }
 0x1d5   : > { %12326 = vst [vmem:[#allocation200_spill] sm:$0xff] %v7684_v10  ;;  %12328 = vst [vmem:[#allocation201_spill] sm:$0xff] %v7687_v54  ;;  %v2038_v27 = vmul.f32 %v12332_v4, %v12336_v44  ;;  %v2039_v11 = vmul.f32 %v12332_v4, %v12337_v41  ;;  %v12338_v46 = vld [vmem:[#allocation51_spill] sm:$0xff]  ;;  %v12339_v59 = vld [vmem:[#allocation52_spill] sm:$0xff]  ;;  %v2043_v26 = vmul.f32 %v12332_v4, %v12341_v40 }
 0x1d6   : > { %12330 = vst [vmem:[#allocation202_spill] sm:$0xff] %v7690_v21  ;;  %v2040_v56 = vmul.f32 %v12332_v4, %v12338_v46  ;;  %v2041_v12 = vmul.f32 %v12332_v4, %v12339_v59  ;;  %v2044_v14 = vmul.f32 %v12332_v4, %v12342_v29  ;;  %v2045_v42 = vmul.f32 %v12332_v4, %v12343_v5 }
 0x1d7   : > { %v2046_v18 = vmul.f32 %v12332_v4, %v12344_v47  ;;  %v2047_v1 = vmul.f32 %v12332_v4, %v12345_v13  ;;  %v2048_v15 = vmul.f32 %v12332_v4, %v12346_v31  ;;  %v2049_v21 = vmul.f32 %v12332_v4, %v12347_v43 }
 0x1d8   : > { %v7725_v54 = vadd.f32 %v2034_v50, %v7580_v52  ;;  %v7728_v10 = vadd.f32 %v2035_v63, %v7582_v60  ;;  %v7731_v3 = vadd.f32 %v2036_v55, %v7584_v25  ;;  %v7734_v28 = vadd.f32 %v2037_v49, %v7586_v57  ;;  %v7816_v49 = vld [vmem:[#allocation14 + $0x18] sm:$0x1f] }
 0x1d9   : > { %v7737_v8 = vadd.f32 %v2038_v27, %v7588_v35  ;;  %v7740_v45 = vadd.f32 %v2039_v11, %v7590_v39  ;;  %v7743_v4 = vadd.f32 %v2040_v56, %v7592_v36  ;;  %v7746_v52 = vadd.f32 %v2041_v12, %v7594_v20  ;;  %12349 = vst [vmem:[#allocation203_spill] sm:$0xff] %v7816_v49  ;;  %v7830_v56 = vld [vmem:[#allocation12 + $0x8] sm:$0x7] }
 0x1da   : > { %v7749_v60 = vadd.f32 %v2042_v61, %v7596_v62  ;;  %v7752_v25 = vadd.f32 %v2043_v26, %v7598_v7  ;;  %v7755_v57 = vadd.f32 %v2044_v14, %v7600_v23  ;;  %v7758_v35 = vadd.f32 %v2045_v42, %v7602_v32  ;;  %v12348_v7 = vld [vmem:[#allocation199_spill] sm:$0xff]  ;;  %12350 = vst [vmem:[#allocation204_spill] sm:$0xff] %v7830_v56 }
 0x1db   : > { %v7761_v39 = vadd.f32 %v2046_v18, %v7604_v30  ;;  %v7764_v36 = vadd.f32 %v2047_v1, %v7606_v38  ;;  %v7767_v20 = vadd.f32 %v2048_v15, %v7608_v16  ;;  %v7770_v62 = vadd.f32 %v2049_v21, %v7610_v37 }
 0x1dc   : > { %v2070_v12 = vmul.f32 %v12348_v7, %v12331_v9  ;;  %v2071_v14 = vmul.f32 %v12348_v7, %v12333_v33  ;;  %v2072_v42 = vmul.f32 %v12348_v7, %v12334_v6  ;;  %v2073_v18 = vmul.f32 %v12348_v7, %v12335_v24 }
 0x1dd   : > { %v2074_v1 = vmul.f32 %v12348_v7, %v12336_v44  ;;  %v2075_v15 = vmul.f32 %v12348_v7, %v12337_v41  ;;  %v2076_v26 = vmul.f32 %v12348_v7, %v12338_v46  ;;  %v2077_v61 = vmul.f32 %v12348_v7, %v12339_v59  ;;  %v12391_v46 = vld [vmem:[#allocation146_spill] sm:$0xff] }
 0x1de   : > { %v2078_v23 = vmul.f32 %v12348_v7, %v12340_v19  ;;  %v2079_v32 = vmul.f32 %v12348_v7, %v12341_v40  ;;  %v2080_v30 = vmul.f32 %v12348_v7, %v12342_v29  ;;  %v2081_v38 = vmul.f32 %v12348_v7, %v12343_v5  ;;  %v12389_v29 = vld [vmem:[#allocation145_spill] sm:$0xff]  ;;  %v12392_v44 = vld [vmem:[#allocation162_spill] sm:$0xff] }
 0x1df   : > { %v2082_v16 = vmul.f32 %v12348_v7, %v12344_v47  ;;  %v2083_v37 = vmul.f32 %v12348_v7, %v12345_v13  ;;  %v2084_v21 = vmul.f32 %v12348_v7, %v12346_v31  ;;  %v2085_v9 = vmul.f32 %v12348_v7, %v12347_v43  ;;  %v12382_v7 = vld [vmem:[#allocation156_spill] sm:$0xff]  ;;  %v12384_v31 = vld [vmem:[#allocation157_spill] sm:$0xff]  ;;  %v12385_v13 = vld [vmem:[#allocation143_spill] sm:$0xff] }
 0x1e0   : > { %v7805_v50 = vadd.f32 %v2070_v12, %v7645_v2  ;;  %v7808_v33 = vadd.f32 %v2071_v14, %v7648_v22  ;;  %v7811_v63 = vadd.f32 %v2072_v42, %v7651_v53  ;;  %v7814_v55 = vadd.f32 %v2073_v18, %v7654_v0  ;;  %v12352_v0 = vld [vmem:[#allocation92_spill] sm:$0xff]  ;;  %v12354_v14 = vld [vmem:[#allocation77_spill] sm:$0xff] }
 0x1e1   : > { %v7819_v27 = vadd.f32 %v2074_v1, %v7657_v51  ;;  %v7822_v11 = vadd.f32 %v2075_v15, %v7660_v34  ;;  %v7825_v2 = vadd.f32 %v2076_v26, %v7663_v58  ;;  %v7828_v22 = vadd.f32 %v2077_v61, %v7666_v48  ;;  %v12356_v42 = vld [vmem:[#allocation124_spill] sm:$0xff]  ;;  %v12358_v18 = vld [vmem:[#allocation109_spill] sm:$0xff] }
 0x1e2   : > { %v7833_v53 = vadd.f32 %v2078_v23, %v7669_v17  ;;  %v7836_v12 = vadd.f32 %v2079_v32, %v12352_v0  ;;  %v7839_v51 = vadd.f32 %v2080_v30, %v12354_v14  ;;  %v7842_v34 = vadd.f32 %v2081_v38, %v12356_v42  ;;  %v12360_v1 = vld [vmem:[#allocation200_spill] sm:$0xff]  ;;  %v12362_v15 = vld [vmem:[#allocation201_spill] sm:$0xff]  ;;  %v12364_v17 = vld [vmem:[#allocation202_spill] sm:$0xff] }
 0x1e3   : > { %v7845_v58 = vadd.f32 %v2082_v16, %v12358_v18  ;;  %v7848_v48 = vadd.f32 %v2083_v37, %v12360_v1  ;;  %v7851_v26 = vadd.f32 %v2084_v21, %v12362_v15  ;;  %v7854_v61 = vadd.f32 %v2085_v9, %v12364_v17  ;;  %v12366_v23 = vld [vmem:[#allocation31_spill] sm:$0xff]  ;;  %v12367_v32 = vld [vmem:[#allocation41_spill] sm:$0xff]  ;;  %v12376_v21 = vld [vmem:[#allocation26_spill] sm:$0xff] }
 0x1e4   : > { %12351 = vst [vmem:[#allocation205_spill] sm:$0xff] %v7833_v53  ;;  %12353 = vst [vmem:[#allocation36_spill] sm:$0xff] %v7836_v12  ;;  %v7858_v0 = vrot.slane %v12367_v32, %v12366_v23  ;;  %v12369_v30 = vld [vmem:[#allocation29_spill] sm:$0xff]  ;;  %v7874_v9 = vrot.slane %v7816_v49, %v12376_v21  ;;  %v7886_v17 = vrot.slane %v7830_v56, %v12376_v21  ;;  %v12383_v23 = vld [vmem:[#allocation142_spill] sm:$0xff] }
 0x1e5   : > { %12355 = vst [vmem:[#allocation40_spill] sm:$0xff] %v7839_v51  ;;  %12357 = vst [vmem:[#allocation190_spill] sm:$0xff] %v7842_v34  ;;  %v12370_v14 = vld [vmem:[#allocation45_spill] sm:$0xff]  ;;  %v7882_v15 = vrot.slane %v7816_v49, %v12369_v30  ;;  %v12387_v21 = vld [vmem:[#allocation144_spill] sm:$0xff] }
 0x1e6   : > { %12359 = vst [vmem:[#allocation191_spill] sm:$0xff] %v7845_v58  ;;  %12361 = vst [vmem:[#allocation192_spill] sm:$0xff] %v7848_v48  ;;  %v7862_v38 = vrot.slane %v12370_v14, %v12369_v30  ;;  %v12372_v42 = vld [vmem:[#allocation33_spill] sm:$0xff]  ;;  %v2124_v43 = vmul.f32 %v7858_v0, %v12383_v23  ;;  %v2126_v30 = vmul.f32 %v7858_v0, %v12385_v13 }
 0x1e7   : > { %12363 = vst [vmem:[#allocation43_spill] sm:$0xff] %v7851_v26  ;;  %12365 = vst [vmem:[#allocation46_spill] sm:$0xff] %v7854_v61  ;;  %v7866_v16 = vrot.slane %v12367_v32, %v12372_v42  ;;  %v12374_v37 = vld [vmem:[#allocation25_spill] sm:$0xff]  ;;  %v2123_v42 = vmul.f32 %v7858_v0, %v12382_v7  ;;  %v2130_v40 = vmul.f32 %v7858_v0, %v12389_v29  ;;  %v12396_v61 = vld [vmem:[#allocation164_spill] sm:$0xff] }
 0x1e8   : > { %12368 = vst [vmem:[#allocation92_spill] sm:$0xff] %v7858_v0  ;;  %12371 = vst [vmem:[#allocation77_spill] sm:$0xff] %v7862_v38  ;;  %v7870_v18 = vrot.slane %v7816_v49, %v12374_v37  ;;  %v7878_v1 = vrot.slane %v7830_v56, %v12374_v37  ;;  %v12381_v32 = vld [vmem:[#allocation141_spill] sm:$0xff]  ;;  %v2125_v37 = vmul.f32 %v7858_v0, %v12384_v31  ;;  %v12386_v49 = vld [vmem:[#allocation159_spill] sm:$0xff] }
 0x1e9   : > { %12373 = vst [vmem:[#allocation124_spill] sm:$0xff] %v7866_v16  ;;  %12377 = vst [vmem:[#allocation200_spill] sm:$0xff] %v7874_v9  ;;  %v2122_v14 = vmul.f32 %v7858_v0, %v12381_v32  ;;  %v2127_v47 = vmul.f32 %v7858_v0, %v12386_v49  ;;  %v2128_v56 = vmul.f32 %v7858_v0, %v12387_v21  ;;  %v12390_v19 = vld [vmem:[#allocation161_spill] sm:$0xff] }
 0x1ea   : > { %12375 = vst [vmem:[#allocation109_spill] sm:$0xff] %v7870_v18  ;;  %12378 = vst [vmem:[#allocation201_spill] sm:$0xff] %v7878_v1  ;;  %v2131_v59 = vmul.f32 %v7858_v0, %v12390_v19  ;;  %v2132_v41 = vmul.f32 %v7858_v0, %v12391_v46  ;;  %v2133_v24 = vmul.f32 %v7858_v0, %v12392_v44  ;;  %v12394_v1 = vld [vmem:[#allocation163_spill] sm:$0xff]  ;;  %v12395_v18 = vld [vmem:[#allocation148_spill] sm:$0xff] }
 0x1eb   : > { %12379 = vst [vmem:[#allocation202_spill] sm:$0xff] %v7882_v15  ;;  %12380 = vst [vmem:[#allocation41_spill] sm:$0xff] %v7886_v17  ;;  %v12388_v17 = vld [vmem:[#allocation160_spill] sm:$0xff]  ;;  %v12393_v15 = vld [vmem:[#allocation147_spill] sm:$0xff]  ;;  %v2135_v9 = vmul.f32 %v7858_v0, %v12394_v1  ;;  %v2136_v16 = vmul.f32 %v7858_v0, %v12395_v18  ;;  %v2137_v26 = vmul.f32 %v7858_v0, %v12396_v61 }
 0x1ec   : > { %v2129_v5 = vmul.f32 %v7858_v0, %v12388_v17  ;;  %v2134_v6 = vmul.f32 %v7858_v0, %v12393_v15  ;;  %v7921_v48 = vadd.f32 %v2122_v14, %v7725_v54  ;;  %v7924_v58 = vadd.f32 %v2123_v42, %v7728_v10 }
 0x1ed   : > { %v7927_v34 = vadd.f32 %v2124_v43, %v7731_v3  ;;  %v7930_v51 = vadd.f32 %v2125_v37, %v7734_v28  ;;  %v7933_v12 = vadd.f32 %v2126_v30, %v7737_v8  ;;  %v7936_v53 = vadd.f32 %v2127_v47, %v7740_v45 }
 0x1ee   : > { %v7939_v0 = vadd.f32 %v2128_v56, %v7743_v4  ;;  %v7942_v54 = vadd.f32 %v2129_v5, %v7746_v52  ;;  %v7945_v10 = vadd.f32 %v2130_v40, %v7749_v60  ;;  %v7948_v43 = vadd.f32 %v2131_v59, %v7752_v25 }
 0x1ef   : > { %v7951_v28 = vadd.f32 %v2132_v41, %v7755_v57  ;;  %v7954_v8 = vadd.f32 %v2133_v24, %v7758_v35  ;;  %v7957_v47 = vadd.f32 %v2134_v6, %v7761_v39  ;;  %v7960_v45 = vadd.f32 %v2135_v9, %v7764_v36 }
 0x1f0   : > { %v7963_v5 = vadd.f32 %v2136_v16, %v7767_v20  ;;  %v7966_v40 = vadd.f32 %v2137_v26, %v7770_v62  ;;  %v2158_v3 = vmul.f32 %v7862_v38, %v12381_v32  ;;  %v2159_v4 = vmul.f32 %v7862_v38, %v12382_v7 }
 0x1f1   : > { %v2160_v24 = vmul.f32 %v7862_v38, %v12383_v23  ;;  %v2161_v6 = vmul.f32 %v7862_v38, %v12384_v31  ;;  %v2162_v41 = vmul.f32 %v7862_v38, %v12385_v13  ;;  %v2163_v59 = vmul.f32 %v7862_v38, %v12386_v49 }
 0x1f2   : > { %v2164_v52 = vmul.f32 %v7862_v38, %v12387_v21  ;;  %v2165_v60 = vmul.f32 %v7862_v38, %v12388_v17  ;;  %v2166_v25 = vmul.f32 %v7862_v38, %v12389_v29  ;;  %v2167_v57 = vmul.f32 %v7862_v38, %v12390_v19 }
 0x1f3   : > { %v2168_v35 = vmul.f32 %v7862_v38, %v12391_v46  ;;  %v2169_v39 = vmul.f32 %v7862_v38, %v12392_v44  ;;  %v2170_v36 = vmul.f32 %v7862_v38, %v12393_v15  ;;  %v2171_v20 = vmul.f32 %v7862_v38, %v12394_v1  ;;  %v12429_v1 = vld [vmem:[#allocation176_spill] sm:$0xff]  ;;  %v12430_v15 = vld [vmem:[#allocation186_spill] sm:$0xff]  ;;  %v12431_v44 = vld [vmem:[#allocation177_spill] sm:$0xff] }
 0x1f4   : > { %v2172_v62 = vmul.f32 %v7862_v38, %v12395_v18  ;;  %v2173_v7 = vmul.f32 %v7862_v38, %v12396_v61  ;;  %v8001_v56 = vadd.f32 %v2158_v3, %v7805_v50  ;;  %v8004_v26 = vadd.f32 %v2159_v4, %v7808_v33  ;;  %v12400_v33 = vld [vmem:[#allocation205_spill] sm:$0xff]  ;;  %v12426_v38 = vld [vmem:[#allocation184_spill] sm:$0xff]  ;;  %v12427_v61 = vld [vmem:[#allocation175_spill] sm:$0xff] }
 0x1f5   : > { %v8007_v30 = vadd.f32 %v2160_v24, %v7811_v63  ;;  %v8010_v42 = vadd.f32 %v2161_v6, %v7814_v55  ;;  %v8013_v16 = vadd.f32 %v2162_v41, %v7819_v27  ;;  %v8016_v37 = vadd.f32 %v2163_v59, %v7822_v11  ;;  %v12402_v63 = vld [vmem:[#allocation36_spill] sm:$0xff]  ;;  %v12406_v27 = vld [vmem:[#allocation190_spill] sm:$0xff]  ;;  %v12408_v11 = vld [vmem:[#allocation191_spill] sm:$0xff] }
 0x1f6   : > { %v8019_v9 = vadd.f32 %v2164_v52, %v7825_v2  ;;  %v8022_v50 = vadd.f32 %v2165_v60, %v7828_v22  ;;  %v8025_v32 = vadd.f32 %v2166_v25, %v12400_v33  ;;  %v8028_v14 = vadd.f32 %v2167_v57, %v12402_v63  ;;  %v12404_v55 = vld [vmem:[#allocation40_spill] sm:$0xff]  ;;  %v12412_v22 = vld [vmem:[#allocation43_spill] sm:$0xff]  ;;  %v12414_v59 = vld [vmem:[#allocation46_spill] sm:$0xff] }
 0x1f7   : > { %12397 = vst [vmem:[#allocation45_spill] sm:$0xff] %v8016_v37  ;;  %v8031_v3 = vadd.f32 %v2168_v35, %v12404_v55  ;;  %v8034_v4 = vadd.f32 %v2169_v39, %v12406_v27  ;;  %v8037_v24 = vadd.f32 %v2170_v36, %v12408_v11  ;;  %v12410_v2 = vld [vmem:[#allocation192_spill] sm:$0xff]  ;;  %v8043_v41 = vadd.f32 %v2172_v62, %v12412_v22  ;;  %v12416_v60 = vld [vmem:[#allocation170_spill] sm:$0xff]  ;;  %v12419_v39 = vld [vmem:[#allocation171_spill] sm:$0xff] }
 0x1f8   : > { %12398 = vst [vmem:[#allocation141_spill] sm:$0xff] %v8019_v9  ;;  %12399 = vst [vmem:[#allocation156_spill] sm:$0xff] %v8022_v50  ;;  %v8040_v6 = vadd.f32 %v2171_v20, %v12410_v2  ;;  %v8046_v52 = vadd.f32 %v2173_v7, %v12414_v59  ;;  %v12417_v25 = vld [vmem:[#allocation124_spill] sm:$0xff]  ;;  %v12420_v36 = vld [vmem:[#allocation181_spill] sm:$0xff] }
 0x1f9   : > { %12401 = vst [vmem:[#allocation205_spill] sm:$0xff] %v8025_v32  ;;  %12403 = vst [vmem:[#allocation36_spill] sm:$0xff] %v8028_v14  ;;  %v2210_v57 = vmul.f32 %v12417_v25, %v12416_v60  ;;  %v12418_v35 = vld [vmem:[#allocation180_spill] sm:$0xff]  ;;  %v2212_v63 = vmul.f32 %v12417_v25, %v12419_v39  ;;  %v2213_v55 = vmul.f32 %v12417_v25, %v12420_v36  ;;  %v12422_v62 = vld [vmem:[#allocation182_spill] sm:$0xff] }
 0x1fa   : > { %12405 = vst [vmem:[#allocation40_spill] sm:$0xff] %v8031_v3  ;;  %12407 = vst [vmem:[#allocation190_spill] sm:$0xff] %v8034_v4  ;;  %v2211_v33 = vmul.f32 %v12417_v25, %v12418_v35  ;;  %v12421_v20 = vld [vmem:[#allocation172_spill] sm:$0xff]  ;;  %v2215_v11 = vmul.f32 %v12417_v25, %v12422_v62  ;;  %v12423_v7 = vld [vmem:[#allocation173_spill] sm:$0xff]  ;;  %v2219_v39 = vmul.f32 %v12417_v25, %v12426_v38 }
 0x1fb   : > { %12409 = vst [vmem:[#allocation191_spill] sm:$0xff] %v8037_v24  ;;  %12411 = vst [vmem:[#allocation192_spill] sm:$0xff] %v8040_v6  ;;  %v2214_v27 = vmul.f32 %v12417_v25, %v12421_v20  ;;  %v2216_v2 = vmul.f32 %v12417_v25, %v12423_v7  ;;  %v12424_v22 = vld [vmem:[#allocation183_spill] sm:$0xff]  ;;  %v12425_v60 = vld [vmem:[#allocation174_spill] sm:$0xff]  ;;  %v2220_v36 = vmul.f32 %v12417_v25, %v12427_v61 }
 0x1fc   : > { %12413 = vst [vmem:[#allocation43_spill] sm:$0xff] %v8043_v41  ;;  %12415 = vst [vmem:[#allocation46_spill] sm:$0xff] %v8046_v52  ;;  %v2217_v59 = vmul.f32 %v12417_v25, %v12424_v22  ;;  %v2218_v35 = vmul.f32 %v12417_v25, %v12425_v60  ;;  %v12428_v18 = vld [vmem:[#allocation185_spill] sm:$0xff]  ;;  %v2222_v62 = vmul.f32 %v12417_v25, %v12429_v1  ;;  %v12432_v46 = vld [vmem:[#allocation187_spill] sm:$0xff] }
 0x1fd   : > { %v2221_v20 = vmul.f32 %v12417_v25, %v12428_v18  ;;  %v2223_v7 = vmul.f32 %v12417_v25, %v12430_v15  ;;  %v2224_v22 = vmul.f32 %v12417_v25, %v12431_v44  ;;  %v2225_v60 = vmul.f32 %v12417_v25, %v12432_v46  ;;  %v12451_v24 = vld [vmem:[#allocation200_spill] sm:$0xff] }
 0x1fe   : > { %v2226_v38 = vadd.f32 %v2210_v57, %v7921_v48  ;;  %v2227_v19 = vadd.f32 %v2211_v33, %v7924_v58  ;;  %v2228_v61 = vadd.f32 %v2212_v63, %v7927_v34  ;;  %v2229_v18 = vadd.f32 %v2213_v55, %v7930_v51  ;;  %v12433_v57 = vld [vmem:[#allocation93_spill] sm:$0xff]  ;;  %v12436_v63 = vld [vmem:[#allocation95_spill] sm:$0xff] }
 0x1ff   : > { %v2230_v29 = vadd.f32 %v2214_v27, %v7933_v12  ;;  %v2231_v1 = vadd.f32 %v2215_v11, %v7936_v53  ;;  %v2232_v15 = vadd.f32 %v2216_v2, %v7939_v0  ;;  %v2233_v17 = vadd.f32 %v2217_v59, %v7942_v54  ;;  %v12434_v0 = vld [vmem:[#allocation109_spill] sm:$0xff]  ;;  %v12435_v54 = vld [vmem:[#allocation78_spill] sm:$0xff]  ;;  %v12444_v2 = vld [vmem:[#allocation99_spill] sm:$0xff] }
 0x200   : > { %v2234_v44 = vadd.f32 %v2218_v35, %v7945_v10  ;;  %v2235_v25 = vadd.f32 %v2219_v39, %v7948_v43  ;;  %v2236_v48 = vadd.f32 %v2220_v36, %v7951_v28  ;;  %v2237_v58 = vadd.f32 %v2221_v20, %v7954_v8  ;;  %v12437_v28 = vld [vmem:[#allocation79_spill] sm:$0xff]  ;;  %v12438_v39 = vld [vmem:[#allocation96_spill] sm:$0xff]  ;;  %v12440_v36 = vld [vmem:[#allocation97_spill] sm:$0xff] }
 0x201   : > { %v2238_v34 = vadd.f32 %v2222_v62, %v7957_v47  ;;  %v2239_v51 = vadd.f32 %v2223_v7, %v7960_v45  ;;  %v2240_v12 = vadd.f32 %v2224_v22, %v7963_v5  ;;  %v2241_v53 = vadd.f32 %v2225_v60, %v7966_v40  ;;  %v12439_v45 = vld [vmem:[#allocation80_spill] sm:$0xff]  ;;  %v12441_v55 = vld [vmem:[#allocation81_spill] sm:$0xff]  ;;  %v12442_v27 = vld [vmem:[#allocation98_spill] sm:$0xff] }
 0x202   : > { %v2263_v33 = vmul.f32 %v12434_v0, %v12433_v57  ;;  %v2264_v10 = vmul.f32 %v12434_v0, %v12435_v54  ;;  %v2265_v43 = vmul.f32 %v12434_v0, %v12436_v63  ;;  %v2266_v8 = vmul.f32 %v12434_v0, %v12437_v28  ;;  %v12443_v11 = vld [vmem:[#allocation82_spill] sm:$0xff]  ;;  %v12445_v59 = vld [vmem:[#allocation83_spill] sm:$0xff]  ;;  %v12446_v35 = vld [vmem:[#allocation100_spill] sm:$0xff] }
 0x203   : > { %v2267_v47 = vmul.f32 %v12434_v0, %v12438_v39  ;;  %v2268_v5 = vmul.f32 %v12434_v0, %v12439_v45  ;;  %v2269_v40 = vmul.f32 %v12434_v0, %v12440_v36  ;;  %v2270_v20 = vmul.f32 %v12434_v0, %v12441_v55  ;;  %v12447_v54 = vld [vmem:[#allocation84_spill] sm:$0xff]  ;;  %v12448_v45 = vld [vmem:[#allocation101_spill] sm:$0xff] }
 0x204   : > { %v2271_v62 = vmul.f32 %v12434_v0, %v12442_v27  ;;  %v2272_v7 = vmul.f32 %v12434_v0, %v12443_v11  ;;  %v2273_v22 = vmul.f32 %v12434_v0, %v12444_v2  ;;  %v2274_v60 = vmul.f32 %v12434_v0, %v12445_v59  ;;  %v12449_v39 = vld [vmem:[#allocation85_spill] sm:$0xff] }
 0x205   : > { %v2275_v57 = vmul.f32 %v12434_v0, %v12446_v35  ;;  %v2276_v36 = vmul.f32 %v12434_v0, %v12447_v54  ;;  %v2277_v55 = vmul.f32 %v12434_v0, %v12448_v45  ;;  %v2278_v27 = vmul.f32 %v12434_v0, %v12449_v39  ;;  %v12450_v45 = vld [vmem:[#allocation125_spill] sm:$0xff]  ;;  %v12452_v0 = vld [vmem:[#allocation110_spill] sm:$0xff] }
 0x206   : > { %v2279_v28 = vadd.f32 %v2263_v33, %v2226_v38  ;;  %v2280_v11 = vadd.f32 %v2264_v10, %v2227_v19  ;;  %v2281_v63 = vadd.f32 %v2265_v43, %v2228_v61  ;;  %v2282_v46 = vadd.f32 %v2266_v8, %v2229_v18  ;;  %v12453_v61 = vld [vmem:[#allocation127_spill] sm:$0xff] }
 0x207   : > { %v2283_v2 = vadd.f32 %v2267_v47, %v2230_v29  ;;  %v2284_v21 = vadd.f32 %v2268_v5, %v2231_v1  ;;  %v2285_v49 = vadd.f32 %v2269_v40, %v2232_v15  ;;  %v2286_v59 = vadd.f32 %v2270_v20, %v2233_v17  ;;  %v12454_v38 = vld [vmem:[#allocation111_spill] sm:$0xff]  ;;  %v12456_v15 = vld [vmem:[#allocation112_spill] sm:$0xff]  ;;  %v12465_v20 = vld [vmem:[#allocation133_spill] sm:$0xff] }
 0x208   : > { %v2287_v13 = vadd.f32 %v2271_v62, %v2234_v44  ;;  %v2288_v31 = vadd.f32 %v2272_v7, %v2235_v25  ;;  %v2289_v35 = vadd.f32 %v2273_v22, %v2236_v48  ;;  %v2290_v23 = vadd.f32 %v2274_v60, %v2237_v58  ;;  %v12455_v44 = vld [vmem:[#allocation128_spill] sm:$0xff]  ;;  %v12457_v25 = vld [vmem:[#allocation129_spill] sm:$0xff]  ;;  %v12461_v10 = vld [vmem:[#allocation131_spill] sm:$0xff] }
 0x209   : > { %v2291_v52 = vadd.f32 %v2275_v57, %v2238_v34  ;;  %v2292_v54 = vadd.f32 %v2276_v36, %v2239_v51  ;;  %v2293_v41 = vadd.f32 %v2277_v55, %v2240_v12  ;;  %v2294_v6 = vadd.f32 %v2278_v27, %v2241_v53  ;;  %v12458_v58 = vld [vmem:[#allocation113_spill] sm:$0xff]  ;;  %v12459_v51 = vld [vmem:[#allocation130_spill] sm:$0xff]  ;;  %v12462_v8 = vld [vmem:[#allocation115_spill] sm:$0xff] }
 0x20a   : > { %v2316_v4 = vmul.f32 %v12451_v24, %v12450_v45  ;;  %v2317_v19 = vmul.f32 %v12451_v24, %v12452_v0  ;;  %v2318_v29 = vmul.f32 %v12451_v24, %v12453_v61  ;;  %v2319_v18 = vmul.f32 %v12451_v24, %v12454_v38  ;;  %v12460_v53 = vld [vmem:[#allocation114_spill] sm:$0xff]  ;;  %v12463_v5 = vld [vmem:[#allocation132_spill] sm:$0xff]  ;;  %v12466_v62 = vld [vmem:[#allocation117_spill] sm:$0xff] }
 0x20b   : > { %v2320_v1 = vmul.f32 %v12451_v24, %v12455_v44  ;;  %v2321_v17 = vmul.f32 %v12451_v24, %v12456_v15  ;;  %v2322_v48 = vmul.f32 %v12451_v24, %v12457_v25  ;;  %v2323_v34 = vmul.f32 %v12451_v24, %v12458_v58  ;;  %v12464_v40 = vld [vmem:[#allocation116_spill] sm:$0xff] }
 0x20c   : > { %v2324_v12 = vmul.f32 %v12451_v24, %v12459_v51  ;;  %v2325_v33 = vmul.f32 %v12451_v24, %v12460_v53  ;;  %v2326_v43 = vmul.f32 %v12451_v24, %v12461_v10  ;;  %v2327_v47 = vmul.f32 %v12451_v24, %v12462_v8 }
 0x20d   : > { %v2328_v36 = vmul.f32 %v12451_v24, %v12463_v5  ;;  %v2329_v55 = vmul.f32 %v12451_v24, %v12464_v40  ;;  %v2330_v27 = vmul.f32 %v12451_v24, %v12465_v20  ;;  %v2331_v7 = vmul.f32 %v12451_v24, %v12466_v62  ;;  %v12495_v24 = vld [vmem:[#allocation55_spill] sm:$0xff] }
 0x20e   : > { %v8160_v22 = vadd.f32 %v2316_v4, %v2279_v28  ;;  %v8162_v60 = vadd.f32 %v2317_v19, %v2280_v11  ;;  %v8164_v57 = vadd.f32 %v2318_v29, %v2281_v63  ;;  %v8166_v39 = vadd.f32 %v2319_v18, %v2282_v46 }
 0x20f   : > { %v8168_v3 = vadd.f32 %v2320_v1, %v2283_v2  ;;  %v8170_v14 = vadd.f32 %v2321_v17, %v2284_v21  ;;  %v8172_v32 = vadd.f32 %v2322_v48, %v2285_v49  ;;  %v8174_v50 = vadd.f32 %v2323_v34, %v2286_v59  ;;  %v12467_v49 = vld [vmem:[#allocation201_spill] sm:$0xff] }
 0x210   : > { %v8176_v9 = vadd.f32 %v2324_v12, %v2287_v13  ;;  %v8178_v37 = vadd.f32 %v2325_v33, %v2288_v31  ;;  %v8180_v4 = vadd.f32 %v2326_v43, %v2289_v35  ;;  %v8182_v28 = vadd.f32 %v2327_v47, %v2290_v23  ;;  %v12468_v43 = vld [vmem:[#allocation45_spill] sm:$0xff] }
 0x211   : > { %v8184_v63 = vadd.f32 %v2328_v36, %v2291_v52  ;;  %v8186_v46 = vadd.f32 %v2329_v55, %v2292_v54  ;;  %v8188_v11 = vadd.f32 %v2330_v27, %v2293_v41  ;;  %v8190_v21 = vadd.f32 %v2331_v7, %v2294_v6  ;;  %v12469_v36 = vld [vmem:[#allocation141_spill] sm:$0xff] }
 0x212   : > { %v2352_v2 = vmul.f32 %v12467_v49, %v12450_v45  ;;  %v2353_v13 = vmul.f32 %v12467_v49, %v12452_v0  ;;  %v2354_v31 = vmul.f32 %v12467_v49, %v12453_v61  ;;  %v2355_v23 = vmul.f32 %v12467_v49, %v12454_v38  ;;  %v12502_v61 = vld [vmem:[#allocation62_spill] sm:$0xff] }
 0x213   : > { %v2356_v52 = vmul.f32 %v12467_v49, %v12455_v44  ;;  %v2357_v41 = vmul.f32 %v12467_v49, %v12456_v15  ;;  %v2358_v6 = vmul.f32 %v12467_v49, %v12457_v25  ;;  %v2359_v45 = vmul.f32 %v12467_v49, %v12458_v58  ;;  %v12500_v25 = vld [vmem:[#allocation60_spill] sm:$0xff]  ;;  %v12501_v44 = vld [vmem:[#allocation61_spill] sm:$0xff] }
 0x214   : > { %v2360_v0 = vmul.f32 %v12467_v49, %v12459_v51  ;;  %v2361_v59 = vmul.f32 %v12467_v49, %v12460_v53  ;;  %v2362_v35 = vmul.f32 %v12467_v49, %v12461_v10  ;;  %v2363_v54 = vmul.f32 %v12467_v49, %v12462_v8  ;;  %v12498_v10 = vld [vmem:[#allocation58_spill] sm:$0xff]  ;;  %v12499_v51 = vld [vmem:[#allocation59_spill] sm:$0xff] }
 0x215   : > { %v2364_v19 = vmul.f32 %v12467_v49, %v12463_v5  ;;  %v2365_v29 = vmul.f32 %v12467_v49, %v12464_v40  ;;  %v2366_v18 = vmul.f32 %v12467_v49, %v12465_v20  ;;  %v2367_v1 = vmul.f32 %v12467_v49, %v12466_v62  ;;  %v12496_v20 = vld [vmem:[#allocation56_spill] sm:$0xff]  ;;  %v12497_v5 = vld [vmem:[#allocation57_spill] sm:$0xff] }
 0x216   : > { %v8225_v17 = vadd.f32 %v2352_v2, %v8001_v56  ;;  %v8228_v48 = vadd.f32 %v2353_v13, %v8004_v26  ;;  %v8231_v34 = vadd.f32 %v2354_v31, %v8007_v30  ;;  %v8234_v12 = vadd.f32 %v2355_v23, %v8010_v42  ;;  %v12470_v56 = vld [vmem:[#allocation156_spill] sm:$0xff]  ;;  %v12471_v26 = vld [vmem:[#allocation205_spill] sm:$0xff]  ;;  %v12478_v23 = vld [vmem:[#allocation191_spill] sm:$0xff] }
 0x217   : > { %v8237_v33 = vadd.f32 %v2356_v52, %v8013_v16  ;;  %v8240_v47 = vadd.f32 %v2357_v41, %v12468_v43  ;;  %v8243_v55 = vadd.f32 %v2358_v6, %v12469_v36  ;;  %v8246_v27 = vadd.f32 %v2359_v45, %v12470_v56  ;;  %v12472_v30 = vld [vmem:[#allocation36_spill] sm:$0xff]  ;;  %v12476_v16 = vld [vmem:[#allocation190_spill] sm:$0xff]  ;;  %v12482_v45 = vld [vmem:[#allocation43_spill] sm:$0xff] }
 0x218   : > { %v8249_v7 = vadd.f32 %v2360_v0, %v12471_v26  ;;  %v8252_v2 = vadd.f32 %v2361_v59, %v12472_v30  ;;  %v12474_v42 = vld [vmem:[#allocation40_spill] sm:$0xff]  ;;  %v8258_v31 = vadd.f32 %v2363_v54, %v12476_v16  ;;  %v8261_v52 = vadd.f32 %v2364_v19, %v12478_v23  ;;  %v12484_v0 = vld [vmem:[#allocation46_spill] sm:$0xff]  ;;  %v12486_v59 = vld [vmem:[#allocation47_spill] sm:$0xff] }
 0x219   : > { %v8255_v13 = vadd.f32 %v2362_v35, %v12474_v42  ;;  %v12480_v41 = vld [vmem:[#allocation192_spill] sm:$0xff]  ;;  %v8267_v43 = vadd.f32 %v2366_v18, %v12482_v45  ;;  %v8270_v36 = vadd.f32 %v2367_v1, %v12484_v0  ;;  %v12487_v56 = vld [vmem:[#allocation202_spill] sm:$0xff]  ;;  %v12489_v54 = vld [vmem:[#allocation49_spill] sm:$0xff] }
 0x21a   : > { %12473 = vst [vmem:[#allocation170_spill] sm:$0xff] %v8252_v2  ;;  %12477 = vst [vmem:[#allocation93_spill] sm:$0xff] %v8258_v31  ;;  %v8264_v6 = vadd.f32 %v2365_v29, %v12480_v41  ;;  %v2405_v26 = vmul.f32 %v12487_v56, %v12486_v59  ;;  %v12488_v35 = vld [vmem:[#allocation48_spill] sm:$0xff]  ;;  %v2407_v42 = vmul.f32 %v12487_v56, %v12489_v54  ;;  %v12490_v19 = vld [vmem:[#allocation50_spill] sm:$0xff] }
 0x21b   : > { %12475 = vst [vmem:[#allocation180_spill] sm:$0xff] %v8255_v13  ;;  %12479 = vst [vmem:[#allocation78_spill] sm:$0xff] %v8261_v52  ;;  %v2406_v30 = vmul.f32 %v12487_v56, %v12488_v35  ;;  %v2408_v16 = vmul.f32 %v12487_v56, %v12490_v19  ;;  %v12491_v29 = vld [vmem:[#allocation51_spill] sm:$0xff]  ;;  %v12492_v18 = vld [vmem:[#allocation52_spill] sm:$0xff]  ;;  %v2413_v62 = vmul.f32 %v12487_v56, %v12495_v24 }
 0x21c   : > { %12481 = vst [vmem:[#allocation125_spill] sm:$0xff] %v8264_v6  ;;  %12483 = vst [vmem:[#allocation110_spill] sm:$0xff] %v8267_v43  ;;  %v2409_v23 = vmul.f32 %v12487_v56, %v12491_v29  ;;  %v2410_v41 = vmul.f32 %v12487_v56, %v12492_v18  ;;  %v12493_v1 = vld [vmem:[#allocation53_spill] sm:$0xff]  ;;  %v12494_v0 = vld [vmem:[#allocation54_spill] sm:$0xff]  ;;  %v2414_v40 = vmul.f32 %v12487_v56, %v12496_v20 }
 0x21d   : > { %12485 = vst [vmem:[#allocation45_spill] sm:$0xff] %v8270_v36  ;;  %v2411_v45 = vmul.f32 %v12487_v56, %v12493_v1  ;;  %v2412_v49 = vmul.f32 %v12487_v56, %v12494_v0  ;;  %v2415_v8 = vmul.f32 %v12487_v56, %v12497_v5  ;;  %v2416_v53 = vmul.f32 %v12487_v56, %v12498_v10 }
 0x21e   : > { %v2417_v58 = vmul.f32 %v12487_v56, %v12499_v51  ;;  %v2418_v15 = vmul.f32 %v12487_v56, %v12500_v25  ;;  %v2419_v38 = vmul.f32 %v12487_v56, %v12501_v44  ;;  %v2420_v36 = vmul.f32 %v12487_v56, %v12502_v61 }
 0x21f   : > { %v8305_v43 = vadd.f32 %v2405_v26, %v8160_v22  ;;  %v8308_v6 = vadd.f32 %v2406_v30, %v8162_v60  ;;  %v8311_v52 = vadd.f32 %v2407_v42, %v8164_v57  ;;  %v8314_v31 = vadd.f32 %v2408_v16, %v8166_v39  ;;  %v1238_v16 = vld [vmem:[#allocation14 + $0x20] sm:$0x1f] }
 0x220   : > { %v8317_v13 = vadd.f32 %v2409_v23, %v8168_v3  ;;  %v8320_v2 = vadd.f32 %v2410_v41, %v8170_v14  ;;  %v8323_v56 = vadd.f32 %v2411_v45, %v8172_v32  ;;  %v8326_v22 = vadd.f32 %v2412_v49, %v8174_v50 }
 0x221   : > { %v8329_v60 = vadd.f32 %v2413_v62, %v8176_v9  ;;  %v8332_v57 = vadd.f32 %v2414_v40, %v8178_v37  ;;  %v8335_v39 = vadd.f32 %v2415_v8, %v8180_v4  ;;  %v8338_v3 = vadd.f32 %v2416_v53, %v8182_v28  ;;  %v12503_v37 = vld [vmem:[#allocation41_spill] sm:$0xff] }
 0x222   : > { %v8341_v14 = vadd.f32 %v2417_v58, %v8184_v63  ;;  %v8344_v32 = vadd.f32 %v2418_v15, %v8186_v46  ;;  %v8347_v50 = vadd.f32 %v2419_v38, %v8188_v11  ;;  %v8350_v9 = vadd.f32 %v2420_v36, %v8190_v21 }
 0x223   : > { %v2441_v40 = vmul.f32 %v12503_v37, %v12486_v59  ;;  %v2442_v8 = vmul.f32 %v12503_v37, %v12488_v35  ;;  %v2443_v53 = vmul.f32 %v12503_v37, %v12489_v54  ;;  %v2444_v58 = vmul.f32 %v12503_v37, %v12490_v19  ;;  %v12546_v19 = vld [vmem:[#allocation148_spill] sm:$0xff] }
 0x224   : > { %v2445_v15 = vmul.f32 %v12503_v37, %v12491_v29  ;;  %v2446_v38 = vmul.f32 %v12503_v37, %v12492_v18  ;;  %v2447_v62 = vmul.f32 %v12503_v37, %v12493_v1  ;;  %v2448_v4 = vmul.f32 %v12503_v37, %v12494_v0  ;;  %v12544_v0 = vld [vmem:[#allocation147_spill] sm:$0xff]  ;;  %v12547_v54 = vld [vmem:[#allocation164_spill] sm:$0xff] }
 0x225   : > { %v2449_v28 = vmul.f32 %v12503_v37, %v12495_v24  ;;  %v2450_v63 = vmul.f32 %v12503_v37, %v12496_v20  ;;  %v2451_v46 = vmul.f32 %v12503_v37, %v12497_v5  ;;  %v2452_v11 = vmul.f32 %v12503_v37, %v12498_v10  ;;  %v12542_v10 = vld [vmem:[#allocation146_spill] sm:$0xff]  ;;  %v12545_v18 = vld [vmem:[#allocation163_spill] sm:$0xff] }
 0x226   : > { %v2453_v21 = vmul.f32 %v12503_v37, %v12499_v51  ;;  %v2454_v49 = vmul.f32 %v12503_v37, %v12500_v25  ;;  %v2455_v36 = vmul.f32 %v12503_v37, %v12501_v44  ;;  %v2456_v59 = vmul.f32 %v12503_v37, %v12502_v61  ;;  %v12543_v20 = vld [vmem:[#allocation162_spill] sm:$0xff] }
 0x227   : > { %v8385_v26 = vadd.f32 %v2441_v40, %v8225_v17  ;;  %v8388_v35 = vadd.f32 %v2442_v8, %v8228_v48  ;;  %v8391_v30 = vadd.f32 %v2443_v53, %v8231_v34  ;;  %v8394_v42 = vadd.f32 %v2444_v58, %v8234_v12  ;;  %v12505_v34 = vld [vmem:[#allocation170_spill] sm:$0xff]  ;;  %v12507_v12 = vld [vmem:[#allocation180_spill] sm:$0xff] }
 0x228   : > { %v8397_v23 = vadd.f32 %v2445_v15, %v8237_v33  ;;  %v8400_v41 = vadd.f32 %v2446_v38, %v8240_v47  ;;  %v8403_v45 = vadd.f32 %v2447_v62, %v8243_v55  ;;  %v8406_v17 = vadd.f32 %v2448_v4, %v8246_v27  ;;  %v12509_v33 = vld [vmem:[#allocation93_spill] sm:$0xff]  ;;  %v12511_v47 = vld [vmem:[#allocation78_spill] sm:$0xff]  ;;  %v12519_v4 = vld [vmem:[#allocation31_spill] sm:$0xff] }
 0x229   : > { %v8409_v48 = vadd.f32 %v2449_v28, %v8249_v7  ;;  %v8412_v40 = vadd.f32 %v2450_v63, %v12505_v34  ;;  %v8415_v8 = vadd.f32 %v2451_v46, %v12507_v12  ;;  %v8418_v53 = vadd.f32 %v2452_v11, %v12509_v33  ;;  %v12513_v55 = vld [vmem:[#allocation125_spill] sm:$0xff]  ;;  %v12515_v27 = vld [vmem:[#allocation110_spill] sm:$0xff]  ;;  %v12520_v28 = vld [vmem:[#allocation203_spill] sm:$0xff] }
 0x22a   : > { %v8421_v58 = vadd.f32 %v2453_v21, %v12511_v47  ;;  %v8424_v15 = vadd.f32 %v2454_v49, %v12513_v55  ;;  %v8427_v38 = vadd.f32 %v2455_v36, %v12515_v27  ;;  %v12517_v7 = vld [vmem:[#allocation45_spill] sm:$0xff]  ;;  %v8434_v63 = vrot.slane %v12520_v28, %v12519_v4  ;;  %v12523_v34 = vld [vmem:[#allocation204_spill] sm:$0xff]  ;;  %v12529_v36 = vld [vmem:[#allocation26_spill] sm:$0xff] }
 0x22b   : > { %12504 = vst [vmem:[#allocation141_spill] sm:$0xff] %v8409_v48  ;;  %12506 = vst [vmem:[#allocation156_spill] sm:$0xff] %v8412_v40  ;;  %v8430_v62 = vadd.f32 %v2456_v59, %v12517_v7  ;;  %v12522_v46 = vld [vmem:[#allocation29_spill] sm:$0xff]  ;;  %v8448_v47 = vrot.slane %v1238_v16, %v12529_v36  ;;  %v8454_v55 = vrot.slane %v1238_v16, %v12519_v4  ;;  %v12534_v7 = vld [vmem:[#allocation142_spill] sm:$0xff] }
 0x22c   : > { %12508 = vst [vmem:[#allocation205_spill] sm:$0xff] %v8415_v8  ;;  %12510 = vst [vmem:[#allocation36_spill] sm:$0xff] %v8418_v53  ;;  %v8438_v11 = vrot.slane %v12523_v34, %v12522_v46  ;;  %v12525_v12 = vld [vmem:[#allocation33_spill] sm:$0xff]  ;;  %v8451_v59 = vrot.slane %v1238_v16, %v12522_v46  ;;  %v2494_v34 = vmul.f32 %v8434_v63, %v12534_v7  ;;  %v12537_v36 = vld [vmem:[#allocation159_spill] sm:$0xff] }
 0x22d   : > { %12512 = vst [vmem:[#allocation40_spill] sm:$0xff] %v8421_v58  ;;  %12514 = vst [vmem:[#allocation190_spill] sm:$0xff] %v8424_v15  ;;  %v8442_v21 = vrot.slane %v12520_v28, %v12525_v12  ;;  %v12527_v49 = vld [vmem:[#allocation25_spill] sm:$0xff]  ;;  %v8457_v27 = vrot.slane %v1238_v16, %v12525_v12  ;;  %v2497_v44 = vmul.f32 %v8434_v63, %v12537_v36  ;;  %v12538_v46 = vld [vmem:[#allocation144_spill] sm:$0xff] }
 0x22e   : > { %12516 = vst [vmem:[#allocation191_spill] sm:$0xff] %v8427_v38  ;;  %12518 = vst [vmem:[#allocation192_spill] sm:$0xff] %v8430_v62  ;;  %v8445_v33 = vrot.slane %v1238_v16, %v12527_v49  ;;  %v12535_v28 = vld [vmem:[#allocation157_spill] sm:$0xff]  ;;  %v12536_v49 = vld [vmem:[#allocation143_spill] sm:$0xff]  ;;  %v2498_v25 = vmul.f32 %v8434_v63, %v12538_v46  ;;  %v2502_v5 = vmul.f32 %v8434_v63, %v12542_v10 }
 0x22f   : > { %12521 = vst [vmem:[#allocation43_spill] sm:$0xff] %v8434_v63  ;;  %12524 = vst [vmem:[#allocation46_spill] sm:$0xff] %v8438_v11  ;;  %v2495_v37 = vmul.f32 %v8434_v63, %v12535_v28  ;;  %v2496_v61 = vmul.f32 %v8434_v63, %v12536_v49  ;;  %v12539_v4 = vld [vmem:[#allocation160_spill] sm:$0xff]  ;;  %v12540_v16 = vld [vmem:[#allocation145_spill] sm:$0xff]  ;;  %v2503_v24 = vmul.f32 %v8434_v63, %v12543_v20 }
 0x230   : > { %12526 = vst [vmem:[#allocation47_spill] sm:$0xff] %v8442_v21  ;;  %12528 = vst [vmem:[#allocation48_spill] sm:$0xff] %v8445_v33  ;;  %v2500_v12 = vmul.f32 %v8434_v63, %v12540_v16  ;;  %v2504_v1 = vmul.f32 %v8434_v63, %v12544_v0  ;;  %v2505_v29 = vmul.f32 %v8434_v63, %v12545_v18  ;;  %v12548_v33 = vld [vmem:[#allocation149_spill] sm:$0xff] }
 0x231   : > { %12530 = vst [vmem:[#allocation170_spill] sm:$0xff] %v8448_v47  ;;  %12531 = vst [vmem:[#allocation180_spill] sm:$0xff] %v8451_v59  ;;  %v2506_v59 = vmul.f32 %v8434_v63, %v12546_v19  ;;  %v2507_v47 = vmul.f32 %v8434_v63, %v12547_v54  ;;  %v2508_v21 = vmul.f32 %v8434_v63, %v12548_v33  ;;  %v12549_v62 = vld [vmem:[#allocation165_spill] sm:$0xff] }
 0x232   : > { %12532 = vst [vmem:[#allocation93_spill] sm:$0xff] %v8454_v55  ;;  %12533 = vst [vmem:[#allocation78_spill] sm:$0xff] %v8457_v27  ;;  %v2499_v55 = vmul.f32 %v8434_v63, %v12539_v4  ;;  %v12541_v27 = vld [vmem:[#allocation161_spill] sm:$0xff]  ;;  %v2509_v38 = vmul.f32 %v8434_v63, %v12549_v62  ;;  %v8492_v15 = vadd.f32 %v2494_v34, %v8305_v43 }
 0x233   : > { %v2501_v51 = vmul.f32 %v8434_v63, %v12541_v27  ;;  %v8495_v58 = vadd.f32 %v2495_v37, %v8308_v6  ;;  %v8498_v53 = vadd.f32 %v2496_v61, %v8311_v52  ;;  %v8501_v8 = vadd.f32 %v2497_v44, %v8314_v31 }
 0x234   : > { %v8504_v40 = vadd.f32 %v2498_v25, %v8317_v13  ;;  %v8507_v48 = vadd.f32 %v2499_v55, %v8320_v2  ;;  %v8510_v63 = vadd.f32 %v2500_v12, %v8323_v56  ;;  %v8516_v6 = vadd.f32 %v2502_v5, %v8329_v60 }
 0x235   : > { %v8513_v43 = vadd.f32 %v2501_v51, %v8326_v22  ;;  %v8519_v61 = vadd.f32 %v2503_v24, %v8332_v57  ;;  %v8522_v44 = vadd.f32 %v2504_v1, %v8335_v39  ;;  %v8525_v25 = vadd.f32 %v2505_v29, %v8338_v3 }
 0x236   : > { %v8528_v2 = vadd.f32 %v2506_v59, %v8341_v14  ;;  %v8531_v13 = vadd.f32 %v2507_v47, %v8344_v32  ;;  %v8534_v51 = vadd.f32 %v2508_v21, %v8347_v50  ;;  %v8537_v5 = vadd.f32 %v2509_v38, %v8350_v9 }
 0x237   : > { %v2530_v24 = vmul.f32 %v8438_v11, %v12534_v7  ;;  %v2531_v31 = vmul.f32 %v8438_v11, %v12535_v28  ;;  %v2532_v52 = vmul.f32 %v8438_v11, %v12536_v49  ;;  %v2533_v56 = vmul.f32 %v8438_v11, %v12537_v36 }
 0x238   : > { %v2534_v29 = vmul.f32 %v8438_v11, %v12538_v46  ;;  %v2535_v1 = vmul.f32 %v8438_v11, %v12539_v4  ;;  %v2536_v22 = vmul.f32 %v8438_v11, %v12540_v16  ;;  %v2537_v60 = vmul.f32 %v8438_v11, %v12541_v27 }
 0x239   : > { %v2538_v57 = vmul.f32 %v8438_v11, %v12542_v10  ;;  %v2539_v39 = vmul.f32 %v8438_v11, %v12543_v20  ;;  %v2540_v3 = vmul.f32 %v8438_v11, %v12544_v0  ;;  %v2541_v14 = vmul.f32 %v8438_v11, %v12545_v18 }
 0x23a   : > { %v2542_v32 = vmul.f32 %v8438_v11, %v12546_v19  ;;  %v2543_v50 = vmul.f32 %v8438_v11, %v12547_v54  ;;  %v2544_v9 = vmul.f32 %v8438_v11, %v12548_v33  ;;  %v2545_v37 = vmul.f32 %v8438_v11, %v12549_v62  ;;  %v12584_v11 = vld [vmem:[#allocation185_spill] sm:$0xff]  ;;  %v12609_v33 = vld [vmem:[#allocation170_spill] sm:$0xff] }
 0x23b   : > { %v8572_v38 = vadd.f32 %v2530_v24, %v8385_v26  ;;  %v8575_v21 = vadd.f32 %v2531_v31, %v8388_v35  ;;  %v8578_v47 = vadd.f32 %v2532_v52, %v8391_v30  ;;  %v8581_v59 = vadd.f32 %v2533_v56, %v8394_v42  ;;  %v12558_v35 = vld [vmem:[#allocation141_spill] sm:$0xff]  ;;  %v12560_v30 = vld [vmem:[#allocation156_spill] sm:$0xff] }
 0x23c   : > { %v8584_v55 = vadd.f32 %v2534_v29, %v8397_v23  ;;  %v8587_v7 = vadd.f32 %v2535_v1, %v8400_v41  ;;  %v8590_v34 = vadd.f32 %v2536_v22, %v8403_v45  ;;  %v8593_v26 = vadd.f32 %v2537_v60, %v8406_v17  ;;  %v12562_v42 = vld [vmem:[#allocation205_spill] sm:$0xff]  ;;  %v12564_v23 = vld [vmem:[#allocation36_spill] sm:$0xff]  ;;  %v12568_v45 = vld [vmem:[#allocation190_spill] sm:$0xff] }
 0x23d   : > { %12550 = vst [vmem:[#allocation125_spill] sm:$0xff] %v8572_v38  ;;  %12551 = vst [vmem:[#allocation110_spill] sm:$0xff] %v8575_v21  ;;  %v8596_v28 = vadd.f32 %v2538_v57, %v12558_v35  ;;  %v8599_v12 = vadd.f32 %v2539_v39, %v12560_v30  ;;  %v8602_v24 = vadd.f32 %v2540_v3, %v12562_v42  ;;  %v12566_v41 = vld [vmem:[#allocation40_spill] sm:$0xff]  ;;  %v12570_v17 = vld [vmem:[#allocation191_spill] sm:$0xff] }
 0x23e   : > { %12552 = vst [vmem:[#allocation45_spill] sm:$0xff] %v8578_v47  ;;  %12553 = vst [vmem:[#allocation31_spill] sm:$0xff] %v8581_v59  ;;  %v8605_v31 = vadd.f32 %v2541_v14, %v12564_v23  ;;  %v8608_v52 = vadd.f32 %v2542_v32, %v12566_v41  ;;  %v8611_v56 = vadd.f32 %v2543_v50, %v12568_v45  ;;  %v12572_v1 = vld [vmem:[#allocation192_spill] sm:$0xff]  ;;  %v12574_v60 = vld [vmem:[#allocation171_spill] sm:$0xff] }
 0x23f   : > { %12554 = vst [vmem:[#allocation203_spill] sm:$0xff] %v8584_v55  ;;  %12555 = vst [vmem:[#allocation29_spill] sm:$0xff] %v8587_v7  ;;  %v8614_v29 = vadd.f32 %v2544_v9, %v12570_v17  ;;  %v8617_v22 = vadd.f32 %v2545_v37, %v12572_v1  ;;  %v12575_v57 = vld [vmem:[#allocation47_spill] sm:$0xff]  ;;  %v12576_v3 = vld [vmem:[#allocation181_spill] sm:$0xff] }
 0x240   : > { %12556 = vst [vmem:[#allocation204_spill] sm:$0xff] %v8590_v34  ;;  %12557 = vst [vmem:[#allocation33_spill] sm:$0xff] %v8593_v26  ;;  %v2583_v39 = vmul.f32 %v12575_v57, %v12574_v60  ;;  %v2584_v35 = vmul.f32 %v12575_v57, %v12576_v3  ;;  %v12577_v14 = vld [vmem:[#allocation172_spill] sm:$0xff]  ;;  %v12578_v32 = vld [vmem:[#allocation182_spill] sm:$0xff] }
 0x241   : > { %12559 = vst [vmem:[#allocation26_spill] sm:$0xff] %v8596_v28  ;;  %12561 = vst [vmem:[#allocation142_spill] sm:$0xff] %v8599_v12  ;;  %v2585_v30 = vmul.f32 %v12575_v57, %v12577_v14  ;;  %v2586_v42 = vmul.f32 %v12575_v57, %v12578_v32  ;;  %v12579_v50 = vld [vmem:[#allocation173_spill] sm:$0xff]  ;;  %v12580_v9 = vld [vmem:[#allocation183_spill] sm:$0xff] }
 0x242   : > { %12563 = vst [vmem:[#allocation157_spill] sm:$0xff] %v8602_v24  ;;  %12565 = vst [vmem:[#allocation143_spill] sm:$0xff] %v8605_v31  ;;  %v2587_v23 = vmul.f32 %v12575_v57, %v12579_v50  ;;  %v2588_v41 = vmul.f32 %v12575_v57, %v12580_v9  ;;  %v12581_v37 = vld [vmem:[#allocation174_spill] sm:$0xff]  ;;  %v12582_v17 = vld [vmem:[#allocation184_spill] sm:$0xff]  ;;  %v2599_v47 = vadd.f32 %v2583_v39, %v8492_v15 }
 0x243   : > { %12567 = vst [vmem:[#allocation159_spill] sm:$0xff] %v8608_v52  ;;  %12569 = vst [vmem:[#allocation144_spill] sm:$0xff] %v8611_v56  ;;  %v2589_v45 = vmul.f32 %v12575_v57, %v12581_v37  ;;  %v2590_v1 = vmul.f32 %v12575_v57, %v12582_v17  ;;  %v12583_v60 = vld [vmem:[#allocation175_spill] sm:$0xff]  ;;  %v12586_v52 = vld [vmem:[#allocation186_spill] sm:$0xff]  ;;  %v2600_v21 = vadd.f32 %v2584_v35, %v8495_v58 }
 0x244   : > { %12571 = vst [vmem:[#allocation160_spill] sm:$0xff] %v8614_v29  ;;  %12573 = vst [vmem:[#allocation145_spill] sm:$0xff] %v8617_v22  ;;  %v2591_v3 = vmul.f32 %v12575_v57, %v12583_v60  ;;  %v2592_v22 = vmul.f32 %v12575_v57, %v12584_v11  ;;  %v12585_v29 = vld [vmem:[#allocation176_spill] sm:$0xff]  ;;  %v2594_v31 = vmul.f32 %v12575_v57, %v12586_v52  ;;  %v12587_v24 = vld [vmem:[#allocation177_spill] sm:$0xff] }
 0x245   : > { %v2593_v56 = vmul.f32 %v12575_v57, %v12585_v29  ;;  %v2595_v12 = vmul.f32 %v12575_v57, %v12587_v24  ;;  %v12588_v28 = vld [vmem:[#allocation187_spill] sm:$0xff]  ;;  %v12589_v34 = vld [vmem:[#allocation178_spill] sm:$0xff]  ;;  %v12590_v55 = vld [vmem:[#allocation188_spill] sm:$0xff]  ;;  %v2601_v38 = vadd.f32 %v2585_v30, %v8498_v53  ;;  %v2602_v52 = vadd.f32 %v2586_v42, %v8501_v8 }
 0x246   : > { %v2596_v26 = vmul.f32 %v12575_v57, %v12588_v28  ;;  %v2597_v7 = vmul.f32 %v12575_v57, %v12589_v34  ;;  %v2598_v59 = vmul.f32 %v12575_v57, %v12590_v55  ;;  %v2603_v29 = vadd.f32 %v2587_v23, %v8504_v40  ;;  %v12591_v39 = vld [vmem:[#allocation95_spill] sm:$0xff]  ;;  %v12594_v30 = vld [vmem:[#allocation96_spill] sm:$0xff] }
 0x247   : > { %v2604_v24 = vadd.f32 %v2588_v41, %v8507_v48  ;;  %v2605_v28 = vadd.f32 %v2589_v45, %v8510_v63  ;;  %v2606_v11 = vadd.f32 %v2590_v1, %v8513_v43  ;;  %v2607_v34 = vadd.f32 %v2591_v3, %v8516_v6  ;;  %v12592_v63 = vld [vmem:[#allocation48_spill] sm:$0xff]  ;;  %v12593_v43 = vld [vmem:[#allocation79_spill] sm:$0xff]  ;;  %v12604_v3 = vld [vmem:[#allocation101_spill] sm:$0xff] }
 0x248   : > { %v2608_v57 = vadd.f32 %v2592_v22, %v8519_v61  ;;  %v2609_v15 = vadd.f32 %v2593_v56, %v8522_v44  ;;  %v2610_v58 = vadd.f32 %v2594_v31, %v8525_v25  ;;  %v2611_v53 = vadd.f32 %v2595_v12, %v8528_v2  ;;  %v12595_v44 = vld [vmem:[#allocation80_spill] sm:$0xff]  ;;  %v12596_v31 = vld [vmem:[#allocation97_spill] sm:$0xff]  ;;  %v12600_v12 = vld [vmem:[#allocation99_spill] sm:$0xff] }
 0x249   : > { %v2612_v8 = vadd.f32 %v2596_v26, %v8531_v13  ;;  %v2613_v40 = vadd.f32 %v2597_v7, %v8534_v51  ;;  %v2614_v48 = vadd.f32 %v2598_v59, %v8537_v5  ;;  %v2636_v35 = vmul.f32 %v12592_v63, %v12591_v39  ;;  %v12597_v13 = vld [vmem:[#allocation81_spill] sm:$0xff]  ;;  %v12598_v7 = vld [vmem:[#allocation98_spill] sm:$0xff]  ;;  %v12601_v22 = vld [vmem:[#allocation83_spill] sm:$0xff] }
 0x24a   : > { %v2637_v6 = vmul.f32 %v12592_v63, %v12593_v43  ;;  %v2638_v61 = vmul.f32 %v12592_v63, %v12594_v30  ;;  %v2639_v25 = vmul.f32 %v12592_v63, %v12595_v44  ;;  %v2640_v2 = vmul.f32 %v12592_v63, %v12596_v31  ;;  %v12599_v59 = vld [vmem:[#allocation82_spill] sm:$0xff]  ;;  %v12602_v23 = vld [vmem:[#allocation100_spill] sm:$0xff]  ;;  %v12605_v43 = vld [vmem:[#allocation85_spill] sm:$0xff] }
 0x24b   : > { %v2641_v51 = vmul.f32 %v12592_v63, %v12597_v13  ;;  %v2642_v5 = vmul.f32 %v12592_v63, %v12598_v7  ;;  %v2643_v26 = vmul.f32 %v12592_v63, %v12599_v59  ;;  %v2644_v56 = vmul.f32 %v12592_v63, %v12600_v12  ;;  %v12603_v45 = vld [vmem:[#allocation84_spill] sm:$0xff]  ;;  %v12606_v44 = vld [vmem:[#allocation102_spill] sm:$0xff] }
 0x24c   : > { %v2645_v42 = vmul.f32 %v12592_v63, %v12601_v22  ;;  %v2646_v41 = vmul.f32 %v12592_v63, %v12602_v23  ;;  %v2647_v1 = vmul.f32 %v12592_v63, %v12603_v45  ;;  %v2648_v39 = vmul.f32 %v12592_v63, %v12604_v3  ;;  %v12607_v13 = vld [vmem:[#allocation86_spill] sm:$0xff] }
 0x24d   : > { %v2649_v30 = vmul.f32 %v12592_v63, %v12605_v43  ;;  %v2650_v31 = vmul.f32 %v12592_v63, %v12606_v44  ;;  %v2651_v7 = vmul.f32 %v12592_v63, %v12607_v13  ;;  %v2652_v59 = vadd.f32 %v2636_v35, %v2599_v47  ;;  %v12608_v44 = vld [vmem:[#allocation127_spill] sm:$0xff]  ;;  %v12619_v35 = vld [vmem:[#allocation132_spill] sm:$0xff] }
 0x24e   : > { %v2653_v22 = vadd.f32 %v2637_v6, %v2600_v21  ;;  %v2654_v12 = vadd.f32 %v2638_v61, %v2601_v38  ;;  %v2655_v55 = vadd.f32 %v2639_v25, %v2602_v52  ;;  %v2656_v23 = vadd.f32 %v2640_v2, %v2603_v29  ;;  %v12610_v63 = vld [vmem:[#allocation111_spill] sm:$0xff]  ;;  %v12611_v38 = vld [vmem:[#allocation128_spill] sm:$0xff]  ;;  %v12614_v52 = vld [vmem:[#allocation113_spill] sm:$0xff] }
 0x24f   : > { %v2657_v60 = vadd.f32 %v2641_v51, %v2604_v24  ;;  %v2658_v17 = vadd.f32 %v2642_v5, %v2605_v28  ;;  %v2659_v45 = vadd.f32 %v2643_v26, %v2606_v11  ;;  %v2660_v37 = vadd.f32 %v2644_v56, %v2607_v34  ;;  %v12612_v24 = vld [vmem:[#allocation112_spill] sm:$0xff]  ;;  %v12613_v34 = vld [vmem:[#allocation129_spill] sm:$0xff]  ;;  %v12623_v56 = vld [vmem:[#allocation134_spill] sm:$0xff] }
 0x250   : > { %v2661_v9 = vadd.f32 %v2645_v42, %v2608_v57  ;;  %v2662_v3 = vadd.f32 %v2646_v41, %v2609_v15  ;;  %v2663_v50 = vadd.f32 %v2647_v1, %v2610_v58  ;;  %v2664_v32 = vadd.f32 %v2648_v39, %v2611_v53  ;;  %v12615_v57 = vld [vmem:[#allocation130_spill] sm:$0xff]  ;;  %v12620_v61 = vld [vmem:[#allocation116_spill] sm:$0xff]  ;;  %v12621_v2 = vld [vmem:[#allocation133_spill] sm:$0xff] }
 0x251   : > { %v2665_v43 = vadd.f32 %v2649_v30, %v2612_v8  ;;  %v2666_v14 = vadd.f32 %v2650_v31, %v2613_v40  ;;  %v2667_v62 = vadd.f32 %v2651_v7, %v2614_v48  ;;  %v2689_v54 = vmul.f32 %v12609_v33, %v12608_v44  ;;  %v12616_v58 = vld [vmem:[#allocation114_spill] sm:$0xff]  ;;  %v12617_v8 = vld [vmem:[#allocation131_spill] sm:$0xff]  ;;  %v12622_v5 = vld [vmem:[#allocation117_spill] sm:$0xff] }
 0x252   : > { %v2690_v21 = vmul.f32 %v12609_v33, %v12610_v63  ;;  %v2691_v47 = vmul.f32 %v12609_v33, %v12611_v38  ;;  %v2692_v11 = vmul.f32 %v12609_v33, %v12612_v24  ;;  %v2693_v28 = vmul.f32 %v12609_v33, %v12613_v34  ;;  %v12618_v48 = vld [vmem:[#allocation115_spill] sm:$0xff]  ;;  %v12624_v41 = vld [vmem:[#allocation118_spill] sm:$0xff] }
 0x253   : > { %v2694_v29 = vmul.f32 %v12609_v33, %v12614_v52  ;;  %v2695_v15 = vmul.f32 %v12609_v33, %v12615_v57  ;;  %v2696_v53 = vmul.f32 %v12609_v33, %v12616_v58  ;;  %v2697_v40 = vmul.f32 %v12609_v33, %v12617_v8  ;;  %v12626_v8 = vld [vmem:[#allocation180_spill] sm:$0xff] }
 0x254   : > { %v2698_v63 = vmul.f32 %v12609_v33, %v12618_v48  ;;  %v2699_v6 = vmul.f32 %v12609_v33, %v12619_v35  ;;  %v2700_v25 = vmul.f32 %v12609_v33, %v12620_v61  ;;  %v2701_v51 = vmul.f32 %v12609_v33, %v12621_v2 }
 0x255   : > { %v2702_v26 = vmul.f32 %v12609_v33, %v12622_v5  ;;  %v2703_v42 = vmul.f32 %v12609_v33, %v12623_v56  ;;  %v2704_v1 = vmul.f32 %v12609_v33, %v12624_v41  ;;  %v2705_v39 = vadd.f32 %v2689_v54, %v2652_v59  ;;  %v12625_v56 = vld [vmem:[#allocation49_spill] sm:$0xff]  ;;  %v12627_v33 = vld [vmem:[#allocation50_spill] sm:$0xff]  ;;  %v12636_v59 = vld [vmem:[#allocation59_spill] sm:$0xff] }
 0x256   : > { %v2706_v30 = vadd.f32 %v2690_v21, %v2653_v22  ;;  %v2707_v44 = vadd.f32 %v2691_v47, %v2654_v12  ;;  %v2708_v31 = vadd.f32 %v2692_v11, %v2655_v55  ;;  %v2709_v7 = vadd.f32 %v2693_v28, %v2656_v23  ;;  %v12628_v12 = vld [vmem:[#allocation51_spill] sm:$0xff]  ;;  %v12633_v22 = vld [vmem:[#allocation56_spill] sm:$0xff]  ;;  %v12638_v28 = vld [vmem:[#allocation61_spill] sm:$0xff] }
 0x257   : > { %v2710_v38 = vadd.f32 %v2694_v29, %v2657_v60  ;;  %v2711_v24 = vadd.f32 %v2695_v15, %v2658_v17  ;;  %v2712_v34 = vadd.f32 %v2696_v53, %v2659_v45  ;;  %v2713_v52 = vadd.f32 %v2697_v40, %v2660_v37  ;;  %v12629_v60 = vld [vmem:[#allocation52_spill] sm:$0xff]  ;;  %v12630_v37 = vld [vmem:[#allocation53_spill] sm:$0xff]  ;;  %v12639_v15 = vld [vmem:[#allocation62_spill] sm:$0xff] }
 0x258   : > { %v2714_v57 = vadd.f32 %v2698_v63, %v2661_v9  ;;  %v2715_v58 = vadd.f32 %v2699_v6, %v2662_v3  ;;  %v2716_v2 = vadd.f32 %v2700_v25, %v2663_v50  ;;  %v2717_v61 = vadd.f32 %v2701_v51, %v2664_v32  ;;  %v12631_v50 = vld [vmem:[#allocation54_spill] sm:$0xff]  ;;  %v12634_v45 = vld [vmem:[#allocation57_spill] sm:$0xff]  ;;  %v12637_v47 = vld [vmem:[#allocation60_spill] sm:$0xff] }
 0x259   : > { %v2718_v5 = vadd.f32 %v2702_v26, %v2665_v43  ;;  %v2719_v35 = vadd.f32 %v2703_v42, %v2666_v14  ;;  %v2720_v48 = vadd.f32 %v2704_v1, %v2667_v62  ;;  %v2742_v13 = vmul.f32 %v12626_v8, %v12625_v56  ;;  %v12632_v14 = vld [vmem:[#allocation55_spill] sm:$0xff]  ;;  %v12635_v3 = vld [vmem:[#allocation58_spill] sm:$0xff]  ;;  %v12641_v6 = vld [vmem:[#allocation64_spill] sm:$0xff] }
 0x25a   : > { %v2743_v54 = vmul.f32 %v12626_v8, %v12627_v33  ;;  %v2744_v55 = vmul.f32 %v12626_v8, %v12628_v12  ;;  %v2745_v17 = vmul.f32 %v12626_v8, %v12629_v60  ;;  %v2746_v9 = vmul.f32 %v12626_v8, %v12630_v37  ;;  %v12640_v40 = vld [vmem:[#allocation63_spill] sm:$0xff] }
 0x25b   : > { %v2747_v32 = vmul.f32 %v12626_v8, %v12631_v50  ;;  %v2748_v62 = vmul.f32 %v12626_v8, %v12632_v14  ;;  %v2749_v23 = vmul.f32 %v12626_v8, %v12633_v22  ;;  %v2750_v33 = vmul.f32 %v12626_v8, %v12634_v45 }
 0x25c   : > { %v2751_v43 = vmul.f32 %v12626_v8, %v12635_v3  ;;  %v2752_v21 = vmul.f32 %v12626_v8, %v12636_v59  ;;  %v2753_v11 = vmul.f32 %v12626_v8, %v12637_v47  ;;  %v2754_v29 = vmul.f32 %v12626_v8, %v12638_v28 }
 0x25d   : > { %v2755_v53 = vmul.f32 %v12626_v8, %v12639_v15  ;;  %v2756_v63 = vmul.f32 %v12626_v8, %v12640_v40  ;;  %v2757_v25 = vmul.f32 %v12626_v8, %v12641_v6  ;;  %v2758_v51 = vadd.f32 %v2742_v13, %v2705_v39  ;;  %v12642_v40 = vld [vmem:[#allocation93_spill] sm:$0xff] }
 0x25e   : > { %v2759_v26 = vadd.f32 %v2743_v54, %v2706_v30  ;;  %v2760_v56 = vadd.f32 %v2744_v55, %v2707_v44  ;;  %v2761_v42 = vadd.f32 %v2745_v17, %v2708_v31  ;;  %v2762_v1 = vadd.f32 %v2746_v9, %v2709_v7  ;;  %v12646_v31 = vld [vmem:[#allocation150_spill] sm:$0xff] }
 0x25f   : > { %v2763_v12 = vadd.f32 %v2747_v32, %v2710_v38  ;;  %v2764_v60 = vadd.f32 %v2748_v62, %v2711_v24  ;;  %v2765_v37 = vadd.f32 %v2749_v23, %v2712_v34  ;;  %v2766_v50 = vadd.f32 %v2750_v33, %v2713_v52  ;;  %v12647_v7 = vld [vmem:[#allocation166_spill] sm:$0xff] }
 0x260   : > { %v2767_v14 = vadd.f32 %v2751_v43, %v2714_v57  ;;  %v2768_v22 = vadd.f32 %v2752_v21, %v2715_v58  ;;  %v2769_v28 = vadd.f32 %v2753_v11, %v2716_v2  ;;  %v2770_v47 = vadd.f32 %v2754_v29, %v2717_v61  ;;  %v12644_v2 = vld [vmem:[#allocation149_spill] sm:$0xff]  ;;  %v12648_v29 = vld [vmem:[#allocation172_spill] sm:$0xff] }
 0x261   : > { %v2771_v15 = vadd.f32 %v2755_v53, %v2718_v5  ;;  %v2772_v59 = vadd.f32 %v2756_v63, %v2719_v35  ;;  %v2773_v3 = vadd.f32 %v2757_v25, %v2720_v48  ;;  %v2795_v45 = vmul.f32 %v12642_v40, %v12536_v49  ;;  %v12643_v35 = vld [vmem:[#allocation164_spill] sm:$0xff]  ;;  %v12645_v5 = vld [vmem:[#allocation165_spill] sm:$0xff]  ;;  %v12649_v53 = vld [vmem:[#allocation78_spill] sm:$0xff] }
 0x262   : > { %v2796_v13 = vmul.f32 %v12642_v40, %v12537_v36  ;;  %v2797_v39 = vmul.f32 %v12642_v40, %v12538_v46  ;;  %v2798_v30 = vmul.f32 %v12642_v40, %v12539_v4  ;;  %v2799_v44 = vmul.f32 %v12642_v40, %v12540_v16  ;;  %v12650_v25 = vld [vmem:[#allocation182_spill] sm:$0xff] }
 0x263   : > { %v2800_v61 = vmul.f32 %v12642_v40, %v12541_v27  ;;  %v2801_v48 = vmul.f32 %v12642_v40, %v12542_v10  ;;  %v2802_v49 = vmul.f32 %v12642_v40, %v12543_v20  ;;  %v2803_v36 = vmul.f32 %v12642_v40, %v12544_v0 }
 0x264   : > { %v2804_v46 = vmul.f32 %v12642_v40, %v12545_v18  ;;  %v2805_v4 = vmul.f32 %v12642_v40, %v12546_v19  ;;  %v2806_v16 = vmul.f32 %v12642_v40, %v12643_v35  ;;  %v2807_v27 = vmul.f32 %v12642_v40, %v12644_v2 }
 0x265   : > { %v2808_v10 = vmul.f32 %v12642_v40, %v12645_v5  ;;  %v2809_v20 = vmul.f32 %v12642_v40, %v12646_v31  ;;  %v2810_v38 = vmul.f32 %v12642_v40, %v12647_v7  ;;  %v2811_v24 = vadd.f32 %v2795_v45, %v2758_v51  ;;  %v12651_v51 = vld [vmem:[#allocation173_spill] sm:$0xff] }
 0x266   : > { %v2812_v34 = vadd.f32 %v2796_v13, %v2759_v26  ;;  %v2813_v52 = vadd.f32 %v2797_v39, %v2760_v56  ;;  %v2814_v57 = vadd.f32 %v2798_v30, %v2761_v42  ;;  %v2815_v58 = vadd.f32 %v2799_v44, %v2762_v1  ;;  %v12652_v56 = vld [vmem:[#allocation183_spill] sm:$0xff]  ;;  %v12653_v1 = vld [vmem:[#allocation174_spill] sm:$0xff]  ;;  %v12659_v13 = vld [vmem:[#allocation177_spill] sm:$0xff] }
 0x267   : > { %v2816_v54 = vadd.f32 %v2800_v61, %v2763_v12  ;;  %v2817_v55 = vadd.f32 %v2801_v48, %v2764_v60  ;;  %v2818_v17 = vadd.f32 %v2802_v49, %v2765_v37  ;;  %v2819_v9 = vadd.f32 %v2803_v36, %v2766_v50  ;;  %v12657_v37 = vld [vmem:[#allocation176_spill] sm:$0xff]  ;;  %v12660_v30 = vld [vmem:[#allocation187_spill] sm:$0xff]  ;;  %v12661_v61 = vld [vmem:[#allocation178_spill] sm:$0xff] }
 0x268   : > { %v2820_v32 = vadd.f32 %v2804_v46, %v2767_v14  ;;  %v2821_v62 = vadd.f32 %v2805_v4, %v2768_v22  ;;  %v2822_v23 = vadd.f32 %v2806_v16, %v2769_v28  ;;  %v2823_v33 = vadd.f32 %v2807_v27, %v2770_v47  ;;  %v12654_v28 = vld [vmem:[#allocation184_spill] sm:$0xff]  ;;  %v12658_v14 = vld [vmem:[#allocation186_spill] sm:$0xff]  ;;  %v12663_v46 = vld [vmem:[#allocation179_spill] sm:$0xff] }
 0x269   : > { %v2824_v43 = vadd.f32 %v2808_v10, %v2771_v15  ;;  %v2825_v21 = vadd.f32 %v2809_v20, %v2772_v59  ;;  %v2826_v11 = vadd.f32 %v2810_v38, %v2773_v3  ;;  %v2848_v63 = vmul.f32 %v12649_v53, %v12648_v29  ;;  %v12655_v59 = vld [vmem:[#allocation175_spill] sm:$0xff]  ;;  %v12656_v15 = vld [vmem:[#allocation185_spill] sm:$0xff]  ;;  %v12662_v49 = vld [vmem:[#allocation188_spill] sm:$0xff] }
 0x26a   : > { %v2849_v45 = vmul.f32 %v12649_v53, %v12650_v25  ;;  %v2850_v26 = vmul.f32 %v12649_v53, %v12651_v51  ;;  %v2851_v42 = vmul.f32 %v12649_v53, %v12652_v56  ;;  %v2852_v12 = vmul.f32 %v12649_v53, %v12653_v1  ;;  %v12664_v16 = vld [vmem:[#allocation189_spill] sm:$0xff]  ;;  %v5321_v25 = vld [vmem:[%s11363_s3] ss:$0 sm:$0xff] }
 0x26b   : > { %v2853_v47 = vmul.f32 %v12649_v53, %v12654_v28  ;;  %v2854_v3 = vmul.f32 %v12649_v53, %v12655_v59  ;;  %v2855_v60 = vmul.f32 %v12649_v53, %v12656_v15  ;;  %v2856_v50 = vmul.f32 %v12649_v53, %v12657_v37 }
 0x26c   : > { %v2857_v22 = vmul.f32 %v12649_v53, %v12658_v14  ;;  %v2858_v39 = vmul.f32 %v12649_v53, %v12659_v13  ;;  %v2859_v44 = vmul.f32 %v12649_v53, %v12660_v30  ;;  %v2860_v48 = vmul.f32 %v12649_v53, %v12661_v61 }
 0x26d   : > { %v2861_v36 = vmul.f32 %v12649_v53, %v12662_v49  ;;  %v2862_v4 = vmul.f32 %v12649_v53, %v12663_v46  ;;  %v2863_v27 = vmul.f32 %v12649_v53, %v12664_v16  ;;  %v2864_v10 = vadd.f32 %v2848_v63, %v2811_v24  ;;  %v12665_v24 = vld [vmem:[#allocation125_spill] sm:$0xff] }
 0x26e   : > { %v2865_v20 = vadd.f32 %v2849_v45, %v2812_v34  ;;  %v2866_v38 = vadd.f32 %v2850_v26, %v2813_v52  ;;  %v2867_v29 = vadd.f32 %v2851_v42, %v2814_v57  ;;  %v2868_v51 = vadd.f32 %v2852_v12, %v2815_v58  ;;  %v12666_v52 = vld [vmem:[#allocation110_spill] sm:$0xff]  ;;  %v12667_v63 = vld [vmem:[#allocation45_spill] sm:$0xff]  ;;  %v12668_v58 = vld [vmem:[#allocation31_spill] sm:$0xff] }
 0x26f   : > { %v2869_v56 = vadd.f32 %v2853_v47, %v2816_v54  ;;  %v2870_v1 = vadd.f32 %v2854_v3, %v2817_v55  ;;  %v2871_v28 = vadd.f32 %v2855_v60, %v2818_v17  ;;  %v2872_v59 = vadd.f32 %v2856_v50, %v2819_v9  ;;  %v12669_v55 = vld [vmem:[#allocation203_spill] sm:$0xff]  ;;  %v12670_v9 = vld [vmem:[#allocation29_spill] sm:$0xff]  ;;  %v12674_v26 = vld [vmem:[#allocation142_spill] sm:$0xff] }
 0x270   : > { %v2873_v15 = vadd.f32 %v2857_v22, %v2820_v32  ;;  %v2874_v40 = vadd.f32 %v2858_v39, %v2821_v62  ;;  %v2875_v8 = vadd.f32 %v2859_v44, %v2822_v23  ;;  %v2876_v46 = vadd.f32 %v2860_v48, %v2823_v33  ;;  %v12671_v62 = vld [vmem:[#allocation204_spill] sm:$0xff]  ;;  %v12672_v33 = vld [vmem:[#allocation33_spill] sm:$0xff]  ;;  %v12676_v3 = vld [vmem:[#allocation143_spill] sm:$0xff] }
 0x271   : > { %v2877_v49 = vadd.f32 %v2861_v36, %v2824_v43  ;;  %v2878_v61 = vadd.f32 %v2862_v4, %v2825_v21  ;;  %v2879_v53 = vadd.f32 %v2863_v27, %v2826_v11  ;;  %v8831_v34 = vadd.f32 %v5321_v25, %v12665_v24  ;;  %v12673_v21 = vld [vmem:[#allocation26_spill] sm:$0xff]  ;;  %v12675_v12 = vld [vmem:[#allocation157_spill] sm:$0xff]  ;;  %v12677_v50 = vld [vmem:[#allocation159_spill] sm:$0xff] }
 0x272   : > { %v8834_v57 = vadd.f32 %v5321_v25, %v12666_v52  ;;  %v8837_v45 = vadd.f32 %v5321_v25, %v12667_v63  ;;  %v8840_v54 = vadd.f32 %v5321_v25, %v12668_v58  ;;  %v8843_v17 = vadd.f32 %v5321_v25, %v12669_v55  ;;  %v12679_v39 = vld [vmem:[#allocation144_spill] sm:$0xff]  ;;  %v12683_v4 = vld [vmem:[#allocation145_spill] sm:$0xff]  ;;  %v5322_v55 = vld [vmem:[%s11363_s3 + $0x1] ss:$0 sm:$0xff] }
 0x273   : > { %v8846_v32 = vadd.f32 %v5321_v25, %v12670_v9  ;;  %v8849_v23 = vadd.f32 %v5321_v25, %v12671_v62  ;;  %v8852_v43 = vadd.f32 %v5321_v25, %v12672_v33  ;;  %v8855_v11 = vadd.f32 %v5321_v25, %v12673_v21  ;;  %v12681_v48 = vld [vmem:[#allocation160_spill] sm:$0xff] }
 0x274   : > { %v8858_v42 = vadd.f32 %v5321_v25, %v12674_v26  ;;  %v8861_v47 = vadd.f32 %v5321_v25, %v12675_v12  ;;  %v8864_v60 = vadd.f32 %v5321_v25, %v12676_v3  ;;  %v8867_v22 = vadd.f32 %v5321_v25, %v12677_v50 }
 0x275   : > { %v8870_v44 = vadd.f32 %v5321_v25, %v12679_v39  ;;  %v8873_v36 = vadd.f32 %v5321_v25, %v12681_v48  ;;  %v8876_v27 = vadd.f32 %v5321_v25, %v12683_v4  ;;  %v11771_v24 = vmax.f32 %v8831_v34, 0.0 }
 0x276   : > { %12678 = vst [vmem:[#allocation161_spill] sm:$0xff] %v8867_v22  ;;  %v11770_v52 = vmax.f32 %v8834_v57, 0.0  ;;  %v11773_v63 = vmax.f32 %v8837_v45, 0.0  ;;  %v11772_v58 = vmax.f32 %v8840_v54, 0.0  ;;  %v2920_v62 = vadd.f32 %v5322_v55, %v2864_v10 }
 0x277   : > { %12680 = vst [vmem:[#allocation146_spill] sm:$0xff] %v8870_v44  ;;  %12682 = vst [vmem:[#allocation162_spill] sm:$0xff] %v8873_v36  ;;  %v2921_v33 = vadd.f32 %v5322_v55, %v2865_v20  ;;  %v2922_v9 = vadd.f32 %v5322_v55, %v2866_v38  ;;  %v8897_v25 = vadd.f32 %v5322_v55, %v2867_v29 }
 0x278   : > { %12684 = vst [vmem:[#allocation141_spill] sm:$0xff] %v8876_v27  ;;  %v8899_v21 = vadd.f32 %v5322_v55, %v2868_v51  ;;  %v8901_v26 = vadd.f32 %v5322_v55, %v2869_v56  ;;  %v8903_v12 = vadd.f32 %v5322_v55, %v2870_v1  ;;  %v8905_v3 = vadd.f32 %v5322_v55, %v2871_v28 }
 0x279   : > { %v8907_v50 = vadd.f32 %v5322_v55, %v2872_v59  ;;  %v8909_v39 = vadd.f32 %v5322_v55, %v2873_v15  ;;  %v8911_v48 = vadd.f32 %v5322_v55, %v2874_v40  ;;  %v8913_v4 = vadd.f32 %v5322_v55, %v2875_v8 }
 0x27a   : > { %v8915_v10 = vadd.f32 %v5322_v55, %v2876_v46  ;;  %v8917_v20 = vadd.f32 %v5322_v55, %v2877_v49  ;;  %v8919_v38 = vadd.f32 %v5322_v55, %v2878_v61  ;;  %v8921_v29 = vadd.f32 %v5322_v55, %v2879_v53 }
 0x27b   : > { %v2936_v51 = vmax.f32 %v2920_v62, 0.0  ;;  %v2937_v56 = vmax.f32 %v2921_v33, 0.0  ;;  %v2938_v1 = vmax.f32 %v2922_v9, 0.0  ;;  %v2939_v28 = vmax.f32 %v8897_v25, 0.0 }
 0x27c   : > { %12685 = vst [vmem:[#allocation156_spill] sm:$0xff] %v8915_v10  ;;  %12686 = vst [vmem:[#allocation205_spill] sm:$0xff] %v8917_v20  ;;  %v2940_v59 = vmax.f32 %v8899_v21, 0.0  ;;  %v2941_v40 = vmax.f32 %v8901_v26, 0.0  ;;  %v2942_v8 = vmax.f32 %v8903_v12, 0.0  ;;  %v2943_v46 = vmax.f32 %v8905_v3, 0.0 }
 0x27d   : > { %12687 = vst [vmem:[#allocation36_spill] sm:$0xff] %v8919_v38  ;;  %12688 = vst [vmem:[#allocation40_spill] sm:$0xff] %v8921_v29  ;;  %v2944_v49 = vmax.f32 %v8907_v50, 0.0  ;;  %v2945_v61 = vmax.f32 %v8909_v39, 0.0  ;;  %v2946_v53 = vmax.f32 %v8911_v48, 0.0  ;;  %v2947_v15 = vmax.f32 %v8913_v4, 0.0 }
 0x27e   : > { %v8940_v25 = vpack.c.bf16 %v11770_v52, %v11771_v24  ;;  %v8946_v21 = vpack.c.bf16 %v11772_v58, %v11773_v63  ;;  %v12691_v26 = vmax.f32 %v8843_v17, 0.0  ;;  %v12692_v12 = vmax.f32 %v8846_v32, 0.0 }
 0x27f   : > { %v12694_v50 = vmax.f32 %v8849_v23, 0.0  ;;  %v12695_v39 = vmax.f32 %v8852_v43, 0.0  ;;  %v12697_v4 = vmax.f32 %v8855_v11, 0.0  ;;  %v12698_v52 = vmax.f32 %v8858_v42, 0.0 }
 0x280   : > { %12689 = vst [vmem:[#allocation190_spill] sm:$0xff] %v8940_v25  ;;  %12690 = vst [vmem:[#allocation191_spill] sm:$0xff] %v8946_v21  ;;  %v8952_v3 = vpack.c.bf16 %v12692_v12, %v12691_v26  ;;  %v12700_v58 = vmax.f32 %v8861_v47, 0.0  ;;  %v12701_v63 = vmax.f32 %v8864_v60, 0.0  ;;  %v12703_v26 = vmax.f32 %v8867_v22, 0.0  ;;  %v12756_v22 = vld [vmem:[#allocation75_spill] sm:$0xff] }
 0x281   : > { %v8958_v48 = vpack.c.bf16 %v12695_v39, %v12694_v50  ;;  %v8964_v24 = vpack.c.bf16 %v12698_v52, %v12697_v4  ;;  %v12704_v12 = vmax.f32 %v8870_v44, 0.0  ;;  %v12706_v50 = vmax.f32 %v8873_v36, 0.0  ;;  %v12748_v36 = vld [vmem:[#allocation71_spill] sm:$0xff]  ;;  %v12752_v44 = vld [vmem:[#allocation73_spill] sm:$0xff] }
 0x282   : > { %12693 = vst [vmem:[#allocation192_spill] sm:$0xff] %v8952_v3  ;;  %v8970_v33 = vpack.c.bf16 %v12701_v63, %v12700_v58  ;;  %v12707_v39 = vmax.f32 %v8876_v27, 0.0  ;;  %v8984_v52 = vpack.c.bf16 %v2937_v56, %v2936_v51  ;;  %v8986_v4 = vpack.c.bf16 %v2939_v28, %v2938_v1  ;;  %v12739_v27 = vld [vmem:[#allocation67_spill] sm:$0xff] }
 0x283   : > { %12696 = vst [vmem:[#allocation171_spill] sm:$0xff] %v8958_v48  ;;  %12699 = vst [vmem:[#allocation181_spill] sm:$0xff] %v8964_v24  ;;  %v8976_v62 = vpack.c.bf16 %v12704_v12, %v12703_v26  ;;  %v8988_v55 = vpack.c.bf16 %v2941_v40, %v2940_v59  ;;  %v8990_v63 = vpack.c.bf16 %v2943_v46, %v2942_v8  ;;  %v12715_v26 = vmax.f32 %v8915_v10, 0.0  ;;  %v12729_v48 = vld [vmem:[#allocation76_spill] sm:$0xff] }
 0x284   : > { %12702 = vst [vmem:[#allocation95_spill] sm:$0xff] %v8970_v33  ;;  %v8982_v9 = vpack.c.bf16 %v12707_v39, %v12706_v50  ;;  %12709 = vst [vmem:[#allocation80_spill] sm:$0xff] %v8984_v52  ;;  %v8992_v58 = vpack.c.bf16 %v2945_v61, %v2944_v49  ;;  %v8994_v33 = vpack.c.bf16 %v2947_v15, %v2946_v53  ;;  %v12716_v12 = vmax.f32 %v8917_v20, 0.0 }
 0x285   : > { %12705 = vst [vmem:[#allocation79_spill] sm:$0xff] %v8976_v62  ;;  %12710 = vst [vmem:[#allocation97_spill] sm:$0xff] %v8986_v4  ;;  %v12718_v50 = vmax.f32 %v8919_v38, 0.0  ;;  %v12719_v39 = vmax.f32 %v8921_v29, 0.0  ;;  %v12721_v4 = vld [vmem:[#allocation72_spill] sm:$0xff]  ;;  %v12727_v24 = vmax.f32 %v8831_v34, 0.0 }
 0x286   : > { %12708 = vst [vmem:[#allocation96_spill] sm:$0xff] %v8982_v9  ;;  %12711 = vst [vmem:[#allocation81_spill] sm:$0xff] %v8988_v55  ;;  %v9000_v62 = vpack.c.bf16 %v12716_v12, %v12715_v26  ;;  %v12722_v55 = vrot.slane %v12721_v4, 1  ;;  %v12728_v12 = vmax.f32 %v8834_v57, 0.0  ;;  %v12730_v3 = vrot.slane %v12729_v48, 1  ;;  %v12742_v57 = vld [vmem:[#allocation70_spill] sm:$0xff] }
 0x287   : > { %12712 = vst [vmem:[#allocation98_spill] sm:$0xff] %v8990_v63  ;;  %12713 = vst [vmem:[#allocation82_spill] sm:$0xff] %v8992_v58  ;;  %v9006_v52 = vpack.c.bf16 %v12719_v39, %v12718_v50  ;;  %v12724_v58 = vld [vmem:[#allocation74_spill] sm:$0xff]  ;;  %v2984_v26 = vadd.f32 %v2936_v51, %v12727_v24  ;;  %v12740_v34 = vrot.slane %v12739_v27, 2  ;;  %v12743_v51 = vrot.slane %v12742_v57, 2 }
 0x288   : > { %12714 = vst [vmem:[#allocation127_spill] sm:$0xff] %v8994_v33  ;;  %12717 = vst [vmem:[#allocation111_spill] sm:$0xff] %v9000_v62  ;;  %v9011_v63 = vsel %vm953_vm5, %v12722_v55, 0.0  ;;  %v12725_v9 = vrot.slane %v12724_v58, 1  ;;  %v2985_v62 = vadd.f32 %v2937_v56, %v12728_v12  ;;  %v9025_v50 = vsel %vm953_vm5, %v12730_v3, 0.0  ;;  %v12732_v39 = vld [vmem:[#allocation66_spill] sm:$0xff] }
 0x289   : > { %12720 = vst [vmem:[#allocation128_spill] sm:$0xff] %v9006_v52  ;;  %12723 = vst [vmem:[#allocation112_spill] sm:$0xff] %v9011_v63  ;;  %v12733_v52 = vrot.slane %v12732_v39, 2  ;;  %v12734_v55 = vld [vmem:[#allocation65_spill] sm:$0xff]  ;;  %v12747_v38 = vrot.slane %v12721_v4, 2  ;;  %v12749_v20 = vrot.slane %v12748_v36, 2 }
 0x28a   : > { %v9016_v33 = vsel %vm953_vm5, %v12725_v9, 0.0  ;;  %12731 = vst [vmem:[#allocation113_spill] sm:$0xff] %v9025_v50  ;;  %v12735_v21 = vrot.slane %v12734_v55, 2  ;;  %v12737_v9 = vld [vmem:[#allocation68_spill] sm:$0xff]  ;;  %v12744_v56 = vld [vmem:[#allocation69_spill] sm:$0xff]  ;;  %v12753_v10 = vrot.slane %v12752_v44, 2 }
 0x28b   : > { %12726 = vst [vmem:[#allocation129_spill] sm:$0xff] %v9016_v33  ;;  %v12738_v29 = vrot.slane %v12737_v9, 2  ;;  %v12745_v12 = vrot.slane %v12744_v56, 2  ;;  %v12757_v50 = vrot.slane %v12756_v22, 2  ;;  %v12762_v44 = vrot.slane %v12737_v9, 2  ;;  %v12815_v36 = vld [vmem:[#allocation57_spill] sm:$0xff] }
 0x28c   : > { %v9032_v25 = vsel %vm1092_vm6, %v12735_v21, %v12733_v52  ;;  %v9053_v21 = vsel %vm1092_vm6, %v12749_v20, %v12747_v38  ;;  %v12751_v52 = vrot.slane %v12724_v58, 2  ;;  %v12760_v20 = vrot.slane %v12732_v39, 2 }
 0x28d   : > { %12736 = vst [vmem:[#allocation130_spill] sm:$0xff] %v9032_v25  ;;  %v9039_v24 = vsel %vm1092_vm6, %v12740_v34, %v12738_v29  ;;  %v9046_v3 = vsel %vm1092_vm6, %v12745_v12, %v12743_v51  ;;  %12750 = vst [vmem:[#allocation50_spill] sm:$0xff] %v9053_v21  ;;  %v12755_v34 = vrot.slane %v12729_v48, 2  ;;  %v12759_v12 = vmax.f32 %v8837_v45, 0.0 }
 0x28e   : > { %12741 = vst [vmem:[#allocation114_spill] sm:$0xff] %v9039_v24  ;;  %12746 = vst [vmem:[#allocation49_spill] sm:$0xff] %v9046_v3  ;;  %v9060_v29 = vsel %vm1092_vm6, %v12753_v10, %v12751_v52  ;;  %v9074_v38 = vsel %vm1092_vm6, %v12760_v20, 0.0  ;;  %v9079_v10 = vsel %vm1092_vm6, %v12762_v44, 0.0  ;;  %v12764_v52 = vrot.slane %v12742_v57, 2 }
 0x28f   : > { %12754 = vst [vmem:[#allocation51_spill] sm:$0xff] %v9060_v29  ;;  %v9067_v51 = vsel %vm1092_vm6, %v12757_v50, %v12755_v34  ;;  %v2986_v33 = vadd.f32 %v2938_v1, %v12759_v12  ;;  %12761 = vst [vmem:[#allocation53_spill] sm:$0xff] %v9074_v38  ;;  %v12766_v50 = vrot.slane %v12721_v4, 2  ;;  %v12768_v1 = vrot.slane %v12724_v58, 2 }
 0x290   : > { %12758 = vst [vmem:[#allocation52_spill] sm:$0xff] %v9067_v51  ;;  %12763 = vst [vmem:[#allocation54_spill] sm:$0xff] %v9079_v10  ;;  %v9084_v22 = vsel %vm1092_vm6, %v12764_v52, 0.0  ;;  %v12770_v12 = vrot.slane %v12729_v48, 2  ;;  %v12772_v20 = vmax.f32 %v8840_v54, 0.0  ;;  %v3000_v52 = vadd.f32 %v2985_v62, %v2984_v26  ;;  %v12790_v26 = vld [vmem:[#allocation86_spill] sm:$0xff] }
 0x291   : > { %12765 = vst [vmem:[#allocation55_spill] sm:$0xff] %v9084_v22  ;;  %v9089_v45 = vsel %vm1092_vm6, %v12766_v50, 0.0  ;;  %v9094_v34 = vsel %vm1092_vm6, %v12768_v1, 0.0  ;;  %v12773_v29 = vmax.f32 %v8843_v17, 0.0  ;;  %v12774_v50 = vmax.f32 %v8846_v32, 0.0 }
 0x292   : > { %12767 = vst [vmem:[#allocation56_spill] sm:$0xff] %v9089_v45  ;;  %12769 = vst [vmem:[#allocation172_spill] sm:$0xff] %v9094_v34  ;;  %v9099_v44 = vsel %vm1092_vm6, %v12770_v12, 0.0  ;;  %v2987_v51 = vadd.f32 %v2939_v28, %v12772_v20  ;;  %v12775_v58 = vmax.f32 %v8849_v23, 0.0  ;;  %v12776_v1 = vmax.f32 %v8852_v43, 0.0  ;;  %v12782_v23 = vld [vmem:[#allocation99_spill] sm:$0xff] }
 0x293   : > { %12771 = vst [vmem:[#allocation182_spill] sm:$0xff] %v9099_v44  ;;  %v2988_v21 = vadd.f32 %v2940_v59, %v12773_v29  ;;  %v2989_v45 = vadd.f32 %v2941_v40, %v12774_v50  ;;  %v12777_v48 = vmax.f32 %v8855_v11, 0.0  ;;  %v12778_v44 = vmax.f32 %v8858_v42, 0.0  ;;  %v12783_v40 = vld [vmem:[#allocation27_spill] sm:$0xff]  ;;  %v12785_v11 = vld [vmem:[#allocation100_spill] sm:$0xff] }
 0x294   : > { %v2990_v22 = vadd.f32 %v2942_v8, %v12775_v58  ;;  %v2991_v34 = vadd.f32 %v2943_v46, %v12776_v1  ;;  %v12779_v28 = vmax.f32 %v8861_v47, 0.0  ;;  %v3001_v17 = vadd.f32 %v3000_v52, %v2986_v33  ;;  %v12784_v43 = vld [vmem:[#allocation83_spill] sm:$0xff]  ;;  %v12793_v1 = vld [vmem:[#allocation104_spill] sm:$0xff] }
 0x295   : > { %v2992_v12 = vadd.f32 %v2944_v49, %v12777_v48  ;;  %v2993_v54 = vadd.f32 %v2945_v61, %v12778_v44  ;;  %v12780_v32 = vmax.f32 %v8864_v60, 0.0  ;;  %v3039_v8 = vmul.f32 %v12783_v40, %v12782_v23  ;;  %v12786_v61 = vld [vmem:[#allocation84_spill] sm:$0xff]  ;;  %v12788_v48 = vld [vmem:[#allocation85_spill] sm:$0xff]  ;;  %v12791_v44 = vld [vmem:[#allocation103_spill] sm:$0xff] }
 0x296   : > { %v9117_v62 = vadd.f32 %v2946_v53, %v12779_v28  ;;  %v3040_v46 = vmul.f32 %v12783_v40, %v12784_v43  ;;  %v3041_v49 = vmul.f32 %v12783_v40, %v12785_v11  ;;  %v3002_v42 = vadd.f32 %v3001_v17, %v2987_v51  ;;  %v12787_v53 = vld [vmem:[#allocation101_spill] sm:$0xff]  ;;  %v12792_v52 = vld [vmem:[#allocation87_spill] sm:$0xff]  ;;  %v12794_v17 = vld [vmem:[#allocation88_spill] sm:$0xff] }
 0x297   : > { %v9121_v59 = vadd.f32 %v2947_v15, %v12780_v32  ;;  %v3042_v47 = vmul.f32 %v12783_v40, %v12786_v61  ;;  %v3043_v33 = vmul.f32 %v12783_v40, %v12787_v53  ;;  %v3044_v60 = vmul.f32 %v12783_v40, %v12788_v48  ;;  %v12789_v15 = vld [vmem:[#allocation102_spill] sm:$0xff]  ;;  %v12795_v23 = vld [vmem:[#allocation105_spill] sm:$0xff] }
 0x298   : > { %v3045_v58 = vmul.f32 %v12783_v40, %v12789_v15  ;;  %v3046_v29 = vmul.f32 %v12783_v40, %v12790_v26  ;;  %v3047_v20 = vmul.f32 %v12783_v40, %v12791_v44  ;;  %v3048_v51 = vmul.f32 %v12783_v40, %v12792_v52  ;;  %v12797_v26 = vld [vmem:[#allocation106_spill] sm:$0xff]  ;;  %v12799_v52 = vld [vmem:[#allocation131_spill] sm:$0xff] }
 0x299   : > { %12781 = vst [vmem:[#allocation173_spill] sm:$0xff] %v9121_v59  ;;  %v3003_v50 = vadd.f32 %v3002_v42, %v2988_v21  ;;  %v3049_v28 = vmul.f32 %v12783_v40, %v12793_v1  ;;  %v3050_v32 = vmul.f32 %v12783_v40, %v12794_v17  ;;  %v3051_v43 = vmul.f32 %v12783_v40, %v12795_v23  ;;  %v12796_v59 = vld [vmem:[#allocation89_spill] sm:$0xff]  ;;  %v12798_v44 = vld [vmem:[#allocation90_spill] sm:$0xff]  ;;  %v12800_v21 = vld [vmem:[#allocation28_spill] sm:$0xff] }
 0x29a   : > { %v3052_v15 = vmul.f32 %v12783_v40, %v12796_v59  ;;  %v3053_v48 = vmul.f32 %v12783_v40, %v12797_v26  ;;  %v3054_v53 = vmul.f32 %v12783_v40, %v12798_v44  ;;  %v3088_v42 = vmul.f32 %v12800_v21, %v12799_v52  ;;  %v12801_v1 = vld [vmem:[#allocation115_spill] sm:$0xff]  ;;  %v12802_v17 = vld [vmem:[#allocation132_spill] sm:$0xff]  ;;  %v12804_v59 = vld [vmem:[#allocation133_spill] sm:$0xff] }
 0x29b   : > { %v3004_v61 = vadd.f32 %v3003_v50, %v2989_v45  ;;  %v3089_v11 = vmul.f32 %v12800_v21, %v12801_v1  ;;  %v3090_v3 = vmul.f32 %v12800_v21, %v12802_v17  ;;  %v12803_v23 = vld [vmem:[#allocation116_spill] sm:$0xff]  ;;  %v3092_v24 = vmul.f32 %v12800_v21, %v12804_v59  ;;  %v12805_v26 = vld [vmem:[#allocation117_spill] sm:$0xff]  ;;  %v12806_v40 = vld [vmem:[#allocation134_spill] sm:$0xff] }
 0x29c   : > { %v3091_v10 = vmul.f32 %v12800_v21, %v12803_v23  ;;  %v3093_v38 = vmul.f32 %v12800_v21, %v12805_v26  ;;  %v3094_v44 = vmul.f32 %v12800_v21, %v12806_v40  ;;  %v3095_v45 = vmul.f32 %v12800_v21, %v12624_v41  ;;  %v12807_v50 = vld [vmem:[#allocation135_spill] sm:$0xff]  ;;  %v12809_v23 = vld [vmem:[#allocation136_spill] sm:$0xff]  ;;  %v12811_v26 = vld [vmem:[#allocation137_spill] sm:$0xff] }
 0x29d   : > { %v3005_v52 = vadd.f32 %v3004_v61, %v2990_v22  ;;  %v3096_v1 = vmul.f32 %v12800_v21, %v12807_v50  ;;  %v12808_v17 = vld [vmem:[#allocation119_spill] sm:$0xff]  ;;  %v3098_v16 = vmul.f32 %v12800_v21, %v12809_v23  ;;  %v12810_v59 = vld [vmem:[#allocation120_spill] sm:$0xff]  ;;  %v3100_v13 = vmul.f32 %v12800_v21, %v12811_v26  ;;  %v12812_v40 = vld [vmem:[#allocation121_spill] sm:$0xff] }
 0x29e   : > { %v3097_v25 = vmul.f32 %v12800_v21, %v12808_v17  ;;  %v3099_v30 = vmul.f32 %v12800_v21, %v12810_v59  ;;  %v3101_v14 = vmul.f32 %v12800_v21, %v12812_v40  ;;  %v12813_v41 = vld [vmem:[#allocation138_spill] sm:$0xff]  ;;  %v3104_v17 = vadd.f32 %v3088_v42, %v3039_v8 }
 0x29f   : > { %v3102_v22 = vmul.f32 %v12800_v21, %v12813_v41  ;;  %v3006_v61 = vadd.f32 %v3005_v52, %v2991_v34  ;;  %v12814_v50 = vld [vmem:[#allocation122_spill] sm:$0xff]  ;;  %v3105_v63 = vadd.f32 %v3089_v11, %v3040_v46  ;;  %v3106_v7 = vadd.f32 %v3090_v3, %v3041_v49 }
 0x2a0   : > { %v3103_v37 = vmul.f32 %v12800_v21, %v12814_v50  ;;  %v3107_v23 = vadd.f32 %v3091_v10, %v3042_v47  ;;  %v3108_v31 = vadd.f32 %v3092_v24, %v3043_v33  ;;  %v3109_v5 = vadd.f32 %v3093_v38, %v3044_v60  ;;  %v12816_v21 = vld [vmem:[#allocation30_spill] sm:$0xff]  ;;  %v12818_v24 = vld [vmem:[#allocation59_spill] sm:$0xff]  ;;  %v12819_v10 = vld [vmem:[#allocation60_spill] sm:$0xff] }
 0x2a1   : > { %v3007_v59 = vadd.f32 %v3006_v61, %v2992_v12  ;;  %v3110_v2 = vadd.f32 %v3094_v44, %v3045_v58  ;;  %v3111_v35 = vadd.f32 %v3095_v45, %v3046_v29  ;;  %v3112_v26 = vadd.f32 %v3096_v1, %v3047_v20  ;;  %v12817_v46 = vld [vmem:[#allocation58_spill] sm:$0xff] }
 0x2a2   : > { %v3113_v19 = vadd.f32 %v3097_v25, %v3048_v51  ;;  %v3114_v18 = vadd.f32 %v3098_v16, %v3049_v28  ;;  %v3115_v40 = vadd.f32 %v3099_v30, %v3050_v32  ;;  %v3116_v0 = vadd.f32 %v3100_v13, %v3051_v43  ;;  %v12820_v25 = vld [vmem:[#allocation61_spill] sm:$0xff]  ;;  %v12821_v13 = vld [vmem:[#allocation62_spill] sm:$0xff]  ;;  %v12822_v16 = vld [vmem:[#allocation63_spill] sm:$0xff] }
 0x2a3   : > { %v3008_v4 = vadd.f32 %v3007_v59, %v2993_v54  ;;  %v3117_v41 = vadd.f32 %v3101_v14, %v3052_v15  ;;  %v3118_v34 = vadd.f32 %v3102_v22, %v3053_v48  ;;  %v3119_v52 = vadd.f32 %v3103_v37, %v3054_v53  ;;  %v12824_v48 = vld [vmem:[#allocation71_spill] sm:$0xff]  ;;  %v12825_v15 = vld [vmem:[#allocation72_spill] sm:$0xff] }
 0x2a4   : > { %v3137_v8 = vmul.f32 %v12816_v21, %v12815_v36  ;;  %v3138_v3 = vmul.f32 %v12816_v21, %v12817_v46  ;;  %v3139_v38 = vmul.f32 %v12816_v21, %v12818_v24  ;;  %v3140_v12 = vmul.f32 %v12816_v21, %v12819_v10 }
 0x2a5   : > { %v3141_v30 = vmul.f32 %v12816_v21, %v12820_v25  ;;  %v3142_v14 = vmul.f32 %v12816_v21, %v12821_v13  ;;  %v3143_v37 = vmul.f32 %v12816_v21, %v12822_v16  ;;  %v3144_v36 = vmul.f32 %v12816_v21, %v12641_v6 }
 0x2a6   : > { %v3145_v54 = vmul.f32 %v12816_v21, %v12734_v55  ;;  %v3146_v59 = vmul.f32 %v12816_v21, %v12732_v39  ;;  %v3147_v11 = vmul.f32 %v12816_v21, %v12739_v27  ;;  %v3148_v49 = vmul.f32 %v12816_v21, %v12737_v9 }
 0x2a7   : > { %v9212_v47 = vadd.f32 %v3008_v4, %v9117_v62  ;;  %v3149_v53 = vmul.f32 %v12816_v21, %v12744_v56  ;;  %v3150_v33 = vmul.f32 %v12816_v21, %v12742_v57  ;;  %v3151_v60 = vmul.f32 %v12816_v21, %v12824_v48  ;;  %v12826_v48 = vld [vmem:[#allocation147_spill] sm:$0xff]  ;;  %v12827_v57 = vld [vmem:[#allocation32_spill] sm:$0xff] }
 0x2a8   : > { %v3152_v58 = vmul.f32 %v12816_v21, %v12825_v15  ;;  %v3153_v29 = vadd.f32 %v3137_v8, %v3104_v17  ;;  %v3154_v44 = vadd.f32 %v3138_v3, %v3105_v63  ;;  %v3155_v20 = vadd.f32 %v3139_v38, %v3106_v7  ;;  %v12828_v21 = vld [vmem:[#allocation163_spill] sm:$0xff]  ;;  %v12829_v7 = vld [vmem:[#allocation148_spill] sm:$0xff]  ;;  %v12834_v17 = vld [vmem:[#allocation166_spill] sm:$0xff] }
 0x2a9   : > { %12823 = vst [vmem:[#allocation183_spill] sm:$0xff] %v9212_v47  ;;  %v3156_v51 = vadd.f32 %v3140_v12, %v3107_v23  ;;  %v3157_v28 = vadd.f32 %v3141_v30, %v3108_v31  ;;  %v3158_v32 = vadd.f32 %v3142_v14, %v3109_v5  ;;  %v3159_v4 = vadd.f32 %v3143_v37, %v3110_v2  ;;  %v12830_v5 = vld [vmem:[#allocation164_spill] sm:$0xff]  ;;  %v12831_v2 = vld [vmem:[#allocation149_spill] sm:$0xff] }
 0x2aa   : > { %v3160_v62 = vadd.f32 %v3144_v36, %v3111_v35  ;;  %v3161_v43 = vadd.f32 %v3145_v54, %v3112_v26  ;;  %v3162_v42 = vadd.f32 %v3146_v59, %v3113_v19  ;;  %v3163_v45 = vadd.f32 %v3147_v11, %v3114_v18  ;;  %v12832_v18 = vld [vmem:[#allocation165_spill] sm:$0xff]  ;;  %v12837_v3 = vld [vmem:[#allocation152_spill] sm:$0xff]  ;;  %v12841_v59 = vld [vmem:[#allocation154_spill] sm:$0xff] }
 0x2ab   : > { %v3164_v1 = vadd.f32 %v3148_v49, %v3115_v40  ;;  %v3165_v22 = vadd.f32 %v3149_v53, %v3116_v0  ;;  %v3166_v61 = vadd.f32 %v3150_v33, %v3117_v41  ;;  %v3167_v46 = vadd.f32 %v3151_v60, %v3118_v34  ;;  %v12833_v41 = vld [vmem:[#allocation150_spill] sm:$0xff]  ;;  %v12835_v40 = vld [vmem:[#allocation151_spill] sm:$0xff]  ;;  %v12838_v12 = vld [vmem:[#allocation168_spill] sm:$0xff] }
 0x2ac   : > { %v3168_v47 = vadd.f32 %v3152_v58, %v3119_v52  ;;  %v3186_v56 = vmul.f32 %v12827_v57, %v12826_v48  ;;  %v3187_v63 = vmul.f32 %v12827_v57, %v12828_v21  ;;  %v3188_v31 = vmul.f32 %v12827_v57, %v12829_v7  ;;  %v12836_v52 = vld [vmem:[#allocation167_spill] sm:$0xff]  ;;  %v12839_v14 = vld [vmem:[#allocation153_spill] sm:$0xff]  ;;  %v12842_v49 = vld [vmem:[#allocation112_spill] sm:$0xff] }
 0x2ad   : > { %v3189_v35 = vmul.f32 %v12827_v57, %v12830_v5  ;;  %v3190_v19 = vmul.f32 %v12827_v57, %v12831_v2  ;;  %v3191_v0 = vmul.f32 %v12827_v57, %v12832_v18  ;;  %v3192_v26 = vmul.f32 %v12827_v57, %v12833_v41  ;;  %v12840_v36 = vld [vmem:[#allocation169_spill] sm:$0xff]  ;;  %v12844_v7 = vld [vmem:[#allocation34_spill] sm:$0xff] }
 0x2ae   : > { %v3193_v23 = vmul.f32 %v12827_v57, %v12834_v17  ;;  %v3194_v34 = vmul.f32 %v12827_v57, %v12835_v40  ;;  %v3195_v8 = vmul.f32 %v12827_v57, %v12836_v52  ;;  %v3196_v38 = vmul.f32 %v12827_v57, %v12837_v3 }
 0x2af   : > { %v3197_v30 = vmul.f32 %v12827_v57, %v12838_v12  ;;  %v3198_v37 = vmul.f32 %v12827_v57, %v12839_v14  ;;  %v3199_v54 = vmul.f32 %v12827_v57, %v12840_v36  ;;  %v3200_v11 = vmul.f32 %v12827_v57, %v12841_v59  ;;  %v12843_v59 = vld [vmem:[#allocation176_spill] sm:$0xff] }
 0x2b0   : > { %v3201_v53 = vmul.f32 %v12827_v57, %v12842_v49  ;;  %v3202_v33 = vadd.f32 %v3186_v56, %v3153_v29  ;;  %v3203_v48 = vadd.f32 %v3187_v63, %v3154_v44  ;;  %v3204_v60 = vadd.f32 %v3188_v31, %v3155_v20  ;;  %v12845_v57 = vld [vmem:[#allocation186_spill] sm:$0xff]  ;;  %v12846_v29 = vld [vmem:[#allocation177_spill] sm:$0xff]  ;;  %v12847_v20 = vld [vmem:[#allocation187_spill] sm:$0xff] }
 0x2b1   : > { %v3205_v58 = vadd.f32 %v3189_v35, %v3156_v51  ;;  %v3206_v21 = vadd.f32 %v3190_v19, %v3157_v28  ;;  %v3207_v3 = vadd.f32 %v3191_v0, %v3158_v32  ;;  %v3208_v52 = vadd.f32 %v3192_v26, %v3159_v4  ;;  %v12848_v28 = vld [vmem:[#allocation178_spill] sm:$0xff]  ;;  %v12849_v4 = vld [vmem:[#allocation188_spill] sm:$0xff]  ;;  %v12856_v0 = vld [vmem:[#allocation49_spill] sm:$0xff] }
 0x2b2   : > { %v3209_v12 = vadd.f32 %v3193_v23, %v3160_v62  ;;  %v3210_v40 = vadd.f32 %v3194_v34, %v3161_v43  ;;  %v3211_v17 = vadd.f32 %v3195_v8, %v3162_v42  ;;  %v3212_v14 = vadd.f32 %v3196_v38, %v3163_v45  ;;  %v12850_v43 = vld [vmem:[#allocation179_spill] sm:$0xff]  ;;  %v12851_v42 = vld [vmem:[#allocation189_spill] sm:$0xff]  ;;  %v12854_v63 = vld [vmem:[#allocation114_spill] sm:$0xff] }
 0x2b3   : > { %v3213_v41 = vadd.f32 %v3197_v30, %v3164_v1  ;;  %v3214_v18 = vadd.f32 %v3198_v37, %v3165_v22  ;;  %v3215_v36 = vadd.f32 %v3199_v54, %v3166_v61  ;;  %v3216_v2 = vadd.f32 %v3200_v11, %v3167_v46  ;;  %v12852_v1 = vld [vmem:[#allocation130_spill] sm:$0xff]  ;;  %v12853_v61 = vld [vmem:[#allocation53_spill] sm:$0xff]  ;;  %v12857_v23 = vld [vmem:[#allocation55_spill] sm:$0xff] }
 0x2b4   : > { %v3217_v5 = vadd.f32 %v3201_v53, %v3168_v47  ;;  %v3235_v15 = vmul.f32 %v12844_v7, %v12843_v59  ;;  %v3236_v56 = vmul.f32 %v12844_v7, %v12845_v57  ;;  %v3237_v44 = vmul.f32 %v12844_v7, %v12846_v29  ;;  %v12855_v35 = vld [vmem:[#allocation54_spill] sm:$0xff]  ;;  %v12859_v30 = vld [vmem:[#allocation56_spill] sm:$0xff]  ;;  %v12861_v29 = vld [vmem:[#allocation35_spill] sm:$0xff] }
 0x2b5   : > { %v3238_v51 = vmul.f32 %v12844_v7, %v12847_v20  ;;  %v3239_v32 = vmul.f32 %v12844_v7, %v12848_v28  ;;  %v3240_v62 = vmul.f32 %v12844_v7, %v12849_v4  ;;  %v3241_v47 = vmul.f32 %v12844_v7, %v12850_v43  ;;  %v12858_v8 = vld [vmem:[#allocation50_spill] sm:$0xff] }
 0x2b6   : > { %v3242_v45 = vmul.f32 %v12844_v7, %v12851_v42  ;;  %v3243_v22 = vmul.f32 %v12844_v7, %v12852_v1  ;;  %v3244_v46 = vmul.f32 %v12844_v7, %v12853_v61  ;;  %v3245_v31 = vmul.f32 %v12844_v7, %v12854_v63 }
 0x2b7   : > { %v3246_v19 = vmul.f32 %v12844_v7, %v12855_v35  ;;  %v3247_v26 = vmul.f32 %v12844_v7, %v12856_v0  ;;  %v3248_v34 = vmul.f32 %v12844_v7, %v12857_v23  ;;  %v3249_v38 = vmul.f32 %v12844_v7, %v12858_v8  ;;  %v12860_v8 = vld [vmem:[#allocation100_spill] sm:$0xff] }
 0x2b8   : > { %v3250_v37 = vmul.f32 %v12844_v7, %v12859_v30  ;;  %v3251_v54 = vadd.f32 %v3235_v15, %v3202_v33  ;;  %v3252_v59 = vadd.f32 %v3236_v56, %v3203_v48  ;;  %v3253_v11 = vadd.f32 %v3237_v44, %v3204_v60  ;;  %v12862_v7 = vld [vmem:[#allocation84_spill] sm:$0xff]  ;;  %v12863_v33 = vld [vmem:[#allocation101_spill] sm:$0xff] }
 0x2b9   : > { %v3254_v53 = vadd.f32 %v3238_v51, %v3205_v58  ;;  %v3255_v57 = vadd.f32 %v3239_v32, %v3206_v21  ;;  %v3256_v63 = vadd.f32 %v3240_v62, %v3207_v3  ;;  %v3257_v61 = vadd.f32 %v3241_v47, %v3208_v52  ;;  %v12864_v3 = vld [vmem:[#allocation85_spill] sm:$0xff]  ;;  %v12870_v58 = vld [vmem:[#allocation88_spill] sm:$0xff]  ;;  %v12873_v62 = vld [vmem:[#allocation106_spill] sm:$0xff] }
 0x2ba   : > { %v3258_v35 = vadd.f32 %v3242_v45, %v3209_v12  ;;  %v3259_v1 = vadd.f32 %v3243_v22, %v3210_v40  ;;  %v3260_v42 = vadd.f32 %v3244_v46, %v3211_v17  ;;  %v3261_v0 = vadd.f32 %v3245_v31, %v3212_v14  ;;  %v12865_v40 = vld [vmem:[#allocation102_spill] sm:$0xff]  ;;  %v12868_v12 = vld [vmem:[#allocation87_spill] sm:$0xff]  ;;  %v12871_v56 = vld [vmem:[#allocation105_spill] sm:$0xff] }
 0x2bb   : > { %v3262_v43 = vadd.f32 %v3246_v19, %v3213_v41  ;;  %v3263_v4 = vadd.f32 %v3247_v26, %v3214_v18  ;;  %v3264_v23 = vadd.f32 %v3248_v34, %v3215_v36  ;;  %v3265_v28 = vadd.f32 %v3249_v38, %v3216_v2  ;;  %v12866_v41 = vld [vmem:[#allocation86_spill] sm:$0xff]  ;;  %v12867_v2 = vld [vmem:[#allocation103_spill] sm:$0xff]  ;;  %v12869_v36 = vld [vmem:[#allocation104_spill] sm:$0xff] }
 0x2bc   : > { %v3266_v20 = vadd.f32 %v3250_v37, %v3217_v5  ;;  %v3284_v49 = vmul.f32 %v12861_v29, %v12860_v8  ;;  %v3285_v15 = vmul.f32 %v12861_v29, %v12862_v7  ;;  %v3286_v48 = vmul.f32 %v12861_v29, %v12863_v33  ;;  %v12872_v51 = vld [vmem:[#allocation89_spill] sm:$0xff]  ;;  %v12874_v45 = vld [vmem:[#allocation90_spill] sm:$0xff]  ;;  %v12875_v46 = vld [vmem:[#allocation107_spill] sm:$0xff] }
 0x2bd   : > { %v3287_v52 = vmul.f32 %v12861_v29, %v12864_v3  ;;  %v3288_v17 = vmul.f32 %v12861_v29, %v12865_v40  ;;  %v3289_v18 = vmul.f32 %v12861_v29, %v12866_v41  ;;  %v3290_v5 = vmul.f32 %v12861_v29, %v12867_v2  ;;  %v12876_v19 = vld [vmem:[#allocation91_spill] sm:$0xff]  ;;  %v12878_v33 = vld [vmem:[#allocation37_spill] sm:$0xff] }
 0x2be   : > { %v3291_v14 = vmul.f32 %v12861_v29, %v12868_v12  ;;  %v3292_v60 = vmul.f32 %v12861_v29, %v12869_v36  ;;  %v3293_v21 = vmul.f32 %v12861_v29, %v12870_v58  ;;  %v3294_v44 = vmul.f32 %v12861_v29, %v12871_v56 }
 0x2bf   : > { %v3295_v32 = vmul.f32 %v12861_v29, %v12872_v51  ;;  %v3296_v47 = vmul.f32 %v12861_v29, %v12873_v62  ;;  %v3297_v22 = vmul.f32 %v12861_v29, %v12874_v45  ;;  %v3298_v31 = vmul.f32 %v12861_v29, %v12875_v46  ;;  %v12877_v46 = vld [vmem:[#allocation132_spill] sm:$0xff] }
 0x2c0   : > { %v3299_v26 = vmul.f32 %v12861_v29, %v12876_v19  ;;  %v3300_v34 = vadd.f32 %v3284_v49, %v3251_v54  ;;  %v3301_v8 = vadd.f32 %v3285_v15, %v3252_v59  ;;  %v3302_v38 = vadd.f32 %v3286_v48, %v3253_v11  ;;  %v12879_v29 = vld [vmem:[#allocation116_spill] sm:$0xff]  ;;  %v12880_v54 = vld [vmem:[#allocation133_spill] sm:$0xff] }
 0x2c1   : > { %v3303_v37 = vadd.f32 %v3287_v52, %v3254_v53  ;;  %v3304_v7 = vadd.f32 %v3288_v17, %v3255_v57  ;;  %v3305_v56 = vadd.f32 %v3289_v18, %v3256_v63  ;;  %v3306_v58 = vadd.f32 %v3290_v5, %v3257_v61  ;;  %v12881_v63 = vld [vmem:[#allocation117_spill] sm:$0xff]  ;;  %v12887_v53 = vld [vmem:[#allocation120_spill] sm:$0xff]  ;;  %v12890_v18 = vld [vmem:[#allocation138_spill] sm:$0xff] }
 0x2c2   : > { %v3307_v51 = vadd.f32 %v3291_v14, %v3258_v35  ;;  %v3308_v36 = vadd.f32 %v3292_v60, %v3259_v1  ;;  %v3309_v12 = vadd.f32 %v3293_v21, %v3260_v42  ;;  %v3310_v62 = vadd.f32 %v3294_v44, %v3261_v0  ;;  %v12882_v1 = vld [vmem:[#allocation134_spill] sm:$0xff]  ;;  %v12885_v35 = vld [vmem:[#allocation119_spill] sm:$0xff]  ;;  %v12888_v15 = vld [vmem:[#allocation137_spill] sm:$0xff] }
 0x2c3   : > { %v3311_v2 = vadd.f32 %v3295_v32, %v3262_v43  ;;  %v3312_v41 = vadd.f32 %v3296_v47, %v3263_v4  ;;  %v3313_v45 = vadd.f32 %v3297_v22, %v3264_v23  ;;  %v3314_v40 = vadd.f32 %v3298_v31, %v3265_v28  ;;  %v12883_v43 = vld [vmem:[#allocation118_spill] sm:$0xff]  ;;  %v12884_v28 = vld [vmem:[#allocation135_spill] sm:$0xff]  ;;  %v12886_v23 = vld [vmem:[#allocation136_spill] sm:$0xff] }
 0x2c4   : > { %v3315_v3 = vadd.f32 %v3299_v26, %v3266_v20  ;;  %v3333_v30 = vmul.f32 %v12878_v33, %v12877_v46  ;;  %v3334_v49 = vmul.f32 %v12878_v33, %v12879_v29  ;;  %v3335_v59 = vmul.f32 %v12878_v33, %v12880_v54  ;;  %v12889_v52 = vld [vmem:[#allocation121_spill] sm:$0xff]  ;;  %v12891_v60 = vld [vmem:[#allocation139_spill] sm:$0xff] }
 0x2c5   : > { %v3336_v61 = vmul.f32 %v12878_v33, %v12881_v63  ;;  %v3337_v42 = vmul.f32 %v12878_v33, %v12882_v1  ;;  %v3338_v4 = vmul.f32 %v12878_v33, %v12883_v43  ;;  %v3339_v20 = vmul.f32 %v12878_v33, %v12884_v28  ;;  %v12892_v44 = vld [vmem:[#allocation123_spill] sm:$0xff] }
 0x2c6   : > { %v3340_v0 = vmul.f32 %v12878_v33, %v12885_v35  ;;  %v3341_v11 = vmul.f32 %v12878_v33, %v12886_v23  ;;  %v3342_v57 = vmul.f32 %v12878_v33, %v12887_v53  ;;  %v3343_v48 = vmul.f32 %v12878_v33, %v12888_v15 }
 0x2c7   : > { %v3344_v17 = vmul.f32 %v12878_v33, %v12889_v52  ;;  %v3345_v5 = vmul.f32 %v12878_v33, %v12890_v18  ;;  %v3346_v14 = vmul.f32 %v12878_v33, %v12814_v50  ;;  %v3347_v21 = vmul.f32 %v12878_v33, %v12891_v60  ;;  %v12893_v60 = vld [vmem:[#allocation39_spill] sm:$0xff] }
 0x2c8   : > { %v3348_v32 = vmul.f32 %v12878_v33, %v12892_v44  ;;  %v3349_v47 = vadd.f32 %v3333_v30, %v3300_v34  ;;  %v3350_v22 = vadd.f32 %v3334_v49, %v3301_v8  ;;  %v3351_v31 = vadd.f32 %v3335_v59, %v3302_v38  ;;  %v12905_v8 = vld [vmem:[#allocation139_spill] sm:$0xff]  ;;  %v12910_v59 = vld [vmem:[#allocation60_spill] sm:$0xff] }
 0x2c9   : > { %v3352_v26 = vadd.f32 %v3336_v61, %v3303_v37  ;;  %v3353_v19 = vadd.f32 %v3337_v42, %v3304_v7  ;;  %v3354_v9 = vadd.f32 %v3338_v4, %v3305_v56  ;;  %v3355_v27 = vadd.f32 %v3339_v20, %v3306_v58  ;;  %v12908_v7 = vld [vmem:[#allocation59_spill] sm:$0xff]  ;;  %v12911_v42 = vld [vmem:[#allocation61_spill] sm:$0xff]  ;;  %v12912_v20 = vld [vmem:[#allocation62_spill] sm:$0xff] }
 0x2ca   : > { %v3356_v39 = vadd.f32 %v3340_v0, %v3307_v51  ;;  %v3357_v55 = vadd.f32 %v3341_v11, %v3308_v36  ;;  %v3358_v6 = vadd.f32 %v3342_v57, %v3309_v12  ;;  %v3359_v16 = vadd.f32 %v3343_v48, %v3310_v62  ;;  %v12901_v62 = vld [vmem:[#allocation138_spill] sm:$0xff]  ;;  %v12913_v11 = vld [vmem:[#allocation63_spill] sm:$0xff]  ;;  %v12914_v48 = vld [vmem:[#allocation64_spill] sm:$0xff] }
 0x2cb   : > { %v3360_v13 = vadd.f32 %v3344_v17, %v3311_v2  ;;  %v3361_v25 = vadd.f32 %v3345_v5, %v3312_v41  ;;  %v3362_v10 = vadd.f32 %v3346_v14, %v3313_v45  ;;  %v3363_v24 = vadd.f32 %v3347_v21, %v3314_v40  ;;  %v12915_v5 = vld [vmem:[#allocation65_spill] sm:$0xff] }
 0x2cc   : > { %v3364_v50 = vadd.f32 %v3348_v32, %v3315_v3  ;;  %v9352_v18 = vmul.f32 %v12893_v60, %v12877_v46  ;;  %v9356_v30 = vmul.f32 %v12893_v60, %v12879_v29  ;;  %v9360_v33 = vmul.f32 %v12893_v60, %v12880_v54  ;;  %v12903_v46 = vld [vmem:[#allocation122_spill] sm:$0xff]  ;;  %v12917_v32 = vld [vmem:[#allocation67_spill] sm:$0xff] }
 0x2cd   : > { %v9364_v12 = vmul.f32 %v12893_v60, %v12881_v63  ;;  %v9368_v40 = vmul.f32 %v12893_v60, %v12882_v1  ;;  %v9372_v3 = vmul.f32 %v12893_v60, %v12883_v43  ;;  %v9376_v41 = vmul.f32 %v12893_v60, %v12884_v28  ;;  %v12909_v29 = vld [vmem:[#allocation38_spill] sm:$0xff]  ;;  %v12922_v28 = vld [vmem:[#allocation72_spill] sm:$0xff]  ;;  %v12923_v1 = vld [vmem:[#allocation73_spill] sm:$0xff] }
 0x2ce   : > { %v9380_v2 = vmul.f32 %v12893_v60, %v12885_v35  ;;  %v9384_v36 = vmul.f32 %v12893_v60, %v12886_v23  ;;  %v9388_v58 = vmul.f32 %v12893_v60, %v12887_v53  ;;  %v9392_v56 = vmul.f32 %v12893_v60, %v12888_v15  ;;  %v12920_v15 = vld [vmem:[#allocation70_spill] sm:$0xff]  ;;  %v12921_v23 = vld [vmem:[#allocation71_spill] sm:$0xff] }
 0x2cf   : > { %12894 = vst [vmem:[#allocation174_spill] sm:$0xff] %v9372_v3  ;;  %12895 = vst [vmem:[#allocation184_spill] sm:$0xff] %v9376_v41  ;;  %v9396_v51 = vmul.f32 %v12893_v60, %v12889_v52  ;;  %v9400_v45 = vmul.f32 %v12893_v60, %v12901_v62  ;;  %v9404_v34 = vmul.f32 %v12893_v60, %v12903_v46  ;;  %v12919_v62 = vld [vmem:[#allocation69_spill] sm:$0xff]  ;;  %v12924_v54 = vld [vmem:[#allocation74_spill] sm:$0xff] }
 0x2d0   : > { %12896 = vst [vmem:[#allocation175_spill] sm:$0xff] %v9380_v2  ;;  %12897 = vst [vmem:[#allocation185_spill] sm:$0xff] %v9384_v36  ;;  %v9408_v38 = vmul.f32 %v12893_v60, %v12905_v8  ;;  %v9412_v37 = vmul.f32 %v12893_v60, %v12892_v44  ;;  %v3414_v49 = vmul.f32 %v12909_v29, %v12908_v7  ;;  %v12916_v60 = vld [vmem:[#allocation66_spill] sm:$0xff]  ;;  %v12918_v8 = vld [vmem:[#allocation68_spill] sm:$0xff] }
 0x2d1   : > { %12898 = vst [vmem:[#allocation125_spill] sm:$0xff] %v9388_v58  ;;  %12899 = vst [vmem:[#allocation110_spill] sm:$0xff] %v9392_v56  ;;  %v3415_v61 = vmul.f32 %v12909_v29, %v12910_v59  ;;  %v3416_v4 = vmul.f32 %v12909_v29, %v12911_v42  ;;  %v3417_v0 = vmul.f32 %v12909_v29, %v12912_v20 }
 0x2d2   : > { %12900 = vst [vmem:[#allocation45_spill] sm:$0xff] %v9396_v51  ;;  %12902 = vst [vmem:[#allocation31_spill] sm:$0xff] %v9400_v45  ;;  %v3418_v57 = vmul.f32 %v12909_v29, %v12913_v11  ;;  %v3419_v17 = vmul.f32 %v12909_v29, %v12914_v48  ;;  %v3420_v14 = vmul.f32 %v12909_v29, %v12915_v5 }
 0x2d3   : > { %12904 = vst [vmem:[#allocation203_spill] sm:$0xff] %v9404_v34  ;;  %12906 = vst [vmem:[#allocation29_spill] sm:$0xff] %v9408_v38  ;;  %v3421_v21 = vmul.f32 %v12909_v29, %v12916_v60  ;;  %v3422_v44 = vmul.f32 %v12909_v29, %v12917_v32  ;;  %v3423_v46 = vmul.f32 %v12909_v29, %v12918_v8 }
 0x2d4   : > { %12907 = vst [vmem:[#allocation204_spill] sm:$0xff] %v9412_v37  ;;  %v3424_v52 = vmul.f32 %v12909_v29, %v12919_v62  ;;  %v3425_v53 = vmul.f32 %v12909_v29, %v12920_v15  ;;  %v3426_v35 = vmul.f32 %v12909_v29, %v12921_v23  ;;  %v3427_v43 = vmul.f32 %v12909_v29, %v12922_v28 }
 0x2d5   : > { %v3428_v63 = vmul.f32 %v12909_v29, %v12923_v1  ;;  %v3429_v37 = vmul.f32 %v12909_v29, %v12924_v54  ;;  %v9446_v38 = vadd.f32 %v3414_v49, %v3349_v47  ;;  %v9448_v34 = vadd.f32 %v3415_v61, %v3350_v22 }
 0x2d6   : > { %v9450_v45 = vadd.f32 %v3416_v4, %v3351_v31  ;;  %v9452_v51 = vadd.f32 %v3417_v0, %v3352_v26  ;;  %v9454_v56 = vadd.f32 %v3418_v57, %v3353_v19  ;;  %v9456_v58 = vadd.f32 %v3419_v17, %v3354_v9  ;;  %v12926_v61 = vld [vmem:[#allocation174_spill] sm:$0xff]  ;;  %v12927_v0 = vld [vmem:[#allocation184_spill] sm:$0xff] }
 0x2d7   : > { %v9458_v36 = vadd.f32 %v3420_v14, %v3355_v27  ;;  %v9460_v2 = vadd.f32 %v3421_v21, %v3356_v39  ;;  %v9462_v41 = vadd.f32 %v3422_v44, %v3357_v55  ;;  %v9464_v3 = vadd.f32 %v3423_v46, %v3358_v6  ;;  %v12925_v27 = vld [vmem:[#allocation44_spill] sm:$0xff] }
 0x2d8   : > { %v9466_v47 = vadd.f32 %v3424_v52, %v3359_v16  ;;  %v9468_v22 = vadd.f32 %v3425_v53, %v3360_v13  ;;  %v9470_v31 = vadd.f32 %v3426_v35, %v3361_v25  ;;  %v9472_v26 = vadd.f32 %v3427_v43, %v3362_v10 }
 0x2d9   : > { %v9474_v19 = vadd.f32 %v3428_v63, %v3363_v24  ;;  %v9476_v9 = vadd.f32 %v3429_v37, %v3364_v50  ;;  %v3446_v39 = vmul.f32 %v12925_v27, %v12908_v7  ;;  %v3447_v55 = vmul.f32 %v12925_v27, %v12910_v59 }
 0x2da   : > { %v3448_v6 = vmul.f32 %v12925_v27, %v12911_v42  ;;  %v3449_v13 = vmul.f32 %v12925_v27, %v12912_v20  ;;  %v3450_v10 = vmul.f32 %v12925_v27, %v12913_v11  ;;  %v3451_v24 = vmul.f32 %v12925_v27, %v12914_v48  ;;  %v12959_v11 = vld [vmem:[#allocation155_spill] sm:$0xff]  ;;  %v12960_v42 = vld [vmem:[#allocation129_spill] sm:$0xff] }
 0x2db   : > { %v3452_v50 = vmul.f32 %v12925_v27, %v12915_v5  ;;  %v3453_v25 = vmul.f32 %v12925_v27, %v12916_v60  ;;  %v3454_v16 = vmul.f32 %v12925_v27, %v12917_v32  ;;  %v3455_v63 = vmul.f32 %v12925_v27, %v12918_v8  ;;  %v12957_v32 = vld [vmem:[#allocation154_spill] sm:$0xff]  ;;  %v12958_v5 = vld [vmem:[#allocation112_spill] sm:$0xff] }
 0x2dc   : > { %v3456_v43 = vmul.f32 %v12925_v27, %v12919_v62  ;;  %v3457_v35 = vmul.f32 %v12925_v27, %v12920_v15  ;;  %v3458_v53 = vmul.f32 %v12925_v27, %v12921_v23  ;;  %v3459_v52 = vmul.f32 %v12925_v27, %v12922_v28  ;;  %v12955_v23 = vld [vmem:[#allocation153_spill] sm:$0xff] }
 0x2dd   : > { %v3460_v44 = vmul.f32 %v12925_v27, %v12923_v1  ;;  %v3461_v46 = vmul.f32 %v12925_v27, %v12924_v54  ;;  %v9511_v37 = vadd.f32 %v3446_v39, %v9352_v18  ;;  %v9514_v7 = vadd.f32 %v3447_v55, %v9356_v30  ;;  %v12928_v18 = vld [vmem:[#allocation175_spill] sm:$0xff]  ;;  %v12929_v30 = vld [vmem:[#allocation185_spill] sm:$0xff]  ;;  %v12954_v1 = vld [vmem:[#allocation168_spill] sm:$0xff] }
 0x2de   : > { %v9517_v29 = vadd.f32 %v3448_v6, %v9360_v33  ;;  %v9520_v49 = vadd.f32 %v3449_v13, %v9364_v12  ;;  %v9523_v59 = vadd.f32 %v3450_v10, %v9368_v40  ;;  %v9526_v4 = vadd.f32 %v3451_v24, %v12926_v61  ;;  %v12930_v33 = vld [vmem:[#allocation125_spill] sm:$0xff]  ;;  %v12932_v12 = vld [vmem:[#allocation110_spill] sm:$0xff]  ;;  %v12936_v55 = vld [vmem:[#allocation31_spill] sm:$0xff] }
 0x2df   : > { %v9529_v57 = vadd.f32 %v3452_v50, %v12927_v0  ;;  %v9532_v17 = vadd.f32 %v3453_v25, %v12928_v18  ;;  %v9535_v14 = vadd.f32 %v3454_v16, %v12929_v30  ;;  %v9538_v21 = vadd.f32 %v3455_v63, %v12930_v33  ;;  %v12934_v40 = vld [vmem:[#allocation45_spill] sm:$0xff]  ;;  %v12938_v13 = vld [vmem:[#allocation203_spill] sm:$0xff]  ;;  %v12942_v25 = vld [vmem:[#allocation204_spill] sm:$0xff] }
 0x2e0   : > { %v9541_v27 = vadd.f32 %v3456_v43, %v12932_v12  ;;  %v9544_v39 = vadd.f32 %v3457_v35, %v12934_v40  ;;  %v9547_v6 = vadd.f32 %v3458_v53, %v12936_v55  ;;  %v9550_v10 = vadd.f32 %v3459_v52, %v12938_v13  ;;  %v12940_v24 = vld [vmem:[#allocation29_spill] sm:$0xff]  ;;  %v12944_v63 = vld [vmem:[#allocation148_spill] sm:$0xff]  ;;  %v12945_v61 = vld [vmem:[#allocation42_spill] sm:$0xff] }
 0x2e1   : > { %12931 = vst [vmem:[#allocation33_spill] sm:$0xff] %v9538_v21  ;;  %v9553_v50 = vadd.f32 %v3460_v44, %v12940_v24  ;;  %v9556_v16 = vadd.f32 %v3461_v46, %v12942_v25  ;;  %v3495_v0 = vmul.f32 %v12945_v61, %v12944_v63  ;;  %v12946_v43 = vld [vmem:[#allocation164_spill] sm:$0xff]  ;;  %v12947_v35 = vld [vmem:[#allocation149_spill] sm:$0xff]  ;;  %v12949_v52 = vld [vmem:[#allocation150_spill] sm:$0xff]  ;;  %v3504_v28 = vmul.f32 %v12945_v61, %v12954_v1 }
 0x2e2   : > { %12933 = vst [vmem:[#allocation26_spill] sm:$0xff] %v9541_v27  ;;  %12935 = vst [vmem:[#allocation142_spill] sm:$0xff] %v9544_v39  ;;  %v3496_v18 = vmul.f32 %v12945_v61, %v12946_v43  ;;  %v3497_v30 = vmul.f32 %v12945_v61, %v12947_v35  ;;  %v12948_v53 = vld [vmem:[#allocation165_spill] sm:$0xff]  ;;  %v3499_v12 = vmul.f32 %v12945_v61, %v12949_v52  ;;  %v12950_v44 = vld [vmem:[#allocation166_spill] sm:$0xff] }
 0x2e3   : > { %12937 = vst [vmem:[#allocation157_spill] sm:$0xff] %v9547_v6  ;;  %12939 = vst [vmem:[#allocation143_spill] sm:$0xff] %v9550_v10  ;;  %v3498_v33 = vmul.f32 %v12945_v61, %v12948_v53  ;;  %v3500_v40 = vmul.f32 %v12945_v61, %v12950_v44  ;;  %v12951_v46 = vld [vmem:[#allocation151_spill] sm:$0xff]  ;;  %v12953_v25 = vld [vmem:[#allocation152_spill] sm:$0xff]  ;;  %v3505_v15 = vmul.f32 %v12945_v61, %v12955_v23 }
 0x2e4   : > { %12941 = vst [vmem:[#allocation159_spill] sm:$0xff] %v9553_v50  ;;  %12943 = vst [vmem:[#allocation144_spill] sm:$0xff] %v9556_v16  ;;  %v3501_v55 = vmul.f32 %v12945_v61, %v12951_v46  ;;  %v12952_v13 = vld [vmem:[#allocation167_spill] sm:$0xff]  ;;  %v3503_v54 = vmul.f32 %v12945_v61, %v12953_v25  ;;  %v12956_v62 = vld [vmem:[#allocation169_spill] sm:$0xff]  ;;  %v3507_v60 = vmul.f32 %v12945_v61, %v12957_v32 }
 0x2e5   : > { %v3502_v24 = vmul.f32 %v12945_v61, %v12952_v13  ;;  %v3506_v8 = vmul.f32 %v12945_v61, %v12956_v62  ;;  %v3508_v48 = vmul.f32 %v12945_v61, %v12958_v5  ;;  %v3509_v20 = vmul.f32 %v12945_v61, %v12959_v11 }
 0x2e6   : > { %v3510_v16 = vmul.f32 %v12945_v61, %v12960_v42  ;;  %v9591_v50 = vadd.f32 %v3495_v0, %v9446_v38  ;;  %v9594_v10 = vadd.f32 %v3496_v18, %v9448_v34  ;;  %v9597_v6 = vadd.f32 %v3497_v30, %v9450_v45 }
 0x2e7   : > { %v9600_v39 = vadd.f32 %v3498_v33, %v9452_v51  ;;  %v9603_v27 = vadd.f32 %v3499_v12, %v9454_v56  ;;  %v9606_v21 = vadd.f32 %v3500_v40, %v9456_v58  ;;  %v9609_v61 = vadd.f32 %v3501_v55, %v9458_v36 }
 0x2e8   : > { %v9612_v38 = vadd.f32 %v3502_v24, %v9460_v2  ;;  %v9615_v34 = vadd.f32 %v3503_v54, %v9462_v41  ;;  %v9618_v45 = vadd.f32 %v3504_v28, %v9464_v3  ;;  %v9621_v51 = vadd.f32 %v3505_v15, %v9466_v47  ;;  %v12961_v28 = vld [vmem:[#allocation193_spill] sm:$0xff] }
 0x2e9   : > { %v9624_v56 = vadd.f32 %v3506_v8, %v9468_v22  ;;  %v9627_v58 = vadd.f32 %v3507_v60, %v9470_v31  ;;  %v9630_v36 = vadd.f32 %v3508_v48, %v9472_v26  ;;  %v9633_v2 = vadd.f32 %v3509_v20, %v9474_v19 }
 0x2ea   : > { %v9636_v54 = vadd.f32 %v3510_v16, %v9476_v9  ;;  %v3527_v3 = vmul.f32 %v12961_v28, %v12944_v63  ;;  %v3528_v15 = vmul.f32 %v12961_v28, %v12946_v43  ;;  %v3529_v41 = vmul.f32 %v12961_v28, %v12947_v35 }
 0x2eb   : > { %v3530_v8 = vmul.f32 %v12961_v28, %v12948_v53  ;;  %v3531_v48 = vmul.f32 %v12961_v28, %v12949_v52  ;;  %v3532_v20 = vmul.f32 %v12961_v28, %v12950_v44  ;;  %v3533_v60 = vmul.f32 %v12961_v28, %v12951_v46 }
 0x2ec   : > { %v3534_v47 = vmul.f32 %v12961_v28, %v12952_v13  ;;  %v3535_v22 = vmul.f32 %v12961_v28, %v12953_v25  ;;  %v3536_v31 = vmul.f32 %v12961_v28, %v12954_v1  ;;  %v3537_v26 = vmul.f32 %v12961_v28, %v12955_v23  ;;  %v12996_v23 = vld [vmem:[#allocation172_spill] sm:$0xff] }
 0x2ed   : > { %v3538_v19 = vmul.f32 %v12961_v28, %v12956_v62  ;;  %v3539_v9 = vmul.f32 %v12961_v28, %v12957_v32  ;;  %v3540_v16 = vmul.f32 %v12961_v28, %v12958_v5  ;;  %v3541_v63 = vmul.f32 %v12961_v28, %v12959_v11  ;;  %v12992_v11 = vld [vmem:[#allocation55_spill] sm:$0xff]  ;;  %v12993_v5 = vld [vmem:[#allocation50_spill] sm:$0xff]  ;;  %v12994_v32 = vld [vmem:[#allocation56_spill] sm:$0xff] }
 0x2ee   : > { %v3542_v0 = vmul.f32 %v12961_v28, %v12960_v42  ;;  %v9671_v43 = vadd.f32 %v3527_v3, %v9511_v37  ;;  %v9674_v18 = vadd.f32 %v3528_v15, %v9514_v7  ;;  %v9677_v30 = vadd.f32 %v3529_v41, %v9517_v29  ;;  %v12966_v29 = vld [vmem:[#allocation33_spill] sm:$0xff]  ;;  %v12995_v62 = vld [vmem:[#allocation51_spill] sm:$0xff] }
 0x2ef   : > { %v9680_v33 = vadd.f32 %v3530_v8, %v9520_v49  ;;  %v9683_v12 = vadd.f32 %v3531_v48, %v9523_v59  ;;  %v9686_v40 = vadd.f32 %v3532_v20, %v9526_v4  ;;  %v9689_v55 = vadd.f32 %v3533_v60, %v9529_v57  ;;  %v12968_v49 = vld [vmem:[#allocation26_spill] sm:$0xff]  ;;  %v12972_v4 = vld [vmem:[#allocation157_spill] sm:$0xff]  ;;  %v12974_v57 = vld [vmem:[#allocation143_spill] sm:$0xff] }
 0x2f0   : > { %v9692_v37 = vadd.f32 %v3534_v47, %v9532_v17  ;;  %v9695_v7 = vadd.f32 %v3535_v22, %v9535_v14  ;;  %v9698_v24 = vadd.f32 %v3536_v31, %v12966_v29  ;;  %v9701_v28 = vadd.f32 %v3537_v26, %v12968_v49  ;;  %v12970_v59 = vld [vmem:[#allocation142_spill] sm:$0xff]  ;;  %v12976_v17 = vld [vmem:[#allocation159_spill] sm:$0xff]  ;;  %v12978_v14 = vld [vmem:[#allocation144_spill] sm:$0xff] }
 0x2f1   : > { %12962 = vst [vmem:[#allocation160_spill] sm:$0xff] %v9686_v40  ;;  %12963 = vst [vmem:[#allocation145_spill] sm:$0xff] %v9689_v55  ;;  %v9704_v3 = vadd.f32 %v3538_v19, %v12970_v59  ;;  %v9707_v15 = vadd.f32 %v3539_v9, %v12972_v4  ;;  %v9710_v41 = vadd.f32 %v3540_v16, %v12974_v57  ;;  %v12980_v20 = vld [vmem:[#allocation177_spill] sm:$0xff]  ;;  %v12981_v60 = vld [vmem:[#allocation194_spill] sm:$0xff] }
 0x2f2   : > { %12964 = vst [vmem:[#allocation99_spill] sm:$0xff] %v9692_v37  ;;  %12965 = vst [vmem:[#allocation27_spill] sm:$0xff] %v9695_v7  ;;  %v9713_v8 = vadd.f32 %v3541_v63, %v12976_v17  ;;  %v9716_v48 = vadd.f32 %v3542_v0, %v12978_v14  ;;  %v3576_v47 = vmul.f32 %v12981_v60, %v12980_v20  ;;  %v12982_v22 = vld [vmem:[#allocation187_spill] sm:$0xff]  ;;  %v12983_v26 = vld [vmem:[#allocation178_spill] sm:$0xff] }
 0x2f3   : > { %12967 = vst [vmem:[#allocation83_spill] sm:$0xff] %v9698_v24  ;;  %12969 = vst [vmem:[#allocation131_spill] sm:$0xff] %v9701_v28  ;;  %v3577_v31 = vmul.f32 %v12981_v60, %v12982_v22  ;;  %v3578_v19 = vmul.f32 %v12981_v60, %v12983_v26  ;;  %v12984_v9 = vld [vmem:[#allocation188_spill] sm:$0xff]  ;;  %v12985_v16 = vld [vmem:[#allocation179_spill] sm:$0xff] }
 0x2f4   : > { %12971 = vst [vmem:[#allocation28_spill] sm:$0xff] %v9704_v3  ;;  %12973 = vst [vmem:[#allocation115_spill] sm:$0xff] %v9707_v15  ;;  %v3579_v29 = vmul.f32 %v12981_v60, %v12984_v9  ;;  %v3580_v49 = vmul.f32 %v12981_v60, %v12985_v16  ;;  %v12986_v63 = vld [vmem:[#allocation189_spill] sm:$0xff]  ;;  %v12987_v0 = vld [vmem:[#allocation130_spill] sm:$0xff]  ;;  %v3587_v16 = vmul.f32 %v12981_v60, %v12992_v11 }
 0x2f5   : > { %12975 = vst [vmem:[#allocation57_spill] sm:$0xff] %v9710_v41  ;;  %12977 = vst [vmem:[#allocation30_spill] sm:$0xff] %v9713_v8  ;;  %v3581_v59 = vmul.f32 %v12981_v60, %v12986_v63  ;;  %v3582_v4 = vmul.f32 %v12981_v60, %v12987_v0  ;;  %v12988_v57 = vld [vmem:[#allocation53_spill] sm:$0xff]  ;;  %v12989_v14 = vld [vmem:[#allocation114_spill] sm:$0xff]  ;;  %v3588_v63 = vmul.f32 %v12981_v60, %v12993_v5 }
 0x2f6   : > { %12979 = vst [vmem:[#allocation58_spill] sm:$0xff] %v9716_v48  ;;  %v3583_v17 = vmul.f32 %v12981_v60, %v12988_v57  ;;  %v3584_v20 = vmul.f32 %v12981_v60, %v12989_v14  ;;  %v12990_v22 = vld [vmem:[#allocation54_spill] sm:$0xff]  ;;  %v12991_v42 = vld [vmem:[#allocation49_spill] sm:$0xff]  ;;  %v3589_v0 = vmul.f32 %v12981_v60, %v12994_v32  ;;  %v3590_v57 = vmul.f32 %v12981_v60, %v12995_v62  ;;  %v13015_v15 = vld [vmem:[#allocation196_spill] sm:$0xff] }
 0x2f7   : > { %v3585_v26 = vmul.f32 %v12981_v60, %v12990_v22  ;;  %v3586_v9 = vmul.f32 %v12981_v60, %v12991_v42  ;;  %v3591_v14 = vmul.f32 %v12981_v60, %v12996_v23  ;;  %v3592_v22 = vadd.f32 %v3576_v47, %v9591_v50  ;;  %v12997_v47 = vld [vmem:[#allocation101_spill] sm:$0xff] }
 0x2f8   : > { %v3593_v1 = vadd.f32 %v3577_v31, %v9594_v10  ;;  %v3594_v42 = vadd.f32 %v3578_v19, %v9597_v6  ;;  %v3595_v11 = vadd.f32 %v3579_v29, %v9600_v39  ;;  %v3596_v25 = vadd.f32 %v3580_v49, %v9603_v27  ;;  %v13000_v19 = vld [vmem:[#allocation102_spill] sm:$0xff]  ;;  %v13005_v29 = vld [vmem:[#allocation88_spill] sm:$0xff]  ;;  %v13006_v49 = vld [vmem:[#allocation105_spill] sm:$0xff] }
 0x2f9   : > { %v3597_v5 = vadd.f32 %v3581_v59, %v9606_v21  ;;  %v3598_v32 = vadd.f32 %v3582_v4, %v9609_v61  ;;  %v3599_v13 = vadd.f32 %v3583_v17, %v9612_v38  ;;  %v3600_v62 = vadd.f32 %v3584_v20, %v9615_v34  ;;  %v12998_v61 = vld [vmem:[#allocation195_spill] sm:$0xff]  ;;  %v12999_v38 = vld [vmem:[#allocation85_spill] sm:$0xff]  ;;  %v13008_v4 = vld [vmem:[#allocation106_spill] sm:$0xff] }
 0x2fa   : > { %v3601_v60 = vadd.f32 %v3585_v26, %v9618_v45  ;;  %v3602_v50 = vadd.f32 %v3586_v9, %v9621_v51  ;;  %v3603_v10 = vadd.f32 %v3587_v16, %v9624_v56  ;;  %v3604_v6 = vadd.f32 %v3588_v63, %v9627_v58  ;;  %v13001_v51 = vld [vmem:[#allocation86_spill] sm:$0xff]  ;;  %v13002_v26 = vld [vmem:[#allocation103_spill] sm:$0xff]  ;;  %v13004_v9 = vld [vmem:[#allocation104_spill] sm:$0xff] }
 0x2fb   : > { %v3605_v39 = vadd.f32 %v3589_v0, %v9630_v36  ;;  %v3606_v27 = vadd.f32 %v3590_v57, %v9633_v2  ;;  %v3607_v21 = vadd.f32 %v3591_v14, %v9636_v54  ;;  %v3625_v31 = vmul.f32 %v12998_v61, %v12997_v47  ;;  %v13003_v36 = vld [vmem:[#allocation87_spill] sm:$0xff]  ;;  %v13007_v59 = vld [vmem:[#allocation89_spill] sm:$0xff]  ;;  %v13009_v17 = vld [vmem:[#allocation90_spill] sm:$0xff] }
 0x2fc   : > { %v3626_v34 = vmul.f32 %v12998_v61, %v12999_v38  ;;  %v3627_v45 = vmul.f32 %v12998_v61, %v13000_v19  ;;  %v3628_v56 = vmul.f32 %v12998_v61, %v13001_v51  ;;  %v3629_v58 = vmul.f32 %v12998_v61, %v13002_v26  ;;  %v13010_v20 = vld [vmem:[#allocation107_spill] sm:$0xff]  ;;  %v13013_v26 = vld [vmem:[#allocation94_spill] sm:$0xff] }
 0x2fd   : > { %v3630_v2 = vmul.f32 %v12998_v61, %v13003_v36  ;;  %v3631_v54 = vmul.f32 %v12998_v61, %v13004_v9  ;;  %v3632_v16 = vmul.f32 %v12998_v61, %v13005_v29  ;;  %v3633_v63 = vmul.f32 %v12998_v61, %v13006_v49  ;;  %v13011_v38 = vld [vmem:[#allocation91_spill] sm:$0xff]  ;;  %v13012_v36 = vld [vmem:[#allocation108_spill] sm:$0xff] }
 0x2fe   : > { %v3634_v0 = vmul.f32 %v12998_v61, %v13007_v59  ;;  %v3635_v57 = vmul.f32 %v12998_v61, %v13008_v4  ;;  %v3636_v14 = vmul.f32 %v12998_v61, %v13009_v17  ;;  %v3637_v47 = vmul.f32 %v12998_v61, %v13010_v20 }
 0x2ff   : > { %v3638_v9 = vmul.f32 %v12998_v61, %v13011_v38  ;;  %v3639_v29 = vmul.f32 %v12998_v61, %v13012_v36  ;;  %v3640_v49 = vmul.f32 %v12998_v61, %v13013_v26  ;;  %v3641_v51 = vadd.f32 %v3625_v31, %v3592_v22  ;;  %v13014_v36 = vld [vmem:[#allocation133_spill] sm:$0xff] }
 0x300   : > { %v3642_v59 = vadd.f32 %v3626_v34, %v3593_v1  ;;  %v3643_v19 = vadd.f32 %v3627_v45, %v3594_v42  ;;  %v3644_v23 = vadd.f32 %v3628_v56, %v3595_v11  ;;  %v3645_v4 = vadd.f32 %v3629_v58, %v3596_v25  ;;  %v13016_v61 = vld [vmem:[#allocation117_spill] sm:$0xff]  ;;  %v13017_v42 = vld [vmem:[#allocation134_spill] sm:$0xff]  ;;  %v13020_v25 = vld [vmem:[#allocation119_spill] sm:$0xff] }
 0x301   : > { %v3646_v46 = vadd.f32 %v3630_v2, %v3597_v5  ;;  %v3647_v44 = vadd.f32 %v3631_v54, %v3598_v32  ;;  %v3648_v17 = vadd.f32 %v3632_v16, %v3599_v13  ;;  %v3649_v52 = vadd.f32 %v3633_v63, %v3600_v62  ;;  %v13018_v5 = vld [vmem:[#allocation118_spill] sm:$0xff]  ;;  %v13019_v62 = vld [vmem:[#allocation135_spill] sm:$0xff]  ;;  %v13029_v16 = vld [vmem:[#allocation140_spill] sm:$0xff] }
 0x302   : > { %v3650_v53 = vadd.f32 %v3634_v0, %v3601_v60  ;;  %v3651_v20 = vadd.f32 %v3635_v57, %v3602_v50  ;;  %v3652_v35 = vadd.f32 %v3636_v14, %v3603_v10  ;;  %v3653_v48 = vadd.f32 %v3637_v47, %v3604_v6  ;;  %v13021_v60 = vld [vmem:[#allocation136_spill] sm:$0xff]  ;;  %v13025_v34 = vld [vmem:[#allocation138_spill] sm:$0xff]  ;;  %v13027_v2 = vld [vmem:[#allocation139_spill] sm:$0xff] }
 0x303   : > { %v3654_v38 = vadd.f32 %v3638_v9, %v3605_v39  ;;  %v3655_v8 = vadd.f32 %v3639_v29, %v3606_v27  ;;  %v3656_v41 = vadd.f32 %v3640_v49, %v3607_v21  ;;  %v3674_v3 = vmul.f32 %v13015_v15, %v13014_v36  ;;  %v13022_v10 = vld [vmem:[#allocation120_spill] sm:$0xff]  ;;  %v13023_v39 = vld [vmem:[#allocation137_spill] sm:$0xff]  ;;  %v13026_v56 = vld [vmem:[#allocation122_spill] sm:$0xff] }
 0x304   : > { %v3675_v1 = vmul.f32 %v13015_v15, %v13016_v61  ;;  %v3676_v11 = vmul.f32 %v13015_v15, %v13017_v42  ;;  %v3677_v32 = vmul.f32 %v13015_v15, %v13018_v5  ;;  %v3678_v13 = vmul.f32 %v13015_v15, %v13019_v62  ;;  %v13024_v21 = vld [vmem:[#allocation121_spill] sm:$0xff]  ;;  %v13028_v54 = vld [vmem:[#allocation123_spill] sm:$0xff]  ;;  %v13030_v63 = vld [vmem:[#allocation126_spill] sm:$0xff] }
 0x305   : > { %v3679_v22 = vmul.f32 %v13015_v15, %v13020_v25  ;;  %v3680_v50 = vmul.f32 %v13015_v15, %v13021_v60  ;;  %v3681_v6 = vmul.f32 %v13015_v15, %v13022_v10  ;;  %v3682_v27 = vmul.f32 %v13015_v15, %v13023_v39 }
 0x306   : > { %v3683_v31 = vmul.f32 %v13015_v15, %v13024_v21  ;;  %v3684_v45 = vmul.f32 %v13015_v15, %v13025_v34  ;;  %v3685_v58 = vmul.f32 %v13015_v15, %v13026_v56  ;;  %v3686_v9 = vmul.f32 %v13015_v15, %v13027_v2 }
 0x307   : > { %v3687_v29 = vmul.f32 %v13015_v15, %v13028_v54  ;;  %v3688_v49 = vmul.f32 %v13015_v15, %v13029_v16  ;;  %v3689_v0 = vmul.f32 %v13015_v15, %v13030_v63  ;;  %v9830_v57 = vadd.f32 %v3674_v3, %v3641_v51 }
 0x308   : > { %v9832_v14 = vadd.f32 %v3675_v1, %v3642_v59  ;;  %v9834_v47 = vadd.f32 %v3676_v11, %v3643_v19  ;;  %v9836_v26 = vadd.f32 %v3677_v32, %v3644_v23  ;;  %v9838_v28 = vadd.f32 %v3678_v13, %v3645_v4 }
 0x309   : > { %v9840_v24 = vadd.f32 %v3679_v22, %v3646_v46  ;;  %v9842_v7 = vadd.f32 %v3680_v50, %v3647_v44  ;;  %v9844_v37 = vadd.f32 %v3681_v6, %v3648_v17  ;;  %v9846_v55 = vadd.f32 %v3682_v27, %v3649_v52  ;;  %v13031_v44 = vld [vmem:[#allocation197_spill] sm:$0xff] }
 0x30a   : > { %v9848_v40 = vadd.f32 %v3683_v31, %v3650_v53  ;;  %v9850_v3 = vadd.f32 %v3684_v45, %v3651_v20  ;;  %v9852_v15 = vadd.f32 %v3685_v58, %v3652_v35  ;;  %v9854_v19 = vadd.f32 %v3686_v9, %v3653_v48  ;;  %v13032_v31 = vld [vmem:[#allocation160_spill] sm:$0xff]  ;;  %v13033_v58 = vld [vmem:[#allocation145_spill] sm:$0xff] }
 0x30b   : > { %v9856_v23 = vadd.f32 %v3687_v29, %v3654_v38  ;;  %v9858_v51 = vadd.f32 %v3688_v49, %v3655_v8  ;;  %v9860_v46 = vadd.f32 %v3689_v0, %v3656_v41  ;;  %v3706_v59 = vmul.f32 %v13031_v44, %v13014_v36 }
 0x30c   : > { %v3707_v52 = vmul.f32 %v13031_v44, %v13016_v61  ;;  %v3708_v53 = vmul.f32 %v13031_v44, %v13017_v42  ;;  %v3709_v35 = vmul.f32 %v13031_v44, %v13018_v5  ;;  %v3710_v48 = vmul.f32 %v13031_v44, %v13019_v62  ;;  %v13065_v62 = vld [vmem:[#allocation75_spill] sm:$0xff]  ;;  %v13066_v42 = vld [vmem:[#allocation76_spill] sm:$0xff] }
 0x30d   : > { %v3711_v8 = vmul.f32 %v13031_v44, %v13020_v25  ;;  %v3712_v41 = vmul.f32 %v13031_v44, %v13021_v60  ;;  %v3713_v36 = vmul.f32 %v13031_v44, %v13022_v10  ;;  %v3714_v4 = vmul.f32 %v13031_v44, %v13023_v39  ;;  %v13063_v39 = vld [vmem:[#allocation73_spill] sm:$0xff]  ;;  %v13064_v60 = vld [vmem:[#allocation74_spill] sm:$0xff] }
 0x30e   : > { %v3715_v17 = vmul.f32 %v13031_v44, %v13024_v21  ;;  %v3716_v20 = vmul.f32 %v13031_v44, %v13025_v34  ;;  %v3717_v38 = vmul.f32 %v13031_v44, %v13026_v56  ;;  %v3718_v61 = vmul.f32 %v13031_v44, %v13027_v2  ;;  %v13061_v2 = vld [vmem:[#allocation71_spill] sm:$0xff]  ;;  %v13062_v34 = vld [vmem:[#allocation72_spill] sm:$0xff] }
 0x30f   : > { %v3719_v1 = vmul.f32 %v13031_v44, %v13028_v54  ;;  %v3720_v11 = vmul.f32 %v13031_v44, %v13029_v16  ;;  %v3721_v32 = vmul.f32 %v13031_v44, %v13030_v63  ;;  %v9895_v13 = vadd.f32 %v3706_v59, %v9671_v43  ;;  %v13034_v43 = vld [vmem:[#allocation99_spill] sm:$0xff]  ;;  %v13060_v16 = vld [vmem:[#allocation70_spill] sm:$0xff] }
 0x310   : > { %v9898_v22 = vadd.f32 %v3707_v52, %v9674_v18  ;;  %v9901_v50 = vadd.f32 %v3708_v53, %v9677_v30  ;;  %v9904_v6 = vadd.f32 %v3709_v35, %v9680_v33  ;;  %v9907_v27 = vadd.f32 %v3710_v48, %v9683_v12  ;;  %v13035_v18 = vld [vmem:[#allocation27_spill] sm:$0xff]  ;;  %v13040_v12 = vld [vmem:[#allocation28_spill] sm:$0xff]  ;;  %v13044_v35 = vld [vmem:[#allocation57_spill] sm:$0xff] }
 0x311   : > { %v9910_v45 = vadd.f32 %v3711_v8, %v13032_v31  ;;  %v9913_v9 = vadd.f32 %v3712_v41, %v13033_v58  ;;  %v9916_v29 = vadd.f32 %v3713_v36, %v13034_v43  ;;  %v9919_v49 = vadd.f32 %v3714_v4, %v13035_v18  ;;  %v13036_v30 = vld [vmem:[#allocation83_spill] sm:$0xff]  ;;  %v13046_v8 = vld [vmem:[#allocation30_spill] sm:$0xff] }
 0x312   : > { %v9922_v0 = vadd.f32 %v3715_v17, %v13036_v30  ;;  %v13038_v33 = vld [vmem:[#allocation131_spill] sm:$0xff]  ;;  %v9928_v59 = vadd.f32 %v3717_v38, %v13040_v12  ;;  %v9934_v48 = vadd.f32 %v3719_v1, %v13044_v35  ;;  %v9937_v41 = vadd.f32 %v3720_v11, %v13046_v8  ;;  %v13048_v36 = vld [vmem:[#allocation58_spill] sm:$0xff]  ;;  %v13050_v17 = vld [vmem:[#allocation61_spill] sm:$0xff] }
 0x313   : > { %v9925_v44 = vadd.f32 %v3716_v20, %v13038_v33  ;;  %v13042_v52 = vld [vmem:[#allocation115_spill] sm:$0xff]  ;;  %v9940_v4 = vadd.f32 %v3721_v32, %v13048_v36  ;;  %v13051_v31 = vld [vmem:[#allocation198_spill] sm:$0xff]  ;;  %v13055_v1 = vld [vmem:[#allocation65_spill] sm:$0xff] }
 0x314   : > { %13037 = vst [vmem:[#allocation147_spill] sm:$0xff] %v9922_v0  ;;  %13041 = vst [vmem:[#allocation163_spill] sm:$0xff] %v9928_v59  ;;  %v9931_v53 = vadd.f32 %v3718_v61, %v13042_v52  ;;  %v3755_v58 = vmul.f32 %v13051_v31, %v13050_v17  ;;  %v13052_v20 = vld [vmem:[#allocation62_spill] sm:$0xff]  ;;  %v13053_v38 = vld [vmem:[#allocation63_spill] sm:$0xff]  ;;  %v3759_v33 = vmul.f32 %v13051_v31, %v13055_v1 }
 0x315   : > { %13039 = vst [vmem:[#allocation32_spill] sm:$0xff] %v9925_v44  ;;  %13045 = vst [vmem:[#allocation34_spill] sm:$0xff] %v9934_v48  ;;  %v3756_v43 = vmul.f32 %v13051_v31, %v13052_v20  ;;  %v3757_v18 = vmul.f32 %v13051_v31, %v13053_v38  ;;  %v13054_v61 = vld [vmem:[#allocation64_spill] sm:$0xff]  ;;  %v13056_v11 = vld [vmem:[#allocation66_spill] sm:$0xff]  ;;  %v3764_v54 = vmul.f32 %v13051_v31, %v13060_v16 }
 0x316   : > { %13043 = vst [vmem:[#allocation176_spill] sm:$0xff] %v9931_v53  ;;  %13047 = vst [vmem:[#allocation186_spill] sm:$0xff] %v9937_v41  ;;  %v3758_v30 = vmul.f32 %v13051_v31, %v13054_v61  ;;  %v3760_v12 = vmul.f32 %v13051_v31, %v13056_v11  ;;  %v13057_v32 = vld [vmem:[#allocation67_spill] sm:$0xff]  ;;  %v13058_v35 = vld [vmem:[#allocation68_spill] sm:$0xff]  ;;  %v3765_v56 = vmul.f32 %v13051_v31, %v13061_v2 }
 0x317   : > { %13049 = vst [vmem:[#allocation100_spill] sm:$0xff] %v9940_v4  ;;  %v3761_v52 = vmul.f32 %v13051_v31, %v13057_v32  ;;  %v3762_v8 = vmul.f32 %v13051_v31, %v13058_v35  ;;  %v13059_v36 = vld [vmem:[#allocation69_spill] sm:$0xff]  ;;  %v3766_v21 = vmul.f32 %v13051_v31, %v13062_v34  ;;  %v3767_v10 = vmul.f32 %v13051_v31, %v13063_v39 }
 0x318   : > { %v3763_v63 = vmul.f32 %v13051_v31, %v13059_v36  ;;  %v3768_v25 = vmul.f32 %v13051_v31, %v13064_v60  ;;  %v3769_v5 = vmul.f32 %v13051_v31, %v13065_v62  ;;  %v3770_v4 = vmul.f32 %v13051_v31, %v13066_v42 }
 0x319   : > { %v9975_v41 = vadd.f32 %v3755_v58, %v9830_v57  ;;  %v9978_v48 = vadd.f32 %v3756_v43, %v9832_v14  ;;  %v9981_v53 = vadd.f32 %v3757_v18, %v9834_v47  ;;  %v9984_v59 = vadd.f32 %v3758_v30, %v9836_v26 }
 0x31a   : > { %v9987_v44 = vadd.f32 %v3759_v33, %v9838_v28  ;;  %v9990_v0 = vadd.f32 %v3760_v12, %v9840_v24  ;;  %v9993_v31 = vadd.f32 %v3761_v52, %v9842_v7  ;;  %v9996_v57 = vadd.f32 %v3762_v8, %v9844_v37 }
 0x31b   : > { %v9999_v14 = vadd.f32 %v3763_v63, %v9846_v55  ;;  %v10002_v47 = vadd.f32 %v3764_v54, %v9848_v40  ;;  %v10005_v26 = vadd.f32 %v3765_v56, %v9850_v3  ;;  %v10008_v28 = vadd.f32 %v3766_v21, %v9852_v15  ;;  %v13067_v40 = vld [vmem:[#allocation199_spill] sm:$0xff] }
 0x31c   : > { %v10011_v24 = vadd.f32 %v3767_v10, %v9854_v19  ;;  %v10014_v7 = vadd.f32 %v3768_v25, %v9856_v23  ;;  %v10017_v37 = vadd.f32 %v3769_v5, %v9858_v51  ;;  %v10020_v55 = vadd.f32 %v3770_v4, %v9860_v46 }
 0x31d   : > { %v3787_v54 = vmul.f32 %v13067_v40, %v13050_v17  ;;  %v3788_v56 = vmul.f32 %v13067_v40, %v13052_v20  ;;  %v3789_v21 = vmul.f32 %v13067_v40, %v13053_v38  ;;  %v3790_v10 = vmul.f32 %v13067_v40, %v13054_v61  ;;  %v13098_v38 = vld [vmem:[#allocation113_spill] sm:$0xff] }
 0x31e   : > { %v3791_v25 = vmul.f32 %v13067_v40, %v13055_v1  ;;  %v3792_v5 = vmul.f32 %v13067_v40, %v13056_v11  ;;  %v3793_v63 = vmul.f32 %v13067_v40, %v13057_v32  ;;  %v3794_v3 = vmul.f32 %v13067_v40, %v13058_v35  ;;  %v13096_v32 = vld [vmem:[#allocation129_spill] sm:$0xff]  ;;  %v13097_v1 = vld [vmem:[#allocation158_spill] sm:$0xff] }
 0x31f   : > { %v3795_v15 = vmul.f32 %v13067_v40, %v13059_v36  ;;  %v3796_v19 = vmul.f32 %v13067_v40, %v13060_v16  ;;  %v3797_v23 = vmul.f32 %v13067_v40, %v13061_v2  ;;  %v3798_v51 = vmul.f32 %v13067_v40, %v13062_v34  ;;  %v13094_v2 = vld [vmem:[#allocation112_spill] sm:$0xff]  ;;  %v13095_v36 = vld [vmem:[#allocation155_spill] sm:$0xff] }
 0x320   : > { %v3799_v46 = vmul.f32 %v13067_v40, %v13063_v39  ;;  %v3800_v4 = vmul.f32 %v13067_v40, %v13064_v60  ;;  %v3801_v17 = vmul.f32 %v13067_v40, %v13065_v62  ;;  %v3802_v58 = vmul.f32 %v13067_v40, %v13066_v42  ;;  %v13092_v62 = vld [vmem:[#allocation169_spill] sm:$0xff]  ;;  %v13093_v39 = vld [vmem:[#allocation154_spill] sm:$0xff] }
 0x321   : > { %v10055_v20 = vadd.f32 %v3787_v54, %v9895_v13  ;;  %v10058_v43 = vadd.f32 %v3788_v56, %v9898_v22  ;;  %v10061_v18 = vadd.f32 %v3789_v21, %v9901_v50  ;;  %v10064_v30 = vadd.f32 %v3790_v10, %v9904_v6  ;;  %v13068_v50 = vld [vmem:[#allocation147_spill] sm:$0xff]  ;;  %v13070_v6 = vld [vmem:[#allocation32_spill] sm:$0xff] }
 0x322   : > { %v10067_v33 = vadd.f32 %v3791_v25, %v9907_v27  ;;  %v10070_v12 = vadd.f32 %v3792_v5, %v9910_v45  ;;  %v10073_v52 = vadd.f32 %v3793_v63, %v9913_v9  ;;  %v10076_v13 = vadd.f32 %v3794_v3, %v9916_v29  ;;  %v13072_v27 = vld [vmem:[#allocation163_spill] sm:$0xff]  ;;  %v13074_v45 = vld [vmem:[#allocation176_spill] sm:$0xff]  ;;  %v13076_v9 = vld [vmem:[#allocation34_spill] sm:$0xff] }
 0x323   : > { %v10079_v22 = vadd.f32 %v3795_v15, %v9919_v49  ;;  %v10082_v8 = vadd.f32 %v3796_v19, %v13068_v50  ;;  %v10085_v40 = vadd.f32 %v3797_v23, %v13070_v6  ;;  %v10088_v54 = vadd.f32 %v3798_v51, %v13072_v27  ;;  %v13078_v29 = vld [vmem:[#allocation186_spill] sm:$0xff]  ;;  %v13080_v49 = vld [vmem:[#allocation100_spill] sm:$0xff]  ;;  %v13082_v5 = vld [vmem:[#allocation149_spill] sm:$0xff] }
 0x324   : > { %v10091_v56 = vadd.f32 %v3799_v46, %v13074_v45  ;;  %v10094_v21 = vadd.f32 %v3800_v4, %v13076_v9  ;;  %v10097_v10 = vadd.f32 %v3801_v17, %v13078_v29  ;;  %v10100_v25 = vadd.f32 %v3802_v58, %v13080_v49  ;;  %v13083_v63 = vld [vmem:[#allocation92_spill] sm:$0xff]  ;;  %v13084_v15 = vld [vmem:[#allocation165_spill] sm:$0xff]  ;;  %v13085_v23 = vld [vmem:[#allocation150_spill] sm:$0xff] }
 0x325   : > { %13069 = vst [vmem:[#allocation35_spill] sm:$0xff] %v10082_v8  ;;  %13071 = vst [vmem:[#allocation84_spill] sm:$0xff] %v10085_v40  ;;  %v3836_v3 = vmul.f32 %v13083_v63, %v13082_v5  ;;  %v3837_v19 = vmul.f32 %v13083_v63, %v13084_v15  ;;  %v3838_v51 = vmul.f32 %v13083_v63, %v13085_v23  ;;  %v13086_v46 = vld [vmem:[#allocation166_spill] sm:$0xff]  ;;  %v13087_v4 = vld [vmem:[#allocation151_spill] sm:$0xff] }
 0x326   : > { %13073 = vst [vmem:[#allocation132_spill] sm:$0xff] %v10088_v54  ;;  %13075 = vst [vmem:[#allocation37_spill] sm:$0xff] %v10091_v56  ;;  %v3839_v50 = vmul.f32 %v13083_v63, %v13086_v46  ;;  %v3840_v6 = vmul.f32 %v13083_v63, %v13087_v4  ;;  %v13088_v17 = vld [vmem:[#allocation167_spill] sm:$0xff]  ;;  %v13089_v58 = vld [vmem:[#allocation152_spill] sm:$0xff]  ;;  %v3845_v60 = vmul.f32 %v13083_v63, %v13092_v62 }
 0x327   : > { %13077 = vst [vmem:[#allocation116_spill] sm:$0xff] %v10094_v21  ;;  %13079 = vst [vmem:[#allocation39_spill] sm:$0xff] %v10097_v10  ;;  %v3841_v27 = vmul.f32 %v13083_v63, %v13088_v17  ;;  %v3842_v45 = vmul.f32 %v13083_v63, %v13089_v58  ;;  %v13090_v9 = vld [vmem:[#allocation168_spill] sm:$0xff]  ;;  %v13091_v49 = vld [vmem:[#allocation153_spill] sm:$0xff]  ;;  %v3846_v34 = vmul.f32 %v13083_v63, %v13093_v39 }
 0x328   : > { %13081 = vst [vmem:[#allocation59_spill] sm:$0xff] %v10100_v25  ;;  %v3843_v29 = vmul.f32 %v13083_v63, %v13090_v9  ;;  %v3844_v42 = vmul.f32 %v13083_v63, %v13091_v49  ;;  %v3847_v16 = vmul.f32 %v13083_v63, %v13094_v2  ;;  %v3848_v35 = vmul.f32 %v13083_v63, %v13095_v36 }
 0x329   : > { %v3849_v11 = vmul.f32 %v13083_v63, %v13096_v32  ;;  %v3850_v61 = vmul.f32 %v13083_v63, %v13097_v1  ;;  %v3851_v25 = vmul.f32 %v13083_v63, %v13098_v38  ;;  %v10135_v10 = vadd.f32 %v3836_v3, %v9975_v41 }
 0x32a   : > { %v10138_v21 = vadd.f32 %v3837_v19, %v9978_v48  ;;  %v10141_v56 = vadd.f32 %v3838_v51, %v9981_v53  ;;  %v10144_v54 = vadd.f32 %v3839_v50, %v9984_v59  ;;  %v10147_v40 = vadd.f32 %v3840_v6, %v9987_v44 }
 0x32b   : > { %v10150_v8 = vadd.f32 %v3841_v27, %v9990_v0  ;;  %v10153_v63 = vadd.f32 %v3842_v45, %v9993_v31  ;;  %v10156_v41 = vadd.f32 %v3843_v29, %v9996_v57  ;;  %v10159_v48 = vadd.f32 %v3844_v42, %v9999_v14 }
 0x32c   : > { %v10162_v53 = vadd.f32 %v3845_v60, %v10002_v47  ;;  %v10165_v59 = vadd.f32 %v3846_v34, %v10005_v26  ;;  %v10168_v44 = vadd.f32 %v3847_v16, %v10008_v28  ;;  %v10171_v0 = vadd.f32 %v3848_v35, %v10011_v24  ;;  %v13099_v60 = vld [vmem:[#allocation77_spill] sm:$0xff] }
 0x32d   : > { %v10174_v31 = vadd.f32 %v3849_v11, %v10014_v7  ;;  %v10177_v57 = vadd.f32 %v3850_v61, %v10017_v37  ;;  %v10180_v42 = vadd.f32 %v3851_v25, %v10020_v55  ;;  %v3868_v14 = vmul.f32 %v13099_v60, %v13082_v5 }
 0x32e   : > { %v3869_v34 = vmul.f32 %v13099_v60, %v13084_v15  ;;  %v3870_v16 = vmul.f32 %v13099_v60, %v13085_v23  ;;  %v3871_v35 = vmul.f32 %v13099_v60, %v13086_v46  ;;  %v3872_v11 = vmul.f32 %v13099_v60, %v13087_v4 }
 0x32f   : > { %v3873_v61 = vmul.f32 %v13099_v60, %v13088_v17  ;;  %v3874_v47 = vmul.f32 %v13099_v60, %v13089_v58  ;;  %v3875_v26 = vmul.f32 %v13099_v60, %v13090_v9  ;;  %v3876_v28 = vmul.f32 %v13099_v60, %v13091_v49 }
 0x330   : > { %v3877_v24 = vmul.f32 %v13099_v60, %v13092_v62  ;;  %v3878_v7 = vmul.f32 %v13099_v60, %v13093_v39  ;;  %v3879_v37 = vmul.f32 %v13099_v60, %v13094_v2  ;;  %v3880_v55 = vmul.f32 %v13099_v60, %v13095_v36  ;;  %v13137_v36 = vld [vmem:[#allocation172_spill] sm:$0xff]  ;;  %v13139_v39 = vld [vmem:[#allocation182_spill] sm:$0xff] }
 0x331   : > { %v3881_v25 = vmul.f32 %v13099_v60, %v13096_v32  ;;  %v3882_v5 = vmul.f32 %v13099_v60, %v13097_v1  ;;  %v3883_v3 = vmul.f32 %v13099_v60, %v13098_v38  ;;  %v10215_v15 = vadd.f32 %v3868_v14, %v10055_v20  ;;  %v13134_v38 = vld [vmem:[#allocation50_spill] sm:$0xff]  ;;  %v13135_v1 = vld [vmem:[#allocation56_spill] sm:$0xff]  ;;  %v13136_v32 = vld [vmem:[#allocation51_spill] sm:$0xff] }
 0x332   : > { %v10218_v19 = vadd.f32 %v3869_v34, %v10058_v43  ;;  %v10221_v51 = vadd.f32 %v3870_v16, %v10061_v18  ;;  %v10224_v50 = vadd.f32 %v3871_v35, %v10064_v30  ;;  %v10227_v6 = vadd.f32 %v3872_v11, %v10067_v33  ;;  %v13109_v18 = vld [vmem:[#allocation35_spill] sm:$0xff]  ;;  %v13111_v30 = vld [vmem:[#allocation84_spill] sm:$0xff] }
 0x333   : > { %13100 = vst [vmem:[#allocation38_spill] sm:$0xff] %v10215_v15  ;;  %v10230_v27 = vadd.f32 %v3873_v61, %v10070_v12  ;;  %v10233_v45 = vadd.f32 %v3874_v47, %v10073_v52  ;;  %v10236_v20 = vadd.f32 %v3875_v26, %v10076_v13  ;;  %v10239_v43 = vadd.f32 %v3876_v28, %v10079_v22  ;;  %v13113_v33 = vld [vmem:[#allocation132_spill] sm:$0xff]  ;;  %v13115_v12 = vld [vmem:[#allocation37_spill] sm:$0xff]  ;;  %v13119_v13 = vld [vmem:[#allocation39_spill] sm:$0xff] }
 0x334   : > { %13101 = vst [vmem:[#allocation60_spill] sm:$0xff] %v10218_v19  ;;  %13102 = vst [vmem:[#allocation44_spill] sm:$0xff] %v10221_v51  ;;  %v10242_v29 = vadd.f32 %v3877_v24, %v13109_v18  ;;  %v10245_v60 = vadd.f32 %v3878_v7, %v13111_v30  ;;  %v10248_v14 = vadd.f32 %v3879_v37, %v13113_v33  ;;  %v13117_v52 = vld [vmem:[#allocation116_spill] sm:$0xff]  ;;  %v13121_v22 = vld [vmem:[#allocation59_spill] sm:$0xff] }
 0x335   : > { %13103 = vst [vmem:[#allocation174_spill] sm:$0xff] %v10224_v50  ;;  %13104 = vst [vmem:[#allocation184_spill] sm:$0xff] %v10227_v6  ;;  %v10251_v34 = vadd.f32 %v3880_v55, %v13115_v12  ;;  %v10254_v16 = vadd.f32 %v3881_v25, %v13117_v52  ;;  %v10257_v35 = vadd.f32 %v3882_v5, %v13119_v13  ;;  %v13123_v61 = vld [vmem:[#allocation178_spill] sm:$0xff]  ;;  %v13124_v47 = vld [vmem:[#allocation124_spill] sm:$0xff] }
 0x336   : > { %13105 = vst [vmem:[#allocation175_spill] sm:$0xff] %v10230_v27  ;;  %13106 = vst [vmem:[#allocation185_spill] sm:$0xff] %v10233_v45  ;;  %v10260_v11 = vadd.f32 %v3883_v3, %v13121_v22  ;;  %v3917_v26 = vmul.f32 %v13124_v47, %v13123_v61  ;;  %v13125_v28 = vld [vmem:[#allocation188_spill] sm:$0xff]  ;;  %v13126_v7 = vld [vmem:[#allocation179_spill] sm:$0xff] }
 0x337   : > { %13107 = vst [vmem:[#allocation125_spill] sm:$0xff] %v10236_v20  ;;  %13108 = vst [vmem:[#allocation110_spill] sm:$0xff] %v10239_v43  ;;  %v3918_v24 = vmul.f32 %v13124_v47, %v13125_v28  ;;  %v3919_v37 = vmul.f32 %v13124_v47, %v13126_v7  ;;  %v13127_v55 = vld [vmem:[#allocation189_spill] sm:$0xff]  ;;  %v13128_v25 = vld [vmem:[#allocation130_spill] sm:$0xff] }
 0x338   : > { %13110 = vst [vmem:[#allocation45_spill] sm:$0xff] %v10242_v29  ;;  %13112 = vst [vmem:[#allocation31_spill] sm:$0xff] %v10245_v60  ;;  %v3920_v18 = vmul.f32 %v13124_v47, %v13127_v55  ;;  %v3921_v30 = vmul.f32 %v13124_v47, %v13128_v25  ;;  %v13129_v5 = vld [vmem:[#allocation53_spill] sm:$0xff]  ;;  %v13130_v3 = vld [vmem:[#allocation114_spill] sm:$0xff]  ;;  %v3927_v55 = vmul.f32 %v13124_v47, %v13134_v38 }
 0x339   : > { %13114 = vst [vmem:[#allocation203_spill] sm:$0xff] %v10248_v14  ;;  %13116 = vst [vmem:[#allocation29_spill] sm:$0xff] %v10251_v34  ;;  %v3922_v33 = vmul.f32 %v13124_v47, %v13129_v5  ;;  %v3923_v12 = vmul.f32 %v13124_v47, %v13130_v3  ;;  %v13131_v52 = vld [vmem:[#allocation54_spill] sm:$0xff]  ;;  %v13132_v22 = vld [vmem:[#allocation49_spill] sm:$0xff]  ;;  %v3928_v25 = vmul.f32 %v13124_v47, %v13135_v1 }
 0x33a   : > { %13118 = vst [vmem:[#allocation204_spill] sm:$0xff] %v10254_v16  ;;  %13120 = vst [vmem:[#allocation148_spill] sm:$0xff] %v10257_v35  ;;  %v3924_v13 = vmul.f32 %v13124_v47, %v13131_v52  ;;  %v3925_v61 = vmul.f32 %v13124_v47, %v13132_v22  ;;  %v13133_v28 = vld [vmem:[#allocation55_spill] sm:$0xff]  ;;  %v3929_v5 = vmul.f32 %v13124_v47, %v13136_v32  ;;  %v13138_v2 = vld [vmem:[#allocation52_spill] sm:$0xff] }
 0x33b   : > { %13122 = vst [vmem:[#allocation42_spill] sm:$0xff] %v10260_v11  ;;  %v3926_v7 = vmul.f32 %v13124_v47, %v13133_v28  ;;  %v3930_v3 = vmul.f32 %v13124_v47, %v13137_v36  ;;  %v3931_v52 = vmul.f32 %v13124_v47, %v13138_v2  ;;  %v3932_v22 = vmul.f32 %v13124_v47, %v13139_v39  ;;  %v13155_v35 = vld [vmem:[#allocation134_spill] sm:$0xff]  ;;  %v13170_v19 = vld [vmem:[#allocation201_spill] sm:$0xff] }
 0x33c   : > { %v3933_v28 = vadd.f32 %v3917_v26, %v10135_v10  ;;  %v3934_v62 = vadd.f32 %v3918_v24, %v10138_v21  ;;  %v3935_v38 = vadd.f32 %v3919_v37, %v10141_v56  ;;  %v3936_v1 = vadd.f32 %v3920_v18, %v10144_v54  ;;  %v13140_v26 = vld [vmem:[#allocation102_spill] sm:$0xff]  ;;  %v13143_v37 = vld [vmem:[#allocation103_spill] sm:$0xff]  ;;  %v13148_v18 = vld [vmem:[#allocation89_spill] sm:$0xff] }
 0x33d   : > { %v3937_v49 = vadd.f32 %v3921_v30, %v10147_v40  ;;  %v3938_v32 = vadd.f32 %v3922_v33, %v10150_v8  ;;  %v3939_v36 = vadd.f32 %v3923_v12, %v10153_v63  ;;  %v3940_v9 = vadd.f32 %v3924_v13, %v10156_v41  ;;  %v13141_v63 = vld [vmem:[#allocation109_spill] sm:$0xff]  ;;  %v13142_v41 = vld [vmem:[#allocation86_spill] sm:$0xff]  ;;  %v13151_v12 = vld [vmem:[#allocation107_spill] sm:$0xff] }
 0x33e   : > { %v3941_v2 = vadd.f32 %v3925_v61, %v10159_v48  ;;  %v3942_v47 = vadd.f32 %v3926_v7, %v10162_v53  ;;  %v3943_v10 = vadd.f32 %v3927_v55, %v10165_v59  ;;  %v3944_v21 = vadd.f32 %v3928_v25, %v10168_v44  ;;  %v13144_v59 = vld [vmem:[#allocation87_spill] sm:$0xff]  ;;  %v13145_v7 = vld [vmem:[#allocation104_spill] sm:$0xff]  ;;  %v13147_v55 = vld [vmem:[#allocation105_spill] sm:$0xff] }
 0x33f   : > { %v3945_v56 = vadd.f32 %v3929_v5, %v10171_v0  ;;  %v3946_v54 = vadd.f32 %v3930_v3, %v10174_v31  ;;  %v3947_v40 = vadd.f32 %v3931_v52, %v10177_v57  ;;  %v3948_v8 = vadd.f32 %v3932_v22, %v10180_v42  ;;  %v13146_v31 = vld [vmem:[#allocation88_spill] sm:$0xff]  ;;  %v13149_v30 = vld [vmem:[#allocation106_spill] sm:$0xff]  ;;  %v13152_v13 = vld [vmem:[#allocation91_spill] sm:$0xff] }
 0x340   : > { %v3966_v24 = vmul.f32 %v13141_v63, %v13140_v26  ;;  %v3967_v48 = vmul.f32 %v13141_v63, %v13142_v41  ;;  %v3968_v53 = vmul.f32 %v13141_v63, %v13143_v37  ;;  %v3969_v44 = vmul.f32 %v13141_v63, %v13144_v59  ;;  %v13150_v33 = vld [vmem:[#allocation90_spill] sm:$0xff]  ;;  %v13153_v61 = vld [vmem:[#allocation108_spill] sm:$0xff] }
 0x341   : > { %v3970_v0 = vmul.f32 %v13141_v63, %v13145_v7  ;;  %v3971_v57 = vmul.f32 %v13141_v63, %v13146_v31  ;;  %v3972_v42 = vmul.f32 %v13141_v63, %v13147_v55  ;;  %v3973_v25 = vmul.f32 %v13141_v63, %v13148_v18  ;;  %v13154_v41 = vld [vmem:[#allocation94_spill] sm:$0xff] }
 0x342   : > { %v3974_v5 = vmul.f32 %v13141_v63, %v13149_v30  ;;  %v3975_v3 = vmul.f32 %v13141_v63, %v13150_v33  ;;  %v3976_v52 = vmul.f32 %v13141_v63, %v13151_v12  ;;  %v3977_v22 = vmul.f32 %v13141_v63, %v13152_v13 }
 0x343   : > { %v3978_v26 = vmul.f32 %v13141_v63, %v13153_v61  ;;  %v3979_v55 = vmul.f32 %v13141_v63, %v13154_v41  ;;  %v3980_v18 = vmul.f32 0.0, %v13141_v63  ;;  %v3982_v31 = vadd.f32 %v3966_v24, %v3933_v28  ;;  %v13156_v41 = vld [vmem:[#allocation200_spill] sm:$0xff]  ;;  %v13157_v63 = vld [vmem:[#allocation118_spill] sm:$0xff] }
 0x344   : > { %v3983_v7 = vadd.f32 %v3967_v48, %v3934_v62  ;;  %v3984_v30 = vadd.f32 %v3968_v53, %v3935_v38  ;;  %v3985_v59 = vadd.f32 %v3969_v44, %v3936_v1  ;;  %v3986_v37 = vadd.f32 %v3970_v0, %v3937_v49  ;;  %v13158_v38 = vld [vmem:[#allocation135_spill] sm:$0xff]  ;;  %v13161_v49 = vld [vmem:[#allocation120_spill] sm:$0xff] }
 0x345   : > { %v3987_v33 = vadd.f32 %v3971_v57, %v3938_v32  ;;  %v3988_v39 = vadd.f32 %v3972_v42, %v3939_v36  ;;  %v3989_v58 = vadd.f32 %v3973_v25, %v3940_v9  ;;  %v3990_v12 = vadd.f32 %v3974_v5, %v3941_v2  ;;  %v13159_v32 = vld [vmem:[#allocation119_spill] sm:$0xff]  ;;  %v13160_v2 = vld [vmem:[#allocation136_spill] sm:$0xff]  ;;  %v13169_v42 = vld [vmem:[#allocation126_spill] sm:$0xff] }
 0x346   : > { %v3991_v17 = vadd.f32 %v3975_v3, %v3942_v47  ;;  %v3992_v4 = vadd.f32 %v3976_v52, %v3943_v10  ;;  %v3993_v13 = vadd.f32 %v3977_v22, %v3944_v21  ;;  %v3994_v46 = vadd.f32 %v3978_v26, %v3945_v56  ;;  %v13162_v47 = vld [vmem:[#allocation137_spill] sm:$0xff]  ;;  %v13166_v48 = vld [vmem:[#allocation139_spill] sm:$0xff]  ;;  %v13168_v57 = vld [vmem:[#allocation140_spill] sm:$0xff] }
 0x347   : > { %v3995_v23 = vadd.f32 %v3979_v55, %v3946_v54  ;;  %v3996_v61 = vadd.f32 %v3980_v18, %v3947_v40  ;;  %v3997_v11 = vadd.f32 %v3980_v18, %v3948_v8  ;;  %v4015_v16 = vmul.f32 %v13156_v41, %v13155_v35  ;;  %v13163_v21 = vld [vmem:[#allocation121_spill] sm:$0xff]  ;;  %v13164_v54 = vld [vmem:[#allocation138_spill] sm:$0xff]  ;;  %v13167_v44 = vld [vmem:[#allocation123_spill] sm:$0xff] }
 0x348   : > { %v4016_v62 = vmul.f32 %v13156_v41, %v13157_v63  ;;  %v4017_v1 = vmul.f32 %v13156_v41, %v13158_v38  ;;  %v4018_v36 = vmul.f32 %v13156_v41, %v13159_v32  ;;  %v4019_v9 = vmul.f32 %v13156_v41, %v13160_v2  ;;  %v13165_v8 = vld [vmem:[#allocation122_spill] sm:$0xff] }
 0x349   : > { %v4020_v28 = vmul.f32 %v13156_v41, %v13161_v49  ;;  %v4021_v10 = vmul.f32 %v13156_v41, %v13162_v47  ;;  %v4022_v56 = vmul.f32 %v13156_v41, %v13163_v21  ;;  %v4023_v40 = vmul.f32 %v13156_v41, %v13164_v54 }
 0x34a   : > { %v4024_v24 = vmul.f32 %v13156_v41, %v13165_v8  ;;  %v4025_v53 = vmul.f32 %v13156_v41, %v13166_v48  ;;  %v4026_v0 = vmul.f32 %v13156_v41, %v13167_v44  ;;  %v4027_v55 = vmul.f32 %v13156_v41, %v13168_v57 }
 0x34b   : > { %v4028_v18 = vmul.f32 %v13156_v41, %v13169_v42  ;;  %v4029_v25 = vmul.f32 0.0, %v13156_v41  ;;  %v4031_v5 = vadd.f32 %v4015_v16, %v3982_v31  ;;  %v4032_v3 = vadd.f32 %v4016_v62, %v3983_v7  ;;  %v13173_v41 = vld [vmem:[#allocation44_spill] sm:$0xff]  ;;  %v13174_v62 = vld [vmem:[#allocation174_spill] sm:$0xff] }
 0x34c   : > { %v4033_v52 = vadd.f32 %v4017_v1, %v3984_v30  ;;  %v4034_v22 = vadd.f32 %v4018_v36, %v3985_v59  ;;  %v4035_v26 = vadd.f32 %v4019_v9, %v3986_v37  ;;  %v4036_v34 = vadd.f32 %v4020_v28, %v3987_v33  ;;  %v13171_v33 = vld [vmem:[#allocation38_spill] sm:$0xff]  ;;  %v13175_v36 = vld [vmem:[#allocation184_spill] sm:$0xff]  ;;  %v13176_v28 = vld [vmem:[#allocation175_spill] sm:$0xff] }
 0x34d   : > { %v4037_v14 = vadd.f32 %v4021_v10, %v3988_v39  ;;  %v4038_v60 = vadd.f32 %v4022_v56, %v3989_v58  ;;  %v4039_v29 = vadd.f32 %v4023_v40, %v3990_v12  ;;  %v4040_v43 = vadd.f32 %v4024_v24, %v3991_v17  ;;  %v13177_v56 = vld [vmem:[#allocation185_spill] sm:$0xff] }
 0x34e   : > { %v4041_v20 = vadd.f32 %v4025_v53, %v3992_v4  ;;  %v4042_v45 = vadd.f32 %v4026_v0, %v3993_v13  ;;  %v4043_v27 = vadd.f32 %v4027_v55, %v3994_v46  ;;  %v4044_v6 = vadd.f32 %v4028_v18, %v3995_v23  ;;  %v13172_v13 = vld [vmem:[#allocation60_spill] sm:$0xff]  ;;  %v13178_v24 = vld [vmem:[#allocation125_spill] sm:$0xff]  ;;  %v13179_v0 = vld [vmem:[#allocation110_spill] sm:$0xff] }
 0x34f   : > { %v4045_v50 = vadd.f32 %v4029_v25, %v3996_v61  ;;  %v4046_v51 = vadd.f32 %v4029_v25, %v3997_v11  ;;  %v4047_v15 = vmul.f32 %v13170_v19, %v13155_v35  ;;  %v4048_v16 = vmul.f32 %v13170_v19, %v13157_v63  ;;  %v13180_v18 = vld [vmem:[#allocation45_spill] sm:$0xff]  ;;  %v13181_v25 = vld [vmem:[#allocation31_spill] sm:$0xff] }
 0x350   : > { %v4049_v37 = vmul.f32 %v13170_v19, %v13158_v38  ;;  %v4050_v39 = vmul.f32 %v13170_v19, %v13159_v32  ;;  %v4051_v4 = vmul.f32 %v13170_v19, %v13160_v2  ;;  %v4052_v23 = vmul.f32 %v13170_v19, %v13161_v49 }
 0x351   : > { %v4053_v46 = vmul.f32 %v13170_v19, %v13162_v47  ;;  %v4054_v17 = vmul.f32 %v13170_v19, %v13163_v21  ;;  %v4055_v58 = vmul.f32 %v13170_v19, %v13164_v54  ;;  %v4056_v35 = vmul.f32 %v13170_v19, %v13165_v8  ;;  %v13200_v54 = vld [vmem:[#allocation75_spill] sm:$0xff]  ;;  %v13201_v47 = vld [vmem:[#allocation76_spill] sm:$0xff] }
 0x352   : > { %v4057_v11 = vmul.f32 %v13170_v19, %v13166_v48  ;;  %v4058_v59 = vmul.f32 %v13170_v19, %v13167_v44  ;;  %v4059_v7 = vmul.f32 %v13170_v19, %v13168_v57  ;;  %v4060_v31 = vmul.f32 %v13170_v19, %v13169_v42  ;;  %v13198_v57 = vld [vmem:[#allocation73_spill] sm:$0xff]  ;;  %v13199_v48 = vld [vmem:[#allocation74_spill] sm:$0xff] }
 0x353   : > { %v4061_v30 = vmul.f32 0.0, %v13170_v19  ;;  %v4063_v12 = vadd.f32 %v4047_v15, %v13171_v33  ;;  %v4064_v61 = vadd.f32 %v4048_v16, %v13172_v13  ;;  %v4065_v63 = vadd.f32 %v4049_v37, %v13173_v41  ;;  %v13182_v33 = vld [vmem:[#allocation203_spill] sm:$0xff]  ;;  %v13183_v13 = vld [vmem:[#allocation29_spill] sm:$0xff]  ;;  %v13184_v41 = vld [vmem:[#allocation204_spill] sm:$0xff] }
 0x354   : > { %v4066_v1 = vadd.f32 %v4050_v39, %v13174_v62  ;;  %v4067_v9 = vadd.f32 %v4051_v4, %v13175_v36  ;;  %v4068_v10 = vadd.f32 %v4052_v23, %v13176_v28  ;;  %v4069_v40 = vadd.f32 %v4053_v46, %v13177_v56  ;;  %v13185_v62 = vld [vmem:[#allocation148_spill] sm:$0xff]  ;;  %v13186_v36 = vld [vmem:[#allocation42_spill] sm:$0xff]  ;;  %v13187_v28 = vld [vmem:[#allocation63_spill] sm:$0xff] }
 0x355   : > { %v4070_v53 = vadd.f32 %v4054_v17, %v13178_v24  ;;  %v4071_v55 = vadd.f32 %v4055_v58, %v13179_v0  ;;  %v4072_v19 = vadd.f32 %v4056_v35, %v13180_v18  ;;  %v4073_v15 = vadd.f32 %v4057_v11, %v13181_v25  ;;  %v13188_v46 = vld [vmem:[#allocation202_spill] sm:$0xff]  ;;  %v13189_v17 = vld [vmem:[#allocation64_spill] sm:$0xff]  ;;  %v13190_v24 = vld [vmem:[#allocation65_spill] sm:$0xff] }
 0x356   : > { %v4074_v16 = vadd.f32 %v4058_v59, %v13182_v33  ;;  %v4075_v37 = vadd.f32 %v4059_v7, %v13183_v13  ;;  %v4076_v39 = vadd.f32 %v4060_v31, %v13184_v41  ;;  %v4077_v4 = vadd.f32 %v4061_v30, %v13185_v62  ;;  %v13191_v11 = vld [vmem:[#allocation66_spill] sm:$0xff]  ;;  %v13192_v0 = vld [vmem:[#allocation67_spill] sm:$0xff]  ;;  %v13193_v31 = vld [vmem:[#allocation68_spill] sm:$0xff] }
 0x357   : > { %v4078_v23 = vadd.f32 %v4061_v30, %v13186_v36  ;;  %v4096_v56 = vmul.f32 %v13188_v46, %v13187_v28  ;;  %v4097_v58 = vmul.f32 %v13188_v46, %v13189_v17  ;;  %v4098_v35 = vmul.f32 %v13188_v46, %v13190_v24  ;;  %v13194_v25 = vld [vmem:[#allocation69_spill] sm:$0xff]  ;;  %v13195_v33 = vld [vmem:[#allocation70_spill] sm:$0xff]  ;;  %v13196_v41 = vld [vmem:[#allocation71_spill] sm:$0xff] }
 0x358   : > { %v4099_v59 = vmul.f32 %v13188_v46, %v13191_v11  ;;  %v4100_v7 = vmul.f32 %v13188_v46, %v13192_v0  ;;  %v4101_v18 = vmul.f32 %v13188_v46, %v13193_v31  ;;  %v4102_v30 = vmul.f32 %v13188_v46, %v13194_v25  ;;  %v13197_v36 = vld [vmem:[#allocation72_spill] sm:$0xff] }
 0x359   : > { %v4103_v13 = vmul.f32 %v13188_v46, %v13195_v33  ;;  %v4104_v62 = vmul.f32 %v13188_v46, %v13196_v41  ;;  %v4105_v42 = vmul.f32 %v13188_v46, %v13197_v36  ;;  %v4106_v44 = vmul.f32 %v13188_v46, %v13198_v57 }
 0x35a   : > { %v4107_v8 = vmul.f32 %v13188_v46, %v13199_v48  ;;  %v4108_v21 = vmul.f32 %v13188_v46, %v13200_v54  ;;  %v4109_v49 = vmul.f32 %v13188_v46, %v13201_v47  ;;  %v4110_v2 = vmul.f32 0.0, %v13188_v46  ;;  %v13202_v46 = vld [vmem:[#allocation63_spill] sm:$0xff] }
 0x35b   : > { %v4112_v32 = vadd.f32 %v4096_v56, %v4031_v5  ;;  %v4113_v38 = vadd.f32 %v4097_v58, %v4032_v3  ;;  %v4114_v41 = vadd.f32 %v4098_v35, %v4033_v52  ;;  %v4115_v33 = vadd.f32 %v4099_v59, %v4034_v22  ;;  %v13203_v5 = vld [vmem:[#allocation41_spill] sm:$0xff]  ;;  %v13204_v3 = vld [vmem:[#allocation64_spill] sm:$0xff]  ;;  %v13215_v35 = vld [vmem:[#allocation75_spill] sm:$0xff] }
 0x35c   : > { %v4116_v25 = vadd.f32 %v4100_v7, %v4035_v26  ;;  %v4117_v36 = vadd.f32 %v4101_v18, %v4036_v34  ;;  %v4118_v31 = vadd.f32 %v4102_v30, %v4037_v14  ;;  %v4119_v0 = vadd.f32 %v4103_v13, %v4038_v60  ;;  %v13205_v52 = vld [vmem:[#allocation65_spill] sm:$0xff]  ;;  %v13206_v34 = vld [vmem:[#allocation66_spill] sm:$0xff]  ;;  %v13211_v14 = vld [vmem:[#allocation71_spill] sm:$0xff] }
 0x35d   : > { %v4120_v57 = vadd.f32 %v4104_v62, %v4039_v29  ;;  %v4121_v11 = vadd.f32 %v4105_v42, %v4040_v43  ;;  %v4122_v24 = vadd.f32 %v4106_v44, %v4041_v20  ;;  %v4123_v48 = vadd.f32 %v4107_v8, %v4042_v45  ;;  %v13207_v29 = vld [vmem:[#allocation67_spill] sm:$0xff]  ;;  %v13208_v45 = vld [vmem:[#allocation68_spill] sm:$0xff]  ;;  %v13213_v8 = vld [vmem:[#allocation73_spill] sm:$0xff] }
 0x35e   : > { %v4124_v17 = vadd.f32 %v4108_v21, %v4043_v27  ;;  %v4125_v28 = vadd.f32 %v4109_v49, %v4044_v6  ;;  %v4126_v54 = vadd.f32 %v4110_v2, %v4045_v50  ;;  %v4127_v47 = vadd.f32 %v4110_v2, %v4046_v51  ;;  %v13209_v50 = vld [vmem:[#allocation69_spill] sm:$0xff]  ;;  %v13210_v27 = vld [vmem:[#allocation70_spill] sm:$0xff]  ;;  %v13212_v49 = vld [vmem:[#allocation72_spill] sm:$0xff] }
 0x35f   : > { %v4128_v56 = vmul.f32 %v13203_v5, %v13202_v46  ;;  %v4129_v58 = vmul.f32 %v13203_v5, %v13204_v3  ;;  %v4130_v22 = vmul.f32 %v13203_v5, %v13205_v52  ;;  %v4131_v60 = vmul.f32 %v13203_v5, %v13206_v34  ;;  %v13214_v42 = vld [vmem:[#allocation74_spill] sm:$0xff]  ;;  %v13216_v7 = vld [vmem:[#allocation76_spill] sm:$0xff] }
 0x360   : > { %v4132_v20 = vmul.f32 %v13203_v5, %v13207_v29  ;;  %v4133_v6 = vmul.f32 %v13203_v5, %v13208_v45  ;;  %v4134_v51 = vmul.f32 %v13203_v5, %v13209_v50  ;;  %v4135_v43 = vmul.f32 %v13203_v5, %v13210_v27 }
 0x361   : > { %v4136_v2 = vmul.f32 %v13203_v5, %v13211_v14  ;;  %v4137_v21 = vmul.f32 %v13203_v5, %v13212_v49  ;;  %v4138_v44 = vmul.f32 %v13203_v5, %v13213_v8  ;;  %v4139_v26 = vmul.f32 %v13203_v5, %v13214_v42 }
 0x362   : > { %v4140_v59 = vmul.f32 %v13203_v5, %v13215_v35  ;;  %v4141_v18 = vmul.f32 %v13203_v5, %v13216_v7  ;;  %v4142_v30 = vmul.f32 0.0, %v13203_v5  ;;  %v4144_v13 = vadd.f32 %v4128_v56, %v4063_v12  ;;  %v13217_v5 = vld [vmem:[#allocation150_spill] sm:$0xff]  ;;  %v13218_v12 = vld [vmem:[#allocation43_spill] sm:$0xff] }
 0x363   : > { %v4145_v62 = vadd.f32 %v4129_v58, %v4064_v61  ;;  %v4146_v46 = vadd.f32 %v4130_v22, %v4065_v63  ;;  %v4147_v3 = vadd.f32 %v4131_v60, %v4066_v1  ;;  %v4148_v14 = vadd.f32 %v4132_v20, %v4067_v9  ;;  %v13219_v58 = vld [vmem:[#allocation166_spill] sm:$0xff]  ;;  %v13220_v63 = vld [vmem:[#allocation151_spill] sm:$0xff]  ;;  %v13227_v22 = vld [vmem:[#allocation112_spill] sm:$0xff] }
 0x364   : > { %v4149_v49 = vadd.f32 %v4133_v6, %v4068_v10  ;;  %v4150_v27 = vadd.f32 %v4134_v51, %v4069_v40  ;;  %v4151_v50 = vadd.f32 %v4135_v43, %v4070_v53  ;;  %v4152_v8 = vadd.f32 %v4136_v2, %v4071_v55  ;;  %v13221_v9 = vld [vmem:[#allocation167_spill] sm:$0xff]  ;;  %v13222_v40 = vld [vmem:[#allocation152_spill] sm:$0xff]  ;;  %v13229_v51 = vld [vmem:[#allocation129_spill] sm:$0xff] }
 0x365   : > { %v4153_v45 = vadd.f32 %v4137_v21, %v4072_v19  ;;  %v4154_v29 = vadd.f32 %v4138_v44, %v4073_v15  ;;  %v4155_v42 = vadd.f32 %v4139_v26, %v4074_v16  ;;  %v4156_v34 = vadd.f32 %v4140_v59, %v4075_v37  ;;  %v13223_v55 = vld [vmem:[#allocation168_spill] sm:$0xff]  ;;  %v13224_v15 = vld [vmem:[#allocation153_spill] sm:$0xff]  ;;  %v13228_v20 = vld [vmem:[#allocation155_spill] sm:$0xff] }
 0x366   : > { %v4157_v52 = vadd.f32 %v4141_v18, %v4076_v39  ;;  %v4158_v35 = vadd.f32 %v4142_v30, %v4077_v4  ;;  %v4159_v7 = vadd.f32 %v4142_v30, %v4078_v23  ;;  %v4177_v56 = vmul.f32 %v13218_v12, %v13217_v5  ;;  %v13225_v37 = vld [vmem:[#allocation169_spill] sm:$0xff]  ;;  %v13226_v4 = vld [vmem:[#allocation154_spill] sm:$0xff] }
 0x367   : > { %v4178_v61 = vmul.f32 %v13218_v12, %v13219_v58  ;;  %v4179_v1 = vmul.f32 %v13218_v12, %v13220_v63  ;;  %v4180_v10 = vmul.f32 %v13218_v12, %v13221_v9  ;;  %v4181_v53 = vmul.f32 %v13218_v12, %v13222_v40  ;;  %v13230_v2 = vld [vmem:[#allocation158_spill] sm:$0xff]  ;;  %v13231_v44 = vld [vmem:[#allocation113_spill] sm:$0xff] }
 0x368   : > { %v4182_v19 = vmul.f32 %v13218_v12, %v13223_v55  ;;  %v4183_v16 = vmul.f32 %v13218_v12, %v13224_v15  ;;  %v4184_v39 = vmul.f32 %v13218_v12, %v13225_v37  ;;  %v4185_v23 = vmul.f32 %v13218_v12, %v13226_v4 }
 0x369   : > { %v4186_v60 = vmul.f32 %v13218_v12, %v13227_v22  ;;  %v4187_v6 = vmul.f32 %v13218_v12, %v13228_v20  ;;  %v4188_v43 = vmul.f32 %v13218_v12, %v13229_v51  ;;  %v4189_v21 = vmul.f32 %v13218_v12, %v13230_v2 }
 0x36a   : > { %v4190_v26 = vmul.f32 %v13218_v12, %v13231_v44  ;;  %v4191_v59 = vmul.f32 0.0, %v13218_v12  ;;  %v4193_v18 = vadd.f32 %v4177_v56, %v4112_v32  ;;  %v4194_v30 = vadd.f32 %v4178_v61, %v4113_v38  ;;  %v13232_v12 = vld [vmem:[#allocation150_spill] sm:$0xff] }
 0x36b   : > { %v4195_v4 = vadd.f32 %v4179_v1, %v4114_v41  ;;  %v4196_v37 = vadd.f32 %v4180_v10, %v4115_v33  ;;  %v4197_v15 = vadd.f32 %v4181_v53, %v4116_v25  ;;  %v4198_v22 = vadd.f32 %v4182_v19, %v4117_v36  ;;  %v13233_v32 = vld [vmem:[#allocation46_spill] sm:$0xff]  ;;  %v13235_v41 = vld [vmem:[#allocation151_spill] sm:$0xff]  ;;  %v13242_v1 = vld [vmem:[#allocation112_spill] sm:$0xff] }
 0x36c   : > { %v4199_v55 = vadd.f32 %v4183_v16, %v4118_v31  ;;  %v4200_v40 = vadd.f32 %v4184_v39, %v4119_v0  ;;  %v4201_v20 = vadd.f32 %v4185_v23, %v4120_v57  ;;  %v4202_v9 = vadd.f32 %v4186_v60, %v4121_v11  ;;  %v13234_v38 = vld [vmem:[#allocation166_spill] sm:$0xff]  ;;  %v13236_v33 = vld [vmem:[#allocation167_spill] sm:$0xff]  ;;  %v13237_v57 = vld [vmem:[#allocation152_spill] sm:$0xff] }
 0x36d   : > { %v4203_v63 = vadd.f32 %v4187_v6, %v4122_v24  ;;  %v4204_v51 = vadd.f32 %v4188_v43, %v4123_v48  ;;  %v4205_v58 = vadd.f32 %v4189_v21, %v4124_v17  ;;  %v4206_v5 = vadd.f32 %v4190_v26, %v4125_v28  ;;  %v13238_v48 = vld [vmem:[#allocation168_spill] sm:$0xff]  ;;  %v13240_v17 = vld [vmem:[#allocation169_spill] sm:$0xff]  ;;  %v13241_v31 = vld [vmem:[#allocation154_spill] sm:$0xff] }
 0x36e   : > { %v4207_v2 = vadd.f32 %v4191_v59, %v4126_v54  ;;  %v4208_v44 = vadd.f32 %v4191_v59, %v4127_v47  ;;  %v4209_v56 = vmul.f32 %v13233_v32, %v13232_v12  ;;  %v4210_v61 = vmul.f32 %v13233_v32, %v13234_v38  ;;  %v13239_v54 = vld [vmem:[#allocation153_spill] sm:$0xff]  ;;  %v13243_v53 = vld [vmem:[#allocation155_spill] sm:$0xff]  ;;  %v13245_v23 = vld [vmem:[#allocation158_spill] sm:$0xff] }
 0x36f   : > { %v4211_v25 = vmul.f32 %v13233_v32, %v13235_v41  ;;  %v4212_v0 = vmul.f32 %v13233_v32, %v13236_v33  ;;  %v4213_v24 = vmul.f32 %v13233_v32, %v13237_v57  ;;  %v4214_v28 = vmul.f32 %v13233_v32, %v13238_v48  ;;  %v13244_v16 = vld [vmem:[#allocation129_spill] sm:$0xff] }
 0x370   : > { %v4215_v47 = vmul.f32 %v13233_v32, %v13239_v54  ;;  %v4216_v11 = vmul.f32 %v13233_v32, %v13240_v17  ;;  %v4217_v36 = vmul.f32 %v13233_v32, %v13241_v31  ;;  %v4218_v10 = vmul.f32 %v13233_v32, %v13242_v1  ;;  %v13246_v6 = vld [vmem:[#allocation113_spill] sm:$0xff] }
 0x371   : > { %v4219_v19 = vmul.f32 %v13233_v32, %v13243_v53  ;;  %v4220_v39 = vmul.f32 %v13233_v32, %v13244_v16  ;;  %v4221_v60 = vmul.f32 %v13233_v32, %v13245_v23  ;;  %v4222_v43 = vmul.f32 %v13233_v32, %v13246_v6 }
 0x372   : > { %v4223_v21 = vmul.f32 0.0, %v13233_v32  ;;  %v10529_v26 = vadd.f32 %v4209_v56, %v4144_v13  ;;  %v10531_v59 = vadd.f32 %v4210_v61, %v4145_v62  ;;  %v10533_v12 = vadd.f32 %v4211_v25, %v4146_v46  ;;  %v13264_v32 = vld [vmem:[#allocation47_spill] sm:$0xff]  ;;  %v13265_v56 = vld [vmem:[#allocation189_spill] sm:$0xff]  ;;  %v13269_v25 = vld [vmem:[#allocation54_spill] sm:$0xff] }
 0x373   : > { %v10535_v38 = vadd.f32 %v4212_v0, %v4147_v3  ;;  %v10537_v53 = vadd.f32 %v4213_v24, %v4148_v14  ;;  %v10539_v1 = vadd.f32 %v4214_v28, %v4149_v49  ;;  %v10541_v16 = vadd.f32 %v4215_v47, %v4150_v27  ;;  %v13263_v27 = vld [vmem:[#allocation179_spill] sm:$0xff]  ;;  %v13267_v61 = vld [vmem:[#allocation53_spill] sm:$0xff]  ;;  %v13272_v47 = vld [vmem:[#allocation50_spill] sm:$0xff] }
 0x374   : > { %13247 = vst [vmem:[#allocation164_spill] sm:$0xff] %v10529_v26  ;;  %13248 = vst [vmem:[#allocation193_spill] sm:$0xff] %v10531_v59  ;;  %v10543_v23 = vadd.f32 %v4216_v11, %v4151_v50  ;;  %v10545_v31 = vadd.f32 %v4217_v36, %v4152_v8  ;;  %v10547_v6 = vadd.f32 %v4218_v10, %v4153_v45  ;;  %v13266_v45 = vld [vmem:[#allocation130_spill] sm:$0xff]  ;;  %v13271_v24 = vld [vmem:[#allocation55_spill] sm:$0xff] }
 0x375   : > { %13249 = vst [vmem:[#allocation33_spill] sm:$0xff] %v10533_v12  ;;  %13250 = vst [vmem:[#allocation26_spill] sm:$0xff] %v10535_v38  ;;  %v10549_v13 = vadd.f32 %v4219_v19, %v4154_v29  ;;  %v10551_v62 = vadd.f32 %v4220_v39, %v4155_v42  ;;  %v10553_v46 = vadd.f32 %v4221_v60, %v4156_v34  ;;  %v13268_v34 = vld [vmem:[#allocation114_spill] sm:$0xff]  ;;  %v13273_v36 = vld [vmem:[#allocation56_spill] sm:$0xff] }
 0x376   : > { %13251 = vst [vmem:[#allocation142_spill] sm:$0xff] %v10537_v53  ;;  %13252 = vst [vmem:[#allocation157_spill] sm:$0xff] %v10539_v1  ;;  %v10555_v3 = vadd.f32 %v4222_v43, %v4157_v52  ;;  %v10557_v14 = vadd.f32 %v4223_v21, %v4158_v35  ;;  %v10559_v49 = vadd.f32 %v4223_v21, %v4159_v7  ;;  %v13270_v7 = vld [vmem:[#allocation49_spill] sm:$0xff]  ;;  %v13274_v19 = vld [vmem:[#allocation51_spill] sm:$0xff] }
 0x377   : > { %13253 = vst [vmem:[#allocation143_spill] sm:$0xff] %v10541_v16  ;;  %13254 = vst [vmem:[#allocation159_spill] sm:$0xff] %v10543_v23  ;;  %v4258_v50 = vmul.f32 %v13264_v32, %v13263_v27  ;;  %v4259_v8 = vmul.f32 %v13264_v32, %v13265_v56  ;;  %v4260_v29 = vmul.f32 %v13264_v32, %v13266_v45  ;;  %v13275_v60 = vld [vmem:[#allocation172_spill] sm:$0xff]  ;;  %v13277_v56 = vld [vmem:[#allocation182_spill] sm:$0xff] }
 0x378   : > { %13255 = vst [vmem:[#allocation144_spill] sm:$0xff] %v10545_v31  ;;  %13256 = vst [vmem:[#allocation177_spill] sm:$0xff] %v10547_v6  ;;  %v4261_v42 = vmul.f32 %v13264_v32, %v13267_v61  ;;  %v4262_v52 = vmul.f32 %v13264_v32, %v13268_v34  ;;  %v4263_v35 = vmul.f32 %v13264_v32, %v13269_v25  ;;  %v13276_v21 = vld [vmem:[#allocation52_spill] sm:$0xff] }
 0x379   : > { %13257 = vst [vmem:[#allocation194_spill] sm:$0xff] %v10549_v13  ;;  %13258 = vst [vmem:[#allocation187_spill] sm:$0xff] %v10551_v62  ;;  %v4264_v0 = vmul.f32 %v13264_v32, %v13270_v7  ;;  %v4265_v28 = vmul.f32 %v13264_v32, %v13271_v24  ;;  %v4266_v11 = vmul.f32 %v13264_v32, %v13272_v47 }
 0x37a   : > { %13259 = vst [vmem:[#allocation101_spill] sm:$0xff] %v10553_v46  ;;  %13260 = vst [vmem:[#allocation195_spill] sm:$0xff] %v10555_v3  ;;  %v4267_v10 = vmul.f32 %v13264_v32, %v13273_v36  ;;  %v4268_v39 = vmul.f32 %v13264_v32, %v13274_v19  ;;  %v4269_v43 = vmul.f32 %v13264_v32, %v13275_v60  ;;  %v13278_v19 = vld [vmem:[#allocation103_spill] sm:$0xff] }
 0x37b   : > { %13261 = vst [vmem:[#allocation85_spill] sm:$0xff] %v10557_v14  ;;  %13262 = vst [vmem:[#allocation133_spill] sm:$0xff] %v10559_v49  ;;  %v4270_v27 = vmul.f32 %v13264_v32, %v13276_v21  ;;  %v4271_v49 = vmul.f32 %v13264_v32, %v13277_v56  ;;  %v4272_v14 = vmul.f32 0.0, %v13264_v32  ;;  %v4274_v3 = vadd.f32 %v4258_v50, %v4193_v18  ;;  %v13279_v56 = vld [vmem:[#allocation48_spill] sm:$0xff]  ;;  %v13280_v32 = vld [vmem:[#allocation87_spill] sm:$0xff] }
 0x37c   : > { %v4275_v46 = vadd.f32 %v4259_v8, %v4194_v30  ;;  %v4276_v62 = vadd.f32 %v4260_v29, %v4195_v4  ;;  %v4277_v13 = vadd.f32 %v4261_v42, %v4196_v37  ;;  %v4278_v6 = vadd.f32 %v4262_v52, %v4197_v15  ;;  %v13281_v4 = vld [vmem:[#allocation104_spill] sm:$0xff]  ;;  %v13288_v30 = vld [vmem:[#allocation91_spill] sm:$0xff]  ;;  %v13290_v8 = vld [vmem:[#allocation94_spill] sm:$0xff] }
 0x37d   : > { %v4279_v31 = vadd.f32 %v4263_v35, %v4198_v22  ;;  %v4280_v23 = vadd.f32 %v4264_v0, %v4199_v55  ;;  %v4281_v16 = vadd.f32 %v4265_v28, %v4200_v40  ;;  %v4282_v1 = vadd.f32 %v4266_v11, %v4201_v20  ;;  %v13282_v37 = vld [vmem:[#allocation88_spill] sm:$0xff]  ;;  %v13283_v55 = vld [vmem:[#allocation105_spill] sm:$0xff]  ;;  %v13286_v20 = vld [vmem:[#allocation90_spill] sm:$0xff] }
 0x37e   : > { %v4283_v53 = vadd.f32 %v4267_v10, %v4202_v9  ;;  %v4284_v38 = vadd.f32 %v4268_v39, %v4203_v63  ;;  %v4285_v12 = vadd.f32 %v4269_v43, %v4204_v51  ;;  %v4286_v59 = vadd.f32 %v4270_v27, %v4205_v58  ;;  %v13284_v9 = vld [vmem:[#allocation89_spill] sm:$0xff]  ;;  %v13285_v58 = vld [vmem:[#allocation106_spill] sm:$0xff] }
 0x37f   : > { %v4287_v26 = vadd.f32 %v4271_v49, %v4206_v5  ;;  %v4288_v21 = vadd.f32 %v4272_v14, %v4207_v2  ;;  %v4289_v60 = vadd.f32 %v4272_v14, %v4208_v44  ;;  %v4307_v36 = vmul.f32 %v13279_v56, %v13278_v19  ;;  %v13287_v2 = vld [vmem:[#allocation107_spill] sm:$0xff]  ;;  %v13289_v49 = vld [vmem:[#allocation108_spill] sm:$0xff] }
 0x380   : > { %v4308_v18 = vmul.f32 %v13279_v56, %v13280_v32  ;;  %v4309_v15 = vmul.f32 %v13279_v56, %v13281_v4  ;;  %v4310_v40 = vmul.f32 %v13279_v56, %v13282_v37  ;;  %v4311_v63 = vmul.f32 %v13279_v56, %v13283_v55 }
 0x381   : > { %v4312_v5 = vmul.f32 %v13279_v56, %v13284_v9  ;;  %v4313_v22 = vmul.f32 %v13279_v56, %v13285_v58  ;;  %v4314_v51 = vmul.f32 %v13279_v56, %v13286_v20  ;;  %v4315_v44 = vmul.f32 %v13279_v56, %v13287_v2  ;;  %v13291_v20 = vld [vmem:[#allocation135_spill] sm:$0xff]  ;;  %v13292_v2 = vld [vmem:[#allocation170_spill] sm:$0xff] }
 0x382   : > { %v4316_v14 = vmul.f32 %v13279_v56, %v13288_v30  ;;  %v4317_v50 = vmul.f32 %v13279_v56, %v13289_v49  ;;  %v4318_v29 = vmul.f32 %v13279_v56, %v13290_v8  ;;  %v4319_v42 = vmul.f32 0.0, %v13279_v56  ;;  %v13293_v56 = vld [vmem:[#allocation119_spill] sm:$0xff] }
 0x383   : > { %v4323_v52 = vadd.f32 %v4307_v36, %v4274_v3  ;;  %v4324_v35 = vadd.f32 %v4308_v18, %v4275_v46  ;;  %v4325_v0 = vadd.f32 %v4309_v15, %v4276_v62  ;;  %v4326_v28 = vadd.f32 %v4310_v40, %v4277_v13  ;;  %v13294_v62 = vld [vmem:[#allocation136_spill] sm:$0xff]  ;;  %v13300_v3 = vld [vmem:[#allocation139_spill] sm:$0xff]  ;;  %v13303_v40 = vld [vmem:[#allocation126_spill] sm:$0xff] }
 0x384   : > { %v4327_v11 = vadd.f32 %v4311_v63, %v4278_v6  ;;  %v4328_v10 = vadd.f32 %v4312_v5, %v4279_v31  ;;  %v4329_v19 = vadd.f32 %v4313_v22, %v4280_v23  ;;  %v4330_v39 = vadd.f32 %v4314_v51, %v4281_v16  ;;  %v13295_v31 = vld [vmem:[#allocation120_spill] sm:$0xff]  ;;  %v13297_v23 = vld [vmem:[#allocation121_spill] sm:$0xff] }
 0x385   : > { %v4331_v43 = vadd.f32 %v4315_v44, %v4282_v1  ;;  %v4332_v27 = vadd.f32 %v4316_v14, %v4283_v53  ;;  %v4333_v32 = vadd.f32 %v4317_v50, %v4284_v38  ;;  %v4334_v4 = vadd.f32 %v4318_v29, %v4285_v12  ;;  %v13296_v1 = vld [vmem:[#allocation137_spill] sm:$0xff]  ;;  %v13299_v38 = vld [vmem:[#allocation122_spill] sm:$0xff]  ;;  %v13302_v18 = vld [vmem:[#allocation140_spill] sm:$0xff] }
 0x386   : > { %v4335_v37 = vadd.f32 %v4319_v42, %v4286_v59  ;;  %v4336_v55 = vadd.f32 %v4319_v42, %v4287_v26  ;;  %v4337_v9 = vadd.f32 %v4319_v42, %v4288_v21  ;;  %v4338_v58 = vadd.f32 %v4319_v42, %v4289_v60  ;;  %v13298_v59 = vld [vmem:[#allocation138_spill] sm:$0xff]  ;;  %v13301_v60 = vld [vmem:[#allocation123_spill] sm:$0xff] }
 0x387   : > { %v4356_v30 = vmul.f32 %v13292_v2, %v13291_v20  ;;  %v4357_v46 = vmul.f32 %v13292_v2, %v13293_v56  ;;  %v4358_v6 = vmul.f32 %v13292_v2, %v13294_v62  ;;  %v4359_v16 = vmul.f32 %v13292_v2, %v13295_v31 }
 0x388   : > { %v4360_v53 = vmul.f32 %v13292_v2, %v13296_v1  ;;  %v4361_v26 = vmul.f32 %v13292_v2, %v13297_v23  ;;  %v4362_v12 = vmul.f32 %v13292_v2, %v13298_v59  ;;  %v4363_v13 = vmul.f32 %v13292_v2, %v13299_v38  ;;  %v13304_v38 = vld [vmem:[#allocation65_spill] sm:$0xff] }
 0x389   : > { %v4364_v36 = vmul.f32 %v13292_v2, %v13300_v3  ;;  %v4365_v21 = vmul.f32 %v13292_v2, %v13301_v60  ;;  %v4366_v15 = vmul.f32 %v13292_v2, %v13302_v18  ;;  %v4367_v63 = vmul.f32 %v13292_v2, %v13303_v40  ;;  %v13305_v3 = vld [vmem:[#allocation180_spill] sm:$0xff] }
 0x38a   : > { %v4368_v5 = vmul.f32 0.0, %v13292_v2  ;;  %v4372_v22 = vadd.f32 %v4356_v30, %v4323_v52  ;;  %v4373_v51 = vadd.f32 %v4357_v46, %v4324_v35  ;;  %v4374_v44 = vadd.f32 %v4358_v6, %v4325_v0  ;;  %v13306_v2 = vld [vmem:[#allocation66_spill] sm:$0xff]  ;;  %v13307_v35 = vld [vmem:[#allocation67_spill] sm:$0xff] }
 0x38b   : > { %v4375_v14 = vadd.f32 %v4359_v16, %v4326_v28  ;;  %v4376_v49 = vadd.f32 %v4360_v53, %v4327_v11  ;;  %v4377_v50 = vadd.f32 %v4361_v26, %v4328_v10  ;;  %v4378_v8 = vadd.f32 %v4362_v12, %v4329_v19  ;;  %v13308_v28 = vld [vmem:[#allocation68_spill] sm:$0xff]  ;;  %v13309_v10 = vld [vmem:[#allocation69_spill] sm:$0xff]  ;;  %v13315_v46 = vld [vmem:[#allocation75_spill] sm:$0xff] }
 0x38c   : > { %v4379_v29 = vadd.f32 %v4363_v13, %v4330_v39  ;;  %v4380_v42 = vadd.f32 %v4364_v36, %v4331_v43  ;;  %v4381_v20 = vadd.f32 %v4365_v21, %v4332_v27  ;;  %v4382_v56 = vadd.f32 %v4366_v15, %v4333_v32  ;;  %v13310_v39 = vld [vmem:[#allocation70_spill] sm:$0xff]  ;;  %v13311_v27 = vld [vmem:[#allocation71_spill] sm:$0xff]  ;;  %v13316_v16 = vld [vmem:[#allocation76_spill] sm:$0xff] }
 0x38d   : > { %v4383_v62 = vadd.f32 %v4367_v63, %v4334_v4  ;;  %v4384_v31 = vadd.f32 %v4368_v5, %v4335_v37  ;;  %v4385_v1 = vadd.f32 %v4368_v5, %v4336_v55  ;;  %v4386_v23 = vadd.f32 %v4368_v5, %v4337_v9  ;;  %v13312_v4 = vld [vmem:[#allocation72_spill] sm:$0xff]  ;;  %v13313_v55 = vld [vmem:[#allocation73_spill] sm:$0xff] }
 0x38e   : > { %v4387_v59 = vadd.f32 %v4368_v5, %v4338_v58  ;;  %v4405_v60 = vmul.f32 %v13305_v3, %v13304_v38  ;;  %v4406_v52 = vmul.f32 %v13305_v3, %v13306_v2  ;;  %v4407_v0 = vmul.f32 %v13305_v3, %v13307_v35  ;;  %v13314_v58 = vld [vmem:[#allocation74_spill] sm:$0xff] }
 0x38f   : > { %v4408_v11 = vmul.f32 %v13305_v3, %v13308_v28  ;;  %v4409_v19 = vmul.f32 %v13305_v3, %v13309_v10  ;;  %v4410_v43 = vmul.f32 %v13305_v3, %v13310_v39  ;;  %v4411_v32 = vmul.f32 %v13305_v3, %v13311_v27 }
 0x390   : > { %v4412_v37 = vmul.f32 %v13305_v3, %v13312_v4  ;;  %v4413_v9 = vmul.f32 %v13305_v3, %v13313_v55  ;;  %v4414_v30 = vmul.f32 %v13305_v3, %v13314_v58  ;;  %v4415_v6 = vmul.f32 %v13305_v3, %v13315_v46  ;;  %v13317_v4 = vld [vmem:[#allocation93_spill] sm:$0xff]  ;;  %v13324_v46 = vld [vmem:[#allocation78_spill] sm:$0xff] }
 0x391   : > { %v4416_v53 = vmul.f32 %v13305_v3, %v13316_v16  ;;  %v4417_v26 = vmul.f32 0.0, %v13305_v3  ;;  %v4421_v12 = vadd.f32 %v4405_v60, %v4372_v22  ;;  %v4422_v13 = vadd.f32 %v4406_v52, %v4373_v51 }
 0x392   : > { %v4423_v36 = vadd.f32 %v4407_v0, %v4374_v44  ;;  %v4424_v21 = vadd.f32 %v4408_v11, %v4375_v14  ;;  %v4425_v18 = vadd.f32 %v4409_v19, %v4376_v49  ;;  %v4426_v15 = vadd.f32 %v4410_v43, %v4377_v50  ;;  %v13318_v50 = vld [vmem:[#allocation154_spill] sm:$0xff] }
 0x393   : > { %v4427_v40 = vadd.f32 %v4411_v32, %v4378_v8  ;;  %v4428_v63 = vadd.f32 %v4412_v37, %v4379_v29  ;;  %v4429_v5 = vadd.f32 %v4413_v9, %v4380_v42  ;;  %v4430_v38 = vadd.f32 %v4414_v30, %v4381_v20  ;;  %v13319_v29 = vld [vmem:[#allocation112_spill] sm:$0xff]  ;;  %v13320_v42 = vld [vmem:[#allocation155_spill] sm:$0xff]  ;;  %v13321_v20 = vld [vmem:[#allocation129_spill] sm:$0xff] }
 0x394   : > { %v4431_v2 = vadd.f32 %v4415_v6, %v4382_v56  ;;  %v4432_v35 = vadd.f32 %v4416_v53, %v4383_v62  ;;  %v4433_v28 = vadd.f32 %v4417_v26, %v4384_v31  ;;  %v4434_v10 = vadd.f32 %v4417_v26, %v4385_v1  ;;  %v13322_v56 = vld [vmem:[#allocation158_spill] sm:$0xff]  ;;  %v13323_v62 = vld [vmem:[#allocation113_spill] sm:$0xff] }
 0x395   : > { %v4435_v39 = vadd.f32 %v4417_v26, %v4386_v23  ;;  %v4436_v27 = vadd.f32 %v4417_v26, %v4387_v59  ;;  %v4454_v55 = vmul.f32 %v13317_v4, %v13235_v41  ;;  %v4455_v22 = vmul.f32 %v13317_v4, %v13236_v33 }
 0x396   : > { %v4456_v51 = vmul.f32 %v13317_v4, %v13237_v57  ;;  %v4457_v44 = vmul.f32 %v13317_v4, %v13238_v48  ;;  %v4458_v14 = vmul.f32 %v13317_v4, %v13239_v54  ;;  %v4459_v49 = vmul.f32 %v13317_v4, %v13240_v17 }
 0x397   : > { %v4460_v8 = vmul.f32 %v13317_v4, %v13318_v50  ;;  %v4461_v41 = vmul.f32 %v13317_v4, %v13319_v29  ;;  %v4462_v33 = vmul.f32 %v13317_v4, %v13320_v42  ;;  %v4463_v57 = vmul.f32 %v13317_v4, %v13321_v20  ;;  %v5666_v50 = vld [vmem:[%s11363_s3] ss:$0 sm:$0xff] }
 0x398   : > { %v4464_v48 = vmul.f32 %v13317_v4, %v13322_v56  ;;  %v4465_v54 = vmul.f32 %v13317_v4, %v13323_v62  ;;  %v4466_v17 = vmul.f32 0.0, %v13317_v4  ;;  %v4470_v31 = vadd.f32 %v4454_v55, %v4421_v12 }
 0x399   : > { %v4471_v1 = vadd.f32 %v4455_v22, %v4422_v13  ;;  %v4472_v23 = vadd.f32 %v4456_v51, %v4423_v36  ;;  %v4473_v59 = vadd.f32 %v4457_v44, %v4424_v21  ;;  %v4474_v3 = vadd.f32 %v4458_v14, %v4425_v18  ;;  %v13325_v21 = vld [vmem:[#allocation56_spill] sm:$0xff]  ;;  %v13326_v18 = vld [vmem:[#allocation51_spill] sm:$0xff] }
 0x39a   : > { %v4475_v60 = vadd.f32 %v4459_v49, %v4426_v15  ;;  %v4476_v52 = vadd.f32 %v4460_v8, %v4427_v40  ;;  %v4477_v0 = vadd.f32 %v4461_v41, %v4428_v63  ;;  %v4478_v11 = vadd.f32 %v4462_v33, %v4429_v5  ;;  %v13327_v15 = vld [vmem:[#allocation172_spill] sm:$0xff]  ;;  %v13329_v63 = vld [vmem:[#allocation182_spill] sm:$0xff]  ;;  %v13331_v41 = vld [vmem:[#allocation193_spill] sm:$0xff] }
 0x39b   : > { %v4479_v19 = vadd.f32 %v4463_v57, %v4430_v38  ;;  %v4480_v43 = vadd.f32 %v4464_v48, %v4431_v2  ;;  %v4481_v32 = vadd.f32 %v4465_v54, %v4432_v35  ;;  %v4482_v37 = vadd.f32 %v4466_v17, %v4433_v28  ;;  %v13328_v40 = vld [vmem:[#allocation52_spill] sm:$0xff]  ;;  %v13332_v33 = vld [vmem:[#allocation33_spill] sm:$0xff]  ;;  %v13333_v57 = vld [vmem:[#allocation26_spill] sm:$0xff] }
 0x39c   : > { %v4483_v9 = vadd.f32 %v4466_v17, %v4434_v10  ;;  %v4484_v58 = vadd.f32 %v4466_v17, %v4435_v39  ;;  %v4485_v30 = vadd.f32 %v4466_v17, %v4436_v27  ;;  %v4503_v6 = vmul.f32 %v13324_v46, %v13266_v45  ;;  %v13330_v8 = vld [vmem:[#allocation164_spill] sm:$0xff]  ;;  %v13334_v48 = vld [vmem:[#allocation142_spill] sm:$0xff]  ;;  %v13335_v54 = vld [vmem:[#allocation157_spill] sm:$0xff] }
 0x39d   : > { %v4504_v16 = vmul.f32 %v13324_v46, %v13267_v61  ;;  %v4505_v53 = vmul.f32 %v13324_v46, %v13268_v34  ;;  %v4506_v26 = vmul.f32 %v13324_v46, %v13269_v25  ;;  %v4507_v12 = vmul.f32 %v13324_v46, %v13270_v7 }
 0x39e   : > { %v4508_v13 = vmul.f32 %v13324_v46, %v13271_v24  ;;  %v4509_v36 = vmul.f32 %v13324_v46, %v13272_v47  ;;  %v4510_v45 = vmul.f32 %v13324_v46, %v13325_v21  ;;  %v4511_v61 = vmul.f32 %v13324_v46, %v13326_v18 }
 0x39f   : > { %v4512_v34 = vmul.f32 %v13324_v46, %v13327_v15  ;;  %v4513_v25 = vmul.f32 %v13324_v46, %v13328_v40  ;;  %v4514_v7 = vmul.f32 %v13324_v46, %v13329_v63  ;;  %v4515_v24 = vmul.f32 0.0, %v13324_v46  ;;  %v13344_v46 = vld [vmem:[#allocation85_spill] sm:$0xff] }
 0x3a0   : > { %v4519_v5 = vadd.f32 %v4503_v6, %v4470_v31  ;;  %v4520_v38 = vadd.f32 %v4504_v16, %v4471_v1  ;;  %v4521_v47 = vadd.f32 %v4505_v53, %v4472_v23  ;;  %v4522_v2 = vadd.f32 %v4506_v26, %v4473_v59  ;;  %v13336_v31 = vld [vmem:[#allocation143_spill] sm:$0xff]  ;;  %v13345_v16 = vld [vmem:[#allocation133_spill] sm:$0xff] }
 0x3a1   : > { %v4523_v35 = vadd.f32 %v4507_v12, %v4474_v3  ;;  %v4524_v28 = vadd.f32 %v4508_v13, %v4475_v60  ;;  %v4525_v10 = vadd.f32 %v4509_v36, %v4476_v52  ;;  %v4526_v39 = vadd.f32 %v4510_v45, %v4477_v0  ;;  %v13337_v23 = vld [vmem:[#allocation159_spill] sm:$0xff]  ;;  %v13338_v3 = vld [vmem:[#allocation144_spill] sm:$0xff]  ;;  %v13339_v52 = vld [vmem:[#allocation177_spill] sm:$0xff] }
 0x3a2   : > { %v4527_v27 = vadd.f32 %v4511_v61, %v4478_v11  ;;  %v4528_v4 = vadd.f32 %v4512_v34, %v4479_v19  ;;  %v4529_v55 = vadd.f32 %v4513_v25, %v4480_v43  ;;  %v4530_v22 = vadd.f32 %v4514_v7, %v4481_v32  ;;  %v13340_v11 = vld [vmem:[#allocation194_spill] sm:$0xff]  ;;  %v13341_v43 = vld [vmem:[#allocation187_spill] sm:$0xff] }
 0x3a3   : > { %v4531_v51 = vadd.f32 %v4515_v24, %v4482_v37  ;;  %v4532_v44 = vadd.f32 %v4515_v24, %v4483_v9  ;;  %v4533_v14 = vadd.f32 %v4515_v24, %v4484_v58  ;;  %v4534_v49 = vadd.f32 %v4515_v24, %v4485_v30  ;;  %v13342_v37 = vld [vmem:[#allocation101_spill] sm:$0xff]  ;;  %v13343_v58 = vld [vmem:[#allocation195_spill] sm:$0xff] }
 0x3a4   : > { %v10719_v29 = vadd.f32 %v5666_v50, %v13330_v8  ;;  %v10722_v42 = vadd.f32 %v5666_v50, %v13331_v41  ;;  %v10725_v20 = vadd.f32 %v5666_v50, %v13332_v33  ;;  %v10728_v56 = vadd.f32 %v5666_v50, %v13333_v57  ;;  %v5667_v8 = vld [vmem:[%s11363_s3 + $0x1] ss:$0 sm:$0xff] }
 0x3a5   : > { %v10731_v62 = vadd.f32 %v5666_v50, %v13334_v48  ;;  %v10734_v17 = vadd.f32 %v5666_v50, %v13335_v54  ;;  %v10737_v1 = vadd.f32 %v5666_v50, %v13336_v31  ;;  %v10740_v59 = vadd.f32 %v5666_v50, %v13337_v23 }
 0x3a6   : > { %v10743_v60 = vadd.f32 %v5666_v50, %v13338_v3  ;;  %v10746_v0 = vadd.f32 %v5666_v50, %v13339_v52  ;;  %v10749_v19 = vadd.f32 %v5666_v50, %v13340_v11  ;;  %v10752_v32 = vadd.f32 %v5666_v50, %v13341_v43 }
 0x3a7   : > { %v10755_v9 = vadd.f32 %v5666_v50, %v13342_v37  ;;  %v10758_v30 = vadd.f32 %v5666_v50, %v13343_v58  ;;  %v10761_v6 = vadd.f32 %v5666_v50, %v13344_v46  ;;  %v10764_v53 = vadd.f32 %v5666_v50, %v13345_v16 }
 0x3a8   : > { %v4551_v26 = vmax.f32 %v10719_v29, 0.0  ;;  %v4552_v12 = vmax.f32 %v10722_v42, 0.0  ;;  %v4553_v13 = vmax.f32 %v10725_v20, 0.0  ;;  %v4554_v36 = vmax.f32 %v10728_v56, 0.0  ;;  %v13353_v29 = vld [vmem:[#allocation146_spill] sm:$0xff] }
 0x3a9   : > { %v11932_v21 = vmax.f32 %v10731_v62, 0.0  ;;  %v11931_v45 = vmax.f32 %v10734_v17, 0.0  ;;  %v11930_v18 = vmax.f32 %v10737_v1, 0.0  ;;  %v11929_v61 = vmax.f32 %v10740_v59, 0.0  ;;  %v13359_v20 = vld [vmem:[#allocation162_spill] sm:$0xff] }
 0x3aa   : > { %v11928_v15 = vmax.f32 %v10743_v60, 0.0  ;;  %v11927_v34 = vmax.f32 %v10746_v0, 0.0  ;;  %v11926_v40 = vmax.f32 %v10749_v19, 0.0  ;;  %v11925_v25 = vmax.f32 %v10752_v32, 0.0 }
 0x3ab   : > { %v11924_v63 = vmax.f32 %v10755_v9, 0.0  ;;  %v11921_v7 = vmax.f32 %v10758_v30, 0.0  ;;  %v11923_v24 = vmax.f32 %v10761_v6, 0.0  ;;  %v11922_v50 = vmax.f32 %v10764_v53, 0.0 }
 0x3ac   : > { %v4567_v41 = vadd.f32 %v5667_v8, %v4519_v5  ;;  %v4568_v33 = vadd.f32 %v5667_v8, %v4520_v38  ;;  %v4569_v57 = vadd.f32 %v5667_v8, %v4521_v47  ;;  %v4570_v48 = vadd.f32 %v5667_v8, %v4522_v2 }
 0x3ad   : > { %v4571_v54 = vadd.f32 %v5667_v8, %v4523_v35  ;;  %v4572_v31 = vadd.f32 %v5667_v8, %v4524_v28  ;;  %v4573_v23 = vadd.f32 %v5667_v8, %v4525_v10  ;;  %v4574_v3 = vadd.f32 %v5667_v8, %v4526_v39 }
 0x3ae   : > { %v4575_v52 = vadd.f32 %v5667_v8, %v4527_v27  ;;  %v10785_v11 = vadd.f32 %v5667_v8, %v4528_v4  ;;  %v10787_v43 = vadd.f32 %v5667_v8, %v4529_v55  ;;  %v10789_v37 = vadd.f32 %v5667_v8, %v4530_v22 }
 0x3af   : > { %v10791_v58 = vadd.f32 %v5667_v8, %v4531_v51  ;;  %v10793_v46 = vadd.f32 %v5667_v8, %v4532_v44  ;;  %v10795_v16 = vadd.f32 %v5667_v8, %v4533_v14  ;;  %v10797_v5 = vadd.f32 %v5667_v8, %v4534_v49 }
 0x3b0   : > { %v4583_v38 = vmax.f32 %v4567_v41, 0.0  ;;  %v4584_v47 = vmax.f32 %v4568_v33, 0.0  ;;  %v4585_v2 = vmax.f32 %v4569_v57, 0.0  ;;  %v4586_v35 = vmax.f32 %v4570_v48, 0.0 }
 0x3b1   : > { %v4587_v28 = vmax.f32 %v4571_v54, 0.0  ;;  %v4588_v10 = vmax.f32 %v4572_v31, 0.0  ;;  %v4589_v39 = vmax.f32 %v4573_v23, 0.0  ;;  %v4590_v27 = vmax.f32 %v4574_v3, 0.0 }
 0x3b2   : > { %v4591_v4 = vmax.f32 %v4575_v52, 0.0  ;;  %v4592_v55 = vmax.f32 %v10785_v11, 0.0  ;;  %v4593_v22 = vmax.f32 %v10787_v43, 0.0  ;;  %v4594_v51 = vmax.f32 %v10789_v37, 0.0 }
 0x3b3   : > { %v4595_v44 = vmax.f32 %v10791_v58, 0.0  ;;  %v4596_v14 = vmax.f32 %v10793_v46, 0.0  ;;  %v4597_v49 = vmax.f32 %v10795_v16, 0.0  ;;  %v11933_v8 = vmax.f32 %v10797_v5, 0.0 }
 0x3b4   : > { %v10810_v41 = vpack.c.bf16 %v4552_v12, %v4551_v26  ;;  %v10816_v33 = vpack.c.bf16 %v4554_v36, %v4553_v13  ;;  %v10822_v57 = vpack.c.bf16 %v11931_v45, %v11932_v21  ;;  %v10828_v48 = vpack.c.bf16 %v11929_v61, %v11930_v18  ;;  %v13351_v61 = vld [vmem:[#allocation173_spill] sm:$0xff]  ;;  %v13352_v18 = vld [vmem:[#allocation183_spill] sm:$0xff] }
 0x3b5   : > { %v10834_v54 = vpack.c.bf16 %v11927_v34, %v11928_v15  ;;  %v10840_v31 = vpack.c.bf16 %v11925_v25, %v11926_v40  ;;  %v10846_v23 = vpack.c.bf16 %v11921_v7, %v11924_v63  ;;  %v10852_v3 = vpack.c.bf16 %v11922_v50, %v11923_v24  ;;  %v13347_v63 = vld [vmem:[#allocation161_spill] sm:$0xff]  ;;  %v13349_v40 = vld [vmem:[#allocation156_spill] sm:$0xff] }
 0x3b6   : > { %v10854_v52 = vpack.c.bf16 %v4584_v47, %v4583_v38  ;;  %v10856_v11 = vpack.c.bf16 %v4586_v35, %v4585_v2  ;;  %v10858_v43 = vpack.c.bf16 %v4588_v10, %v4587_v28  ;;  %v10860_v37 = vpack.c.bf16 %v4590_v27, %v4589_v39 }
 0x3b7   : > { %v10862_v58 = vpack.c.bf16 %v4592_v55, %v4591_v4  ;;  %v10864_v46 = vpack.c.bf16 %v4594_v51, %v4593_v22  ;;  %v10866_v16 = vpack.c.bf16 %v4596_v14, %v4595_v44  ;;  %v10870_v7 = vpack.c.bf16 %v11933_v8, %v4597_v49 }
 0x3b8   : > { %v4633_v50 = vadd.f32 %v4583_v38, %v4551_v26  ;;  %v4634_v24 = vadd.f32 %v4584_v47, %v4552_v12  ;;  %v13348_v25 = vmax.f32 %v13347_v63, 0.0  ;;  %v13350_v34 = vmax.f32 %v13349_v40, 0.0  ;;  %v13355_v38 = vld [vmem:[#allocation205_spill] sm:$0xff] }
 0x3b9   : > { %13346 = vst [vmem:[#allocation196_spill] sm:$0xff] %v10870_v7  ;;  %v3010_v45 = vadd.f32 %v13352_v18, %v13351_v61  ;;  %v4635_v21 = vadd.f32 %v4585_v2, %v4553_v13  ;;  %v4636_v8 = vadd.f32 %v4586_v35, %v4554_v36  ;;  %v13354_v26 = vmax.f32 %v13353_v29, 0.0  ;;  %v13361_v2 = vld [vmem:[#allocation36_spill] sm:$0xff] }
 0x3ba   : > { %v2996_v15 = vadd.f32 %v13350_v34, %v13348_v25  ;;  %v4649_v7 = vadd.f32 %v4634_v24, %v4633_v50  ;;  %v13356_v42 = vmax.f32 %v13355_v38, 0.0  ;;  %v13357_v63 = vmax.f32 %v10731_v62, 0.0 }
 0x3bb   : > { %v13358_v25 = vmax.f32 %v10734_v17, 0.0  ;;  %v13360_v13 = vmax.f32 %v13359_v20, 0.0  ;;  %v13362_v56 = vmax.f32 %v13361_v2, 0.0  ;;  %v13363_v50 = vmax.f32 %v10737_v1, 0.0  ;;  %v4762_v2 = vld [vmem:[#allocation17 + $0x10] sm:$0xff] }
 0x3bc   : > { %v2997_v12 = vadd.f32 %v13356_v42, %v13354_v26  ;;  %v3011_v47 = vadd.f32 %v3010_v45, %v2996_v15  ;;  %v4637_v40 = vadd.f32 %v4587_v28, %v13357_v63  ;;  %v4650_v34 = vadd.f32 %v4649_v7, %v4635_v21  ;;  %v13365_v28 = vld [vmem:[#allocation141_spill] sm:$0xff]  ;;  %v13367_v7 = vld [vmem:[#allocation40_spill] sm:$0xff] }
 0x3bd   : > { %v4638_v18 = vadd.f32 %v4588_v10, %v13358_v25  ;;  %v2998_v36 = vadd.f32 %v13362_v56, %v13360_v13  ;;  %v4639_v35 = vadd.f32 %v4589_v39, %v13363_v50  ;;  %v13364_v45 = vmax.f32 %v10740_v59, 0.0 }
 0x3be   : > { %v4651_v61 = vadd.f32 %v4650_v34, %v4636_v8  ;;  %v3012_v24 = vadd.f32 %v3011_v47, %v2997_v12  ;;  %v13366_v21 = vmax.f32 %v13365_v28, 0.0  ;;  %v13368_v17 = vmax.f32 %v13367_v7, 0.0 }
 0x3bf   : > { %v4640_v15 = vadd.f32 %v4590_v27, %v13364_v45  ;;  %v13369_v26 = vmax.f32 %v10743_v60, 0.0  ;;  %v13370_v12 = vmax.f32 %v10746_v0, 0.0  ;;  %v13371_v63 = vmax.f32 %v10749_v19, 0.0  ;;  %v4763_v0 = vld [vmem:[#allocation17 + $0x18] sm:$0xff] }
 0x3c0   : > { %v4652_v29 = vadd.f32 %v4651_v61, %v4637_v40  ;;  %v2999_v10 = vadd.f32 %v13368_v17, %v13366_v21  ;;  %v3013_v8 = vadd.f32 %v3012_v24, %v2998_v36  ;;  %v13372_v40 = vmax.f32 %v10752_v32, 0.0  ;;  %v4761_v61 = vld [vmem:[#allocation17 + $0x8] sm:$0xff]  ;;  %v4766_v21 = vld [vmem:[#allocation17 + $0x30] sm:$0xff] }
 0x3c1   : > { %v4641_v38 = vadd.f32 %v4591_v4, %v13369_v26  ;;  %v4642_v47 = vadd.f32 %v4592_v55, %v13370_v12  ;;  %v4643_v59 = vadd.f32 %v4593_v22, %v13371_v63  ;;  %v13373_v60 = vmax.f32 %v10755_v9, 0.0  ;;  %v4765_v9 = vld [vmem:[#allocation17 + $0x28] sm:$0xff]  ;;  %v4770_v12 = vld [vmem:[#allocation17 + $0x50] sm:$0xff] }
 0x3c2   : > { %v4653_v62 = vadd.f32 %v4652_v29, %v4638_v18  ;;  %v3014_v39 = vadd.f32 %v3013_v8, %v2999_v10  ;;  %v4644_v34 = vadd.f32 %v4594_v51, %v13372_v40  ;;  %v4760_v18 = vld [vmem:[#allocation17] sm:$0xff]  ;;  %v13374_v56 = vmax.f32 %v10758_v30, 0.0  ;;  %v4769_v8 = vld [vmem:[#allocation17 + $0x48] sm:$0xff] }
 0x3c3   : > { %v4645_v4 = vadd.f32 %v4595_v44, %v13373_v60  ;;  %v5511_v55 = vpack.c.bf16 %v4761_v61, %v4760_v18  ;;  %v5514_v22 = vpack.c.bf16 %v4763_v0, %v4762_v2  ;;  %v13375_v32 = vmax.f32 %v10761_v6, 0.0  ;;  %v4764_v29 = vld [vmem:[#allocation17 + $0x20] sm:$0xff]  ;;  %v4767_v6 = vld [vmem:[#allocation17 + $0x38] sm:$0xff]  ;;  %v4773_v40 = vld [vmem:[#allocation17 + $0x68] sm:$0xff] }
 0x3c4   : > { %v4654_v42 = vadd.f32 %v4653_v62, %v4639_v35  ;;  %v3015_v20 = vrot.slane %v3014_v39, 4  ;;  %v4646_v36 = vadd.f32 %v4596_v14, %v13374_v56  ;;  %v13376_v35 = vmov 0.0|0.0   ;;  %v4849_v18 = vld [vmem:[#allocation17 + $0x88] sm:$0xff]  ;;  %v4851_v2 = vld [vmem:[#allocation17 + $0x98] sm:$0xff]  ;;  %v4852_v56 = vld [vmem:[#allocation17 + $0xa0] sm:$0xff] }
 0x3c5   : > { %5512 = vmatpush3.bf16.msra.mxu1 %v5511_v55  ;;  %v4647_v51 = vadd.f32 %v4597_v49, %v13375_v32  ;;  %v13377_v44 = vmax.f32 %v10764_v53, 0.0  ;;  %v13378_v45 = vmax.f32 %v10797_v5, 0.0  ;;  %v5517_v30 = vpack.c.bf16 %v4765_v9, %v4764_v29  ;;  %v4768_v53 = vld [vmem:[#allocation17 + $0x40] sm:$0xff]  ;;  %v4858_v9 = vld [vmem:[#allocation17 + $0xd0] sm:$0xff] }
 0x3c6   : > { %v4655_v1 = vadd.f32 %v4654_v42, %v4640_v15  ;;  %v3016_v24 = vadd.f32 %v3015_v20, %v3014_v39  ;;  %5513 = vmatprep.subr.bf16.mxu1 %v13376_v35  ;;  %v5520_v7 = vpack.c.bf16 %v4767_v6, %v4766_v21  ;;  %v5523_v26 = vpack.c.bf16 %v4769_v8, %v4768_v53  ;;  %v4862_v21 = vld [vmem:[#allocation17 + $0xf0] sm:$0xff] }
 0x3c7   : > { %v4648_v15 = vadd.f32 %v13378_v45, %v13377_v44  ;;  %v13379_v55 = vmov 0.0   ;;  %v4859_v44 = vld [vmem:[#allocation17 + $0xd8] sm:$0xff] }
 0x3c8   : > { %v4656_v27 = vadd.f32 %v4655_v1, %v4641_v38  ;;  %v3017_v14 = vrot.slane %v3016_v24, 2  ;;  %v5550_v45 = vpack.c.bf16 %v4859_v44, %v4858_v9 }
 0x3c9   : > { %5515 = vmatpush3.bf16.msra.mxu1 %v5514_v22  ;;  %v4854_v22 = vld [vmem:[#allocation17 + $0xb0] sm:$0xff] }
 0x3ca   : > { %v4657_v25 = vadd.f32 %v4656_v27, %v4642_v47  ;;  %5516 = vmatprep.subr.bf16.mxu1 %v13376_v35  ;;  %v3018_v17 = vadd.f32 %v3017_v14, %v3016_v24  ;;  %v4771_v47 = vld [vmem:[#allocation17 + $0x58] sm:$0xff]  ;;  %v4772_v27 = vld [vmem:[#allocation17 + $0x60] sm:$0xff]  ;;  %v4774_v14 = vld [vmem:[#allocation17 + $0x70] sm:$0xff] }
 0x3cb   : > { %v5526_v39 = vpack.c.bf16 %v4771_v47, %v4770_v12  ;;  %v5529_v61 = vpack.c.bf16 %v4773_v40, %v4772_v27  ;;  %v4855_v24 = vld [vmem:[#allocation17 + $0xb8] sm:$0xff] }
 0x3cc   : > { %v4658_v13 = vadd.f32 %v4657_v25, %v4643_v59  ;;  %v3019_v38 = vrot.slane %v3018_v17, 1  ;;  %v4848_v25 = vld [vmem:[#allocation17 + $0x80] sm:$0xff]  ;;  %v5544_v32 = vpack.c.bf16 %v4855_v24, %v4854_v22 }
 0x3cd   : > { %5518 = vmatpush3.bf16.msra.mxu1 %v5517_v30  ;;  %v5535_v60 = vpack.c.bf16 %v4849_v18, %v4848_v25 }
 0x3ce   : > { %v4659_v19 = vadd.f32 %v4658_v13, %v4644_v34  ;;  %5519 = vmatprep.subr.bf16.mxu1 %v13376_v35  ;;  %v3020_v63 = vadd.f32 %v3019_v38, %v3018_v17  ;;  %v4850_v13 = vld [vmem:[#allocation17 + $0x90] sm:$0xff]  ;;  %v4688_v17 = vld [vmem:[%s11365_s5] sm:$0x1] }
 0x3cf   : > { %v5538_v0 = vpack.c.bf16 %v4851_v2, %v4850_v13 }
 0x3d0   : > { %v4660_v50 = vadd.f32 %v4659_v19, %v4645_v4 }
 0x3d1   : > { %5521 = vmatpush3.bf16.msra.mxu1 %v5520_v7 }
 0x3d2   : > { %v4661_v62 = vadd.f32 %v4660_v50, %v4646_v36  ;;  %5522 = vmatprep.subr.bf16.mxu1 %v13376_v35  ;;  %v4853_v36 = vld [vmem:[#allocation17 + $0xa8] sm:$0xff] }
 0x3d3   : > { %v5541_v19 = vpack.c.bf16 %v4853_v36, %v4852_v56  ;;  %v4857_v50 = vld [vmem:[#allocation17 + $0xc8] sm:$0xff] }
 0x3d4   : > { %v4662_v28 = vadd.f32 %v4661_v62, %v4647_v51  ;;  %v4856_v51 = vld [vmem:[#allocation17 + $0xc0] sm:$0xff]  ;;  %v4861_v62 = vld [vmem:[#allocation17 + $0xe8] sm:$0xff] }
 0x3d5   : > { %5524 = vmatpush3.bf16.msra.mxu1 %v5523_v26  ;;  %v5547_v29 = vpack.c.bf16 %v4857_v50, %v4856_v51  ;;  %v4864_v26 = vld [vmem:[%s11367_s7 + $0x1] sm:$0x1] }
 0x3d6   : > { %v4663_v49 = vadd.f32 %v4662_v28, %v4648_v15  ;;  %5525 = vmatprep.subr.bf16.mxu1 %v13376_v35  ;;  %v4860_v15 = vld [vmem:[#allocation17 + $0xe0] sm:$0xff]  ;;  %v4775_v28 = vld [vmem:[#allocation17 + $0x78] sm:$0xff] }
 0x3d7   : > { %v5553_v30 = vpack.c.bf16 %v4861_v62, %v4860_v15  ;;  %v5532_v6 = vpack.c.bf16 %v4775_v28, %v4774_v14 }
 0x3d8   : > { %v4664_v10 = vrot.slane %v4663_v49, 4 }
 0x3d9   : > { %5527 = vmatpush3.bf16.msra.mxu1 %v5526_v39 }
 0x3da   : > { %v4665_v5 = vadd.f32 %v4664_v10, %v4663_v49  ;;  %5528 = vmatprep.subr.bf16.mxu1 %v13376_v35  ;;  %v4863_v49 = vld [vmem:[#allocation17 + $0xf8] sm:$0xff] }
 0x3db   : > { %v5556_v7 = vpack.c.bf16 %v4863_v49, %v4862_v21  ;;  %v4979_v21 = vunpack.c.l.bf16 %v10810_v41  ;;  %v13396_v49 = vld [vmem:[#allocation25_spill] sm:$0xff] }
 0x3dc   : > { %v4666_v42 = vrot.slane %v4665_v5, 2 }
 0x3dd   : > { %5530 = vmatpush3.bf16.msra.mxu1 %v5529_v61  ;;  %v13380_v61 = vld [vmem:[#allocation190_spill] sm:$0xff] }
 0x3de   : > { %v4667_v1 = vadd.f32 %v4666_v42, %v4665_v5  ;;  %5531 = vmatprep.subr.bf16.mxu1 %v13376_v35 }
 0x3e0   : > { %v4668_v59 = vrot.slane %v4667_v1, 1 }
 0x3e1   : > { %5533 = vmatpush3.bf16.msra.mxu1 %v5532_v6  ;;  %v4980_v6 = vunpack.c.h.bf16 %v10810_v41  ;;  %v13403_v41 = vunpack.c.l.bf16 %v10828_v48 }
 0x3e2   : > { %v4669_v34 = vadd.f32 %v4668_v59, %v4667_v1 }
 0x3e4   : > { %v4670_v20 = vadd.f32 %v4669_v34, %v3020_v63 }
 0x3e6   : > { %v4671_v4 = vmul.f32 0.00390625, %v4670_v20  ;;  %v4963_v20 = vunpack.c.l.bf16 %v13380_v61 }
 0x3e8   : > { %5414 = vmatmul.mubr.f32.vlgmr.msra.gmra.mrb[0].mxu0 %v4671_v4  ;;  %v13381_v4 = vld [vmem:[#allocation191_spill] sm:$0xff] }
 0x3e9   : > { %5536 = vmatpush3.bf16.msra.mxu0 %v5535_v60  ;;  %5483 = vmatprep.mubr.msk.f32.mxu0 %vm5896_vm0, %v13379_v55  ;;  %v4964_v60 = vunpack.c.h.bf16 %v13380_v61  ;;  %v4965_v13 = vunpack.c.l.bf16 %v13381_v4  ;;  %v4966_v2 = vunpack.c.h.bf16 %v13381_v4 }
 0x3ea   : > { %5537 = vmatprep.subr.bf16.mxu0 %v13376_v35 }
 0x3ed   : > { %5539 = vmatpush3.bf16.msra.mxu0 %v5538_v0  ;;  %v13382_v0 = vld [vmem:[#allocation192_spill] sm:$0xff] }
 0x3ee   : > { %5540 = vmatprep.subr.bf16.mxu0 %v13376_v35  ;;  %v4967_v55 = vunpack.c.l.bf16 %v13382_v0  ;;  %v4968_v36 = vunpack.c.h.bf16 %v13382_v0 }
 0x3f1   : > { %5542 = vmatpush3.bf16.msra.mxu0 %v5541_v19  ;;  %v13383_v19 = vld [vmem:[#allocation171_spill] sm:$0xff] }
 0x3f2   : > { %5543 = vmatprep.subr.bf16.mxu0 %v13376_v35  ;;  %v4969_v22 = vunpack.c.l.bf16 %v13383_v19  ;;  %v4970_v24 = vunpack.c.h.bf16 %v13383_v19 }
 0x3f5   : > { %5545 = vmatpush3.bf16.msra.mxu0 %v5544_v32  ;;  %v13384_v32 = vld [vmem:[#allocation181_spill] sm:$0xff] }
 0x3f6   : > { %5546 = vmatprep.subr.bf16.mxu0 %v13376_v35  ;;  %v4971_v51 = vunpack.c.l.bf16 %v13384_v32  ;;  %v4972_v50 = vunpack.c.h.bf16 %v13384_v32 }
 0x3f9   : > { %5548 = vmatpush3.bf16.msra.mxu0 %v5547_v29  ;;  %v13385_v29 = vld [vmem:[#allocation95_spill] sm:$0xff] }
 0x3fa   : > { %5549 = vmatprep.subr.bf16.mxu0 %v13376_v35  ;;  %v4973_v9 = vunpack.c.l.bf16 %v13385_v29  ;;  %v4974_v44 = vunpack.c.h.bf16 %v13385_v29  ;;  %v13399_v29 = vunpack.c.h.bf16 %v10816_v33 }
 0x3fd   : > { %5551 = vmatpush3.bf16.msra.mxu0 %v5550_v45  ;;  %v13386_v45 = vld [vmem:[#allocation79_spill] sm:$0xff] }
 0x3fe   : > { %5552 = vmatprep.subr.bf16.mxu0 %v13376_v35  ;;  %v4975_v15 = vunpack.c.l.bf16 %v13386_v45  ;;  %v4976_v62 = vunpack.c.h.bf16 %v13386_v45 }
 0x401   : > { %5554 = vmatpush3.bf16.msra.mxu0 %v5553_v30  ;;  %v13387_v30 = vld [vmem:[#allocation96_spill] sm:$0xff] }
 0x402   : > { %5555 = vmatprep.subr.bf16.mxu0 %v13376_v35  ;;  %v4776_v35 = vld [vmem:[%s11367_s7] sm:$0x1]  ;;  %v4977_v14 = vunpack.c.l.bf16 %v13387_v30  ;;  %v4978_v28 = vunpack.c.h.bf16 %v13387_v30 }
 0x405   : > { %5557 = vmatpush3.bf16.msra.mxu0 %v5556_v7 }
 0x4bb   : > { %v4755_v10 = vpop.f32.mrb[0].mxu0 }
 0x4bc   : > { %v4756_v53 = vadd.f32 %v4755_v10, %v4688_v17  ;;  %v5415_v8 = vpop.f32.mrb[1].mxu0  ;;  %v13395_v10 = vld [vmem:[#allocation128_spill] sm:$0xff] }
 0x4bd   : > { %v13393_v8 = vld [vmem:[#allocation127_spill] sm:$0xff] }
 0x4be   : > { %v4759_v5 = vmax.f32 %v4756_v53, 0.0  ;;  %v13394_v53 = vld [vmem:[#allocation111_spill] sm:$0xff] }
 0x4c0   : > { %5449 = vmatmul.mubr.f32.vlgmr.msra.gmra.mrb[0].mxu1 %v4759_v5  ;;  %5484 = vmatmul.mubr.f32.vlgmr.msra.gmra.mrb[2].mxu0 %v4759_v5  ;;  %v13392_v5 = vld [vmem:[#allocation82_spill] sm:$0xff] }
 0x593   : > { %v4843_v38 = vpop.f32.mrb[0].mxu1  ;;  %v4931_v42 = vpop.f32.mrb[2].mxu0 }
 0x594   : > { %v4844_v12 = vadd.f32 %v4843_v38, %v4776_v35  ;;  %v4932_v47 = vadd.f32 %v4931_v42, %v4864_v26  ;;  %v5450_v1 = vpop.f32.mrb[1].mxu1  ;;  %v5485_v39 = vpop.f32.mrb[3].mxu0  ;;  %v13391_v35 = vld [vmem:[#allocation98_spill] sm:$0xff]  ;;  %v13434_v38 = vunpack.c.h.bf16 %v13393_v8 }
 0x595   : > { %v13388_v39 = vld [vmem:[#allocation80_spill] sm:$0xff]  ;;  %v13430_v1 = vunpack.c.h.bf16 %v13391_v35 }
 0x596   : > { %v4935_v63 = vmax.f32 %v4844_v12, %v4932_v47 }
 0x598   : > { %v4936_v59 = vsub.f32 %v4844_v12, %v4935_v63  ;;  %v4939_v27 = vsub.f32 %v4932_v47, %v4935_v63  ;;  %v13432_v12 = vunpack.c.h.bf16 %v13392_v5 }
 0x59a   : > { %v4937_v40 = vmul.f32 1.442695, %v4936_v59  ;;  %v4940_v34 = vmul.f32 1.442695, %v4939_v27  ;;  %v13389_v27 = vld [vmem:[#allocation97_spill] sm:$0xff] }
 0x59b   : > { %v13426_v59 = vunpack.c.h.bf16 %v13389_v27 }
 0x59c   : > { %5658 = vpow2.f32 %v4937_v40 }
 0x59d   : > { %5660 = vpow2.f32 %v4940_v34  ;;  %v13436_v34 = vunpack.c.h.bf16 %v13394_v53 }
 0x5a6   : > { %v5659_v25 = vpop.eup %5658 }
 0x5a7   : > { %v5661_v18 = vpop.eup %5660 }
 0x5a8   : > { %v4942_v56 = vadd.f32 %v5661_v18, %v5659_v25 }
 0x5aa   : > { %5662 = vrcp.f32 %v4942_v56  ;;  %v13390_v56 = vld [vmem:[#allocation81_spill] sm:$0xff] }
 0x5b4   : > { %v5663_v17 = vpop.eup %5662 }
 0x5b5   : > { %v4945_v40 = vmul.f32 %v5663_v17, %v5659_v25  ;;  %v4946_v7 = vmul.f32 %v5663_v17, %v5661_v18  ;;  %v13397_v25 = vld [vmem:[#allocation196_spill] sm:$0xff]  ;;  %v13424_v17 = vunpack.c.h.bf16 %v13388_v39 }
 0x5b7   : > { %v4998_v63 = vrot.slane %v4945_v40, %v13396_v49  ;;  %v11015_v26 = vrot.slane %v4946_v7, %v13396_v49 }
 0x5b9   : > { %v11019_v42 = vmul.f32 %v4998_v63, %v4963_v20  ;;  %v11023_v47 = vmul.f32 %v4998_v63, %v4964_v60  ;;  %v11027_v40 = vmul.f32 %v4998_v63, %v4965_v13  ;;  %v11031_v18 = vmul.f32 %v4998_v63, %v4966_v2 }
 0x5ba   : > { %v11035_v49 = vmul.f32 %v4998_v63, %v4967_v55  ;;  %v11039_v20 = vmul.f32 %v4998_v63, %v4968_v36  ;;  %v11043_v61 = vmul.f32 %v4998_v63, %v4969_v22  ;;  %v11047_v60 = vmul.f32 %v4998_v63, %v4970_v24 }
 0x5bb   : > { %v11051_v4 = vmul.f32 %v4998_v63, %v4971_v51  ;;  %v11055_v13 = vmul.f32 %v4998_v63, %v4972_v50  ;;  %v11059_v2 = vmul.f32 %v4998_v63, %v4973_v9  ;;  %v11063_v0 = vmul.f32 %v4998_v63, %v4974_v44 }
 0x5bc   : > { %v11067_v55 = vmul.f32 %v4998_v63, %v4975_v15  ;;  %v11071_v36 = vmul.f32 %v4998_v63, %v4976_v62  ;;  %v11075_v19 = vmul.f32 %v4998_v63, %v4977_v14  ;;  %v11079_v22 = vmul.f32 %v4998_v63, %v4978_v28 }
 0x5bd   : > { %v11083_v24 = vmul.f32 %v4998_v63, %v4979_v21  ;;  %v11087_v32 = vmul.f32 %v4998_v63, %v4980_v6  ;;  %v13398_v51 = vunpack.c.l.bf16 %v10816_v33  ;;  %v11095_v9 = vmul.f32 %v4998_v63, %v13399_v29 }
 0x5be   : > { %v13400_v44 = vunpack.c.l.bf16 %v10822_v57  ;;  %v13401_v15 = vunpack.c.h.bf16 %v10822_v57  ;;  %v11107_v30 = vmul.f32 %v4998_v63, %v13403_v41  ;;  %v13405_v14 = vunpack.c.h.bf16 %v10828_v48 }
 0x5bf   : > { %v11091_v50 = vmul.f32 %v4998_v63, %v13398_v51  ;;  %v13407_v33 = vunpack.c.l.bf16 %v10834_v54  ;;  %v13409_v6 = vunpack.c.h.bf16 %v10834_v54  ;;  %v13411_v57 = vunpack.c.l.bf16 %v10840_v31 }
 0x5c0   : > { %v11099_v45 = vmul.f32 %v4998_v63, %v13400_v44  ;;  %v11103_v62 = vmul.f32 %v4998_v63, %v13401_v15  ;;  %13404 = vst [vmem:[#allocation197_spill] sm:$0xff] %v11107_v30  ;;  %v11111_v28 = vmul.f32 %v4998_v63, %v13405_v14  ;;  %v13413_v29 = vunpack.c.h.bf16 %v10840_v31 }
 0x5c1   : > { %v11115_v21 = vmul.f32 %v4998_v63, %v13407_v33  ;;  %v11119_v7 = vmul.f32 %v4998_v63, %v13409_v6  ;;  %v11123_v51 = vmul.f32 %v4998_v63, %v13411_v57  ;;  %v13415_v48 = vunpack.c.l.bf16 %v10846_v23 }
 0x5c2   : > { %13402 = vst [vmem:[#allocation117_spill] sm:$0xff] %v11103_v62  ;;  %13406 = vst [vmem:[#allocation160_spill] sm:$0xff] %v11111_v28  ;;  %v11127_v44 = vmul.f32 %v4998_v63, %v13413_v29  ;;  %v13417_v41 = vunpack.c.h.bf16 %v10846_v23  ;;  %v13419_v54 = vunpack.c.l.bf16 %v10852_v3  ;;  %v13421_v6 = vunpack.c.h.bf16 %v10852_v3 }
 0x5c3   : > { %13408 = vst [vmem:[#allocation145_spill] sm:$0xff] %v11115_v21  ;;  %13410 = vst [vmem:[#allocation99_spill] sm:$0xff] %v11119_v7  ;;  %v11131_v15 = vmul.f32 %v4998_v63, %v13415_v48  ;;  %v13423_v31 = vunpack.c.l.bf16 %v13388_v39  ;;  %v5084_v48 = vmul.f32 %v11015_v26, %v13424_v17  ;;  %v13425_v23 = vunpack.c.l.bf16 %v13389_v27 }
 0x5c4   : > { %13412 = vst [vmem:[#allocation27_spill] sm:$0xff] %v11123_v51  ;;  %13414 = vst [vmem:[#allocation83_spill] sm:$0xff] %v11127_v44  ;;  %v11135_v14 = vmul.f32 %v4998_v63, %v13417_v41  ;;  %v11139_v33 = vmul.f32 %v4998_v63, %v13419_v54  ;;  %v11143_v57 = vmul.f32 %v4998_v63, %v13421_v6  ;;  %v13427_v3 = vunpack.c.l.bf16 %v13390_v56 }
 0x5c5   : > { %13416 = vst [vmem:[#allocation131_spill] sm:$0xff] %v11131_v15  ;;  %v5083_v29 = vmul.f32 %v11015_v26, %v13423_v31  ;;  %v5085_v41 = vmul.f32 %v11015_v26, %v13425_v23  ;;  %v5086_v54 = vmul.f32 %v11015_v26, %v13426_v59  ;;  %v13428_v6 = vunpack.c.h.bf16 %v13390_v56 }
 0x5c6   : > { %13418 = vst [vmem:[#allocation28_spill] sm:$0xff] %v11135_v14  ;;  %13420 = vst [vmem:[#allocation115_spill] sm:$0xff] %v11139_v33  ;;  %v5087_v63 = vmul.f32 %v11015_v26, %v13427_v3  ;;  %v13429_v39 = vunpack.c.l.bf16 %v13391_v35  ;;  %v5090_v23 = vmul.f32 %v11015_v26, %v13430_v1  ;;  %v13431_v27 = vunpack.c.l.bf16 %v13392_v5 }
 0x5c7   : > { %13422 = vst [vmem:[#allocation57_spill] sm:$0xff] %v11143_v57  ;;  %v5088_v31 = vmul.f32 %v11015_v26, %v13428_v6  ;;  %v5092_v3 = vmul.f32 %v11015_v26, %v13432_v12  ;;  %v13433_v56 = vunpack.c.l.bf16 %v13393_v8  ;;  %v13435_v35 = vunpack.c.l.bf16 %v13394_v53 }
 0x5c8   : > { %v5089_v17 = vmul.f32 %v11015_v26, %v13429_v39  ;;  %v5091_v59 = vmul.f32 %v11015_v26, %v13431_v27  ;;  %v5094_v39 = vmul.f32 %v11015_v26, %v13434_v38  ;;  %v5096_v27 = vmul.f32 %v11015_v26, %v13436_v34 }
 0x5c9   : > { %v5093_v6 = vmul.f32 %v11015_v26, %v13433_v56  ;;  %v5095_v1 = vmul.f32 %v11015_v26, %v13435_v35  ;;  %v13437_v5 = vunpack.c.l.bf16 %v13395_v10  ;;  %v13438_v57 = vunpack.c.h.bf16 %v13395_v10 }
 0x5ca   : > { %v13439_v8 = vunpack.c.l.bf16 %v10854_v52  ;;  %v13440_v33 = vunpack.c.h.bf16 %v10854_v52  ;;  %v13441_v53 = vunpack.c.l.bf16 %v10856_v11  ;;  %v13442_v14 = vunpack.c.h.bf16 %v10856_v11 }
 0x5cb   : > { %v5097_v12 = vmul.f32 %v11015_v26, %v13437_v5  ;;  %v5098_v56 = vmul.f32 %v11015_v26, %v13438_v57  ;;  %v13443_v10 = vunpack.c.l.bf16 %v10858_v43  ;;  %v13444_v15 = vunpack.c.h.bf16 %v10858_v43 }
 0x5cc   : > { %v5099_v38 = vmul.f32 %v11015_v26, %v13439_v8  ;;  %v5100_v35 = vmul.f32 %v11015_v26, %v13440_v33  ;;  %v5101_v34 = vmul.f32 %v11015_v26, %v13441_v53  ;;  %v5102_v5 = vmul.f32 %v11015_v26, %v13442_v14 }
 0x5cd   : > { %v5103_v57 = vmul.f32 %v11015_v26, %v13443_v10  ;;  %v5104_v8 = vmul.f32 %v11015_v26, %v13444_v15  ;;  %v13445_v52 = vunpack.c.l.bf16 %v10860_v37  ;;  %v13446_v44 = vunpack.c.h.bf16 %v10860_v37 }
 0x5ce   : > { %v13447_v11 = vunpack.c.l.bf16 %v10862_v58  ;;  %v13448_v51 = vunpack.c.h.bf16 %v10862_v58  ;;  %v13449_v43 = vunpack.c.l.bf16 %v10864_v46  ;;  %v13450_v7 = vunpack.c.h.bf16 %v10864_v46 }
 0x5cf   : > { %v5105_v33 = vmul.f32 %v11015_v26, %v13445_v52  ;;  %v5106_v53 = vmul.f32 %v11015_v26, %v13446_v44  ;;  %v13451_v37 = vunpack.c.l.bf16 %v10866_v16  ;;  %v13452_v21 = vunpack.c.h.bf16 %v10866_v16 }
 0x5d0   : > { %v5107_v14 = vmul.f32 %v11015_v26, %v13447_v11  ;;  %v5108_v10 = vmul.f32 %v11015_v26, %v13448_v51  ;;  %v5109_v15 = vmul.f32 %v11015_v26, %v13449_v43  ;;  %v5110_v52 = vmul.f32 %v11015_v26, %v13450_v7 }
 0x5d1   : > { %v5111_v44 = vmul.f32 %v11015_v26, %v13451_v37  ;;  %v5112_v11 = vmul.f32 %v11015_v26, %v13452_v21  ;;  %v13453_v58 = vunpack.c.l.bf16 %v13397_v25  ;;  %v13454_v28 = vunpack.c.h.bf16 %v13397_v25 }
 0x5d2   : > { %v5115_v46 = vadd.f32 %v5083_v29, %v11019_v42  ;;  %v5116_v7 = vadd.f32 %v5084_v48, %v11023_v47  ;;  %v5117_v30 = vadd.f32 %v5085_v41, %v11027_v40  ;;  %v5118_v37 = vadd.f32 %v5086_v54, %v11031_v18  ;;  %v13463_v48 = vld [vmem:[#allocation131_spill] sm:$0xff]  ;;  %v13464_v54 = vld [vmem:[#allocation28_spill] sm:$0xff] }
 0x5d3   : > { %v5113_v51 = vmul.f32 %v11015_v26, %v13453_v58  ;;  %v5114_v43 = vmul.f32 %v11015_v26, %v13454_v28  ;;  %v5119_v16 = vadd.f32 %v5087_v63, %v11035_v49  ;;  %v5120_v21 = vadd.f32 %v5088_v31, %v11039_v20  ;;  %v13461_v28 = vld [vmem:[#allocation83_spill] sm:$0xff] }
 0x5d4   : > { %v5121_v62 = vadd.f32 %v5089_v17, %v11043_v61  ;;  %v5122_v58 = vadd.f32 %v5090_v23, %v11047_v60  ;;  %v5123_v25 = vadd.f32 %v5091_v59, %v11051_v4  ;;  %v5124_v26 = vadd.f32 %v5092_v3, %v11055_v13  ;;  %5147 = vst [vmem:[%s11255_s11] sm:$0xff] %v5115_v46  ;;  %v13465_v31 = vld [vmem:[#allocation115_spill] sm:$0xff]  ;;  %v13466_v23 = vld [vmem:[#allocation57_spill] sm:$0xff] }
 0x5d5   : > { %v5125_v42 = vadd.f32 %v5093_v6, %v11059_v2  ;;  %v5126_v47 = vadd.f32 %v5094_v39, %v11063_v0  ;;  %5148 = vst [vmem:[%s11255_s11 + $0x8] sm:$0xff] %v5116_v7  ;;  %5149 = vst [vmem:[%s11255_s11 + $0x10] sm:$0xff] %v5117_v30  ;;  %v5127_v18 = vadd.f32 %v5095_v1, %v11067_v55  ;;  %v13455_v0 = vld [vmem:[#allocation117_spill] sm:$0xff]  ;;  %v13460_v30 = vld [vmem:[#allocation27_spill] sm:$0xff] }
 0x5d6   : > { %5150 = vst [vmem:[%s11255_s11 + $0x18] sm:$0xff] %v5118_v37  ;;  %v5128_v40 = vadd.f32 %v5096_v27, %v11071_v36  ;;  %v5129_v49 = vadd.f32 %v5097_v12, %v11075_v19  ;;  %v5130_v20 = vadd.f32 %v5098_v56, %v11079_v22  ;;  %5151 = vst [vmem:[%s11255_s11 + $0x20] sm:$0xff] %v5119_v16  ;;  %v13456_v36 = vld [vmem:[#allocation197_spill] sm:$0xff]  ;;  %v13457_v22 = vld [vmem:[#allocation160_spill] sm:$0xff] }
 0x5d7   : > { %5152 = vst [vmem:[%s11255_s11 + $0x28] sm:$0xff] %v5120_v21  ;;  %5153 = vst [vmem:[%s11255_s11 + $0x30] sm:$0xff] %v5121_v62  ;;  %v5131_v61 = vadd.f32 %v5099_v38, %v11083_v24  ;;  %v5132_v60 = vadd.f32 %v5100_v35, %v11087_v32  ;;  %v5133_v4 = vadd.f32 %v5101_v34, %v11091_v50  ;;  %v13458_v32 = vld [vmem:[#allocation145_spill] sm:$0xff] }
 0x5d8   : > { %5154 = vst [vmem:[%s11255_s11 + $0x38] sm:$0xff] %v5122_v58  ;;  %v5134_v13 = vadd.f32 %v5102_v5, %v11095_v9  ;;  %5155 = vst [vmem:[%s11255_s11 + $0x40] sm:$0xff] %v5123_v25  ;;  %v5135_v2 = vadd.f32 %v5103_v57, %v11099_v45  ;;  %v5136_v55 = vadd.f32 %v5104_v8, %v13455_v0  ;;  %v13459_v9 = vld [vmem:[#allocation99_spill] sm:$0xff] }
 0x5d9   : > { %5156 = vst [vmem:[%s11255_s11 + $0x48] sm:$0xff] %v5124_v26  ;;  %5157 = vst [vmem:[%s11255_s11 + $0x50] sm:$0xff] %v5125_v42  ;;  %v5137_v19 = vadd.f32 %v5105_v33, %v13456_v36  ;;  %v5138_v24 = vadd.f32 %v5106_v53, %v13457_v22  ;;  %v5139_v50 = vadd.f32 %v5107_v14, %v13458_v32 }
 0x5da   : > { %5158 = vst [vmem:[%s11255_s11 + $0x58] sm:$0xff] %v5126_v47  ;;  %5159 = vst [vmem:[%s11255_s11 + $0x60] sm:$0xff] %v5127_v18  ;;  %v5140_v62 = vadd.f32 %v5108_v10, %v13459_v9  ;;  %v5141_v45 = vadd.f32 %v5109_v15, %v13460_v30  ;;  %v5142_v29 = vadd.f32 %v5110_v52, %v13461_v28 }
 0x5db   : > { %5160 = vst [vmem:[%s11255_s11 + $0x68] sm:$0xff] %v5128_v40  ;;  %5161 = vst [vmem:[%s11255_s11 + $0x70] sm:$0xff] %v5129_v49  ;;  %v5143_v41 = vadd.f32 %v5111_v44, %v13463_v48  ;;  %v5144_v63 = vadd.f32 %v5112_v11, %v13464_v54  ;;  %v5145_v17 = vadd.f32 %v5113_v51, %v13465_v31 }
 0x5dc   : > { %5162 = vst [vmem:[%s11255_s11 + $0x78] sm:$0xff] %v5130_v20  ;;  %5163 = vst [vmem:[%s11255_s11 + $0x80] sm:$0xff] %v5131_v61  ;;  %v5146_v59 = vadd.f32 %v5114_v43, %v13466_v23 }
 0x5dd   : > { %5164 = vst [vmem:[%s11255_s11 + $0x88] sm:$0xff] %v5132_v60  ;;  %5165 = vst [vmem:[%s11255_s11 + $0x90] sm:$0xff] %v5133_v4 }
 0x5de   : > { %5166 = vst [vmem:[%s11255_s11 + $0x98] sm:$0xff] %v5134_v13  ;;  %5167 = vst [vmem:[%s11255_s11 + $0xa0] sm:$0xff] %v5135_v2 }
 0x5df   : > { %5168 = vst [vmem:[%s11255_s11 + $0xa8] sm:$0xff] %v5136_v55  ;;  %5169 = vst [vmem:[%s11255_s11 + $0xb0] sm:$0xff] %v5137_v19 }
 0x5e0   : > { %5170 = vst [vmem:[%s11255_s11 + $0xb8] sm:$0xff] %v5138_v24  ;;  %5171 = vst [vmem:[%s11255_s11 + $0xc0] sm:$0xff] %v5139_v50 }
 0x5e1   : > { %5172 = vst [vmem:[%s11255_s11 + $0xc8] sm:$0xff] %v5140_v62  ;;  %5173 = vst [vmem:[%s11255_s11 + $0xd0] sm:$0xff] %v5141_v45 }
 0x5e2   : > { %5174 = vst [vmem:[%s11255_s11 + $0xd8] sm:$0xff] %v5142_v29  ;;  %5175 = vst [vmem:[%s11255_s11 + $0xe0] sm:$0xff] %v5143_v41 }
 0x5e3   : > { %5176 = vst [vmem:[%s11255_s11 + $0xe8] sm:$0xff] %v5144_v63  ;;  %5177 = vst [vmem:[%s11255_s11 + $0xf0] sm:$0xff] %v5145_v17 }
 0x5e4   : > { %5178 = vst [vmem:[%s11255_s11 + $0xf8] sm:$0xff] %v5146_v59 }
 0x5e5   : > { %5823 = shalt.err (!%p5820_p13)
}
 0x5e6   : > { %s5824_s15 = scalar_lea.hbm %s11298_s25, 4096  ;;  %s5828_s10 = scalar_lea.hbm %s13462_s14, 8192 }
 0x5e7   : > { %p5825_p0 = scmp.ne.s32.totalorder %s11298_s25, %s5824_s15  ;;  %p5829_p1 = scmp.lt.u32.totalorder %s11298_s25, %s13462_s14 }
 0x5e8   : > { %p5830_p2 = scmp.lt.u32.totalorder %s5828_s10, %s5824_s15  ;;  %p5832_p8 = scmp.lt.u32.totalorder %s5824_s15, %s11298_s25 }
 0x5e9   : > { %p5826_p5 = pnand %p5825_p0, %p6097_p6 }
 0x5ea   : > { %p5831_p4 = por %p5830_p2, %p5829_p1 }
 0x5eb   : > { %p5827_p11 = pneg %p5826_p5 }
 0x5ec   : > { %p5833_p10 = por %p5832_p8, %p5831_p4 }
 0x5ee   : > { %p5834_p12 = pnand %p5833_p10, %p5827_p11 }
 0x5f0   : > { %5837 = shalt.err (!%p5834_p12)
}
 0x5f1   : > { %s5899_s9 = smov 128   ;;  %s5900_s12 = smov 8  }
 0x5f2   : > { %5576 = dma.vmem_to_hbm [thread:$0]  (%p6097_p6), %s11300_s13, 4096, %s11298_s25, %s5180_s22, %s5899_s9, %s5899_s9, %s5900_s12  }
 0x5f3 PF: > { %s13467_s18 = sld [smem:[#allocation23_spill]]  ;;  %s13468_s23 = sld [smem:[#allocation24_spill]] }
 0x5f4   : > { %p13470_p7 = scmp.ge.s32.totalorder %s5884_s30, 2 }
 0x5f9   : > { %s5208_s19 = sand.u32 1, %s13467_s18   ;;  %p13469_p3 = scmp.ne.s32.totalorder %s13468_s23, 0 }
 0x5fa   : > { %s5209_s26 = scalar_lea.sflag [#allocation11], %s5208_s19 }
 0x5fb   : > { %p5596_p9 = pnand %p13470_p7, %p13469_p3 }
 0x5fd   : > { %5867 = dma.done.wait (!%p5596_p9), %s5209_s26, 4096  }
 0x5fe   : > { %5869 = vsyncadd (!%p5596_p9), %s5209_s26, 4294963200  ;;  %p23_p13 = scmp.ge.s32.totalorder %s6087_s24, 4   ;;  %s13471_s27 = smov %s5876_s28 }
 0x5ff   : > { %s13472_s28 = smov %s5880_s29  ;;  %s13473_s29 = smov %s6103_s17 }
 0x600   : > { %s13474_s30 = smov %s6087_s24  ;;  %25 = sbr.rel (!%p23_p13) target bundleno = 9 (0x9), region = 166 }
 0x607   :  { %5214 = vsyncpa [#allocation10], 1 }
 0x608   :  { %5216 = vsyncpa [#allocation10 + $0x1], 1 }
 0x609   :  { %5217 = vsyncpa [#allocation13], 1 }
 0x60a   :  { %5218 = vsyncpa [#allocation16], 1 }
 0x60b   :  { %5219 = vsyncpa [#allocation11], 1 }
 0x60c   :  { %5221 = vsyncpa [#allocation11 + $0x1], 1 }

</bundles_post_ra>
